<compile_context>
chip_gen: v6e
topology: v6e:2x2x1
jax: 0.10.0
libtpu: 0.0.40
codegen_flags: <defaults>
</compile_context>

<pallas_src>
import math
import functools

import jax
import jax.numpy as jnp
from jax.experimental import pallas as pl
from jax.experimental.pallas import tpu as pltpu

# ----------------------------- config ---------------------------------------
D_MODEL = 32
N_HEADS = 4
D_FF = 64
N_LAYERS = 2
MAX_SEQ_LEN = 64
SLAB_WIDTH = 128      # lane-dense weight slab width
OUT_WIDTH = 128       # lane-dense packed output: hidden | cursor | key | pad


# --------------------------- fused Pallas kernel -----------------------------
def _fused_forward_kernel(feats_ref, w_ref, out_ref, *, offs, n_layers,
                          n_heads, head_dim, seq_len, n_batch_blk):
    f32 = jnp.float32
    d = n_heads * head_dim
    mb = n_batch_blk * seq_len
    scale = 1.0 / math.sqrt(head_dim)

    def W(name):
        r0, r, c = offs[name]             # static Python ints -> free slices
        return w_ref[r0:r0 + r, 0:c]

    def gelu(y):
        # TODO(synk): nn.GELU default is exact erf; tanh approximation used.
        c = math.sqrt(2.0 / math.pi)
        return 0.5 * y * (1.0 + jnp.tanh(c * (y + 0.044715 * y * y * y)))

    def layer_norm(y, g, b):
        mu = jnp.mean(y, axis=-1, keepdims=True)
        yc = y - mu
        var = jnp.mean(yc * yc, axis=-1, keepdims=True)
        return yc * jax.lax.rsqrt(var + 1e-5) * g + b

    # Fused encoder stack: all affine encoders + PE + timing + accuracy
    # conditioning folded host-side into a single (F -> d) matmul (the one-hot
    # position block in feats carries the PE rows and all biases).
    x = jnp.dot(feats_ref[...], W("w_enc"), preferred_element_type=f32)   # (mb, d)

    # --- transformer blocks (statically unrolled) ----------------------------
    for layer in range(n_layers):
        p = "l%d_" % layer

        # one full-width (mb,32)x(32,96) QKV matmul per layer
        qkv = jnp.dot(x, W(p + "w_qkv"), preferred_element_type=f32) \
            + W(p + "b_qkv")                                              # (mb, 3d)

        heads = []
        for h in range(n_heads):
            lo = h * head_dim
            q = qkv[:, lo:lo + head_dim].reshape(n_batch_blk, seq_len, head_dim)
            k = qkv[:, d + lo:d + lo + head_dim].reshape(n_batch_blk, seq_len, head_dim)
            v = qkv[:, 2 * d + lo:2 * d + lo + head_dim].reshape(n_batch_blk, seq_len, head_dim)

            s = jnp.einsum("bqd,bkd->bqk", q, k,
                           preferred_element_type=f32) * scale
            s = s - jnp.max(s, axis=-1, keepdims=True)
            e = jnp.exp(s)
            prob = e * pl.reciprocal(jnp.sum(e, axis=-1, keepdims=True),
                                     approx=True)
            o = jnp.einsum("bqk,bkd->bqd", prob, v, preferred_element_type=f32)
            heads.append(o.reshape(mb, head_dim))

        # lane-concat of head outputs + single (32,32) out-projection matmul
        attn = jnp.dot(jnp.concatenate(heads, axis=-1), W(p + "w_out"),
                       preferred_element_type=f32) + W(p + "b_out")

        # residual + LN1
        x = layer_norm(x + attn, W(p + "ln1_g"), W(p + "ln1_b"))

        # FFN + residual + LN2
        ff = gelu(jnp.dot(x, W(p + "w_ff1"), preferred_element_type=f32)
                  + W(p + "b_ff1"))
        ff = jnp.dot(ff, W(p + "w_ff2"), preferred_element_type=f32) \
            + W(p + "b_ff2")
        x = layer_norm(x + ff, W(p + "ln2_g"), W(p + "ln2_b"))

    # --- output heads (VMEM-resident) ----------------------------------------
    hc = layer_norm(x, W("ch_ln_g"), W("ch_ln_b"))
    hc = gelu(jnp.dot(hc, W("ch_w1"), preferred_element_type=f32) + W("ch_b1"))
    c_logit = jnp.dot(hc, W("ch_w2"), preferred_element_type=f32) + W("ch_b2")
    cursor = pl.reciprocal(1.0 + jnp.exp(-c_logit), approx=True)   # sigmoid (EUP)

    hk = layer_norm(x, W("kh_ln_g"), W("kh_ln_b"))
    hk = gelu(jnp.dot(hk, W("kh_w1"), preferred_element_type=f32) + W("kh_b1"))
    key = jnp.dot(hk, W("kh_w2"), preferred_element_type=f32) + W("kh_b2")

    # one lane-dense packed store: hidden | cursor | key | zero pad
    pad = jnp.zeros((mb, OUT_WIDTH - (d + 2 + 4)), f32)
    out_ref[...] = jnp.concatenate([x, cursor, key, pad], axis=-1)


# --------------------------- parameters -------------------------------------
def sinusoidal_pe(max_len, d):
    pos = jnp.arange(max_len, dtype=jnp.float32)[:, None]
    i = jnp.arange(0, d, 2, dtype=jnp.float32)
    div = jnp.exp(-math.log(10000.0) * i / d)
    pe = jnp.zeros((max_len, d), jnp.float32)
    pe = pe.at[:, 0::2].set(jnp.sin(pos * div))
    pe = pe.at[:, 1::2].set(jnp.cos(pos * div))
    return pe


def init_params(seed=42):
    keys = iter(jax.random.split(jax.random.PRNGKey(seed), 256))

    def lin(fan_in, fan_out):
        w = jax.random.normal(next(keys), (fan_in, fan_out), jnp.float32) * 0.02
        return (w, jnp.zeros((fan_out,), jnp.float32))

    d = D_MODEL
    params = {
        "cursor_enc": lin(2 + 4, d),      # cursor (2) + key states (4)
        "beatmap_enc": lin(8, d),
        "slider_enc": lin(13, d),
        "timing_enc": lin(1, d),
        "acc_cond": lin(1, d),
        "input_proj": lin(3 * d, d),
        "pe": sinusoidal_pe(MAX_SEQ_LEN, d),
        "layers": [],
    }
    for _ in range(N_LAYERS):
        wq, bq = lin(d, 3 * d)
        wo, bo = lin(d, d)
        w1, b1 = lin(d, D_FF)
        w2, b2 = lin(D_FF, d)
        params["layers"].append({
            "attn": {"w_qkv": wq, "b_qkv": bq, "w_out": wo, "b_out": bo},
            "ln1_g": jnp.ones((d,), jnp.float32),
            "ln1_b": jnp.zeros((d,), jnp.float32),
            "ln2_g": jnp.ones((d,), jnp.float32),
            "ln2_b": jnp.zeros((d,), jnp.float32),
            "w_ff1": w1, "b_ff1": b1, "w_ff2": w2, "b_ff2": b2,
        })
    cw1, cb1 = lin(d, d // 2)
    cw2, cb2 = lin(d // 2, 2)
    params["cursor_head"] = {"ln_g": jnp.ones((d,), jnp.float32),
                             "ln_b": jnp.zeros((d,), jnp.float32),
                             "w1": cw1, "b1": cb1, "w2": cw2, "b2": cb2}
    kw1, kb1 = lin(d, d // 4)
    kw2, kb2 = lin(d // 4, 4)
    params["key_head"] = {"ln_g": jnp.ones((d,), jnp.float32),
                          "ln_b": jnp.zeros((d,), jnp.float32),
                          "w1": kw1, "b1": kb1, "w2": kw2, "b2": kb2}
    return params


# ---------------------- weight packing (one lane-dense slab) -----------------
def _pack_weights(params, L):
    """Fold the affine encoder stack and pack every weight/bias into one
    (R, 128) f32 slab. Returns (slab, {name: (row_off, rows, cols)})."""
    d = D_MODEL
    w_in, b_in = params["input_proj"]
    W1, W2, W3 = w_in[:d], w_in[d:2 * d], w_in[2 * d:]
    Wsum = W1 + W2 + W3
    wc, bc = params["cursor_enc"]
    wb, bb = params["beatmap_enc"]
    ws, bs = params["slider_enc"]
    wt, bt = params["timing_enc"]
    wa, ba = params["acc_cond"]
    # all biases + PE rows fold into the one-hot position block of the fused
    # encoder matmul (each token row has exactly one 1 in that block).
    b_fused = bc @ W1 + bb @ W2 + bs @ W3 + bt @ Wsum + b_in + ba        # (d,)
    pe_rows = params["pe"][:L] @ Wsum + b_fused[None, :]                 # (L, d)
    # feats column layout: cursor(2) key(4) beatmap(8) slider(13) timing(1)
    #                      accuracy(1) one-hot position(L)
    w_enc = jnp.concatenate([wc @ W1, wb @ W2, ws @ W3, wt @ Wsum, wa,
                             pe_rows], axis=0)

    entries = [("w_enc", w_enc)]
    for li, lp in enumerate(params["layers"]):
        p = "l%d_" % li
        a = lp["attn"]
        entries += [
            (p + "w_qkv", a["w_qkv"]), (p + "b_qkv", a["b_qkv"][None, :]),
            (p + "w_out", a["w_out"]), (p + "b_out", a["b_out"][None, :]),
            (p + "ln1_g", lp["ln1_g"][None, :]), (p + "ln1_b", lp["ln1_b"][None, :]),
            (p + "ln2_g", lp["ln2_g"][None, :]), (p + "ln2_b", lp["ln2_b"][None, :]),
            (p + "w_ff1", lp["w_ff1"]), (p + "b_ff1", lp["b_ff1"][None, :]),
            (p + "w_ff2", lp["w_ff2"]), (p + "b_ff2", lp["b_ff2"][None, :]),
        ]
    cp, kp = params["cursor_head"], params["key_head"]
    entries += [
        ("ch_ln_g", cp["ln_g"][None, :]), ("ch_ln_b", cp["ln_b"][None, :]),
        ("ch_w1", cp["w1"]), ("ch_b1", cp["b1"][None, :]),
        ("ch_w2", cp["w2"]), ("ch_b2", cp["b2"][None, :]),
        ("kh_ln_g", kp["ln_g"][None, :]), ("kh_ln_b", kp["ln_b"][None, :]),
        ("kh_w1", kp["w1"]), ("kh_b1", kp["b1"][None, :]),
        ("kh_w2", kp["w2"]), ("kh_b2", kp["b2"][None, :]),
    ]

    offs, blocks, cur = {}, [], 0
    for name, arr in entries:
        arr = arr.astype(jnp.float32)
        r, c = arr.shape
        offs[name] = (cur, r, c)                  # static Python ints
        blk = jnp.pad(arr, ((0, 0), (0, SLAB_WIDTH - c)))
        r_pad = (-r) % 8                          # 8-sublane alignment per entry
        if r_pad:
            blk = jnp.pad(blk, ((0, r_pad), (0, 0)))
        blocks.append(blk)
        cur += r + r_pad
    slab = jnp.concatenate(blocks, axis=0)
    return slab, offs


def _num_tensorcores():
    # TODO(synk): on v7x, verify in a profile that the grid=(2,) axis actually
    # core-shards with "parallel"; if not, switch to pltpu.CORE_PARALLEL.
    try:
        kind = jax.devices()[0].device_kind.lower()
    except Exception:
        return 1
    return 2 if "v7" in kind else 1


# --------------------------- full forward -----------------------------------
def osu_transformer_forward(params, cursor_data, beatmap_data, slider_data,
                            timing_data, key_data, accuracy_target):
    d, H = D_MODEL, N_HEADS
    dh = d // H
    S, B = cursor_data.shape[0], cursor_data.shape[1]
    if S != B or accuracy_target.shape[0] != S:
        # Reference transpose quirk: the accuracy_emb expand only broadcasts
        # when seq_len == batch_size.
        raise ValueError("reference forward requires seq_len == batch_size")
    # Internal seq axis L = original batch B, internal batch axis N = original
    # seq S (the reference's dim0/dim1 transpose).
    L, N = B, S
    M = N * L

    # Token features in internal (n, l) row order == original (s, b) order,
    # augmented with a one-hot position block (carries PE + all fused biases).
    acc_feat = jnp.broadcast_to(accuracy_target[:, None, :], (N, L, 1))
    pos_onehot = jnp.broadcast_to(jnp.eye(L, dtype=jnp.float32)[None], (N, L, L))
    feats = jnp.concatenate([cursor_data, key_data, beatmap_data, slider_data,
                             timing_data, acc_feat, pos_onehot], axis=-1)
    feats = feats.reshape(M, -1).astype(jnp.float32)
    F = feats.shape[-1]

    # One lane-dense weight slab => one weight DMA instead of ~23.
    slab, offs = _pack_weights(params, L)
    R = slab.shape[0]

    # Only split across cores on 2-TC chips (v7x); a second grid step on
    # v5e/v6e is pure per-step overhead.
    n_tc = _num_tensorcores()
    G = 2 if (n_tc == 2 and N % 2 == 0 and ((N // 2) * L) % 8 == 0) else 1
    Mb = M // G
    n_blk = N // G

    kernel = functools.partial(
        _fused_forward_kernel, offs=offs, n_layers=N_LAYERS, n_heads=H,
        head_dim=dh, seq_len=L, n_batch_blk=n_blk)

    packed = pl.pallas_call(
        kernel,
        grid=(G,),
        out_shape=jax.ShapeDtypeStruct((M, OUT_WIDTH), jnp.float32),
        in_specs=[pl.BlockSpec((Mb, F), lambda i: (i, 0)),
                  pl.BlockSpec((R, SLAB_WIDTH), lambda i: (0, 0))],
        out_specs=pl.BlockSpec((Mb, OUT_WIDTH), lambda i: (i, 0)),
        compiler_params=pltpu.CompilerParams(
            dimension_semantics=("parallel",) if G == 2 else ("arbitrary",)),
    )(feats, slab)

    # Back to the reference's (seq_internal=L, batch_internal=N, feat) layout,
    # then slice hidden / cursor / key out of the packed lanes.
    packed = jnp.swapaxes(packed.reshape(N, L, OUT_WIDTH), 0, 1)
    return {"cursor_pred": packed[..., d:d + 2],
            "key_pred": packed[..., d + 2:d + 6],
            "hidden_states": packed[..., :d]}


# ------------------------------- main ----------------------------------------
if __name__ == "__main__":
    S = 8   # seq_len
    B = 8   # batch_size (must equal S — see reference forward's accuracy expand)

    root = jax.random.PRNGKey(0)
    ks = jax.random.split(root, 6)
    cursor_data = jax.random.uniform(ks[0], (S, B, 2), jnp.float32)
    beatmap_data = jax.random.normal(ks[1], (S, B, 8), jnp.float32)
    slider_data = jax.random.normal(ks[2], (S, B, 13), jnp.float32)
    timing_data = jax.random.uniform(ks[3], (S, B, 1), jnp.float32)
    key_data = (jax.random.uniform(ks[4], (S, B, 4)) > 0.5).astype(jnp.float32)
    accuracy_target = jax.random.uniform(ks[5], (B, 1), jnp.float32)

    params = init_params(seed=42)

    fwd = jax.jit(osu_transformer_forward)
    out = fwd(params, cursor_data, beatmap_data, slider_data,
              timing_data, key_data, accuracy_target)
    jax.block_until_ready(out)

    assert out["cursor_pred"].shape == (B, S, 2)
    assert out["key_pred"].shape == (B, S, 4)
    assert out["hidden_states"].shape == (B, S, D_MODEL)
    assert bool(jnp.all(jnp.isfinite(out["hidden_states"])))
    assert bool(jnp.all(jnp.isfinite(out["cursor_pred"])))
    assert bool(jnp.all(jnp.isfinite(out["key_pred"])))
    assert bool(jnp.all((out["cursor_pred"] >= 0.0) & (out["cursor_pred"] <= 1.0)))
    print("KERNEL_OK")
</pallas_src>

<mosaic_0001>
module attributes {stable_mosaic.version = 11 : i64} {
  func.func @_fused_forward_kernel(%arg0: i32, %arg1: memref<64x37xf32, #tpu.memory_space<vmem>>, %arg2: memref<640x128xf32, #tpu.memory_space<vmem>>, %arg3: memref<64x128xf32, #tpu.memory_space<vmem>>) attributes {dimension_semantics = [#tpu.dimension_semantics<arbitrary>], iteration_bounds = array<i64: 1>, scalar_prefetch = 0 : i64, scratch_operands = 0 : i64, tpu.core_type = #tpu.core_type<tc>, window_params = [{transform_indices = @transform_0, window_bounds = array<i64: 64, 37>}, {pipeline_mode = #tpu.pipeline_mode<synchronous>, transform_indices = @transform_1, window_bounds = array<i64: 640, 128>}, {transform_indices = @transform_2, window_bounds = array<i64: 64, 128>}]} {
    %c0 = arith.constant 0 : index
    %c0_0 = arith.constant 0 : index
    %0 = vector.load %arg1[%c0, %c0_0] : memref<64x37xf32, #tpu.memory_space<vmem>>, vector<64x37xf32>
    %c0_1 = arith.constant 0 : index
    %c0_2 = arith.constant 0 : index
    %1 = vector.load %arg2[%c0_1, %c0_2] : memref<640x128xf32, #tpu.memory_space<vmem>>, vector<37x32xf32>
    %cst = arith.constant dense<0.000000e+00> : vector<64x32xf32>
    %2 = tpu.matmul %0, %1, %cst {dimension_numbers = #tpu.dot_dimension_numbers<[1], [0], [0], [1], [0, 0, 1, 1], [], []>} : vector<64x37xf32>, vector<37x32xf32>, vector<64x32xf32> -> vector<64x32xf32>
    %c40 = arith.constant 40 : index
    %c0_3 = arith.constant 0 : index
    %3 = vector.load %arg2[%c40, %c0_3] : memref<640x128xf32, #tpu.memory_space<vmem>>, vector<32x96xf32>
    %cst_4 = arith.constant dense<0.000000e+00> : vector<64x96xf32>
    %4 = tpu.matmul %2, %3, %cst_4 {dimension_numbers = #tpu.dot_dimension_numbers<[1], [0], [0], [1], [0, 0, 1, 1], [], []>} : vector<64x32xf32>, vector<32x96xf32>, vector<64x96xf32> -> vector<64x96xf32>
    %c72 = arith.constant 72 : index
    %c0_5 = arith.constant 0 : index
    %5 = vector.load %arg2[%c72, %c0_5] : memref<640x128xf32, #tpu.memory_space<vmem>>, vector<1x96xf32>
    %6 = vector.broadcast %5 : vector<1x96xf32> to vector<64x96xf32>
    %7 = arith.addf %4, %6 : vector<64x96xf32>
    %8 = vector.extract_strided_slice %7 {offsets = [0, 0], sizes = [64, 8], strides = [1, 1]} : vector<64x96xf32> to vector<64x8xf32>
    %9 = vector.shape_cast %8 : vector<64x8xf32> to vector<8x8x8xf32>
    %10 = vector.extract_strided_slice %7 {offsets = [0, 32], sizes = [64, 8], strides = [1, 1]} : vector<64x96xf32> to vector<64x8xf32>
    %11 = vector.shape_cast %10 : vector<64x8xf32> to vector<8x8x8xf32>
    %12 = vector.extract_strided_slice %7 {offsets = [0, 64], sizes = [64, 8], strides = [1, 1]} : vector<64x96xf32> to vector<64x8xf32>
    %13 = vector.shape_cast %12 : vector<64x8xf32> to vector<8x8x8xf32>
    "tpu.trace_start"() <{level = 10 : i32, message = "bqd,bkd->bqk"}> : () -> ()
    %cst_6 = arith.constant dense<0.000000e+00> : vector<8x8x8xf32>
    %14 = tpu.matmul %9, %11, %cst_6 {dimension_numbers = #tpu.dot_dimension_numbers<[2], [2], [1], [1], [0, 0, 0, 1, 1, 1], [0], [0]>} : vector<8x8x8xf32>, vector<8x8x8xf32>, vector<8x8x8xf32> -> vector<8x8x8xf32>
    "tpu.trace_stop"() : () -> ()
    %cst_7 = arith.constant 0.353553385 : f32
    %15 = vector.broadcast %cst_7 : f32 to vector<8x8x8xf32>
    %16 = arith.mulf %14, %15 : vector<8x8x8xf32>
    %cst_8 = arith.constant dense<0xFF800000> : vector<8x8xf32>
    %17 = vector.multi_reduction <maximumf>, %16, %cst_8 [2] : vector<8x8x8xf32> to vector<8x8xf32>
    %18 = vector.shape_cast %17 : vector<8x8xf32> to vector<8x8x1xf32>
    %19 = vector.broadcast %18 : vector<8x8x1xf32> to vector<8x8x8xf32>
    %20 = arith.subf %16, %19 : vector<8x8x8xf32>
    %21 = math.exp %20 : vector<8x8x8xf32>
    %cst_9 = arith.constant dense<0.000000e+00> : vector<8x8xf32>
    %22 = vector.multi_reduction <add>, %21, %cst_9 [2] : vector<8x8x8xf32> to vector<8x8xf32>
    %23 = vector.shape_cast %22 : vector<8x8xf32> to vector<8x8x1xf32>
    %24 = tpu.reciprocal %23 {approx = true} : vector<8x8x1xf32> -> vector<8x8x1xf32>
    %25 = vector.broadcast %24 : vector<8x8x1xf32> to vector<8x8x8xf32>
    %26 = arith.mulf %21, %25 : vector<8x8x8xf32>
    "tpu.trace_start"() <{level = 10 : i32, message = "bqk,bkd->bqd"}> : () -> ()
    %cst_10 = arith.constant dense<0.000000e+00> : vector<8x8x8xf32>
    %27 = tpu.matmul %26, %13, %cst_10 {dimension_numbers = #tpu.dot_dimension_numbers<[2], [1], [1], [2], [0, 0, 0, 1, 1, 2], [0], [0]>} : vector<8x8x8xf32>, vector<8x8x8xf32>, vector<8x8x8xf32> -> vector<8x8x8xf32>
    "tpu.trace_stop"() : () -> ()
    %28 = vector.shape_cast %27 : vector<8x8x8xf32> to vector<64x8xf32>
    %29 = vector.extract_strided_slice %7 {offsets = [0, 8], sizes = [64, 8], strides = [1, 1]} : vector<64x96xf32> to vector<64x8xf32>
    %30 = vector.shape_cast %29 : vector<64x8xf32> to vector<8x8x8xf32>
    %31 = vector.extract_strided_slice %7 {offsets = [0, 40], sizes = [64, 8], strides = [1, 1]} : vector<64x96xf32> to vector<64x8xf32>
    %32 = vector.shape_cast %31 : vector<64x8xf32> to vector<8x8x8xf32>
    %33 = vector.extract_strided_slice %7 {offsets = [0, 72], sizes = [64, 8], strides = [1, 1]} : vector<64x96xf32> to vector<64x8xf32>
    %34 = vector.shape_cast %33 : vector<64x8xf32> to vector<8x8x8xf32>
    "tpu.trace_start"() <{level = 10 : i32, message = "bqd,bkd->bqk"}> : () -> ()
    %cst_11 = arith.constant dense<0.000000e+00> : vector<8x8x8xf32>
    %35 = tpu.matmul %30, %32, %cst_11 {dimension_numbers = #tpu.dot_dimension_numbers<[2], [2], [1], [1], [0, 0, 0, 1, 1, 1], [0], [0]>} : vector<8x8x8xf32>, vector<8x8x8xf32>, vector<8x8x8xf32> -> vector<8x8x8xf32>
    "tpu.trace_stop"() : () -> ()
    %cst_12 = arith.constant 0.353553385 : f32
    %36 = vector.broadcast %cst_12 : f32 to vector<8x8x8xf32>
    %37 = arith.mulf %35, %36 : vector<8x8x8xf32>
    %cst_13 = arith.constant dense<0xFF800000> : vector<8x8xf32>
    %38 = vector.multi_reduction <maximumf>, %37, %cst_13 [2] : vector<8x8x8xf32> to vector<8x8xf32>
    %39 = vector.shape_cast %38 : vector<8x8xf32> to vector<8x8x1xf32>
    %40 = vector.broadcast %39 : vector<8x8x1xf32> to vector<8x8x8xf32>
    %41 = arith.subf %37, %40 : vector<8x8x8xf32>
    %42 = math.exp %41 : vector<8x8x8xf32>
    %cst_14 = arith.constant dense<0.000000e+00> : vector<8x8xf32>
    %43 = vector.multi_reduction <add>, %42, %cst_14 [2] : vector<8x8x8xf32> to vector<8x8xf32>
    %44 = vector.shape_cast %43 : vector<8x8xf32> to vector<8x8x1xf32>
    %45 = tpu.reciprocal %44 {approx = true} : vector<8x8x1xf32> -> vector<8x8x1xf32>
    %46 = vector.broadcast %45 : vector<8x8x1xf32> to vector<8x8x8xf32>
    %47 = arith.mulf %42, %46 : vector<8x8x8xf32>
    "tpu.trace_start"() <{level = 10 : i32, message = "bqk,bkd->bqd"}> : () -> ()
    %cst_15 = arith.constant dense<0.000000e+00> : vector<8x8x8xf32>
    %48 = tpu.matmul %47, %34, %cst_15 {dimension_numbers = #tpu.dot_dimension_numbers<[2], [1], [1], [2], [0, 0, 0, 1, 1, 2], [0], [0]>} : vector<8x8x8xf32>, vector<8x8x8xf32>, vector<8x8x8xf32> -> vector<8x8x8xf32>
    "tpu.trace_stop"() : () -> ()
    %49 = vector.shape_cast %48 : vector<8x8x8xf32> to vector<64x8xf32>
    %50 = vector.extract_strided_slice %7 {offsets = [0, 16], sizes = [64, 8], strides = [1, 1]} : vector<64x96xf32> to vector<64x8xf32>
    %51 = vector.shape_cast %50 : vector<64x8xf32> to vector<8x8x8xf32>
    %52 = vector.extract_strided_slice %7 {offsets = [0, 48], sizes = [64, 8], strides = [1, 1]} : vector<64x96xf32> to vector<64x8xf32>
    %53 = vector.shape_cast %52 : vector<64x8xf32> to vector<8x8x8xf32>
    %54 = vector.extract_strided_slice %7 {offsets = [0, 80], sizes = [64, 8], strides = [1, 1]} : vector<64x96xf32> to vector<64x8xf32>
    %55 = vector.shape_cast %54 : vector<64x8xf32> to vector<8x8x8xf32>
    "tpu.trace_start"() <{level = 10 : i32, message = "bqd,bkd->bqk"}> : () -> ()
    %cst_16 = arith.constant dense<0.000000e+00> : vector<8x8x8xf32>
    %56 = tpu.matmul %51, %53, %cst_16 {dimension_numbers = #tpu.dot_dimension_numbers<[2], [2], [1], [1], [0, 0, 0, 1, 1, 1], [0], [0]>} : vector<8x8x8xf32>, vector<8x8x8xf32>, vector<8x8x8xf32> -> vector<8x8x8xf32>
    "tpu.trace_stop"() : () -> ()
    %cst_17 = arith.constant 0.353553385 : f32
    %57 = vector.broadcast %cst_17 : f32 to vector<8x8x8xf32>
    %58 = arith.mulf %56, %57 : vector<8x8x8xf32>
    %cst_18 = arith.constant dense<0xFF800000> : vector<8x8xf32>
    %59 = vector.multi_reduction <maximumf>, %58, %cst_18 [2] : vector<8x8x8xf32> to vector<8x8xf32>
    %60 = vector.shape_cast %59 : vector<8x8xf32> to vector<8x8x1xf32>
    %61 = vector.broadcast %60 : vector<8x8x1xf32> to vector<8x8x8xf32>
    %62 = arith.subf %58, %61 : vector<8x8x8xf32>
    %63 = math.exp %62 : vector<8x8x8xf32>
    %cst_19 = arith.constant dense<0.000000e+00> : vector<8x8xf32>
    %64 = vector.multi_reduction <add>, %63, %cst_19 [2] : vector<8x8x8xf32> to vector<8x8xf32>
    %65 = vector.shape_cast %64 : vector<8x8xf32> to vector<8x8x1xf32>
    %66 = tpu.reciprocal %65 {approx = true} : vector<8x8x1xf32> -> vector<8x8x1xf32>
    %67 = vector.broadcast %66 : vector<8x8x1xf32> to vector<8x8x8xf32>
    %68 = arith.mulf %63, %67 : vector<8x8x8xf32>
    "tpu.trace_start"() <{level = 10 : i32, message = "bqk,bkd->bqd"}> : () -> ()
    %cst_20 = arith.constant dense<0.000000e+00> : vector<8x8x8xf32>
    %69 = tpu.matmul %68, %55, %cst_20 {dimension_numbers = #tpu.dot_dimension_numbers<[2], [1], [1], [2], [0, 0, 0, 1, 1, 2], [0], [0]>} : vector<8x8x8xf32>, vector<8x8x8xf32>, vector<8x8x8xf32> -> vector<8x8x8xf32>
    "tpu.trace_stop"() : () -> ()
    %70 = vector.shape_cast %69 : vector<8x8x8xf32> to vector<64x8xf32>
    %71 = vector.extract_strided_slice %7 {offsets = [0, 24], sizes = [64, 8], strides = [1, 1]} : vector<64x96xf32> to vector<64x8xf32>
    %72 = vector.shape_cast %71 : vector<64x8xf32> to vector<8x8x8xf32>
    %73 = vector.extract_strided_slice %7 {offsets = [0, 56], sizes = [64, 8], strides = [1, 1]} : vector<64x96xf32> to vector<64x8xf32>
    %74 = vector.shape_cast %73 : vector<64x8xf32> to vector<8x8x8xf32>
    %75 = vector.extract_strided_slice %7 {offsets = [0, 88], sizes = [64, 8], strides = [1, 1]} : vector<64x96xf32> to vector<64x8xf32>
    %76 = vector.shape_cast %75 : vector<64x8xf32> to vector<8x8x8xf32>
    "tpu.trace_start"() <{level = 10 : i32, message = "bqd,bkd->bqk"}> : () -> ()
    %cst_21 = arith.constant dense<0.000000e+00> : vector<8x8x8xf32>
    %77 = tpu.matmul %72, %74, %cst_21 {dimension_numbers = #tpu.dot_dimension_numbers<[2], [2], [1], [1], [0, 0, 0, 1, 1, 1], [0], [0]>} : vector<8x8x8xf32>, vector<8x8x8xf32>, vector<8x8x8xf32> -> vector<8x8x8xf32>
    "tpu.trace_stop"() : () -> ()
    %cst_22 = arith.constant 0.353553385 : f32
    %78 = vector.broadcast %cst_22 : f32 to vector<8x8x8xf32>
    %79 = arith.mulf %77, %78 : vector<8x8x8xf32>
    %cst_23 = arith.constant dense<0xFF800000> : vector<8x8xf32>
    %80 = vector.multi_reduction <maximumf>, %79, %cst_23 [2] : vector<8x8x8xf32> to vector<8x8xf32>
    %81 = vector.shape_cast %80 : vector<8x8xf32> to vector<8x8x1xf32>
    %82 = vector.broadcast %81 : vector<8x8x1xf32> to vector<8x8x8xf32>
    %83 = arith.subf %79, %82 : vector<8x8x8xf32>
    %84 = math.exp %83 : vector<8x8x8xf32>
    %cst_24 = arith.constant dense<0.000000e+00> : vector<8x8xf32>
    %85 = vector.multi_reduction <add>, %84, %cst_24 [2] : vector<8x8x8xf32> to vector<8x8xf32>
    %86 = vector.shape_cast %85 : vector<8x8xf32> to vector<8x8x1xf32>
    %87 = tpu.reciprocal %86 {approx = true} : vector<8x8x1xf32> -> vector<8x8x1xf32>
    %88 = vector.broadcast %87 : vector<8x8x1xf32> to vector<8x8x8xf32>
    %89 = arith.mulf %84, %88 : vector<8x8x8xf32>
    "tpu.trace_start"() <{level = 10 : i32, message = "bqk,bkd->bqd"}> : () -> ()
    %cst_25 = arith.constant dense<0.000000e+00> : vector<8x8x8xf32>
    %90 = tpu.matmul %89, %76, %cst_25 {dimension_numbers = #tpu.dot_dimension_numbers<[2], [1], [1], [2], [0, 0, 0, 1, 1, 2], [0], [0]>} : vector<8x8x8xf32>, vector<8x8x8xf32>, vector<8x8x8xf32> -> vector<8x8x8xf32>
    "tpu.trace_stop"() : () -> ()
    %91 = vector.shape_cast %90 : vector<8x8x8xf32> to vector<64x8xf32>
    %92 = tpu.concatenate %28, %49, %70, %91 in 1 : vector<64x8xf32>, vector<64x8xf32>, vector<64x8xf32>, vector<64x8xf32> -> vector<64x32xf32>
    %c80 = arith.constant 80 : index
    %c0_26 = arith.constant 0 : index
    %93 = vector.load %arg2[%c80, %c0_26] : memref<640x128xf32, #tpu.memory_space<vmem>>, vector<32x32xf32>
    %cst_27 = arith.constant dense<0.000000e+00> : vector<64x32xf32>
    %94 = tpu.matmul %92, %93, %cst_27 {dimension_numbers = #tpu.dot_dimension_numbers<[1], [0], [0], [1], [0, 0, 1, 1], [], []>} : vector<64x32xf32>, vector<32x32xf32>, vector<64x32xf32> -> vector<64x32xf32>
    %c112 = arith.constant 112 : index
    %c0_28 = arith.constant 0 : index
    %95 = vector.load %arg2[%c112, %c0_28] : memref<640x128xf32, #tpu.memory_space<vmem>>, vector<1x32xf32>
    %96 = vector.broadcast %95 : vector<1x32xf32> to vector<64x32xf32>
    %97 = arith.addf %94, %96 : vector<64x32xf32>
    %98 = arith.addf %2, %97 : vector<64x32xf32>
    %c120 = arith.constant 120 : index
    %c0_29 = arith.constant 0 : index
    %99 = vector.load %arg2[%c120, %c0_29] : memref<640x128xf32, #tpu.memory_space<vmem>>, vector<1x32xf32>
    %c128 = arith.constant 128 : index
    %c0_30 = arith.constant 0 : index
    %100 = vector.load %arg2[%c128, %c0_30] : memref<640x128xf32, #tpu.memory_space<vmem>>, vector<1x32xf32>
    %cst_31 = arith.constant dense<0.000000e+00> : vector<64xf32>
    %101 = vector.multi_reduction <add>, %98, %cst_31 [1] : vector<64x32xf32> to vector<64xf32>
    %102 = vector.shape_cast %101 : vector<64xf32> to vector<64x1xf32>
    %cst_32 = arith.constant 3.200000e+01 : f32
    %103 = vector.broadcast %cst_32 : f32 to vector<64x1xf32>
    %104 = arith.divf %102, %103 : vector<64x1xf32>
    %105 = vector.broadcast %104 : vector<64x1xf32> to vector<64x32xf32>
    %106 = arith.subf %98, %105 : vector<64x32xf32>
    %107 = arith.mulf %106, %106 : vector<64x32xf32>
    %cst_33 = arith.constant dense<0.000000e+00> : vector<64xf32>
    %108 = vector.multi_reduction <add>, %107, %cst_33 [1] : vector<64x32xf32> to vector<64xf32>
    %109 = vector.shape_cast %108 : vector<64xf32> to vector<64x1xf32>
    %cst_34 = arith.constant 3.200000e+01 : f32
    %110 = vector.broadcast %cst_34 : f32 to vector<64x1xf32>
    %111 = arith.divf %109, %110 : vector<64x1xf32>
    %cst_35 = arith.constant 9.99999974E-6 : f32
    %112 = vector.broadcast %cst_35 : f32 to vector<64x1xf32>
    %113 = arith.addf %111, %112 : vector<64x1xf32>
    %114 = math.rsqrt %113 : vector<64x1xf32>
    %115 = vector.broadcast %114 : vector<64x1xf32> to vector<64x32xf32>
    %116 = arith.mulf %106, %115 : vector<64x32xf32>
    %117 = vector.broadcast %99 : vector<1x32xf32> to vector<64x32xf32>
    %118 = arith.mulf %116, %117 : vector<64x32xf32>
    %119 = vector.broadcast %100 : vector<1x32xf32> to vector<64x32xf32>
    %120 = arith.addf %118, %119 : vector<64x32xf32>
    %c152 = arith.constant 152 : index
    %c0_36 = arith.constant 0 : index
    %121 = vector.load %arg2[%c152, %c0_36] : memref<640x128xf32, #tpu.memory_space<vmem>>, vector<32x64xf32>
    %cst_37 = arith.constant dense<0.000000e+00> : vector<64x64xf32>
    %122 = tpu.matmul %120, %121, %cst_37 {dimension_numbers = #tpu.dot_dimension_numbers<[1], [0], [0], [1], [0, 0, 1, 1], [], []>} : vector<64x32xf32>, vector<32x64xf32>, vector<64x64xf32> -> vector<64x64xf32>
    %c184 = arith.constant 184 : index
    %c0_38 = arith.constant 0 : index
    %123 = vector.load %arg2[%c184, %c0_38] : memref<640x128xf32, #tpu.memory_space<vmem>>, vector<1x64xf32>
    %124 = vector.broadcast %123 : vector<1x64xf32> to vector<64x64xf32>
    %125 = arith.addf %122, %124 : vector<64x64xf32>
    %cst_39 = arith.constant 5.000000e-01 : f32
    %126 = vector.broadcast %cst_39 : f32 to vector<64x64xf32>
    %127 = arith.mulf %126, %125 : vector<64x64xf32>
    %cst_40 = arith.constant 4.471500e-02 : f32
    %128 = vector.broadcast %cst_40 : f32 to vector<64x64xf32>
    %129 = arith.mulf %128, %125 : vector<64x64xf32>
    %130 = arith.mulf %129, %125 : vector<64x64xf32>
    %131 = arith.mulf %130, %125 : vector<64x64xf32>
    %132 = arith.addf %125, %131 : vector<64x64xf32>
    %cst_41 = arith.constant 0.797884583 : f32
    %133 = vector.broadcast %cst_41 : f32 to vector<64x64xf32>
    %134 = arith.mulf %133, %132 : vector<64x64xf32>
    %135 = math.tanh %134 : vector<64x64xf32>
    %cst_42 = arith.constant 1.000000e+00 : f32
    %136 = vector.broadcast %cst_42 : f32 to vector<64x64xf32>
    %137 = arith.addf %136, %135 : vector<64x64xf32>
    %138 = arith.mulf %127, %137 : vector<64x64xf32>
    %c192 = arith.constant 192 : index
    %c0_43 = arith.constant 0 : index
    %139 = vector.load %arg2[%c192, %c0_43] : memref<640x128xf32, #tpu.memory_space<vmem>>, vector<64x32xf32>
    %cst_44 = arith.constant dense<0.000000e+00> : vector<64x32xf32>
    %140 = tpu.matmul %138, %139, %cst_44 {dimension_numbers = #tpu.dot_dimension_numbers<[1], [0], [0], [1], [0, 0, 1, 1], [], []>} : vector<64x64xf32>, vector<64x32xf32>, vector<64x32xf32> -> vector<64x32xf32>
    %c256 = arith.constant 256 : index
    %c0_45 = arith.constant 0 : index
    %141 = vector.load %arg2[%c256, %c0_45] : memref<640x128xf32, #tpu.memory_space<vmem>>, vector<1x32xf32>
    %142 = vector.broadcast %141 : vector<1x32xf32> to vector<64x32xf32>
    %143 = arith.addf %140, %142 : vector<64x32xf32>
    %144 = arith.addf %120, %143 : vector<64x32xf32>
    %c136 = arith.constant 136 : index
    %c0_46 = arith.constant 0 : index
    %145 = vector.load %arg2[%c136, %c0_46] : memref<640x128xf32, #tpu.memory_space<vmem>>, vector<1x32xf32>
    %c144 = arith.constant 144 : index
    %c0_47 = arith.constant 0 : index
    %146 = vector.load %arg2[%c144, %c0_47] : memref<640x128xf32, #tpu.memory_space<vmem>>, vector<1x32xf32>
    %cst_48 = arith.constant dense<0.000000e+00> : vector<64xf32>
    %147 = vector.multi_reduction <add>, %144, %cst_48 [1] : vector<64x32xf32> to vector<64xf32>
    %148 = vector.shape_cast %147 : vector<64xf32> to vector<64x1xf32>
    %cst_49 = arith.constant 3.200000e+01 : f32
    %149 = vector.broadcast %cst_49 : f32 to vector<64x1xf32>
    %150 = arith.divf %148, %149 : vector<64x1xf32>
    %151 = vector.broadcast %150 : vector<64x1xf32> to vector<64x32xf32>
    %152 = arith.subf %144, %151 : vector<64x32xf32>
    %153 = arith.mulf %152, %152 : vector<64x32xf32>
    %cst_50 = arith.constant dense<0.000000e+00> : vector<64xf32>
    %154 = vector.multi_reduction <add>, %153, %cst_50 [1] : vector<64x32xf32> to vector<64xf32>
    %155 = vector.shape_cast %154 : vector<64xf32> to vector<64x1xf32>
    %cst_51 = arith.constant 3.200000e+01 : f32
    %156 = vector.broadcast %cst_51 : f32 to vector<64x1xf32>
    %157 = arith.divf %155, %156 : vector<64x1xf32>
    %cst_52 = arith.constant 9.99999974E-6 : f32
    %158 = vector.broadcast %cst_52 : f32 to vector<64x1xf32>
    %159 = arith.addf %157, %158 : vector<64x1xf32>
    %160 = math.rsqrt %159 : vector<64x1xf32>
    %161 = vector.broadcast %160 : vector<64x1xf32> to vector<64x32xf32>
    %162 = arith.mulf %152, %161 : vector<64x32xf32>
    %163 = vector.broadcast %145 : vector<1x32xf32> to vector<64x32xf32>
    %164 = arith.mulf %162, %163 : vector<64x32xf32>
    %165 = vector.broadcast %146 : vector<1x32xf32> to vector<64x32xf32>
    %166 = arith.addf %164, %165 : vector<64x32xf32>
    %c264 = arith.constant 264 : index
    %c0_53 = arith.constant 0 : index
    %167 = vector.load %arg2[%c264, %c0_53] : memref<640x128xf32, #tpu.memory_space<vmem>>, vector<32x96xf32>
    %cst_54 = arith.constant dense<0.000000e+00> : vector<64x96xf32>
    %168 = tpu.matmul %166, %167, %cst_54 {dimension_numbers = #tpu.dot_dimension_numbers<[1], [0], [0], [1], [0, 0, 1, 1], [], []>} : vector<64x32xf32>, vector<32x96xf32>, vector<64x96xf32> -> vector<64x96xf32>
    %c296 = arith.constant 296 : index
    %c0_55 = arith.constant 0 : index
    %169 = vector.load %arg2[%c296, %c0_55] : memref<640x128xf32, #tpu.memory_space<vmem>>, vector<1x96xf32>
    %170 = vector.broadcast %169 : vector<1x96xf32> to vector<64x96xf32>
    %171 = arith.addf %168, %170 : vector<64x96xf32>
    %172 = vector.extract_strided_slice %171 {offsets = [0, 0], sizes = [64, 8], strides = [1, 1]} : vector<64x96xf32> to vector<64x8xf32>
    %173 = vector.shape_cast %172 : vector<64x8xf32> to vector<8x8x8xf32>
    %174 = vector.extract_strided_slice %171 {offsets = [0, 32], sizes = [64, 8], strides = [1, 1]} : vector<64x96xf32> to vector<64x8xf32>
    %175 = vector.shape_cast %174 : vector<64x8xf32> to vector<8x8x8xf32>
    %176 = vector.extract_strided_slice %171 {offsets = [0, 64], sizes = [64, 8], strides = [1, 1]} : vector<64x96xf32> to vector<64x8xf32>
    %177 = vector.shape_cast %176 : vector<64x8xf32> to vector<8x8x8xf32>
    "tpu.trace_start"() <{level = 10 : i32, message = "bqd,bkd->bqk"}> : () -> ()
    %cst_56 = arith.constant dense<0.000000e+00> : vector<8x8x8xf32>
    %178 = tpu.matmul %173, %175, %cst_56 {dimension_numbers = #tpu.dot_dimension_numbers<[2], [2], [1], [1], [0, 0, 0, 1, 1, 1], [0], [0]>} : vector<8x8x8xf32>, vector<8x8x8xf32>, vector<8x8x8xf32> -> vector<8x8x8xf32>
    "tpu.trace_stop"() : () -> ()
    %cst_57 = arith.constant 0.353553385 : f32
    %179 = vector.broadcast %cst_57 : f32 to vector<8x8x8xf32>
    %180 = arith.mulf %178, %179 : vector<8x8x8xf32>
    %cst_58 = arith.constant dense<0xFF800000> : vector<8x8xf32>
    %181 = vector.multi_reduction <maximumf>, %180, %cst_58 [2] : vector<8x8x8xf32> to vector<8x8xf32>
    %182 = vector.shape_cast %181 : vector<8x8xf32> to vector<8x8x1xf32>
    %183 = vector.broadcast %182 : vector<8x8x1xf32> to vector<8x8x8xf32>
    %184 = arith.subf %180, %183 : vector<8x8x8xf32>
    %185 = math.exp %184 : vector<8x8x8xf32>
    %cst_59 = arith.constant dense<0.000000e+00> : vector<8x8xf32>
    %186 = vector.multi_reduction <add>, %185, %cst_59 [2] : vector<8x8x8xf32> to vector<8x8xf32>
    %187 = vector.shape_cast %186 : vector<8x8xf32> to vector<8x8x1xf32>
    %188 = tpu.reciprocal %187 {approx = true} : vector<8x8x1xf32> -> vector<8x8x1xf32>
    %189 = vector.broadcast %188 : vector<8x8x1xf32> to vector<8x8x8xf32>
    %190 = arith.mulf %185, %189 : vector<8x8x8xf32>
    "tpu.trace_start"() <{level = 10 : i32, message = "bqk,bkd->bqd"}> : () -> ()
    %cst_60 = arith.constant dense<0.000000e+00> : vector<8x8x8xf32>
    %191 = tpu.matmul %190, %177, %cst_60 {dimension_numbers = #tpu.dot_dimension_numbers<[2], [1], [1], [2], [0, 0, 0, 1, 1, 2], [0], [0]>} : vector<8x8x8xf32>, vector<8x8x8xf32>, vector<8x8x8xf32> -> vector<8x8x8xf32>
    "tpu.trace_stop"() : () -> ()
    %192 = vector.shape_cast %191 : vector<8x8x8xf32> to vector<64x8xf32>
    %193 = vector.extract_strided_slice %171 {offsets = [0, 8], sizes = [64, 8], strides = [1, 1]} : vector<64x96xf32> to vector<64x8xf32>
    %194 = vector.shape_cast %193 : vector<64x8xf32> to vector<8x8x8xf32>
    %195 = vector.extract_strided_slice %171 {offsets = [0, 40], sizes = [64, 8], strides = [1, 1]} : vector<64x96xf32> to vector<64x8xf32>
    %196 = vector.shape_cast %195 : vector<64x8xf32> to vector<8x8x8xf32>
    %197 = vector.extract_strided_slice %171 {offsets = [0, 72], sizes = [64, 8], strides = [1, 1]} : vector<64x96xf32> to vector<64x8xf32>
    %198 = vector.shape_cast %197 : vector<64x8xf32> to vector<8x8x8xf32>
    "tpu.trace_start"() <{level = 10 : i32, message = "bqd,bkd->bqk"}> : () -> ()
    %cst_61 = arith.constant dense<0.000000e+00> : vector<8x8x8xf32>
    %199 = tpu.matmul %194, %196, %cst_61 {dimension_numbers = #tpu.dot_dimension_numbers<[2], [2], [1], [1], [0, 0, 0, 1, 1, 1], [0], [0]>} : vector<8x8x8xf32>, vector<8x8x8xf32>, vector<8x8x8xf32> -> vector<8x8x8xf32>
    "tpu.trace_stop"() : () -> ()
    %cst_62 = arith.constant 0.353553385 : f32
    %200 = vector.broadcast %cst_62 : f32 to vector<8x8x8xf32>
    %201 = arith.mulf %199, %200 : vector<8x8x8xf32>
    %cst_63 = arith.constant dense<0xFF800000> : vector<8x8xf32>
    %202 = vector.multi_reduction <maximumf>, %201, %cst_63 [2] : vector<8x8x8xf32> to vector<8x8xf32>
    %203 = vector.shape_cast %202 : vector<8x8xf32> to vector<8x8x1xf32>
    %204 = vector.broadcast %203 : vector<8x8x1xf32> to vector<8x8x8xf32>
    %205 = arith.subf %201, %204 : vector<8x8x8xf32>
    %206 = math.exp %205 : vector<8x8x8xf32>
    %cst_64 = arith.constant dense<0.000000e+00> : vector<8x8xf32>
    %207 = vector.multi_reduction <add>, %206, %cst_64 [2] : vector<8x8x8xf32> to vector<8x8xf32>
    %208 = vector.shape_cast %207 : vector<8x8xf32> to vector<8x8x1xf32>
    %209 = tpu.reciprocal %208 {approx = true} : vector<8x8x1xf32> -> vector<8x8x1xf32>
    %210 = vector.broadcast %209 : vector<8x8x1xf32> to vector<8x8x8xf32>
    %211 = arith.mulf %206, %210 : vector<8x8x8xf32>
    "tpu.trace_start"() <{level = 10 : i32, message = "bqk,bkd->bqd"}> : () -> ()
    %cst_65 = arith.constant dense<0.000000e+00> : vector<8x8x8xf32>
    %212 = tpu.matmul %211, %198, %cst_65 {dimension_numbers = #tpu.dot_dimension_numbers<[2], [1], [1], [2], [0, 0, 0, 1, 1, 2], [0], [0]>} : vector<8x8x8xf32>, vector<8x8x8xf32>, vector<8x8x8xf32> -> vector<8x8x8xf32>
    "tpu.trace_stop"() : () -> ()
    %213 = vector.shape_cast %212 : vector<8x8x8xf32> to vector<64x8xf32>
    %214 = vector.extract_strided_slice %171 {offsets = [0, 16], sizes = [64, 8], strides = [1, 1]} : vector<64x96xf32> to vector<64x8xf32>
    %215 = vector.shape_cast %214 : vector<64x8xf32> to vector<8x8x8xf32>
    %216 = vector.extract_strided_slice %171 {offsets = [0, 48], sizes = [64, 8], strides = [1, 1]} : vector<64x96xf32> to vector<64x8xf32>
    %217 = vector.shape_cast %216 : vector<64x8xf32> to vector<8x8x8xf32>
    %218 = vector.extract_strided_slice %171 {offsets = [0, 80], sizes = [64, 8], strides = [1, 1]} : vector<64x96xf32> to vector<64x8xf32>
    %219 = vector.shape_cast %218 : vector<64x8xf32> to vector<8x8x8xf32>
    "tpu.trace_start"() <{level = 10 : i32, message = "bqd,bkd->bqk"}> : () -> ()
    %cst_66 = arith.constant dense<0.000000e+00> : vector<8x8x8xf32>
    %220 = tpu.matmul %215, %217, %cst_66 {dimension_numbers = #tpu.dot_dimension_numbers<[2], [2], [1], [1], [0, 0, 0, 1, 1, 1], [0], [0]>} : vector<8x8x8xf32>, vector<8x8x8xf32>, vector<8x8x8xf32> -> vector<8x8x8xf32>
    "tpu.trace_stop"() : () -> ()
    %cst_67 = arith.constant 0.353553385 : f32
    %221 = vector.broadcast %cst_67 : f32 to vector<8x8x8xf32>
    %222 = arith.mulf %220, %221 : vector<8x8x8xf32>
    %cst_68 = arith.constant dense<0xFF800000> : vector<8x8xf32>
    %223 = vector.multi_reduction <maximumf>, %222, %cst_68 [2] : vector<8x8x8xf32> to vector<8x8xf32>
    %224 = vector.shape_cast %223 : vector<8x8xf32> to vector<8x8x1xf32>
    %225 = vector.broadcast %224 : vector<8x8x1xf32> to vector<8x8x8xf32>
    %226 = arith.subf %222, %225 : vector<8x8x8xf32>
    %227 = math.exp %226 : vector<8x8x8xf32>
    %cst_69 = arith.constant dense<0.000000e+00> : vector<8x8xf32>
    %228 = vector.multi_reduction <add>, %227, %cst_69 [2] : vector<8x8x8xf32> to vector<8x8xf32>
    %229 = vector.shape_cast %228 : vector<8x8xf32> to vector<8x8x1xf32>
    %230 = tpu.reciprocal %229 {approx = true} : vector<8x8x1xf32> -> vector<8x8x1xf32>
    %231 = vector.broadcast %230 : vector<8x8x1xf32> to vector<8x8x8xf32>
    %232 = arith.mulf %227, %231 : vector<8x8x8xf32>
    "tpu.trace_start"() <{level = 10 : i32, message = "bqk,bkd->bqd"}> : () -> ()
    %cst_70 = arith.constant dense<0.000000e+00> : vector<8x8x8xf32>
    %233 = tpu.matmul %232, %219, %cst_70 {dimension_numbers = #tpu.dot_dimension_numbers<[2], [1], [1], [2], [0, 0, 0, 1, 1, 2], [0], [0]>} : vector<8x8x8xf32>, vector<8x8x8xf32>, vector<8x8x8xf32> -> vector<8x8x8xf32>
    "tpu.trace_stop"() : () -> ()
    %234 = vector.shape_cast %233 : vector<8x8x8xf32> to vector<64x8xf32>
    %235 = vector.extract_strided_slice %171 {offsets = [0, 24], sizes = [64, 8], strides = [1, 1]} : vector<64x96xf32> to vector<64x8xf32>
    %236 = vector.shape_cast %235 : vector<64x8xf32> to vector<8x8x8xf32>
    %237 = vector.extract_strided_slice %171 {offsets = [0, 56], sizes = [64, 8], strides = [1, 1]} : vector<64x96xf32> to vector<64x8xf32>
    %238 = vector.shape_cast %237 : vector<64x8xf32> to vector<8x8x8xf32>
    %239 = vector.extract_strided_slice %171 {offsets = [0, 88], sizes = [64, 8], strides = [1, 1]} : vector<64x96xf32> to vector<64x8xf32>
    %240 = vector.shape_cast %239 : vector<64x8xf32> to vector<8x8x8xf32>
    "tpu.trace_start"() <{level = 10 : i32, message = "bqd,bkd->bqk"}> : () -> ()
    %cst_71 = arith.constant dense<0.000000e+00> : vector<8x8x8xf32>
    %241 = tpu.matmul %236, %238, %cst_71 {dimension_numbers = #tpu.dot_dimension_numbers<[2], [2], [1], [1], [0, 0, 0, 1, 1, 1], [0], [0]>} : vector<8x8x8xf32>, vector<8x8x8xf32>, vector<8x8x8xf32> -> vector<8x8x8xf32>
    "tpu.trace_stop"() : () -> ()
    %cst_72 = arith.constant 0.353553385 : f32
    %242 = vector.broadcast %cst_72 : f32 to vector<8x8x8xf32>
    %243 = arith.mulf %241, %242 : vector<8x8x8xf32>
    %cst_73 = arith.constant dense<0xFF800000> : vector<8x8xf32>
    %244 = vector.multi_reduction <maximumf>, %243, %cst_73 [2] : vector<8x8x8xf32> to vector<8x8xf32>
    %245 = vector.shape_cast %244 : vector<8x8xf32> to vector<8x8x1xf32>
    %246 = vector.broadcast %245 : vector<8x8x1xf32> to vector<8x8x8xf32>
    %247 = arith.subf %243, %246 : vector<8x8x8xf32>
    %248 = math.exp %247 : vector<8x8x8xf32>
    %cst_74 = arith.constant dense<0.000000e+00> : vector<8x8xf32>
    %249 = vector.multi_reduction <add>, %248, %cst_74 [2] : vector<8x8x8xf32> to vector<8x8xf32>
    %250 = vector.shape_cast %249 : vector<8x8xf32> to vector<8x8x1xf32>
    %251 = tpu.reciprocal %250 {approx = true} : vector<8x8x1xf32> -> vector<8x8x1xf32>
    %252 = vector.broadcast %251 : vector<8x8x1xf32> to vector<8x8x8xf32>
    %253 = arith.mulf %248, %252 : vector<8x8x8xf32>
    "tpu.trace_start"() <{level = 10 : i32, message = "bqk,bkd->bqd"}> : () -> ()
    %cst_75 = arith.constant dense<0.000000e+00> : vector<8x8x8xf32>
    %254 = tpu.matmul %253, %240, %cst_75 {dimension_numbers = #tpu.dot_dimension_numbers<[2], [1], [1], [2], [0, 0, 0, 1, 1, 2], [0], [0]>} : vector<8x8x8xf32>, vector<8x8x8xf32>, vector<8x8x8xf32> -> vector<8x8x8xf32>
    "tpu.trace_stop"() : () -> ()
    %255 = vector.shape_cast %254 : vector<8x8x8xf32> to vector<64x8xf32>
    %256 = tpu.concatenate %192, %213, %234, %255 in 1 : vector<64x8xf32>, vector<64x8xf32>, vector<64x8xf32>, vector<64x8xf32> -> vector<64x32xf32>
    %c304 = arith.constant 304 : index
    %c0_76 = arith.constant 0 : index
    %257 = vector.load %arg2[%c304, %c0_76] : memref<640x128xf32, #tpu.memory_space<vmem>>, vector<32x32xf32>
    %cst_77 = arith.constant dense<0.000000e+00> : vector<64x32xf32>
    %258 = tpu.matmul %256, %257, %cst_77 {dimension_numbers = #tpu.dot_dimension_numbers<[1], [0], [0], [1], [0, 0, 1, 1], [], []>} : vector<64x32xf32>, vector<32x32xf32>, vector<64x32xf32> -> vector<64x32xf32>
    %c336 = arith.constant 336 : index
    %c0_78 = arith.constant 0 : index
    %259 = vector.load %arg2[%c336, %c0_78] : memref<640x128xf32, #tpu.memory_space<vmem>>, vector<1x32xf32>
    %260 = vector.broadcast %259 : vector<1x32xf32> to vector<64x32xf32>
    %261 = arith.addf %258, %260 : vector<64x32xf32>
    %262 = arith.addf %166, %261 : vector<64x32xf32>
    %c344 = arith.constant 344 : index
    %c0_79 = arith.constant 0 : index
    %263 = vector.load %arg2[%c344, %c0_79] : memref<640x128xf32, #tpu.memory_space<vmem>>, vector<1x32xf32>
    %c352 = arith.constant 352 : index
    %c0_80 = arith.constant 0 : index
    %264 = vector.load %arg2[%c352, %c0_80] : memref<640x128xf32, #tpu.memory_space<vmem>>, vector<1x32xf32>
    %cst_81 = arith.constant dense<0.000000e+00> : vector<64xf32>
    %265 = vector.multi_reduction <add>, %262, %cst_81 [1] : vector<64x32xf32> to vector<64xf32>
    %266 = vector.shape_cast %265 : vector<64xf32> to vector<64x1xf32>
    %cst_82 = arith.constant 3.200000e+01 : f32
    %267 = vector.broadcast %cst_82 : f32 to vector<64x1xf32>
    %268 = arith.divf %266, %267 : vector<64x1xf32>
    %269 = vector.broadcast %268 : vector<64x1xf32> to vector<64x32xf32>
    %270 = arith.subf %262, %269 : vector<64x32xf32>
    %271 = arith.mulf %270, %270 : vector<64x32xf32>
    %cst_83 = arith.constant dense<0.000000e+00> : vector<64xf32>
    %272 = vector.multi_reduction <add>, %271, %cst_83 [1] : vector<64x32xf32> to vector<64xf32>
    %273 = vector.shape_cast %272 : vector<64xf32> to vector<64x1xf32>
    %cst_84 = arith.constant 3.200000e+01 : f32
    %274 = vector.broadcast %cst_84 : f32 to vector<64x1xf32>
    %275 = arith.divf %273, %274 : vector<64x1xf32>
    %cst_85 = arith.constant 9.99999974E-6 : f32
    %276 = vector.broadcast %cst_85 : f32 to vector<64x1xf32>
    %277 = arith.addf %275, %276 : vector<64x1xf32>
    %278 = math.rsqrt %277 : vector<64x1xf32>
    %279 = vector.broadcast %278 : vector<64x1xf32> to vector<64x32xf32>
    %280 = arith.mulf %270, %279 : vector<64x32xf32>
    %281 = vector.broadcast %263 : vector<1x32xf32> to vector<64x32xf32>
    %282 = arith.mulf %280, %281 : vector<64x32xf32>
    %283 = vector.broadcast %264 : vector<1x32xf32> to vector<64x32xf32>
    %284 = arith.addf %282, %283 : vector<64x32xf32>
    %c376 = arith.constant 376 : index
    %c0_86 = arith.constant 0 : index
    %285 = vector.load %arg2[%c376, %c0_86] : memref<640x128xf32, #tpu.memory_space<vmem>>, vector<32x64xf32>
    %cst_87 = arith.constant dense<0.000000e+00> : vector<64x64xf32>
    %286 = tpu.matmul %284, %285, %cst_87 {dimension_numbers = #tpu.dot_dimension_numbers<[1], [0], [0], [1], [0, 0, 1, 1], [], []>} : vector<64x32xf32>, vector<32x64xf32>, vector<64x64xf32> -> vector<64x64xf32>
    %c408 = arith.constant 408 : index
    %c0_88 = arith.constant 0 : index
    %287 = vector.load %arg2[%c408, %c0_88] : memref<640x128xf32, #tpu.memory_space<vmem>>, vector<1x64xf32>
    %288 = vector.broadcast %287 : vector<1x64xf32> to vector<64x64xf32>
    %289 = arith.addf %286, %288 : vector<64x64xf32>
    %cst_89 = arith.constant 5.000000e-01 : f32
    %290 = vector.broadcast %cst_89 : f32 to vector<64x64xf32>
    %291 = arith.mulf %290, %289 : vector<64x64xf32>
    %cst_90 = arith.constant 4.471500e-02 : f32
    %292 = vector.broadcast %cst_90 : f32 to vector<64x64xf32>
    %293 = arith.mulf %292, %289 : vector<64x64xf32>
    %294 = arith.mulf %293, %289 : vector<64x64xf32>
    %295 = arith.mulf %294, %289 : vector<64x64xf32>
    %296 = arith.addf %289, %295 : vector<64x64xf32>
    %cst_91 = arith.constant 0.797884583 : f32
    %297 = vector.broadcast %cst_91 : f32 to vector<64x64xf32>
    %298 = arith.mulf %297, %296 : vector<64x64xf32>
    %299 = math.tanh %298 : vector<64x64xf32>
    %cst_92 = arith.constant 1.000000e+00 : f32
    %300 = vector.broadcast %cst_92 : f32 to vector<64x64xf32>
    %301 = arith.addf %300, %299 : vector<64x64xf32>
    %302 = arith.mulf %291, %301 : vector<64x64xf32>
    %c416 = arith.constant 416 : index
    %c0_93 = arith.constant 0 : index
    %303 = vector.load %arg2[%c416, %c0_93] : memref<640x128xf32, #tpu.memory_space<vmem>>, vector<64x32xf32>
    %cst_94 = arith.constant dense<0.000000e+00> : vector<64x32xf32>
    %304 = tpu.matmul %302, %303, %cst_94 {dimension_numbers = #tpu.dot_dimension_numbers<[1], [0], [0], [1], [0, 0, 1, 1], [], []>} : vector<64x64xf32>, vector<64x32xf32>, vector<64x32xf32> -> vector<64x32xf32>
    %c480 = arith.constant 480 : index
    %c0_95 = arith.constant 0 : index
    %305 = vector.load %arg2[%c480, %c0_95] : memref<640x128xf32, #tpu.memory_space<vmem>>, vector<1x32xf32>
    %306 = vector.broadcast %305 : vector<1x32xf32> to vector<64x32xf32>
    %307 = arith.addf %304, %306 : vector<64x32xf32>
    %308 = arith.addf %284, %307 : vector<64x32xf32>
    %c360 = arith.constant 360 : index
    %c0_96 = arith.constant 0 : index
    %309 = vector.load %arg2[%c360, %c0_96] : memref<640x128xf32, #tpu.memory_space<vmem>>, vector<1x32xf32>
    %c368 = arith.constant 368 : index
    %c0_97 = arith.constant 0 : index
    %310 = vector.load %arg2[%c368, %c0_97] : memref<640x128xf32, #tpu.memory_space<vmem>>, vector<1x32xf32>
    %cst_98 = arith.constant dense<0.000000e+00> : vector<64xf32>
    %311 = vector.multi_reduction <add>, %308, %cst_98 [1] : vector<64x32xf32> to vector<64xf32>
    %312 = vector.shape_cast %311 : vector<64xf32> to vector<64x1xf32>
    %cst_99 = arith.constant 3.200000e+01 : f32
    %313 = vector.broadcast %cst_99 : f32 to vector<64x1xf32>
    %314 = arith.divf %312, %313 : vector<64x1xf32>
    %315 = vector.broadcast %314 : vector<64x1xf32> to vector<64x32xf32>
    %316 = arith.subf %308, %315 : vector<64x32xf32>
    %317 = arith.mulf %316, %316 : vector<64x32xf32>
    %cst_100 = arith.constant dense<0.000000e+00> : vector<64xf32>
    %318 = vector.multi_reduction <add>, %317, %cst_100 [1] : vector<64x32xf32> to vector<64xf32>
    %319 = vector.shape_cast %318 : vector<64xf32> to vector<64x1xf32>
    %cst_101 = arith.constant 3.200000e+01 : f32
    %320 = vector.broadcast %cst_101 : f32 to vector<64x1xf32>
    %321 = arith.divf %319, %320 : vector<64x1xf32>
    %cst_102 = arith.constant 9.99999974E-6 : f32
    %322 = vector.broadcast %cst_102 : f32 to vector<64x1xf32>
    %323 = arith.addf %321, %322 : vector<64x1xf32>
    %324 = math.rsqrt %323 : vector<64x1xf32>
    %325 = vector.broadcast %324 : vector<64x1xf32> to vector<64x32xf32>
    %326 = arith.mulf %316, %325 : vector<64x32xf32>
    %327 = vector.broadcast %309 : vector<1x32xf32> to vector<64x32xf32>
    %328 = arith.mulf %326, %327 : vector<64x32xf32>
    %329 = vector.broadcast %310 : vector<1x32xf32> to vector<64x32xf32>
    %330 = arith.addf %328, %329 : vector<64x32xf32>
    %c488 = arith.constant 488 : index
    %c0_103 = arith.constant 0 : index
    %331 = vector.load %arg2[%c488, %c0_103] : memref<640x128xf32, #tpu.memory_space<vmem>>, vector<1x32xf32>
    %c496 = arith.constant 496 : index
    %c0_104 = arith.constant 0 : index
    %332 = vector.load %arg2[%c496, %c0_104] : memref<640x128xf32, #tpu.memory_space<vmem>>, vector<1x32xf32>
    %cst_105 = arith.constant dense<0.000000e+00> : vector<64xf32>
    %333 = vector.multi_reduction <add>, %330, %cst_105 [1] : vector<64x32xf32> to vector<64xf32>
    %334 = vector.shape_cast %333 : vector<64xf32> to vector<64x1xf32>
    %cst_106 = arith.constant 3.200000e+01 : f32
    %335 = vector.broadcast %cst_106 : f32 to vector<64x1xf32>
    %336 = arith.divf %334, %335 : vector<64x1xf32>
    %337 = vector.broadcast %336 : vector<64x1xf32> to vector<64x32xf32>
    %338 = arith.subf %330, %337 : vector<64x32xf32>
    %339 = arith.mulf %338, %338 : vector<64x32xf32>
    %cst_107 = arith.constant dense<0.000000e+00> : vector<64xf32>
    %340 = vector.multi_reduction <add>, %339, %cst_107 [1] : vector<64x32xf32> to vector<64xf32>
    %341 = vector.shape_cast %340 : vector<64xf32> to vector<64x1xf32>
    %cst_108 = arith.constant 3.200000e+01 : f32
    %342 = vector.broadcast %cst_108 : f32 to vector<64x1xf32>
    %343 = arith.divf %341, %342 : vector<64x1xf32>
    %cst_109 = arith.constant 9.99999974E-6 : f32
    %344 = vector.broadcast %cst_109 : f32 to vector<64x1xf32>
    %345 = arith.addf %343, %344 : vector<64x1xf32>
    %346 = math.rsqrt %345 : vector<64x1xf32>
    %347 = vector.broadcast %346 : vector<64x1xf32> to vector<64x32xf32>
    %348 = arith.mulf %338, %347 : vector<64x32xf32>
    %349 = vector.broadcast %331 : vector<1x32xf32> to vector<64x32xf32>
    %350 = arith.mulf %348, %349 : vector<64x32xf32>
    %351 = vector.broadcast %332 : vector<1x32xf32> to vector<64x32xf32>
    %352 = arith.addf %350, %351 : vector<64x32xf32>
    %c504 = arith.constant 504 : index
    %c0_110 = arith.constant 0 : index
    %353 = vector.load %arg2[%c504, %c0_110] : memref<640x128xf32, #tpu.memory_space<vmem>>, vector<32x16xf32>
    %cst_111 = arith.constant dense<0.000000e+00> : vector<64x16xf32>
    %354 = tpu.matmul %352, %353, %cst_111 {dimension_numbers = #tpu.dot_dimension_numbers<[1], [0], [0], [1], [0, 0, 1, 1], [], []>} : vector<64x32xf32>, vector<32x16xf32>, vector<64x16xf32> -> vector<64x16xf32>
    %c536 = arith.constant 536 : index
    %c0_112 = arith.constant 0 : index
    %355 = vector.load %arg2[%c536, %c0_112] : memref<640x128xf32, #tpu.memory_space<vmem>>, vector<1x16xf32>
    %356 = vector.broadcast %355 : vector<1x16xf32> to vector<64x16xf32>
    %357 = arith.addf %354, %356 : vector<64x16xf32>
    %cst_113 = arith.constant 5.000000e-01 : f32
    %358 = vector.broadcast %cst_113 : f32 to vector<64x16xf32>
    %359 = arith.mulf %358, %357 : vector<64x16xf32>
    %cst_114 = arith.constant 4.471500e-02 : f32
    %360 = vector.broadcast %cst_114 : f32 to vector<64x16xf32>
    %361 = arith.mulf %360, %357 : vector<64x16xf32>
    %362 = arith.mulf %361, %357 : vector<64x16xf32>
    %363 = arith.mulf %362, %357 : vector<64x16xf32>
    %364 = arith.addf %357, %363 : vector<64x16xf32>
    %cst_115 = arith.constant 0.797884583 : f32
    %365 = vector.broadcast %cst_115 : f32 to vector<64x16xf32>
    %366 = arith.mulf %365, %364 : vector<64x16xf32>
    %367 = math.tanh %366 : vector<64x16xf32>
    %cst_116 = arith.constant 1.000000e+00 : f32
    %368 = vector.broadcast %cst_116 : f32 to vector<64x16xf32>
    %369 = arith.addf %368, %367 : vector<64x16xf32>
    %370 = arith.mulf %359, %369 : vector<64x16xf32>
    %c544 = arith.constant 544 : index
    %c0_117 = arith.constant 0 : index
    %371 = vector.load %arg2[%c544, %c0_117] : memref<640x128xf32, #tpu.memory_space<vmem>>, vector<16x2xf32>
    %cst_118 = arith.constant dense<0.000000e+00> : vector<64x2xf32>
    %372 = tpu.matmul %370, %371, %cst_118 {dimension_numbers = #tpu.dot_dimension_numbers<[1], [0], [0], [1], [0, 0, 1, 1], [], []>} : vector<64x16xf32>, vector<16x2xf32>, vector<64x2xf32> -> vector<64x2xf32>
    %c560 = arith.constant 560 : index
    %c0_119 = arith.constant 0 : index
    %373 = vector.load %arg2[%c560, %c0_119] : memref<640x128xf32, #tpu.memory_space<vmem>>, vector<1x2xf32>
    %374 = vector.broadcast %373 : vector<1x2xf32> to vector<64x2xf32>
    %375 = arith.addf %372, %374 : vector<64x2xf32>
    %cst_120 = arith.constant 0.000000e+00 : f32
    %376 = vector.broadcast %cst_120 : f32 to vector<64x2xf32>
    %377 = arith.subf %376, %375 : vector<64x2xf32>
    %378 = math.exp %377 : vector<64x2xf32>
    %cst_121 = arith.constant 1.000000e+00 : f32
    %379 = vector.broadcast %cst_121 : f32 to vector<64x2xf32>
    %380 = arith.addf %379, %378 : vector<64x2xf32>
    %381 = tpu.reciprocal %380 {approx = true} : vector<64x2xf32> -> vector<64x2xf32>
    %c568 = arith.constant 568 : index
    %c0_122 = arith.constant 0 : index
    %382 = vector.load %arg2[%c568, %c0_122] : memref<640x128xf32, #tpu.memory_space<vmem>>, vector<1x32xf32>
    %c576 = arith.constant 576 : index
    %c0_123 = arith.constant 0 : index
    %383 = vector.load %arg2[%c576, %c0_123] : memref<640x128xf32, #tpu.memory_space<vmem>>, vector<1x32xf32>
    %cst_124 = arith.constant dense<0.000000e+00> : vector<64xf32>
    %384 = vector.multi_reduction <add>, %330, %cst_124 [1] : vector<64x32xf32> to vector<64xf32>
    %385 = vector.shape_cast %384 : vector<64xf32> to vector<64x1xf32>
    %cst_125 = arith.constant 3.200000e+01 : f32
    %386 = vector.broadcast %cst_125 : f32 to vector<64x1xf32>
    %387 = arith.divf %385, %386 : vector<64x1xf32>
    %388 = vector.broadcast %387 : vector<64x1xf32> to vector<64x32xf32>
    %389 = arith.subf %330, %388 : vector<64x32xf32>
    %390 = arith.mulf %389, %389 : vector<64x32xf32>
    %cst_126 = arith.constant dense<0.000000e+00> : vector<64xf32>
    %391 = vector.multi_reduction <add>, %390, %cst_126 [1] : vector<64x32xf32> to vector<64xf32>
    %392 = vector.shape_cast %391 : vector<64xf32> to vector<64x1xf32>
    %cst_127 = arith.constant 3.200000e+01 : f32
    %393 = vector.broadcast %cst_127 : f32 to vector<64x1xf32>
    %394 = arith.divf %392, %393 : vector<64x1xf32>
    %cst_128 = arith.constant 9.99999974E-6 : f32
    %395 = vector.broadcast %cst_128 : f32 to vector<64x1xf32>
    %396 = arith.addf %394, %395 : vector<64x1xf32>
    %397 = math.rsqrt %396 : vector<64x1xf32>
    %398 = vector.broadcast %397 : vector<64x1xf32> to vector<64x32xf32>
    %399 = arith.mulf %389, %398 : vector<64x32xf32>
    %400 = vector.broadcast %382 : vector<1x32xf32> to vector<64x32xf32>
    %401 = arith.mulf %399, %400 : vector<64x32xf32>
    %402 = vector.broadcast %383 : vector<1x32xf32> to vector<64x32xf32>
    %403 = arith.addf %401, %402 : vector<64x32xf32>
    %c584 = arith.constant 584 : index
    %c0_129 = arith.constant 0 : index
    %404 = vector.load %arg2[%c584, %c0_129] : memref<640x128xf32, #tpu.memory_space<vmem>>, vector<32x8xf32>
    %cst_130 = arith.constant dense<0.000000e+00> : vector<64x8xf32>
    %405 = tpu.matmul %403, %404, %cst_130 {dimension_numbers = #tpu.dot_dimension_numbers<[1], [0], [0], [1], [0, 0, 1, 1], [], []>} : vector<64x32xf32>, vector<32x8xf32>, vector<64x8xf32> -> vector<64x8xf32>
    %c616 = arith.constant 616 : index
    %c0_131 = arith.constant 0 : index
    %406 = vector.load %arg2[%c616, %c0_131] : memref<640x128xf32, #tpu.memory_space<vmem>>, vector<1x8xf32>
    %407 = vector.broadcast %406 : vector<1x8xf32> to vector<64x8xf32>
    %408 = arith.addf %405, %407 : vector<64x8xf32>
    %cst_132 = arith.constant 5.000000e-01 : f32
    %409 = vector.broadcast %cst_132 : f32 to vector<64x8xf32>
    %410 = arith.mulf %409, %408 : vector<64x8xf32>
    %cst_133 = arith.constant 4.471500e-02 : f32
    %411 = vector.broadcast %cst_133 : f32 to vector<64x8xf32>
    %412 = arith.mulf %411, %408 : vector<64x8xf32>
    %413 = arith.mulf %412, %408 : vector<64x8xf32>
    %414 = arith.mulf %413, %408 : vector<64x8xf32>
    %415 = arith.addf %408, %414 : vector<64x8xf32>
    %cst_134 = arith.constant 0.797884583 : f32
    %416 = vector.broadcast %cst_134 : f32 to vector<64x8xf32>
    %417 = arith.mulf %416, %415 : vector<64x8xf32>
    %418 = math.tanh %417 : vector<64x8xf32>
    %cst_135 = arith.constant 1.000000e+00 : f32
    %419 = vector.broadcast %cst_135 : f32 to vector<64x8xf32>
    %420 = arith.addf %419, %418 : vector<64x8xf32>
    %421 = arith.mulf %410, %420 : vector<64x8xf32>
    %c624 = arith.constant 624 : index
    %c0_136 = arith.constant 0 : index
    %422 = vector.load %arg2[%c624, %c0_136] : memref<640x128xf32, #tpu.memory_space<vmem>>, vector<8x4xf32>
    %cst_137 = arith.constant dense<0.000000e+00> : vector<64x4xf32>
    %423 = tpu.matmul %421, %422, %cst_137 {dimension_numbers = #tpu.dot_dimension_numbers<[1], [0], [0], [1], [0, 0, 1, 1], [], []>} : vector<64x8xf32>, vector<8x4xf32>, vector<64x4xf32> -> vector<64x4xf32>
    %c632 = arith.constant 632 : index
    %c0_138 = arith.constant 0 : index
    %424 = vector.load %arg2[%c632, %c0_138] : memref<640x128xf32, #tpu.memory_space<vmem>>, vector<1x4xf32>
    %425 = vector.broadcast %424 : vector<1x4xf32> to vector<64x4xf32>
    %426 = arith.addf %423, %425 : vector<64x4xf32>
    %cst_139 = arith.constant 0.000000e+00 : f32
    %427 = vector.broadcast %cst_139 : f32 to vector<64x90xf32>
    %428 = tpu.concatenate %330, %381, %426, %427 in 1 : vector<64x32xf32>, vector<64x2xf32>, vector<64x4xf32>, vector<64x90xf32> -> vector<64x128xf32>
    %c0_140 = arith.constant 0 : index
    %c0_141 = arith.constant 0 : index
    %429 = vector.load %arg3[%c0_140, %c0_141] : memref<64x128xf32, #tpu.memory_space<vmem>>, vector<64x128xf32>
    tpu.vector_store %arg3[%c0_140, %c0_141], %428 {strides = array<i32>} : memref<64x128xf32, #tpu.memory_space<vmem>>, vector<64x128xf32>,
    return
  }
  func.func @transform_0(%arg0: i32) -> (i32, i32) {
    %c0_i32 = arith.constant 0 : i32
    %c0_i32_0 = arith.constant 0 : i32
    return %arg0, %c0_i32 : i32, i32
  }
  func.func @transform_1(%arg0: i32) -> (i32, i32) {
    %c0_i32 = arith.constant 0 : i32
    %c0_i32_0 = arith.constant 0 : i32
    %c0_i32_1 = arith.constant 0 : i32
    return %c0_i32, %c0_i32_0 : i32, i32
  }
  func.func @transform_2(%arg0: i32) -> (i32, i32) {
    %c0_i32 = arith.constant 0 : i32
    %c0_i32_0 = arith.constant 0 : i32
    return %arg0, %c0_i32 : i32, i32
  }
}

</mosaic_0001>

<bundles_post_ra>
// kernel: osu_transformer_forward.1
= control target key start
LH: loop header
LB: loop body
LE: loop exit
PB: predicated region body
PF: predicated region fallthrough
CT: control target
= control target key end

     0   :  { %vm49_vm0 = vcmask 1044480   ;;  %vm24_vm1 = vcmask 302080   ;;  %vm167_vm2 = vcmask 261120   ;;  %v18739_v25 = vmov 0.0   ;;  %s15914_s16 = smov 96   ;;  %s15915_s17 = smov 64   ;;  %s18736_s1 = inlined_call_operand.vmem [shape: f32[640,128], index: 1, kind: input, shape index: {}]   ;;  %s18737_s0 = inlined_call_operand.vmem [shape: f32[64,37], index: 0, kind: input, shape index: {}]   ;;  %s18738_s2 = inlined_call_operand.vmem [shape: f32[64,128], index: 2, kind: output, shape index: {}]  }
   0x1   :  { %v23_v0 = vld [vmem:[%s18736_s1 + $0x20] sm:$0x1f]  ;;  %v22_v1 = vld [vmem:[%s18736_s1 + $0x18] sm:$0xff]  ;;  %v21_v3 = vld [vmem:[%s18736_s1 + $0x10] sm:$0xff]  ;;  %vm15913_vm3 = vmmov 0   ;;  %vm300_vm4 = vcmask 64512  }
   0x2   :  { %14546 = vmatprep.subr.msk.mxu0 %vm49_vm0, %v23_v0  ;;  %v11_v2 = vld [vmem:[%s18737_s0] sm:$0xff]  ;;  %v20_v4 = vld [vmem:[%s18736_s1 + $0x8] sm:$0xff]  ;;  %v160_v7 = vld [vmem:[%s18736_s1 + $0x38] sm:$0xff]  ;;  %s15916_s18 = smov 88   ;;  %s15917_s19 = smov 120   ;;  %vm5715_vm5 = vcmask 195584  }
   0x3   :  { %14547 = vmatpush3.msk.msra.mxu0 %vm49_vm0, %v23_v0  ;;  %14556 = vmatprep.mubr.msk.f32.mxu0 %vm24_vm1, %v11_v2  ;;  %v161_v5 = vld [vmem:[%s18736_s1 + $0x40] sm:$0xff]  ;;  %v12_v8 = vld [vmem:[%s18737_s0 + $0x8] sm:$0xff]  ;;  %v13_v9 = vld [vmem:[%s18737_s0 + $0x10] sm:$0xff]  ;;  %s15918_s20 = smov 56   ;;  %s15919_s21 = smov 80   ;;  %vm5706_vm6 = vcmask 130048  }
   0x4   :  { %14548 = vmatprep.subr.mxu0 %v22_v1  ;;  %15454 = vmatprep.subr.mxu1 %v161_v5  ;;  %v19_v6 = vld [vmem:[%s18736_s1] sm:$0xff]  ;;  %v14_v10 = vld [vmem:[%s18737_s0 + $0x18] sm:$0xff]  ;;  %v16_v12 = vld [vmem:[%s18737_s0 + $0x28] sm:$0xff]  ;;  %s15920_s22 = smov 112   ;;  %s15921_s23 = smov 48   ;;  %vm6224_vm7 = vcmask 523264  }
   0x5   :  { %14549 = vmatpush3.msra.mxu0 %v22_v1  ;;  %15458 = vmatpush3.msra.mxu1 %v161_v5  ;;  %v15_v11 = vld [vmem:[%s18737_s0 + $0x20] sm:$0xff]  ;;  %v17_v13 = vld [vmem:[%s18737_s0 + $0x30] sm:$0xff]  ;;  %v18_v14 = vld [vmem:[%s18737_s0 + $0x38] sm:$0xff]  ;;  %s15922_s24 = smov 72   ;;  %s15923_s25 = smov 104   ;;  %vm13779_vm8 = vcmask 277504  }
   0x6   :  { %14550 = vmatprep.subr.mxu0 %v21_v3  ;;  %15455 = vmatprep.subr.mxu1 %v160_v7  ;;  %v159_v15 = vld [vmem:[%s18736_s1 + $0x30] sm:$0xff]  ;;  %v158_v16 = vld [vmem:[%s18736_s1 + $0x28] sm:$0xff]  ;;  %s15924_s26 = smov 40   ;;  %s15925_s27 = smov 8   ;;  %vm13788_vm9 = vcmask 310272  }
   0x7   :  { %14551 = vmatpush3.msra.mxu0 %v21_v3  ;;  %15459 = vmatpush3.msra.mxu1 %v160_v7  ;;  %v13818_v27 = vld [vmem:[%s18736_s1 + $0x48] ss:$0 sm:$0xff]  ;;  %s15926_s28 = smov 16   ;;  %s15927_s9 = smov 24  }
   0x8   :  { %14552 = vmatprep.subr.mxu0 %v20_v4  ;;  %15456 = vmatprep.subr.mxu1 %v159_v15  ;;  %s15928_s10 = smov 34  }
   0x9   :  { %14553 = vmatpush3.msra.mxu0 %v20_v4  ;;  %15460 = vmatpush3.msra.mxu1 %v159_v15 }
   0xa   :  { %14554 = vmatprep.subr.mxu0 %v19_v6  ;;  %15457 = vmatprep.subr.mxu1 %v158_v16 }
   0xb   :  { %14555 = vmatpush3.msra.mxu0 %v19_v6  ;;  %15461 = vmatpush3.msra.mxu1 %v158_v16 }
   0xc   :  { %14557 = vmatmul.mubr.msk.f32.vlgmr.msra.gmra.mxu0 %vm24_vm1, %v12_v8  ;;  %14568 = vmatprep.subr.mxu0 %v161_v5 }
   0xd   :  { %14559 = vmatprep.mubr.msk.f32.mxu0 %vm24_vm1, %v13_v9  ;;  %14569 = vmatpush3.msra.mxu0 %v161_v5 }
   0xe   :  { %14570 = vmatprep.subr.mxu0 %v160_v7  ;;  %14598 = vmatprep.subr.mxu1 %v18739_v25 }
   0xf   :  { %14571 = vmatpush3.msra.mxu0 %v160_v7 }
  0x10   :  { %14560 = vmatmul.mubr.msk.f32.gmra.mxu0 %vm24_vm1, %v14_v10  ;;  %14572 = vmatprep.subr.mxu0 %v159_v15 }
  0x11   :  { %14562 = vmatprep.mubr.msk.f32.mxu0 %vm24_vm1, %v15_v11  ;;  %14573 = vmatpush3.msra.mxu0 %v159_v15 }
  0x12   :  { %14574 = vmatprep.subr.mxu0 %v158_v16 }
  0x13   :  { %14575 = vmatpush3.msra.mxu0 %v158_v16 }
  0x14   :  { %14563 = vmatmul.mubr.msk.f32.gmra.mxu0 %vm24_vm1, %v16_v12  ;;  %14588 = vmatprep.subr.mxu0 %v18739_v25 }
  0x15   :  { %14565 = vmatprep.mubr.msk.f32.mxu0 %vm24_vm1, %v17_v13 }
  0x18   :  { %14566 = vmatmul.mubr.msk.f32.gmra.mxu0 %vm24_vm1, %v18_v14 }
  0xcc   :  { %v16004_v17 = vpop.f32.mrf.mxu0 }
  0xce   :  { %v16006_v18 = vpop.f32.mrf.mxu0 }
  0xcf   :  { %14576 = vmatprep.mubr.msk.f32.mxu0 %vm167_vm2, %v16006_v18 }
  0xd0   :  { %v16010_v19 = vpop.f32.mrf.mxu0  ;;  %14577 = vmatmul.mubr.msk.f32.vlgmr.msra.gmra.mxu0 %vm167_vm2, %v16004_v17 }
  0xd1   :  { %14590 = vmatprep.mubr.msk.f32.mxu0 %vm15913_vm3, %v18739_v25 }
  0xd2   :  { %v16014_v20 = vpop.f32.mrf.mxu0 }
  0xd3   :  { %14579 = vmatprep.mubr.msk.f32.mxu1 %vm167_vm2, %v16014_v20 }
  0xd4   :  { %v16018_v21 = vpop.f32.mrf.mxu0  ;;  %14580 = vmatmul.mubr.msk.f32.vlgmr.msra.gmra.mxu1 %vm167_vm2, %v16010_v19 }
  0xd6   :  { %v16022_v22 = vpop.f32.mrf.mxu0 }
  0xd7   :  { %14582 = vmatprep.mubr.msk.f32.mxu1 %vm167_vm2, %v16022_v22 }
  0xd8   :  { %v16026_v23 = vpop.f32.mrf.mxu0  ;;  %14583 = vmatmul.mubr.msk.f32.gmra.mxu1 %vm167_vm2, %v16018_v21 }
  0xd9   :  { %18742 = vst [vmem:[#allocation2_spill] sm:$0xff] %v16026_v23 }
  0xda   :  { %v16030_v24 = vpop.f32.mrf.mxu0 }
  0xdb   :  { %14585 = vmatprep.mubr.msk.f32.mxu1 %vm167_vm2, %v16030_v24 }
  0xdc   :  { %14586 = vmatmul.mubr.msk.f32.gmra.mxu1 %vm167_vm2, %v16026_v23 }
  0xdd   :  { %14600 = vmatprep.mubr.msk.f32.mxu1 %vm15913_vm3, %v18739_v25 }
 0x190   :  { %v14578_v26 = vpop.f32.mrf.mxu0 }
 0x191   :  { %v16049_v32 = vadd.f32 %v14578_v26, %v13818_v27 }
 0x192   :  { %v258_v28 = vpop.f32.mrf.mxu0 }
 0x193   :  { %v16045_v29 = vadd.f32 %v13818_v27, %v258_v28 }
 0x194   :  { %v14581_v30 = vpop.f32.mrf.mxu1 }
 0x195   :  { %298 = vrot.lane.b32.xlu0 %v16045_v29, %s15914_s16  ;;  %v16057_v36 = vadd.f32 %v14581_v30, %v13818_v27 }
 0x196   :  { %v268_v31 = vpop.f32.mrf.mxu1 }
 0x197   :  { %v16051_v33 = vadd.f32 %v13818_v27, %v268_v31 }
 0x198   :  { %v14584_v34 = vpop.f32.mrf.mxu1 }
 0x199   :  { %453 = vrot.lane.b32.xlu1 %v16051_v33, %s15914_s16  ;;  %376 = vrot.lane.b32.xlu0 %v16049_v32, %s15914_s16  ;;  %v16065_v40 = vadd.f32 %v14584_v34, %v13818_v27 }
 0x19a   :  { %v278_v35 = vpop.f32.mrf.mxu1 }
 0x19b   :  { %v16059_v37 = vadd.f32 %v13818_v27, %v278_v35 }
 0x19c   :  { %v14587_v38 = vpop.f32.mrf.mxu1 }
 0x19d   :  { %530 = vrot.lane.b32.xlu1 %v16057_v36, %s15914_s16  ;;  %607 = vrot.lane.b32.xlu0 %v16059_v37, %s15914_s16  ;;  %v16073_v42 = vadd.f32 %v14587_v38, %v13818_v27 }
 0x19e   :  { %v288_v39 = vpop.f32.mrf.mxu1 }
 0x19f   :  { %v16067_v41 = vadd.f32 %v13818_v27, %v288_v39 }
 0x1a1   :  { %684 = vrot.lane.b32.xlu1 %v16065_v40, %s15914_s16  ;;  %761 = vrot.lane.b32.xlu0 %v16067_v41, %s15914_s16 }
 0x1a5   :  { %838 = vrot.lane.b32.xlu1 %v16073_v42, %s15914_s16 }
 0x1a9   :  { %1010 = vrot.lane.b32.xlu1 %v16045_v29, %s15915_s17 }
 0x207   :  { %v299_v43 = vpop.permute.xlu0 %298 }
 0x208   :  { %14589 = vmatpush3.xpose.msk.msra.mxu0 %vm300_vm4, %v299_v43 }
 0x209   :  { %14593 = vmatprep.subr.mxu0 %v18739_v25 }
 0x20b   :  { %v454_v44 = vpop.permute.xlu1 %453  ;;  %14591 = vmatmul.mubr.msk.f32.vlgmr.msra.gmra.mxu0 %vm300_vm4, %v16045_v29  ;;  %v377_v45 = vpop.permute.xlu0 %376 }
 0x20c   :  { %14594 = vmatpush3.xpose.msk.msra.mxu0 %vm300_vm4, %v377_v45  ;;  %14599 = vmatpush3.xpose.msk.msra.mxu1 %vm300_vm4, %v454_v44 }
 0x20d   :  { %14595 = vmatprep.mubr.msk.f32.mxu0 %vm15913_vm3, %v18739_v25  ;;  %14608 = vmatprep.subr.mxu1 %v18739_v25 }
 0x20e   :  { %14603 = vmatprep.subr.mxu0 %v18739_v25 }
 0x20f   :  { %v531_v46 = vpop.permute.xlu1 %530  ;;  %14596 = vmatmul.mubr.msk.f32.vlgmr.msra.gmra.mxu0 %vm300_vm4, %v16049_v32  ;;  %14601 = vmatmul.mubr.msk.f32.vlgmr.msra.gmra.mxu1 %vm300_vm4, %v16051_v33  ;;  %v608_v47 = vpop.permute.xlu0 %607 }
 0x210   :  { %14604 = vmatpush3.xpose.msk.msra.mxu0 %vm300_vm4, %v531_v46  ;;  %14609 = vmatpush3.xpose.msk.msra.mxu1 %vm300_vm4, %v608_v47 }
 0x211   :  { %14605 = vmatprep.mubr.msk.f32.mxu0 %vm15913_vm3, %v18739_v25  ;;  %14610 = vmatprep.mubr.msk.f32.mxu1 %vm15913_vm3, %v18739_v25 }
 0x212   :  { %14613 = vmatprep.subr.mxu0 %v18739_v25  ;;  %14618 = vmatprep.subr.mxu1 %v18739_v25 }
 0x213   :  { %v685_v48 = vpop.permute.xlu1 %684  ;;  %14606 = vmatmul.mubr.msk.f32.vlgmr.msra.gmra.mxu0 %vm300_vm4, %v16057_v36  ;;  %14611 = vmatmul.mubr.msk.f32.vlgmr.msra.gmra.mxu1 %vm300_vm4, %v16059_v37  ;;  %v762_v49 = vpop.permute.xlu0 %761 }
 0x214   :  { %14614 = vmatpush3.xpose.msk.msra.mxu0 %vm300_vm4, %v685_v48  ;;  %14619 = vmatpush3.xpose.msk.msra.mxu1 %vm300_vm4, %v762_v49 }
 0x215   :  { %14615 = vmatprep.mubr.msk.f32.mxu0 %vm15913_vm3, %v18739_v25  ;;  %14620 = vmatprep.mubr.msk.f32.mxu1 %vm15913_vm3, %v18739_v25 }
 0x216   :  { %14623 = vmatprep.subr.mxu0 %v18739_v25  ;;  %14628 = vmatprep.subr.mxu1 %v18739_v25 }
 0x217   :  { %v839_v50 = vpop.permute.xlu1 %838  ;;  %14616 = vmatmul.mubr.msk.f32.vlgmr.msra.gmra.mxu0 %vm300_vm4, %v16065_v40  ;;  %14621 = vmatmul.mubr.msk.f32.vlgmr.msra.gmra.mxu1 %vm300_vm4, %v16067_v41 }
 0x218   :  { %14624 = vmatpush3.xpose.msk.msra.mxu0 %vm300_vm4, %v839_v50  ;;  %14625 = vmatprep.mubr.msk.f32.mxu0 %vm15913_vm3, %v18739_v25 }
 0x219   :  { %14633 = vmatprep.subr.mxu0 %v18739_v25  ;;  %14630 = vmatprep.mubr.msk.f32.mxu1 %vm15913_vm3, %v18739_v25 }
 0x21b   :  { %v1011_v51 = vpop.permute.xlu1 %1010  ;;  %14626 = vmatmul.mubr.msk.f32.vlgmr.msra.gmra.mxu0 %vm300_vm4, %v16073_v42 }
 0x21c   :  { %14629 = vmatpush3.msra.mxu1 %v1011_v51  ;;  %14635 = vmatprep.mubr.msk.f32.mxu0 %vm15913_vm3, %v18739_v25 }
 0x21d   :  { %14638 = vmatprep.subr.mxu1 %v18739_v25 }
 0x2cb   :  { %v371_v52 = vpop.f32.mrf.mxu0 }
 0x2cc   :  { %v914_v53 = vmul.f32 0.35355338, %v371_v52 }
 0x2cd   :  { %v14592_v54 = vpop.f32.mrf.mxu0 }
 0x2ce   :  { %v922_v55 = vsel %vm300_vm4, %v914_v53, -inf }
 0x2cf   :  { %v525_v56 = vpop.f32.mrf.mxu1  ;;  %923 = vmax.xlane.f32.xlu0 %v922_v55  ;;  %v448_v57 = vpop.f32.mrf.mxu0 }
 0x2d0   :  { %v916_v58 = vmul.f32 0.35355338, %v525_v56  ;;  %v915_v59 = vmul.f32 0.35355338, %v448_v57 }
 0x2d1   :  { %v14597_v60 = vpop.f32.mrf.mxu0  ;;  %v14602_v61 = vpop.f32.mrf.mxu1 }
 0x2d2   :  { %v928_v62 = vsel %vm300_vm4, %v916_v58, -inf  ;;  %v925_v63 = vsel %vm300_vm4, %v915_v59, -inf }
 0x2d3   :  { %929 = vmax.xlane.f32.xlu0 %v928_v62  ;;  %926 = vmax.xlane.f32.xlu1 %v925_v63  ;;  %v602_v0 = vpop.f32.mrf.mxu0  ;;  %v679_v1 = vpop.f32.mrf.mxu1 }
 0x2d4   :  { %v917_v2 = vmul.f32 0.35355338, %v602_v0  ;;  %v918_v3 = vmul.f32 0.35355338, %v679_v1 }
 0x2d5   :  { %v14607_v4 = vpop.f32.mrf.mxu0  ;;  %v14612_v5 = vpop.f32.mrf.mxu1 }
 0x2d6   :  { %v931_v6 = vsel %vm300_vm4, %v917_v2, -inf  ;;  %v934_v7 = vsel %vm300_vm4, %v918_v3, -inf }
 0x2d7   :  { %932 = vmax.xlane.f32.xlu0 %v931_v6  ;;  %v756_v8 = vpop.f32.mrf.mxu0  ;;  %935 = vmax.xlane.f32.xlu1 %v934_v7  ;;  %v833_v9 = vpop.f32.mrf.mxu1 }
 0x2d8   :  { %v919_v10 = vmul.f32 0.35355338, %v756_v8  ;;  %v920_v11 = vmul.f32 0.35355338, %v833_v9 }
 0x2d9   :  { %v14617_v12 = vpop.f32.mrf.mxu0  ;;  %v14622_v13 = vpop.f32.mrf.mxu1 }
 0x2da   :  { %v937_v14 = vsel %vm300_vm4, %v919_v10, -inf  ;;  %v940_v15 = vsel %vm300_vm4, %v920_v11, -inf }
 0x2db   :  { %938 = vmax.xlane.f32.xlu0 %v937_v14  ;;  %v910_v16 = vpop.f32.mrf.mxu0  ;;  %941 = vmax.xlane.f32.xlu1 %v940_v15 }
 0x2dc   :  { %v921_v26 = vmul.f32 0.35355338, %v910_v16 }
 0x2dd   :  { %v14627_v27 = vpop.f32.mrf.mxu0 }
 0x2de   :  { %v943_v28 = vsel %vm300_vm4, %v921_v26, -inf }
 0x2df   :  { %944 = vmax.xlane.f32.xlu0 %v943_v28 }
 0x2ec   :  { %1162 = vrot.lane.b32.xlu1 %v16051_v33, %s15915_s17 }
 0x2f0   :  { %1238 = vrot.lane.b32.xlu1 %v16057_v36, %s15915_s17 }
 0x2f4   :  { %1390 = vrot.lane.b32.xlu1 %v16065_v40, %s15915_s17 }
 0x2f5   :  { %1086 = vrot.lane.b32.xlu0 %v16049_v32, %s15915_s17 }
 0x2f8   :  { %1542 = vrot.lane.b32.xlu1 %v16073_v42, %s15915_s17 }
 0x2f9   :  { %1314 = vrot.lane.b32.xlu0 %v16059_v37, %s15915_s17 }
 0x2fc   :  { %1698 = vrot.lane.b32.xlu1 %v16049_v32, %s15916_s18 }
 0x2fd   :  { %1466 = vrot.lane.b32.xlu0 %v16067_v41, %s15915_s17 }
 0x300   :  { %1696 = vrot.lane.b32.xlu1 %v16049_v32, %s15917_s19 }
 0x301   :  { %1620 = vrot.lane.b32.xlu0 %v16045_v29, %s15916_s18 }
 0x304   :  { %1854 = vrot.lane.b32.xlu1 %v16057_v36, %s15916_s18 }
 0x305   :  { %1618 = vrot.lane.b32.xlu0 %v16045_v29, %s15917_s19 }
 0x308   :  { %1852 = vrot.lane.b32.xlu1 %v16057_v36, %s15917_s19 }
 0x309   :  { %1776 = vrot.lane.b32.xlu0 %v16051_v33, %s15916_s18 }
 0x30d   :  { %1774 = vrot.lane.b32.xlu0 %v16051_v33, %s15917_s19 }
 0x358   :  { %v924_v30 = vpop.xlane.xlu0 %923 }
 0x359   :  { %v946_v31 = vsub.f32 %v914_v53, %v924_v30 }
 0x35b   :  { %v954_v34 = vmul.f32 1.442695, %v946_v31 }
 0x35c   :  { %v927_v35 = vpop.xlane.xlu1 %926  ;;  %v930_v38 = vpop.xlane.xlu0 %929 }
 0x35d   :  { %15480 = vpow2.f32 %v954_v34  ;;  %v947_v39 = vsub.f32 %v915_v59, %v927_v35  ;;  %v948_v43 = vsub.f32 %v916_v58, %v930_v38 }
 0x35f   :  { %v956_v44 = vmul.f32 1.442695, %v947_v39  ;;  %v958_v45 = vmul.f32 1.442695, %v948_v43 }
 0x360   :  { %v936_v46 = vpop.xlane.xlu1 %935  ;;  %v933_v47 = vpop.xlane.xlu0 %932 }
 0x361   :  { %15482 = vpow2.f32 %v956_v44  ;;  %v950_v48 = vsub.f32 %v918_v3, %v936_v46  ;;  %v949_v49 = vsub.f32 %v917_v2, %v933_v47 }
 0x362   :  { %15484 = vpow2.f32 %v958_v45 }
 0x363   :  { %v962_v50 = vmul.f32 1.442695, %v950_v48  ;;  %v960_v51 = vmul.f32 1.442695, %v949_v49 }
 0x364   :  { %v942_v52 = vpop.xlane.xlu1 %941  ;;  %v939_v54 = vpop.xlane.xlu0 %938 }
 0x365   :  { %15486 = vpow2.f32 %v962_v50  ;;  %v952_v53 = vsub.f32 %v920_v11, %v942_v52  ;;  %v951_v55 = vsub.f32 %v919_v10, %v939_v54 }
 0x366   :  { %15488 = vpow2.f32 %v960_v51 }
 0x367   :  { %v966_v56 = vmul.f32 1.442695, %v952_v53  ;;  %v964_v57 = vmul.f32 1.442695, %v951_v55 }
 0x368   :  { %v945_v59 = vpop.xlane.xlu0 %944  ;;  %v1163_v14 = vpop.permute.xlu1 %1162 }
 0x369   :  { %15490 = vpow2.f32 %v966_v56  ;;  %v953_v58 = vsub.f32 %v921_v26, %v945_v59 }
 0x36a   :  { %v16166_v60 = vpop.eup %15480  ;;  %15492 = vpow2.f32 %v964_v57 }
 0x36b   :  { %v968_v61 = vmul.f32 1.442695, %v953_v58  ;;  %v970_v62 = vsel %vm300_vm4, %v16166_v60, 0.0 }
 0x36c   :  { %971 = vadd.xlane.f32.xlu1 %v970_v62  ;;  %v1087_v63 = vpop.permute.xlu0 %1086  ;;  %v1239_v15 = vpop.permute.xlu1 %1238 }
 0x36d   :  { %15494 = vpow2.f32 %v968_v61  ;;  %14634 = vmatpush3.msra.mxu0 %v1087_v63 }
 0x36e   :  { %v16170_v0 = vpop.eup %15482  ;;  %14643 = vmatprep.subr.mxu0 %v18739_v25 }
 0x36f   :  { %v16173_v1 = vpop.eup %15484  ;;  %v973_v2 = vsel %vm300_vm4, %v16170_v0, 0.0 }
 0x370   :  { %974 = vadd.xlane.f32.xlu0 %v973_v2  ;;  %v976_v3 = vsel %vm300_vm4, %v16173_v1, 0.0  ;;  %v1391_v16 = vpop.permute.xlu1 %1390  ;;  %v1315_v26 = vpop.permute.xlu0 %1314 }
 0x371   :  { %977 = vadd.xlane.f32.xlu1 %v976_v3 }
 0x372   :  { %v16179_v4 = vpop.eup %15486 }
 0x373   :  { %v16181_v5 = vpop.eup %15488  ;;  %v982_v6 = vsel %vm300_vm4, %v16179_v4, 0.0 }
 0x374   :  { %v979_v7 = vsel %vm300_vm4, %v16181_v5, 0.0  ;;  %v16217_v27 = vpop.permute.xlu1 %1542  ;;  %v1467_v28 = vpop.permute.xlu0 %1466 }
 0x375   :  { %983 = vadd.xlane.f32.xlu1 %v982_v6  ;;  %980 = vadd.xlane.f32.xlu0 %v979_v7 }
 0x376   :  { %v16187_v8 = vpop.eup %15490 }
 0x377   :  { %v16189_v9 = vpop.eup %15492  ;;  %v988_v10 = vsel %vm300_vm4, %v16187_v8, 0.0 }
 0x378   :  { %v985_v11 = vsel %vm300_vm4, %v16189_v9, 0.0  ;;  %v16219_v30 = vpop.permute.xlu1 %1698  ;;  %v16221_v31 = vpop.permute.xlu0 %1620 }
 0x379   :  { %989 = vadd.xlane.f32.xlu1 %v988_v10  ;;  %986 = vadd.xlane.f32.xlu0 %v985_v11 }
 0x37a   :  { %v16195_v12 = vpop.eup %15494 }
 0x37b   :  { %v991_v13 = vsel %vm300_vm4, %v16195_v12, 0.0 }
 0x37c   :  { %v16223_v34 = vpop.permute.xlu1 %1696  ;;  %v16225_v35 = vpop.permute.xlu0 %1618 }
 0x37d   :  { %992 = vadd.xlane.f32.xlu0 %v991_v13 }
 0x380   :  { %v16227_v38 = vpop.permute.xlu1 %1854  ;;  %v16229_v39 = vpop.permute.xlu0 %1776 }
 0x384   :  { %v16231_v43 = vpop.permute.xlu1 %1852  ;;  %v16233_v44 = vpop.permute.xlu0 %1774 }
 0x38a   :  { %2010 = vrot.lane.b32.xlu1 %v16065_v40, %s15916_s18 }
 0x38e   :  { %2008 = vrot.lane.b32.xlu1 %v16065_v40, %s15917_s19 }
 0x392   :  { %2166 = vrot.lane.b32.xlu1 %v16073_v42, %s15916_s18 }
 0x393   :  { %1932 = vrot.lane.b32.xlu0 %v16059_v37, %s15916_s18 }
 0x396   :  { %2164 = vrot.lane.b32.xlu1 %v16073_v42, %s15917_s19 }
 0x397   :  { %1930 = vrot.lane.b32.xlu0 %v16059_v37, %s15917_s19 }
 0x39a   :  { %2338 = vrot.lane.b32.xlu1 %v16045_v29, %s15918_s20 }
 0x39b   :  { %2088 = vrot.lane.b32.xlu0 %v16067_v41, %s15916_s18 }
 0x39f   :  { %2086 = vrot.lane.b32.xlu0 %v16067_v41, %s15917_s19 }
 0x3f5   :  { %v972_v45 = vpop.xlane.xlu1 %971 }
 0x3f6   :  { %15496 = vrcp.f32 %v972_v45 }
 0x3f9   :  { %v975_v46 = vpop.xlane.xlu0 %974 }
 0x3fa   :  { %v978_v47 = vpop.xlane.xlu1 %977  ;;  %15498 = vrcp.f32 %v975_v46 }
 0x3fb   :  { %15500 = vrcp.f32 %v978_v47 }
 0x3fe   :  { %v984_v48 = vpop.xlane.xlu1 %983  ;;  %v981_v49 = vpop.xlane.xlu0 %980 }
 0x3ff   :  { %15502 = vrcp.f32 %v984_v48 }
 0x400   :  { %15504 = vrcp.f32 %v981_v49 }
 0x402   :  { %v990_v50 = vpop.xlane.xlu1 %989  ;;  %v987_v51 = vpop.xlane.xlu0 %986 }
 0x403   :  { %v15497_v52 = vpop.eup %15496  ;;  %15506 = vrcp.f32 %v990_v50 }
 0x404   :  { %15508 = vrcp.f32 %v987_v51  ;;  %v1002_v54 = vmul.f32 %v15497_v52, %v16166_v60 }
 0x406   :  { %v993_v53 = vpop.xlane.xlu0 %992  ;;  %14631 = vmatmul.mubr.msk.f32.vlgmr.msra.gmra.mxu1 %vm300_vm4, %v1002_v54  ;;  %v2011_v58 = vpop.permute.xlu1 %2010 }
 0x407   :  { %v15499_v55 = vpop.eup %15498  ;;  %15510 = vrcp.f32 %v993_v53  ;;  %14639 = vmatpush3.msra.mxu1 %v1163_v14  ;;  %14640 = vmatprep.mubr.msk.f32.mxu1 %vm15913_vm3, %v18739_v25 }
 0x408   :  { %v15501_v56 = vpop.eup %15500  ;;  %14648 = vmatprep.subr.mxu1 %v18739_v25  ;;  %v1003_v57 = vmul.f32 %v15499_v55, %v16170_v0 }
 0x409   :  { %v1004_v59 = vmul.f32 %v15501_v56, %v16173_v1 }
 0x40a   :  { %14636 = vmatmul.mubr.msk.f32.vlgmr.msra.gmra.mxu0 %vm300_vm4, %v1003_v57  ;;  %v1933_v1 = vpop.permute.xlu0 %1932  ;;  %v2009_v3 = vpop.permute.xlu1 %2008 }
 0x40b   :  { %14641 = vmatmul.mubr.msk.f32.vlgmr.msra.gmra.mxu1 %vm300_vm4, %v1004_v59  ;;  %14644 = vmatpush3.msra.mxu0 %v1239_v15 }
 0x40c   :  { %v15503_v60 = vpop.eup %15502  ;;  %14649 = vmatpush3.msra.mxu1 %v1315_v26  ;;  %14650 = vmatprep.mubr.msk.f32.mxu1 %vm15913_vm3, %v18739_v25 }
 0x40d   :  { %v15505_v61 = vpop.eup %15504  ;;  %14645 = vmatprep.mubr.msk.f32.mxu0 %vm15913_vm3, %v18739_v25  ;;  %14653 = vmatprep.subr.mxu0 %v18739_v25  ;;  %v1006_v62 = vmul.f32 %v15503_v60, %v16179_v4 }
 0x40e   :  { %14658 = vmatprep.subr.mxu1 %v18739_v25  ;;  %v1005_v63 = vmul.f32 %v15505_v61, %v16181_v5 }
 0x40f   :  { %14651 = vmatmul.mubr.msk.f32.vlgmr.msra.gmra.mxu1 %vm300_vm4, %v1006_v62 }
 0x410   :  { %v15507_v0 = vpop.eup %15506  ;;  %14646 = vmatmul.mubr.msk.f32.vlgmr.msra.gmra.mxu0 %vm300_vm4, %v1005_v63  ;;  %14659 = vmatpush3.msra.mxu1 %v1467_v28 }
 0x411   :  { %v15509_v2 = vpop.eup %15508  ;;  %14654 = vmatpush3.msra.mxu0 %v1391_v16  ;;  %14655 = vmatprep.mubr.msk.f32.mxu0 %vm15913_vm3, %v18739_v25  ;;  %v1008_v6 = vmul.f32 %v15507_v0, %v16187_v8  ;;  %v1931_v8 = vpop.permute.xlu0 %1930 }
 0x412   :  { %14660 = vmatprep.mubr.msk.f32.mxu1 %vm15913_vm3, %v18739_v25  ;;  %14663 = vmatprep.subr.mxu0 %v18739_v25  ;;  %v1007_v4 = vmul.f32 %v15509_v2, %v16189_v9  ;;  %v2167_v9 = vpop.permute.xlu1 %2166 }
 0x413   :  { %14668 = vmatprep.subr.mxu1 %v18739_v25  ;;  %14661 = vmatmul.mubr.msk.f32.vlgmr.msra.gmra.mxu1 %vm300_vm4, %v1008_v6 }
 0x414   :  { %v15511_v5 = vpop.eup %15510  ;;  %14656 = vmatmul.mubr.msk.f32.vlgmr.msra.gmra.mxu0 %vm300_vm4, %v1007_v4  ;;  %14669 = vmatpush3.xpose.msk.msra.mxu1 %vm300_vm4, %v16221_v31 }
 0x415   :  { %14664 = vmatpush3.msra.mxu0 %v16217_v27  ;;  %14665 = vmatprep.mubr.msk.f32.mxu0 %vm15913_vm3, %v18739_v25  ;;  %v1009_v7 = vmul.f32 %v15511_v5, %v16195_v12  ;;  %v2089_v10 = vpop.permute.xlu0 %2088 }
 0x416   :  { %14670 = vmatprep.mubr.msk.f32.mxu1 %vm15913_vm3, %v18739_v25  ;;  %14673 = vmatprep.subr.mxu0 %v18739_v25  ;;  %v2165_v11 = vpop.permute.xlu1 %2164 }
 0x417   :  { %14678 = vmatprep.subr.mxu1 %v18739_v25  ;;  %14671 = vmatmul.mubr.msk.f32.vlgmr.msra.gmra.mxu1 %vm300_vm4, %v16225_v35 }
 0x418   :  { %14666 = vmatmul.mubr.msk.f32.vlgmr.msra.gmra.mxu0 %vm300_vm4, %v1009_v7  ;;  %14679 = vmatpush3.xpose.msk.msra.mxu1 %vm300_vm4, %v16229_v39 }
 0x419   :  { %14674 = vmatpush3.xpose.msk.msra.mxu0 %vm300_vm4, %v16219_v30  ;;  %14675 = vmatprep.mubr.msk.f32.mxu0 %vm15913_vm3, %v18739_v25  ;;  %v2087_v12 = vpop.permute.xlu0 %2086 }
 0x41a   :  { %14680 = vmatprep.mubr.msk.f32.mxu1 %vm15913_vm3, %v18739_v25  ;;  %14683 = vmatprep.subr.mxu0 %v18739_v25  ;;  %v2339_v13 = vpop.permute.xlu1 %2338 }
 0x41b   :  { %14688 = vmatprep.subr.mxu1 %v18739_v25  ;;  %14681 = vmatmul.mubr.msk.f32.vlgmr.msra.gmra.mxu1 %vm300_vm4, %v16233_v44 }
 0x41c   :  { %14676 = vmatmul.mubr.msk.f32.vlgmr.msra.gmra.mxu0 %vm300_vm4, %v16223_v34  ;;  %14689 = vmatpush3.xpose.msk.msra.mxu1 %vm300_vm4, %v1933_v1 }
 0x41d   :  { %14684 = vmatpush3.xpose.msk.msra.mxu0 %vm300_vm4, %v16227_v38  ;;  %14685 = vmatprep.mubr.msk.f32.mxu0 %vm15913_vm3, %v18739_v25 }
 0x41e   :  { %14690 = vmatprep.mubr.msk.f32.mxu1 %vm15913_vm3, %v18739_v25  ;;  %14693 = vmatprep.subr.mxu0 %v18739_v25 }
 0x41f   :  { %14698 = vmatprep.subr.mxu1 %v18739_v25  ;;  %14691 = vmatmul.mubr.msk.f32.vlgmr.msra.gmra.mxu1 %vm300_vm4, %v1931_v8 }
 0x420   :  { %14686 = vmatmul.mubr.msk.f32.vlgmr.msra.gmra.mxu0 %vm300_vm4, %v16231_v43  ;;  %14699 = vmatpush3.xpose.msk.msra.mxu1 %vm300_vm4, %v2089_v10 }
 0x421   :  { %14694 = vmatpush3.xpose.msk.msra.mxu0 %vm300_vm4, %v2011_v58  ;;  %14695 = vmatprep.mubr.msk.f32.mxu0 %vm15913_vm3, %v18739_v25 }
 0x422   :  { %14700 = vmatprep.mubr.msk.f32.mxu1 %vm15913_vm3, %v18739_v25  ;;  %14703 = vmatprep.subr.mxu0 %v18739_v25 }
 0x423   :  { %14708 = vmatprep.subr.mxu1 %v18739_v25  ;;  %14701 = vmatmul.mubr.msk.f32.vlgmr.msra.gmra.mxu1 %vm300_vm4, %v2087_v12 }
 0x424   :  { %14696 = vmatmul.mubr.msk.f32.vlgmr.msra.gmra.mxu0 %vm300_vm4, %v2009_v3  ;;  %14709 = vmatpush3.msra.mxu1 %v2339_v13 }
 0x425   :  { %14704 = vmatpush3.xpose.msk.msra.mxu0 %vm300_vm4, %v2167_v9  ;;  %14705 = vmatprep.mubr.msk.f32.mxu0 %vm15913_vm3, %v18739_v25 }
 0x426   :  { %14713 = vmatprep.subr.mxu0 %v18739_v25  ;;  %14710 = vmatprep.mubr.msk.f32.mxu1 %vm15913_vm3, %v18739_v25 }
 0x427   :  { %14718 = vmatprep.subr.mxu1 %v18739_v25 }
 0x428   :  { %14706 = vmatmul.mubr.msk.f32.vlgmr.msra.gmra.mxu0 %vm300_vm4, %v2165_v11 }
 0x429   :  { %14715 = vmatprep.mubr.msk.f32.mxu0 %vm15913_vm3, %v18739_v25 }
 0x4c6   :  { %v16323_v14 = vpop.f32.mrf.mxu1 }
 0x4c8   :  { %v14632_v15 = vpop.f32.mrf.mxu1 }
 0x4ca   :  { %v16325_v16 = vpop.f32.mrf.mxu0 }
 0x4cb   :  { %v16327_v26 = vpop.f32.mrf.mxu1 }
 0x4cc   :  { %v14637_v27 = vpop.f32.mrf.mxu0 }
 0x4cd   :  { %v14642_v28 = vpop.f32.mrf.mxu1 }
 0x4cf   :  { %v16329_v30 = vpop.f32.mrf.mxu1 }
 0x4d0   :  { %v16331_v31 = vpop.f32.mrf.mxu0 }
 0x4d1   :  { %v14652_v34 = vpop.f32.mrf.mxu1 }
 0x4d2   :  { %v14647_v35 = vpop.f32.mrf.mxu0 }
 0x4d3   :  { %v16333_v38 = vpop.f32.mrf.mxu1 }
 0x4d4   :  { %v16335_v39 = vpop.f32.mrf.mxu0 }
 0x4d5   :  { %v14662_v43 = vpop.f32.mrf.mxu1 }
 0x4d6   :  { %v14657_v44 = vpop.f32.mrf.mxu0 }
 0x4d7   :  { %v1692_v45 = vpop.f32.mrf.mxu1 }
 0x4d8   :  { %v16337_v46 = vpop.f32.mrf.mxu0  ;;  %v2242_v47 = vmul.f32 0.35355338, %v1692_v45 }
 0x4d9   :  { %v14672_v48 = vpop.f32.mrf.mxu1 }
 0x4da   :  { %v14667_v49 = vpop.f32.mrf.mxu0  ;;  %v2250_v50 = vsel %vm300_vm4, %v2242_v47, -inf }
 0x4db   :  { %2251 = vmax.xlane.f32.xlu0 %v2250_v50  ;;  %v1848_v51 = vpop.f32.mrf.mxu1 }
 0x4dc   :  { %v1770_v52 = vpop.f32.mrf.mxu0  ;;  %v2244_v54 = vmul.f32 0.35355338, %v1848_v51 }
 0x4dd   :  { %v2243_v53 = vmul.f32 0.35355338, %v1770_v52  ;;  %v14682_v55 = vpop.f32.mrf.mxu1 }
 0x4de   :  { %v14677_v56 = vpop.f32.mrf.mxu0  ;;  %v2256_v57 = vsel %vm300_vm4, %v2244_v54, -inf }
 0x4df   :  { %2257 = vmax.xlane.f32.xlu0 %v2256_v57  ;;  %v2253_v59 = vsel %vm300_vm4, %v2243_v53, -inf  ;;  %v2004_v58 = vpop.f32.mrf.mxu1 }
 0x4e0   :  { %2254 = vmax.xlane.f32.xlu1 %v2253_v59  ;;  %v1926_v60 = vpop.f32.mrf.mxu0  ;;  %v2246_v61 = vmul.f32 0.35355338, %v2004_v58 }
 0x4e1   :  { %v2245_v62 = vmul.f32 0.35355338, %v1926_v60  ;;  %v14692_v63 = vpop.f32.mrf.mxu1 }
 0x4e2   :  { %v14687_v0 = vpop.f32.mrf.mxu0  ;;  %v2262_v1 = vsel %vm300_vm4, %v2246_v61, -inf }
 0x4e3   :  { %v2259_v2 = vsel %vm300_vm4, %v2245_v62, -inf  ;;  %v2160_v3 = vpop.f32.mrf.mxu1 }
 0x4e4   :  { %2260 = vmax.xlane.f32.xlu0 %v2259_v2  ;;  %v2082_v6 = vpop.f32.mrf.mxu0  ;;  %2263 = vmax.xlane.f32.xlu1 %v2262_v1  ;;  %v2248_v4 = vmul.f32 0.35355338, %v2160_v3 }
 0x4e5   :  { %v2247_v5 = vmul.f32 0.35355338, %v2082_v6  ;;  %v14702_v7 = vpop.f32.mrf.mxu1 }
 0x4e6   :  { %v14697_v8 = vpop.f32.mrf.mxu0  ;;  %v2268_v9 = vsel %vm300_vm4, %v2248_v4, -inf }
 0x4e7   :  { %v2265_v10 = vsel %vm300_vm4, %v2247_v5, -inf }
 0x4e8   :  { %2266 = vmax.xlane.f32.xlu0 %v2265_v10  ;;  %v2238_v11 = vpop.f32.mrf.mxu0  ;;  %2269 = vmax.xlane.f32.xlu1 %v2268_v9 }
 0x4e9   :  { %v2249_v12 = vmul.f32 0.35355338, %v2238_v11 }
 0x4ea   :  { %v14707_v13 = vpop.f32.mrf.mxu0 }
 0x4eb   :  { %v2271_v15 = vsel %vm300_vm4, %v2249_v12, -inf }
 0x4ec   :  { %2272 = vmax.xlane.f32.xlu0 %v2271_v15 }
 0x4f9   :  { %2490 = vrot.lane.b32.xlu1 %v16051_v33, %s15918_s20 }
 0x4fd   :  { %2566 = vrot.lane.b32.xlu1 %v16057_v36, %s15918_s20 }
 0x501   :  { %2718 = vrot.lane.b32.xlu1 %v16065_v40, %s15918_s20 }
 0x502   :  { %2414 = vrot.lane.b32.xlu0 %v16049_v32, %s15918_s20 }
 0x505   :  { %2870 = vrot.lane.b32.xlu1 %v16073_v42, %s15918_s20 }
 0x506   :  { %2642 = vrot.lane.b32.xlu0 %v16059_v37, %s15918_s20 }
 0x509   :  { %3026 = vrot.lane.b32.xlu1 %v16049_v32, %s15919_s21 }
 0x50a   :  { %2794 = vrot.lane.b32.xlu0 %v16067_v41, %s15918_s20 }
 0x50d   :  { %3024 = vrot.lane.b32.xlu1 %v16049_v32, %s15920_s22 }
 0x50e   :  { %2948 = vrot.lane.b32.xlu0 %v16045_v29, %s15919_s21 }
 0x511   :  { %3182 = vrot.lane.b32.xlu1 %v16057_v36, %s15919_s21 }
 0x512   :  { %2946 = vrot.lane.b32.xlu0 %v16045_v29, %s15920_s22 }
 0x515   :  { %3180 = vrot.lane.b32.xlu1 %v16057_v36, %s15920_s22 }
 0x516   :  { %3104 = vrot.lane.b32.xlu0 %v16051_v33, %s15919_s21 }
 0x51a   :  { %3102 = vrot.lane.b32.xlu0 %v16051_v33, %s15920_s22 }
 0x564   :  { %v2252_v27 = vpop.xlane.xlu0 %2251 }
 0x565   :  { %v2274_v28 = vsub.f32 %v2242_v47, %v2252_v27 }
 0x567   :  { %v2282_v34 = vmul.f32 1.442695, %v2274_v28 }
 0x568   :  { %v2258_v35 = vpop.xlane.xlu0 %2257 }
 0x569   :  { %15512 = vpow2.f32 %v2282_v34  ;;  %v2255_v43 = vpop.xlane.xlu1 %2254  ;;  %v2276_v44 = vsub.f32 %v2244_v54, %v2258_v35 }
 0x56a   :  { %v2275_v45 = vsub.f32 %v2243_v53, %v2255_v43 }
 0x56b   :  { %v2286_v48 = vmul.f32 1.442695, %v2276_v44 }
 0x56c   :  { %v2284_v49 = vmul.f32 1.442695, %v2275_v45 }
 0x56d   :  { %15514 = vpow2.f32 %v2286_v48  ;;  %v2264_v50 = vpop.xlane.xlu1 %2263  ;;  %v2261_v51 = vpop.xlane.xlu0 %2260 }
 0x56e   :  { %15516 = vpow2.f32 %v2284_v49  ;;  %v2278_v52 = vsub.f32 %v2246_v61, %v2264_v50  ;;  %v2277_v55 = vsub.f32 %v2245_v62, %v2261_v51 }
 0x570   :  { %v2290_v56 = vmul.f32 1.442695, %v2278_v52  ;;  %v2288_v57 = vmul.f32 1.442695, %v2277_v55 }
 0x571   :  { %v2270_v59 = vpop.xlane.xlu1 %2269  ;;  %v2267_v58 = vpop.xlane.xlu0 %2266 }
 0x572   :  { %15518 = vpow2.f32 %v2290_v56  ;;  %v2280_v47 = vsub.f32 %v2248_v4, %v2270_v59  ;;  %v2279_v60 = vsub.f32 %v2247_v5, %v2267_v58 }
 0x573   :  { %15520 = vpow2.f32 %v2288_v57 }
 0x574   :  { %v2294_v63 = vmul.f32 1.442695, %v2280_v47  ;;  %v2292_v0 = vmul.f32 1.442695, %v2279_v60 }
 0x575   :  { %v2273_v54 = vpop.xlane.xlu0 %2272  ;;  %v2491_v34 = vpop.permute.xlu1 %2490 }
 0x576   :  { %v16377_v53 = vpop.eup %15512  ;;  %15522 = vpow2.f32 %v2294_v63  ;;  %v2281_v1 = vsub.f32 %v2249_v12, %v2273_v54 }
 0x577   :  { %15524 = vpow2.f32 %v2292_v0  ;;  %v2298_v61 = vsel %vm300_vm4, %v16377_v53, 0.0 }
 0x578   :  { %v2296_v62 = vmul.f32 1.442695, %v2281_v1  ;;  %2299 = vadd.xlane.f32.xlu1 %v2298_v61 }
 0x579   :  { %v2415_v2 = vpop.permute.xlu0 %2414  ;;  %v2567_v35 = vpop.permute.xlu1 %2566 }
 0x57a   :  { %v16381_v3 = vpop.eup %15514  ;;  %15526 = vpow2.f32 %v2296_v62  ;;  %14714 = vmatpush3.msra.mxu0 %v2415_v2 }
 0x57b   :  { %v16383_v6 = vpop.eup %15516  ;;  %v2304_v4 = vsel %vm300_vm4, %v16381_v3, 0.0  ;;  %14723 = vmatprep.subr.mxu0 %v18739_v25 }
 0x57c   :  { %v2301_v5 = vsel %vm300_vm4, %v16383_v6, 0.0  ;;  %2305 = vadd.xlane.f32.xlu1 %v2304_v4 }
 0x57d   :  { %2302 = vadd.xlane.f32.xlu0 %v2301_v5  ;;  %v2719_v43 = vpop.permute.xlu1 %2718  ;;  %v2643_v44 = vpop.permute.xlu0 %2642 }
 0x57f   :  { %v16390_v7 = vpop.eup %15518 }
 0x580   :  { %v16392_v8 = vpop.eup %15520  ;;  %v2310_v9 = vsel %vm300_vm4, %v16390_v7, 0.0 }
 0x581   :  { %2311 = vadd.xlane.f32.xlu1 %v2310_v9  ;;  %v2307_v10 = vsel %vm300_vm4, %v16392_v8, 0.0  ;;  %v16428_v45 = vpop.permute.xlu1 %2870  ;;  %v2795_v48 = vpop.permute.xlu0 %2794 }
 0x582   :  { %2308 = vadd.xlane.f32.xlu0 %v2307_v10 }
 0x583   :  { %v16398_v11 = vpop.eup %15522 }
 0x584   :  { %v16400_v12 = vpop.eup %15524  ;;  %v2316_v13 = vsel %vm300_vm4, %v16398_v11, 0.0 }
 0x585   :  { %2317 = vadd.xlane.f32.xlu1 %v2316_v13  ;;  %v2313_v15 = vsel %vm300_vm4, %v16400_v12, 0.0  ;;  %v16430_v49 = vpop.permute.xlu1 %3026  ;;  %v2949_v50 = vpop.permute.xlu0 %2948 }
 0x586   :  { %2314 = vadd.xlane.f32.xlu0 %v2313_v15 }
 0x587   :  { %v16406_v27 = vpop.eup %15526 }
 0x588   :  { %v2319_v28 = vsel %vm300_vm4, %v16406_v27, 0.0 }
 0x589   :  { %v16432_v51 = vpop.permute.xlu1 %3024  ;;  %v16434_v52 = vpop.permute.xlu0 %2946 }
 0x58a   :  { %2320 = vadd.xlane.f32.xlu0 %v2319_v28 }
 0x58d   :  { %v16436_v55 = vpop.permute.xlu1 %3182  ;;  %v16438_v56 = vpop.permute.xlu0 %3104 }
 0x591   :  { %v16440_v57 = vpop.permute.xlu1 %3180  ;;  %v16442_v58 = vpop.permute.xlu0 %3102 }
 0x596   :  { %3338 = vrot.lane.b32.xlu1 %v16065_v40, %s15919_s21 }
 0x59a   :  { %3336 = vrot.lane.b32.xlu1 %v16065_v40, %s15920_s22 }
 0x59e   :  { %3494 = vrot.lane.b32.xlu1 %v16073_v42, %s15919_s21 }
 0x5a0   :  { %3260 = vrot.lane.b32.xlu0 %v16059_v37, %s15919_s21 }
 0x5a2   :  { %3492 = vrot.lane.b32.xlu1 %v16073_v42, %s15920_s22 }
 0x5a4   :  { %3258 = vrot.lane.b32.xlu0 %v16059_v37, %s15920_s22 }
 0x5a6   :  { %3666 = vrot.lane.b32.xlu1 %v16045_v29, %s15921_s23 }
 0x5a8   :  { %3416 = vrot.lane.b32.xlu0 %v16067_v41, %s15919_s21 }
 0x5ac   :  { %3414 = vrot.lane.b32.xlu0 %v16067_v41, %s15920_s22 }
 0x601   :  { %v2300_v59 = vpop.xlane.xlu1 %2299 }
 0x602   :  { %15528 = vrcp.f32 %v2300_v59 }
 0x605   :  { %v2306_v47 = vpop.xlane.xlu1 %2305 }
 0x606   :  { %15530 = vrcp.f32 %v2306_v47  ;;  %v2303_v60 = vpop.xlane.xlu0 %2302 }
 0x607   :  { %15532 = vrcp.f32 %v2303_v60 }
 0x60a   :  { %v2312_v63 = vpop.xlane.xlu1 %2311 }
 0x60b   :  { %15534 = vrcp.f32 %v2312_v63  ;;  %v2309_v0 = vpop.xlane.xlu0 %2308 }
 0x60c   :  { %15536 = vrcp.f32 %v2309_v0 }
 0x60e   :  { %v2318_v54 = vpop.xlane.xlu1 %2317 }
 0x60f   :  { %v15529_v1 = vpop.eup %15528  ;;  %15538 = vrcp.f32 %v2318_v54  ;;  %v2315_v61 = vpop.xlane.xlu0 %2314 }
 0x610   :  { %15540 = vrcp.f32 %v2315_v61  ;;  %v2330_v62 = vmul.f32 %v15529_v1, %v16377_v53 }
 0x612   :  { %14711 = vmatmul.mubr.msk.f32.vlgmr.msra.gmra.mxu1 %vm300_vm4, %v2330_v62  ;;  %v3339_v13 = vpop.permute.xlu1 %3338 }
 0x613   :  { %v15531_v2 = vpop.eup %15530  ;;  %v2321_v4 = vpop.xlane.xlu0 %2320  ;;  %14719 = vmatpush3.msra.mxu1 %v2491_v34  ;;  %14720 = vmatprep.mubr.msk.f32.mxu1 %vm15913_vm3, %v18739_v25 }
 0x614   :  { %v15533_v5 = vpop.eup %15532  ;;  %15542 = vrcp.f32 %v2321_v4  ;;  %14728 = vmatprep.subr.mxu1 %v18739_v25  ;;  %v2332_v9 = vmul.f32 %v15531_v2, %v16381_v3 }
 0x615   :  { %v2331_v10 = vmul.f32 %v15533_v5, %v16383_v6 }
 0x616   :  { %14721 = vmatmul.mubr.msk.f32.vlgmr.msra.gmra.mxu1 %vm300_vm4, %v2332_v9 }
 0x617   :  { %14716 = vmatmul.mubr.msk.f32.vlgmr.msra.gmra.mxu0 %vm300_vm4, %v2331_v10  ;;  %14729 = vmatpush3.msra.mxu1 %v2643_v44  ;;  %v3261_v34 = vpop.permute.xlu0 %3260  ;;  %v3337_v44 = vpop.permute.xlu1 %3336 }
 0x618   :  { %v15535_v53 = vpop.eup %15534  ;;  %14724 = vmatpush3.msra.mxu0 %v2567_v35  ;;  %14730 = vmatprep.mubr.msk.f32.mxu1 %vm15913_vm3, %v18739_v25 }
 0x619   :  { %v15537_v15 = vpop.eup %15536  ;;  %14725 = vmatprep.mubr.msk.f32.mxu0 %vm15913_vm3, %v18739_v25  ;;  %14733 = vmatprep.subr.mxu0 %v18739_v25  ;;  %v2334_v3 = vmul.f32 %v15535_v53, %v16390_v7 }
 0x61a   :  { %14738 = vmatprep.subr.mxu1 %v18739_v25  ;;  %v2333_v6 = vmul.f32 %v15537_v15, %v16392_v8 }
 0x61b   :  { %14731 = vmatmul.mubr.msk.f32.vlgmr.msra.gmra.mxu1 %vm300_vm4, %v2334_v3 }
 0x61c   :  { %v15539_v28 = vpop.eup %15538  ;;  %14726 = vmatmul.mubr.msk.f32.vlgmr.msra.gmra.mxu0 %vm300_vm4, %v2333_v6  ;;  %14739 = vmatpush3.msra.mxu1 %v2795_v48 }
 0x61d   :  { %v15541_v35 = vpop.eup %15540  ;;  %14734 = vmatpush3.msra.mxu0 %v2719_v43  ;;  %14735 = vmatprep.mubr.msk.f32.mxu0 %vm15913_vm3, %v18739_v25  ;;  %v2336_v59 = vmul.f32 %v15539_v28, %v16398_v11  ;;  %v3259_v11 = vpop.permute.xlu0 %3258 }
 0x61e   :  { %14740 = vmatprep.mubr.msk.f32.mxu1 %vm15913_vm3, %v18739_v25  ;;  %14743 = vmatprep.subr.mxu0 %v18739_v25  ;;  %v2335_v7 = vmul.f32 %v15541_v35, %v16400_v12  ;;  %v3495_v43 = vpop.permute.xlu1 %3494 }
 0x61f   :  { %14748 = vmatprep.subr.mxu1 %v18739_v25  ;;  %14741 = vmatmul.mubr.msk.f32.vlgmr.msra.gmra.mxu1 %vm300_vm4, %v2336_v59 }
 0x620   :  { %14736 = vmatmul.mubr.msk.f32.vlgmr.msra.gmra.mxu0 %vm300_vm4, %v2335_v7  ;;  %14749 = vmatpush3.xpose.msk.msra.mxu1 %vm300_vm4, %v2949_v50 }
 0x621   :  { %v15543_v8 = vpop.eup %15542  ;;  %14744 = vmatpush3.msra.mxu0 %v16428_v45  ;;  %14745 = vmatprep.mubr.msk.f32.mxu0 %vm15913_vm3, %v18739_v25 }
 0x622   :  { %14750 = vmatprep.mubr.msk.f32.mxu1 %vm15913_vm3, %v18739_v25  ;;  %14753 = vmatprep.subr.mxu0 %v18739_v25  ;;  %v2337_v12 = vmul.f32 %v15543_v8, %v16406_v27  ;;  %v3417_v27 = vpop.permute.xlu0 %3416  ;;  %v3493_v45 = vpop.permute.xlu1 %3492 }
 0x623   :  { %14758 = vmatprep.subr.mxu1 %v18739_v25  ;;  %14751 = vmatmul.mubr.msk.f32.vlgmr.msra.gmra.mxu1 %vm300_vm4, %v16434_v52 }
 0x624   :  { %14746 = vmatmul.mubr.msk.f32.vlgmr.msra.gmra.mxu0 %vm300_vm4, %v2337_v12  ;;  %14759 = vmatpush3.xpose.msk.msra.mxu1 %vm300_vm4, %v16438_v56 }
 0x625   :  { %14754 = vmatpush3.xpose.msk.msra.mxu0 %vm300_vm4, %v16430_v49  ;;  %14755 = vmatprep.mubr.msk.f32.mxu0 %vm15913_vm3, %v18739_v25 }
 0x626   :  { %14760 = vmatprep.mubr.msk.f32.mxu1 %vm15913_vm3, %v18739_v25  ;;  %14763 = vmatprep.subr.mxu0 %v18739_v25  ;;  %v3415_v48 = vpop.permute.xlu0 %3414  ;;  %v3667_v49 = vpop.permute.xlu1 %3666 }
 0x627   :  { %14768 = vmatprep.subr.mxu1 %v18739_v25  ;;  %14761 = vmatmul.mubr.msk.f32.vlgmr.msra.gmra.mxu1 %vm300_vm4, %v16442_v58 }
 0x628   :  { %14756 = vmatmul.mubr.msk.f32.vlgmr.msra.gmra.mxu0 %vm300_vm4, %v16432_v51  ;;  %14769 = vmatpush3.xpose.msk.msra.mxu1 %vm300_vm4, %v3261_v34 }
 0x629   :  { %14764 = vmatpush3.xpose.msk.msra.mxu0 %vm300_vm4, %v16436_v55  ;;  %14765 = vmatprep.mubr.msk.f32.mxu0 %vm15913_vm3, %v18739_v25 }
 0x62a   :  { %14770 = vmatprep.mubr.msk.f32.mxu1 %vm15913_vm3, %v18739_v25  ;;  %14773 = vmatprep.subr.mxu0 %v18739_v25 }
 0x62b   :  { %14778 = vmatprep.subr.mxu1 %v18739_v25  ;;  %14771 = vmatmul.mubr.msk.f32.vlgmr.msra.gmra.mxu1 %vm300_vm4, %v3259_v11 }
 0x62c   :  { %14766 = vmatmul.mubr.msk.f32.vlgmr.msra.gmra.mxu0 %vm300_vm4, %v16440_v57  ;;  %14779 = vmatpush3.xpose.msk.msra.mxu1 %vm300_vm4, %v3417_v27 }
 0x62d   :  { %14774 = vmatpush3.xpose.msk.msra.mxu0 %vm300_vm4, %v3339_v13  ;;  %14775 = vmatprep.mubr.msk.f32.mxu0 %vm15913_vm3, %v18739_v25 }
 0x62e   :  { %14780 = vmatprep.mubr.msk.f32.mxu1 %vm15913_vm3, %v18739_v25  ;;  %14783 = vmatprep.subr.mxu0 %v18739_v25 }
 0x62f   :  { %14788 = vmatprep.subr.mxu1 %v18739_v25  ;;  %14781 = vmatmul.mubr.msk.f32.vlgmr.msra.gmra.mxu1 %vm300_vm4, %v3415_v48 }
 0x630   :  { %14776 = vmatmul.mubr.msk.f32.vlgmr.msra.gmra.mxu0 %vm300_vm4, %v3337_v44  ;;  %14789 = vmatpush3.msra.mxu1 %v3667_v49 }
 0x631   :  { %14784 = vmatpush3.xpose.msk.msra.mxu0 %vm300_vm4, %v3495_v43  ;;  %14785 = vmatprep.mubr.msk.f32.mxu0 %vm15913_vm3, %v18739_v25 }
 0x632   :  { %14793 = vmatprep.subr.mxu0 %v18739_v25  ;;  %14790 = vmatprep.mubr.msk.f32.mxu1 %vm15913_vm3, %v18739_v25 }
 0x633   :  { %14798 = vmatprep.subr.mxu1 %v18739_v25 }
 0x634   :  { %14786 = vmatmul.mubr.msk.f32.vlgmr.msra.gmra.mxu0 %vm300_vm4, %v3493_v45 }
 0x635   :  { %14795 = vmatprep.mubr.msk.f32.mxu0 %vm15913_vm3, %v18739_v25 }
 0x6d2   :  { %v16531_v50 = vpop.f32.mrf.mxu1 }
 0x6d4   :  { %v14712_v51 = vpop.f32.mrf.mxu1 }
 0x6d6   :  { %v16533_v52 = vpop.f32.mrf.mxu1 }
 0x6d7   :  { %v16535_v55 = vpop.f32.mrf.mxu0 }
 0x6d8   :  { %v14722_v56 = vpop.f32.mrf.mxu1 }
 0x6d9   :  { %v14717_v57 = vpop.f32.mrf.mxu0 }
 0x6db   :  { %v16537_v58 = vpop.f32.mrf.mxu1 }
 0x6dc   :  { %v16539_v47 = vpop.f32.mrf.mxu0 }
 0x6dd   :  { %v14732_v60 = vpop.f32.mrf.mxu1 }
 0x6de   :  { %v14727_v63 = vpop.f32.mrf.mxu0 }
 0x6df   :  { %v16541_v0 = vpop.f32.mrf.mxu1 }
 0x6e0   :  { %v16543_v54 = vpop.f32.mrf.mxu0 }
 0x6e1   :  { %v14742_v1 = vpop.f32.mrf.mxu1 }
 0x6e2   :  { %v14737_v61 = vpop.f32.mrf.mxu0 }
 0x6e3   :  { %v3020_v62 = vpop.f32.mrf.mxu1 }
 0x6e4   :  { %v16545_v2 = vpop.f32.mrf.mxu0  ;;  %v3570_v4 = vmul.f32 0.35355338, %v3020_v62 }
 0x6e5   :  { %v14752_v5 = vpop.f32.mrf.mxu1 }
 0x6e6   :  { %v14747_v9 = vpop.f32.mrf.mxu0  ;;  %v3578_v10 = vsel %vm300_vm4, %v3570_v4, -inf }
 0x6e7   :  { %3579 = vmax.xlane.f32.xlu0 %v3578_v10  ;;  %v3176_v13 = vpop.f32.mrf.mxu1 }
 0x6e8   :  { %v3098_v53 = vpop.f32.mrf.mxu0  ;;  %v3572_v15 = vmul.f32 0.35355338, %v3176_v13 }
 0x6e9   :  { %v3571_v3 = vmul.f32 0.35355338, %v3098_v53  ;;  %v14762_v6 = vpop.f32.mrf.mxu1 }
 0x6ea   :  { %v14757_v28 = vpop.f32.mrf.mxu0  ;;  %v3584_v34 = vsel %vm300_vm4, %v3572_v15, -inf }
 0x6eb   :  { %3585 = vmax.xlane.f32.xlu0 %v3584_v34  ;;  %v3581_v35 = vsel %vm300_vm4, %v3571_v3, -inf  ;;  %v3332_v44 = vpop.f32.mrf.mxu1 }
 0x6ec   :  { %3582 = vmax.xlane.f32.xlu1 %v3581_v35  ;;  %v3254_v59 = vpop.f32.mrf.mxu0  ;;  %v3574_v7 = vmul.f32 0.35355338, %v3332_v44 }
 0x6ed   :  { %v3573_v8 = vmul.f32 0.35355338, %v3254_v59  ;;  %v14772_v11 = vpop.f32.mrf.mxu1 }
 0x6ee   :  { %v14767_v12 = vpop.f32.mrf.mxu0  ;;  %v3590_v43 = vsel %vm300_vm4, %v3574_v7, -inf }
 0x6ef   :  { %v3587_v27 = vsel %vm300_vm4, %v3573_v8, -inf  ;;  %v3488_v45 = vpop.f32.mrf.mxu1 }
 0x6f0   :  { %3588 = vmax.xlane.f32.xlu0 %v3587_v27  ;;  %v3410_v48 = vpop.f32.mrf.mxu0  ;;  %3591 = vmax.xlane.f32.xlu1 %v3590_v43  ;;  %v3576_v49 = vmul.f32 0.35355338, %v3488_v45 }
 0x6f1   :  { %v3575_v51 = vmul.f32 0.35355338, %v3410_v48  ;;  %v14782_v56 = vpop.f32.mrf.mxu1 }
 0x6f2   :  { %v14777_v57 = vpop.f32.mrf.mxu0  ;;  %v3596_v60 = vsel %vm300_vm4, %v3576_v49, -inf }
 0x6f3   :  { %v3593_v63 = vsel %vm300_vm4, %v3575_v51, -inf }
 0x6f4   :  { %3594 = vmax.xlane.f32.xlu0 %v3593_v63  ;;  %v3566_v1 = vpop.f32.mrf.mxu0  ;;  %3597 = vmax.xlane.f32.xlu1 %v3596_v60 }
 0x6f5   :  { %v3577_v61 = vmul.f32 0.35355338, %v3566_v1 }
 0x6f6   :  { %v14787_v62 = vpop.f32.mrf.mxu0 }
 0x6f7   :  { %v3599_v5 = vsel %vm300_vm4, %v3577_v61, -inf }
 0x6f8   :  { %3600 = vmax.xlane.f32.xlu0 %v3599_v5 }
 0x705   :  { %3818 = vrot.lane.b32.xlu1 %v16051_v33, %s15921_s23 }
 0x709   :  { %3894 = vrot.lane.b32.xlu1 %v16057_v36, %s15921_s23 }
 0x70d   :  { %4046 = vrot.lane.b32.xlu1 %v16065_v40, %s15921_s23 }
 0x70e   :  { %3742 = vrot.lane.b32.xlu0 %v16049_v32, %s15921_s23 }
 0x711   :  { %4198 = vrot.lane.b32.xlu1 %v16073_v42, %s15921_s23 }
 0x712   :  { %3970 = vrot.lane.b32.xlu0 %v16059_v37, %s15921_s23 }
 0x715   :  { %4354 = vrot.lane.b32.xlu1 %v16049_v32, %s15922_s24 }
 0x716   :  { %4122 = vrot.lane.b32.xlu0 %v16067_v41, %s15921_s23 }
 0x719   :  { %4352 = vrot.lane.b32.xlu1 %v16049_v32, %s15923_s25 }
 0x71a   :  { %4276 = vrot.lane.b32.xlu0 %v16045_v29, %s15922_s24 }
 0x71d   :  { %4510 = vrot.lane.b32.xlu1 %v16057_v36, %s15922_s24 }
 0x71e   :  { %4274 = vrot.lane.b32.xlu0 %v16045_v29, %s15923_s25 }
 0x721   :  { %4508 = vrot.lane.b32.xlu1 %v16057_v36, %s15923_s25 }
 0x722   :  { %4432 = vrot.lane.b32.xlu0 %v16051_v33, %s15922_s24 }
 0x726   :  { %4430 = vrot.lane.b32.xlu0 %v16051_v33, %s15923_s25 }
 0x770   :  { %v3580_v9 = vpop.xlane.xlu0 %3579 }
 0x771   :  { %v3602_v10 = vsub.f32 %v3570_v4, %v3580_v9 }
 0x773   :  { %v3610_v13 = vmul.f32 1.442695, %v3602_v10 }
 0x774   :  { %v3586_v53 = vpop.xlane.xlu0 %3585 }
 0x775   :  { %15544 = vpow2.f32 %v3610_v13  ;;  %v3583_v6 = vpop.xlane.xlu1 %3582  ;;  %v3604_v28 = vsub.f32 %v3572_v15, %v3586_v53 }
 0x776   :  { %v3603_v34 = vsub.f32 %v3571_v3, %v3583_v6 }
 0x777   :  { %v3614_v35 = vmul.f32 1.442695, %v3604_v28 }
 0x778   :  { %v3612_v44 = vmul.f32 1.442695, %v3603_v34 }
 0x779   :  { %15546 = vpow2.f32 %v3614_v35  ;;  %v3592_v59 = vpop.xlane.xlu1 %3591  ;;  %v3589_v11 = vpop.xlane.xlu0 %3588 }
 0x77a   :  { %15548 = vpow2.f32 %v3612_v44  ;;  %v3606_v12 = vsub.f32 %v3574_v7, %v3592_v59  ;;  %v3605_v43 = vsub.f32 %v3573_v8, %v3589_v11 }
 0x77c   :  { %v3618_v27 = vmul.f32 1.442695, %v3606_v12  ;;  %v3616_v45 = vmul.f32 1.442695, %v3605_v43 }
 0x77d   :  { %v3598_v48 = vpop.xlane.xlu1 %3597  ;;  %v3595_v56 = vpop.xlane.xlu0 %3594 }
 0x77e   :  { %15550 = vpow2.f32 %v3618_v27  ;;  %v3608_v4 = vsub.f32 %v3576_v49, %v3598_v48  ;;  %v3607_v57 = vsub.f32 %v3575_v51, %v3595_v56 }
 0x77f   :  { %15552 = vpow2.f32 %v3616_v45 }
 0x780   :  { %v3622_v60 = vmul.f32 1.442695, %v3608_v4  ;;  %v3620_v63 = vmul.f32 1.442695, %v3607_v57 }
 0x781   :  { %v3601_v15 = vpop.xlane.xlu0 %3600  ;;  %v3819_v11 = vpop.permute.xlu1 %3818 }
 0x782   :  { %v16585_v3 = vpop.eup %15544  ;;  %15554 = vpow2.f32 %v3622_v60  ;;  %v3609_v1 = vsub.f32 %v3577_v61, %v3601_v15 }
 0x783   :  { %15556 = vpow2.f32 %v3620_v63  ;;  %v3626_v7 = vsel %vm300_vm4, %v16585_v3, 0.0 }
 0x784   :  { %v3624_v8 = vmul.f32 1.442695, %v3609_v1  ;;  %3627 = vadd.xlane.f32.xlu1 %v3626_v7 }
 0x785   :  { %v3743_v62 = vpop.permute.xlu0 %3742  ;;  %v3895_v12 = vpop.permute.xlu1 %3894 }
 0x786   :  { %v16589_v5 = vpop.eup %15546  ;;  %15558 = vpow2.f32 %v3624_v8  ;;  %14794 = vmatpush3.msra.mxu0 %v3743_v62 }
 0x787   :  { %v16591_v49 = vpop.eup %15548  ;;  %v3632_v51 = vsel %vm300_vm4, %v16589_v5, 0.0  ;;  %14803 = vmatprep.subr.mxu0 %v18739_v25 }
 0x788   :  { %v3629_v61 = vsel %vm300_vm4, %v16591_v49, 0.0  ;;  %3633 = vadd.xlane.f32.xlu1 %v3632_v51 }
 0x789   :  { %3630 = vadd.xlane.f32.xlu0 %v3629_v61  ;;  %v4047_v43 = vpop.permute.xlu1 %4046  ;;  %v3971_v27 = vpop.permute.xlu0 %3970 }
 0x78b   :  { %v16598_v9 = vpop.eup %15550 }
 0x78c   :  { %v16600_v10 = vpop.eup %15552  ;;  %v3638_v13 = vsel %vm300_vm4, %v16598_v9, 0.0 }
 0x78d   :  { %3639 = vadd.xlane.f32.xlu1 %v3638_v13  ;;  %v3635_v53 = vsel %vm300_vm4, %v16600_v10, 0.0  ;;  %v16634_v45 = vpop.permute.xlu1 %4198  ;;  %v4123_v48 = vpop.permute.xlu0 %4122 }
 0x78e   :  { %3636 = vadd.xlane.f32.xlu0 %v3635_v53 }
 0x78f   :  { %v16606_v6 = vpop.eup %15554 }
 0x790   :  { %v16608_v28 = vpop.eup %15556  ;;  %v3644_v34 = vsel %vm300_vm4, %v16606_v6, 0.0 }
 0x791   :  { %3645 = vadd.xlane.f32.xlu1 %v3644_v34  ;;  %v3641_v35 = vsel %vm300_vm4, %v16608_v28, 0.0  ;;  %v16636_v56 = vpop.permute.xlu1 %4354  ;;  %v4277_v4 = vpop.permute.xlu0 %4276 }
 0x792   :  { %3642 = vadd.xlane.f32.xlu0 %v3641_v35 }
 0x793   :  { %v16614_v44 = vpop.eup %15558 }
 0x794   :  { %v3647_v59 = vsel %vm300_vm4, %v16614_v44, 0.0 }
 0x795   :  { %v16638_v57 = vpop.permute.xlu1 %4352  ;;  %v16640_v60 = vpop.permute.xlu0 %4274 }
 0x796   :  { %3648 = vadd.xlane.f32.xlu0 %v3647_v59 }
 0x799   :  { %v16642_v63 = vpop.permute.xlu1 %4510  ;;  %v16644_v15 = vpop.permute.xlu0 %4432 }
 0x79d   :  { %v16646_v1 = vpop.permute.xlu1 %4508  ;;  %v16648_v8 = vpop.permute.xlu0 %4430 }
 0x7a2   :  { %4666 = vrot.lane.b32.xlu1 %v16065_v40, %s15922_s24 }
 0x7a6   :  { %4664 = vrot.lane.b32.xlu1 %v16065_v40, %s15923_s25 }
 0x7aa   :  { %4822 = vrot.lane.b32.xlu1 %v16073_v42, %s15922_s24 }
 0x7ac   :  { %4588 = vrot.lane.b32.xlu0 %v16059_v37, %s15922_s24 }
 0x7ae   :  { %4820 = vrot.lane.b32.xlu1 %v16073_v42, %s15923_s25 }
 0x7b0   :  { %4586 = vrot.lane.b32.xlu0 %v16059_v37, %s15923_s25 }
 0x7b4   :  { %4744 = vrot.lane.b32.xlu0 %v16067_v41, %s15922_s24 }
 0x7b8   :  { %4742 = vrot.lane.b32.xlu0 %v16067_v41, %s15923_s25 }
 0x80d   :  { %v3628_v7 = vpop.xlane.xlu1 %3627 }
 0x80e   :  { %15560 = vrcp.f32 %v3628_v7  ;;  %v18743_v7 = vmov 0.0  }
 0x811   :  { %v3634_v62 = vpop.xlane.xlu1 %3633 }
 0x812   :  { %15562 = vrcp.f32 %v3634_v62  ;;  %v3631_v51 = vpop.xlane.xlu0 %3630 }
 0x813   :  { %15564 = vrcp.f32 %v3631_v51 }
 0x816   :  { %v3640_v61 = vpop.xlane.xlu1 %3639 }
 0x817   :  { %15566 = vrcp.f32 %v3640_v61  ;;  %v3637_v13 = vpop.xlane.xlu0 %3636 }
 0x818   :  { %15568 = vrcp.f32 %v3637_v13 }
 0x81a   :  { %v3646_v53 = vpop.xlane.xlu1 %3645 }
 0x81b   :  { %v15561_v34 = vpop.eup %15560  ;;  %15570 = vrcp.f32 %v3646_v53  ;;  %v3643_v35 = vpop.xlane.xlu0 %3642 }
 0x81c   :  { %15572 = vrcp.f32 %v3643_v35  ;;  %v3658_v59 = vmul.f32 %v15561_v34, %v16585_v3 }
 0x81e   :  { %14791 = vmatmul.mubr.msk.f32.vlgmr.msra.gmra.mxu1 %vm300_vm4, %v3658_v59 }
 0x81f   :  { %v15563_v25 = vpop.eup %15562  ;;  %v3649_v23 = vpop.xlane.xlu0 %3648  ;;  %14799 = vmatpush3.msra.mxu1 %v3819_v11  ;;  %14800 = vmatprep.mubr.msk.f32.mxu1 %vm15913_vm3, %v18743_v7 }
 0x820   :  { %v15565_v62 = vpop.eup %15564  ;;  %15574 = vrcp.f32 %v3649_v23  ;;  %14808 = vmatprep.subr.mxu1 %v18743_v7  ;;  %v3660_v51 = vmul.f32 %v15563_v25, %v16589_v5 }
 0x821   :  { %v3659_v61 = vmul.f32 %v15565_v62, %v16591_v49 }
 0x822   :  { %14801 = vmatmul.mubr.msk.f32.vlgmr.msra.gmra.mxu1 %vm300_vm4, %v3660_v51 }
 0x823   :  { %14796 = vmatmul.mubr.msk.f32.vlgmr.msra.gmra.mxu0 %vm300_vm4, %v3659_v61  ;;  %14809 = vmatpush3.msra.mxu1 %v3971_v27  ;;  %v4589_v49 = vpop.permute.xlu0 %4588 }
 0x824   :  { %v15567_v3 = vpop.eup %15566  ;;  %14804 = vmatpush3.msra.mxu0 %v3895_v12  ;;  %14810 = vmatprep.mubr.msk.f32.mxu1 %vm15913_vm3, %v18743_v7 }
 0x825   :  { %v15569_v11 = vpop.eup %15568  ;;  %14805 = vmatprep.mubr.msk.f32.mxu0 %vm15913_vm3, %v18743_v7  ;;  %14813 = vmatprep.subr.mxu0 %v18743_v7  ;;  %v3662_v23 = vmul.f32 %v15567_v3, %v16598_v9 }
 0x826   :  { %14818 = vmatprep.subr.mxu1 %v18743_v7  ;;  %v3661_v25 = vmul.f32 %v15569_v11, %v16600_v10 }
 0x827   :  { %14811 = vmatmul.mubr.msk.f32.vlgmr.msra.gmra.mxu1 %vm300_vm4, %v3662_v23 }
 0x828   :  { %v15571_v5 = vpop.eup %15570  ;;  %14806 = vmatmul.mubr.msk.f32.vlgmr.msra.gmra.mxu0 %vm300_vm4, %v3661_v25  ;;  %14819 = vmatpush3.msra.mxu1 %v4123_v48 }
 0x829   :  { %v15573_v12 = vpop.eup %15572  ;;  %14814 = vmatpush3.msra.mxu0 %v4047_v43  ;;  %14815 = vmatprep.mubr.msk.f32.mxu0 %vm15913_vm3, %v18743_v7  ;;  %v3664_v27 = vmul.f32 %v15571_v5, %v16606_v6  ;;  %v4667_v43 = vpop.permute.xlu1 %4666 }
 0x82a   :  { %14820 = vmatprep.mubr.msk.f32.mxu1 %vm15913_vm3, %v18743_v7  ;;  %14823 = vmatprep.subr.mxu0 %v18743_v7  ;;  %v3663_v9 = vmul.f32 %v15573_v12, %v16608_v28  ;;  %v4587_v6 = vpop.permute.xlu0 %4586 }
 0x82b   :  { %14828 = vmatprep.subr.mxu1 %v18743_v7  ;;  %14821 = vmatmul.mubr.msk.f32.vlgmr.msra.gmra.mxu1 %vm300_vm4, %v3664_v27 }
 0x82c   :  { %14816 = vmatmul.mubr.msk.f32.vlgmr.msra.gmra.mxu0 %vm300_vm4, %v3663_v9  ;;  %14829 = vmatpush3.xpose.msk.msra.mxu1 %vm300_vm4, %v4277_v4 }
 0x82d   :  { %v15575_v10 = vpop.eup %15574  ;;  %14824 = vmatpush3.msra.mxu0 %v16634_v45  ;;  %14825 = vmatprep.mubr.msk.f32.mxu0 %vm15913_vm3, %v18743_v7 }
 0x82e   :  { %14830 = vmatprep.mubr.msk.f32.mxu1 %vm15913_vm3, %v18743_v7  ;;  %14833 = vmatprep.subr.mxu0 %v18743_v7  ;;  %v3665_v28 = vmul.f32 %v15575_v10, %v16614_v44  ;;  %v4665_v44 = vpop.permute.xlu1 %4664  ;;  %v4745_v45 = vpop.permute.xlu0 %4744 }
 0x82f   :  { %14838 = vmatprep.subr.mxu1 %v18743_v7  ;;  %14831 = vmatmul.mubr.msk.f32.vlgmr.msra.gmra.mxu1 %vm300_vm4, %v16640_v60 }
 0x830   :  { %14826 = vmatmul.mubr.msk.f32.vlgmr.msra.gmra.mxu0 %vm300_vm4, %v3665_v28  ;;  %14839 = vmatpush3.xpose.msk.msra.mxu1 %vm300_vm4, %v16644_v15 }
 0x831   :  { %14834 = vmatpush3.xpose.msk.msra.mxu0 %vm300_vm4, %v16636_v56  ;;  %14835 = vmatprep.mubr.msk.f32.mxu0 %vm15913_vm3, %v18743_v7 }
 0x832   :  { %14840 = vmatprep.mubr.msk.f32.mxu1 %vm15913_vm3, %v18743_v7  ;;  %14843 = vmatprep.subr.mxu0 %v18743_v7  ;;  %v4823_v48 = vpop.permute.xlu1 %4822  ;;  %v4743_v56 = vpop.permute.xlu0 %4742 }
 0x833   :  { %14848 = vmatprep.subr.mxu1 %v18743_v7  ;;  %14841 = vmatmul.mubr.msk.f32.vlgmr.msra.gmra.mxu1 %vm300_vm4, %v16648_v8 }
 0x834   :  { %14836 = vmatmul.mubr.msk.f32.vlgmr.msra.gmra.mxu0 %vm300_vm4, %v16638_v57  ;;  %14849 = vmatpush3.xpose.msk.msra.mxu1 %vm300_vm4, %v4589_v49 }
 0x835   :  { %14844 = vmatpush3.xpose.msk.msra.mxu0 %vm300_vm4, %v16642_v63  ;;  %14845 = vmatprep.mubr.msk.f32.mxu0 %vm15913_vm3, %v18743_v7 }
 0x836   :  { %14850 = vmatprep.mubr.msk.f32.mxu1 %vm15913_vm3, %v18743_v7  ;;  %14853 = vmatprep.subr.mxu0 %v18743_v7  ;;  %v4821_v4 = vpop.permute.xlu1 %4820 }
 0x837   :  { %14858 = vmatprep.subr.mxu1 %v18743_v7  ;;  %14851 = vmatmul.mubr.msk.f32.vlgmr.msra.gmra.mxu1 %vm300_vm4, %v4587_v6 }
 0x838   :  { %14846 = vmatmul.mubr.msk.f32.vlgmr.msra.gmra.mxu0 %vm300_vm4, %v16646_v1  ;;  %14859 = vmatpush3.xpose.msk.msra.mxu1 %vm300_vm4, %v4745_v45 }
 0x839   :  { %14854 = vmatpush3.xpose.msk.msra.mxu0 %vm300_vm4, %v4667_v43  ;;  %14855 = vmatprep.mubr.msk.f32.mxu0 %vm15913_vm3, %v18743_v7 }
 0x83a   :  { %14860 = vmatprep.mubr.msk.f32.mxu1 %vm15913_vm3, %v18743_v7  ;;  %14863 = vmatprep.subr.mxu0 %v18743_v7 }
 0x83b   :  { %14861 = vmatmul.mubr.msk.f32.vlgmr.msra.gmra.mxu1 %vm300_vm4, %v4743_v56  ;;  %14868 = vmatprep.subr.mxu1 %v18743_v7 }
 0x83c   :  { %14856 = vmatmul.mubr.msk.f32.vlgmr.msra.gmra.mxu0 %vm300_vm4, %v4665_v44  ;;  %14870 = vmatprep.mubr.msk.f32.mxu1 %vm15913_vm3, %v18743_v7 }
 0x83d   :  { %14864 = vmatpush3.xpose.msk.msra.mxu0 %vm300_vm4, %v4823_v48  ;;  %14865 = vmatprep.mubr.msk.f32.mxu0 %vm15913_vm3, %v18743_v7 }
 0x83e   :  { %14873 = vmatprep.subr.mxu0 %v18743_v7 }
 0x840   :  { %14866 = vmatmul.mubr.msk.f32.vlgmr.msra.gmra.mxu0 %vm300_vm4, %v4821_v4 }
 0x841   :  { %14875 = vmatprep.mubr.msk.f32.mxu0 %vm15913_vm3, %v18743_v7 }
 0x8de   :  { %v16736_v57 = vpop.f32.mrf.mxu1 }
 0x8e0   :  { %v14792_v60 = vpop.f32.mrf.mxu1 }
 0x8e2   :  { %v16738_v63 = vpop.f32.mrf.mxu1 }
 0x8e3   :  { %v16740_v15 = vpop.f32.mrf.mxu0 }
 0x8e4   :  { %v14802_v1 = vpop.f32.mrf.mxu1 }
 0x8e5   :  { %v14797_v8 = vpop.f32.mrf.mxu0 }
 0x8e7   :  { %v16742_v13 = vpop.f32.mrf.mxu1 }
 0x8e8   :  { %v16744_v53 = vpop.f32.mrf.mxu0 }
 0x8e9   :  { %v14812_v34 = vpop.f32.mrf.mxu1 }
 0x8ea   :  { %v14807_v35 = vpop.f32.mrf.mxu0 }
 0x8eb   :  { %v16746_v59 = vpop.f32.mrf.mxu1 }
 0x8ec   :  { %v16748_v62 = vpop.f32.mrf.mxu0 }
 0x8ed   :  { %v14822_v51 = vpop.f32.mrf.mxu1 }
 0x8ee   :  { %v14817_v61 = vpop.f32.mrf.mxu0 }
 0x8ef   :  { %v4348_v3 = vpop.f32.mrf.mxu1 }
 0x8f0   :  { %v16750_v11 = vpop.f32.mrf.mxu0  ;;  %v4898_v23 = vmul.f32 0.35355338, %v4348_v3 }
 0x8f1   :  { %v14832_v25 = vpop.f32.mrf.mxu1 }
 0x8f2   :  { %v14827_v5 = vpop.f32.mrf.mxu0  ;;  %v4906_v49 = vsel %vm300_vm4, %v4898_v23, -inf }
 0x8f3   :  { %4907 = vmax.xlane.f32.xlu0 %v4906_v49  ;;  %v4504_v12 = vpop.f32.mrf.mxu1 }
 0x8f4   :  { %v4426_v27 = vpop.f32.mrf.mxu0  ;;  %v4900_v9 = vmul.f32 0.35355338, %v4504_v12 }
 0x8f5   :  { %v4899_v10 = vmul.f32 0.35355338, %v4426_v27  ;;  %v14842_v43 = vpop.f32.mrf.mxu1 }
 0x8f6   :  { %v14837_v6 = vpop.f32.mrf.mxu0  ;;  %v4912_v28 = vsel %vm300_vm4, %v4900_v9, -inf }
 0x8f7   :  { %4913 = vmax.xlane.f32.xlu0 %v4912_v28  ;;  %v4909_v44 = vsel %vm300_vm4, %v4899_v10, -inf  ;;  %v4660_v45 = vpop.f32.mrf.mxu1 }
 0x8f8   :  { %4910 = vmax.xlane.f32.xlu1 %v4909_v44  ;;  %v4582_v48 = vpop.f32.mrf.mxu0  ;;  %v4902_v56 = vmul.f32 0.35355338, %v4660_v45 }
 0x8f9   :  { %v4901_v4 = vmul.f32 0.35355338, %v4582_v48  ;;  %v14852_v60 = vpop.f32.mrf.mxu1 }
 0x8fa   :  { %v14847_v1 = vpop.f32.mrf.mxu0  ;;  %v4918_v8 = vsel %vm300_vm4, %v4902_v56, -inf }
 0x8fb   :  { %v4915_v34 = vsel %vm300_vm4, %v4901_v4, -inf  ;;  %v4816_v35 = vpop.f32.mrf.mxu1 }
 0x8fc   :  { %4916 = vmax.xlane.f32.xlu0 %v4915_v34  ;;  %v4738_v51 = vpop.f32.mrf.mxu0  ;;  %4919 = vmax.xlane.f32.xlu1 %v4918_v8  ;;  %v4904_v61 = vmul.f32 0.35355338, %v4816_v35 }
 0x8fd   :  { %v4903_v3 = vmul.f32 0.35355338, %v4738_v51  ;;  %v14862_v25 = vpop.f32.mrf.mxu1 }
 0x8fe   :  { %v14857_v5 = vpop.f32.mrf.mxu0  ;;  %v4924_v49 = vsel %vm300_vm4, %v4904_v61, -inf }
 0x8ff   :  { %v4921_v12 = vsel %vm300_vm4, %v4903_v3, -inf }
 0x900   :  { %4922 = vmax.xlane.f32.xlu0 %v4921_v12  ;;  %v4894_v27 = vpop.f32.mrf.mxu0  ;;  %4925 = vmax.xlane.f32.xlu1 %v4924_v49 }
 0x901   :  { %v4905_v43 = vmul.f32 0.35355338, %v4894_v27 }
 0x902   :  { %v14867_v6 = vpop.f32.mrf.mxu0 }
 0x903   :  { %v4927_v28 = vsel %vm300_vm4, %v4905_v43, -inf }
 0x904   :  { %4928 = vmax.xlane.f32.xlu0 %v4927_v28 }
 0x911   :  { %4994 = vrot.lane.b32.xlu1 %v16045_v29, %s15924_s26 }
 0x915   :  { %5146 = vrot.lane.b32.xlu1 %v16051_v33, %s15924_s26 }
 0x919   :  { %5222 = vrot.lane.b32.xlu1 %v16057_v36, %s15924_s26 }
 0x91a   :  { %5070 = vrot.lane.b32.xlu0 %v16049_v32, %s15924_s26 }
 0x91d   :  { %5374 = vrot.lane.b32.xlu1 %v16065_v40, %s15924_s26 }
 0x91e   :  { %5298 = vrot.lane.b32.xlu0 %v16059_v37, %s15924_s26 }
 0x97c   :  { %v4908_v44 = vpop.xlane.xlu0 %4907 }
 0x97d   :  { %v4930_v45 = vsub.f32 %v4898_v23, %v4908_v44 }
 0x97f   :  { %v4938_v48 = vmul.f32 1.442695, %v4930_v45 }
 0x980   :  { %v4914_v60 = vpop.xlane.xlu0 %4913 }
 0x981   :  { %15576 = vpow2.f32 %v4938_v48  ;;  %v4911_v29 = vpop.xlane.xlu1 %4910  ;;  %v4932_v1 = vsub.f32 %v4900_v9, %v4914_v60 }
 0x982   :  { %v4931_v33 = vsub.f32 %v4899_v10, %v4911_v29 }
 0x983   :  { %v4942_v8 = vmul.f32 1.442695, %v4932_v1 }
 0x984   :  { %v4940_v34 = vmul.f32 1.442695, %v4931_v33 }
 0x985   :  { %15578 = vpow2.f32 %v4942_v8  ;;  %v4920_v36 = vpop.xlane.xlu1 %4919  ;;  %v4917_v35 = vpop.xlane.xlu0 %4916 }
 0x986   :  { %15580 = vpow2.f32 %v4940_v34  ;;  %v4934_v32 = vsub.f32 %v4902_v56, %v4920_v36  ;;  %v4933_v51 = vsub.f32 %v4901_v4, %v4917_v35 }
 0x988   :  { %v4946_v40 = vmul.f32 1.442695, %v4934_v32  ;;  %v4944_v25 = vmul.f32 1.442695, %v4933_v51 }
 0x989   :  { %v4926_v5 = vpop.xlane.xlu1 %4925  ;;  %v4923_v37 = vpop.xlane.xlu0 %4922 }
 0x98a   :  { %15582 = vpow2.f32 %v4946_v40  ;;  %v4936_v23 = vsub.f32 %v4904_v61, %v4926_v5  ;;  %v4935_v49 = vsub.f32 %v4903_v3, %v4923_v37 }
 0x98b   :  { %15584 = vpow2.f32 %v4944_v25 }
 0x98c   :  { %v4950_v12 = vmul.f32 1.442695, %v4936_v23  ;;  %v4948_v27 = vmul.f32 1.442695, %v4935_v49 }
 0x98d   :  { %v4995_v9 = vpop.permute.xlu1 %4994  ;;  %v4929_v10 = vpop.xlane.xlu0 %4928 }
 0x98e   :  { %v16772_v6 = vpop.eup %15576  ;;  %15586 = vpow2.f32 %v4950_v12  ;;  %v4937_v28 = vsub.f32 %v4905_v43, %v4929_v10  ;;  %14869 = vmatpush3.msra.mxu1 %v4995_v9 }
 0x98f   :  { %15588 = vpow2.f32 %v4948_v27  ;;  %v4954_v56 = vsel %vm300_vm4, %v16772_v6, 0.0  ;;  %14878 = vmatprep.subr.mxu1 %v18743_v7 }
 0x990   :  { %v4952_v4 = vmul.f32 1.442695, %v4937_v28  ;;  %4955 = vadd.xlane.f32.xlu1 %v4954_v56  ;;  %v5727_v28 = vld [vmem:[%s18736_s1 + $0x68] sm:$0xff]  ;;  %v5726_v56 = vld [vmem:[%s18736_s1 + $0x60] sm:$0xff] }
 0x991   :  { %v5071_v61 = vpop.permute.xlu0 %5070 }
 0x992   :  { %v16777_v3 = vpop.eup %15578  ;;  %15590 = vpow2.f32 %v4952_v4  ;;  %14874 = vmatpush3.msra.mxu0 %v5071_v61  ;;  %v5725_v4 = vld [vmem:[%s18736_s1 + $0x58] sm:$0xff]  ;;  %v5724_v61 = vld [vmem:[%s18736_s1 + $0x50] sm:$0xff] }
 0x993   :  { %v16779_v44 = vpop.eup %15580  ;;  %v4960_v45 = vsel %vm300_vm4, %v16777_v3, 0.0  ;;  %14883 = vmatprep.subr.mxu0 %v18743_v7 }
 0x994   :  { %v4957_v43 = vsel %vm300_vm4, %v16779_v44, 0.0  ;;  %4961 = vadd.xlane.f32.xlu1 %v4960_v45 }
 0x995   :  { %4958 = vadd.xlane.f32.xlu0 %v4957_v43 }
 0x997   :  { %v16786_v48 = vpop.eup %15582 }
 0x998   :  { %v16788_v60 = vpop.eup %15584  ;;  %v4966_v29 = vsel %vm300_vm4, %v16786_v48, 0.0 }
 0x999   :  { %4967 = vadd.xlane.f32.xlu1 %v4966_v29  ;;  %v4963_v1 = vsel %vm300_vm4, %v16788_v60, 0.0 }
 0x99a   :  { %4964 = vadd.xlane.f32.xlu0 %v4963_v1 }
 0x99b   :  { %v16794_v33 = vpop.eup %15586 }
 0x99c   :  { %v16796_v8 = vpop.eup %15588  ;;  %v4972_v34 = vsel %vm300_vm4, %v16794_v33, 0.0 }
 0x99d   :  { %4973 = vadd.xlane.f32.xlu1 %v4972_v34  ;;  %v4969_v36 = vsel %vm300_vm4, %v16796_v8, 0.0 }
 0x99e   :  { %4970 = vadd.xlane.f32.xlu0 %v4969_v36 }
 0x99f   :  { %v16802_v35 = vpop.eup %15590 }
 0x9a0   :  { %v4975_v32 = vsel %vm300_vm4, %v16802_v35, 0.0 }
 0x9a2   :  { %4976 = vadd.xlane.f32.xlu0 %v4975_v32 }
 0x9ae   :  { %5526 = vrot.lane.b32.xlu1 %v16073_v42, %s15924_s26 }
 0x9b2   :  { %5612 = vrot.lane.b32.xlu1 %v16535_v55, %s15925_s27  ;;  %v5299_v55 = vpop.permute.xlu0 %5298 }
 0x9b6   :  { %5644 = vrot.lane.b32.xlu1 %v16740_v15, %s15926_s28 }
 0x9b8   :  { %5450 = vrot.lane.b32.xlu0 %v16067_v41, %s15924_s26  ;;  %v5147_v41 = vpop.permute.xlu1 %5146 }
 0x9ba   :  { %5616 = vrot.lane.b32.xlu1 %v16539_v47, %s15925_s27 }
 0x9bc   :  { %5610 = vrot.lane.b32.xlu0 %v16531_v50, %s15925_s27  ;;  %v5223_v42 = vpop.permute.xlu1 %5222 }
 0x9be   :  { %5648 = vrot.lane.b32.xlu1 %v16744_v53, %s15926_s28 }
 0x9c0   :  { %5642 = vrot.lane.b32.xlu0 %v16736_v57, %s15926_s28  ;;  %v5375_v50 = vpop.permute.xlu1 %5374 }
 0x9c2   :  { %5620 = vrot.lane.b32.xlu1 %v16543_v54, %s15925_s27 }
 0x9c4   :  { %5614 = vrot.lane.b32.xlu0 %v16533_v52, %s15925_s27 }
 0x9c6   :  { %5652 = vrot.lane.b32.xlu1 %v16748_v62, %s15926_s28 }
 0x9c8   :  { %5646 = vrot.lane.b32.xlu0 %v16738_v63, %s15926_s28 }
 0x9ca   :  { %5624 = vrot.lane.b32.xlu1 %v16545_v2, %s15925_s27 }
 0x9cc   :  { %5618 = vrot.lane.b32.xlu0 %v16537_v58, %s15925_s27 }
 0x9ce   :  { %5656 = vrot.lane.b32.xlu1 %v16750_v11, %s15926_s28 }
 0x9d0   :  { %5650 = vrot.lane.b32.xlu0 %v16742_v13, %s15926_s28 }
 0x9d4   :  { %5622 = vrot.lane.b32.xlu0 %v16541_v0, %s15925_s27 }
 0x9d8   :  { %5654 = vrot.lane.b32.xlu0 %v16746_v59, %s15926_s28 }
 0xa19   :  { %v4956_v52 = vpop.xlane.xlu1 %4955 }
 0xa1a   :  { %15592 = vrcp.f32 %v4956_v52 }
 0xa1d   :  { %v4962_v47 = vpop.xlane.xlu1 %4961 }
 0xa1e   :  { %15594 = vrcp.f32 %v4962_v47  ;;  %v4959_v58 = vpop.xlane.xlu0 %4958 }
 0xa1f   :  { %15596 = vrcp.f32 %v4959_v58 }
 0xa22   :  { %v4968_v54 = vpop.xlane.xlu1 %4967 }
 0xa23   :  { %15598 = vrcp.f32 %v4968_v54  ;;  %v4965_v2 = vpop.xlane.xlu0 %4964 }
 0xa24   :  { %15600 = vrcp.f32 %v4965_v2 }
 0xa26   :  { %v4974_v57 = vpop.xlane.xlu1 %4973 }
 0xa27   :  { %v15593_v63 = vpop.eup %15592  ;;  %15602 = vrcp.f32 %v4974_v57  ;;  %v4971_v0 = vpop.xlane.xlu0 %4970 }
 0xa28   :  { %15604 = vrcp.f32 %v4971_v0  ;;  %v4986_v15 = vmul.f32 %v15593_v63, %v16772_v6 }
 0xa2a   :  { %14871 = vmatmul.mubr.msk.f32.vlgmr.msra.gmra.mxu1 %vm300_vm4, %v4986_v15  ;;  %v5527_v9 = vpop.permute.xlu1 %5526 }
 0xa2b   :  { %v15595_v13 = vpop.eup %15594  ;;  %v4977_v53 = vpop.xlane.xlu0 %4976  ;;  %14879 = vmatpush3.msra.mxu1 %v5147_v41  ;;  %14880 = vmatprep.mubr.msk.f32.mxu1 %vm15913_vm3, %v18743_v7 }
 0xa2c   :  { %v15597_v59 = vpop.eup %15596  ;;  %15606 = vrcp.f32 %v4977_v53  ;;  %14888 = vmatprep.subr.mxu1 %v18743_v7  ;;  %v4988_v62 = vmul.f32 %v15595_v13, %v16777_v3 }
 0xa2d   :  { %v4987_v11 = vmul.f32 %v15597_v59, %v16779_v44 }
 0xa2e   :  { %14881 = vmatmul.mubr.msk.f32.vlgmr.msra.gmra.mxu1 %vm300_vm4, %v4988_v62  ;;  %v5613_v52 = vpop.permute.xlu1 %5612 }
 0xa2f   :  { %14876 = vmatmul.mubr.msk.f32.vlgmr.msra.gmra.mxu0 %vm300_vm4, %v4987_v11  ;;  %14889 = vmatpush3.msra.mxu1 %v5299_v55  ;;  %v5451_v37 = vpop.permute.xlu0 %5450 }
 0xa30   :  { %v15599_v51 = vpop.eup %15598  ;;  %14884 = vmatpush3.msra.mxu0 %v5223_v42  ;;  %14890 = vmatprep.mubr.msk.f32.mxu1 %vm15913_vm3, %v18743_v7 }
 0xa31   :  { %v15601_v40 = vpop.eup %15600  ;;  %14885 = vmatprep.mubr.msk.f32.mxu0 %vm15913_vm3, %v18743_v7  ;;  %14893 = vmatprep.subr.mxu0 %v18743_v7  ;;  %v4990_v25 = vmul.f32 %v15599_v51, %v16786_v48 }
 0xa32   :  { %14898 = vmatprep.subr.mxu1 %v18743_v7  ;;  %v4989_v5 = vmul.f32 %v15601_v40, %v16788_v60  ;;  %v5645_v47 = vpop.permute.xlu1 %5644 }
 0xa33   :  { %14891 = vmatmul.mubr.msk.f32.vlgmr.msra.gmra.mxu1 %vm300_vm4, %v4990_v25 }
 0xa34   :  { %v15603_v23 = vpop.eup %15602  ;;  %14886 = vmatmul.mubr.msk.f32.vlgmr.msra.gmra.mxu0 %vm300_vm4, %v4989_v5  ;;  %14899 = vmatpush3.msra.mxu1 %v5451_v37 }
 0xa35   :  { %v15605_v49 = vpop.eup %15604  ;;  %14894 = vmatpush3.msra.mxu0 %v5375_v50  ;;  %14895 = vmatprep.mubr.msk.f32.mxu0 %vm15913_vm3, %v18743_v7  ;;  %v4992_v12 = vmul.f32 %v15603_v23, %v16794_v33  ;;  %v5611_v50 = vpop.permute.xlu0 %5610  ;;  %v5699_v23 = vsel %vm300_vm4, %v16325_v16, %v5613_v52 }
 0xa36   :  { %14900 = vmatprep.mubr.msk.f32.mxu1 %vm15913_vm3, %v18743_v7  ;;  %14903 = vmatprep.subr.mxu0 %v18743_v7  ;;  %v4991_v27 = vmul.f32 %v15605_v49, %v16796_v8  ;;  %v5617_v54 = vpop.permute.xlu1 %5616  ;;  %v5698_v11 = vsel %vm300_vm4, %v16323_v14, %v5611_v50 }
 0xa37   :  { %14901 = vmatmul.mubr.msk.f32.vlgmr.msra.gmra.mxu1 %vm300_vm4, %v4992_v12  ;;  %14908 = vmatprep.subr.mxu1 %v5727_v28  ;;  %v5701_v16 = vsel %vm300_vm4, %v16331_v31, %v5617_v54 }
 0xa38   :  { %14896 = vmatmul.mubr.msk.f32.vlgmr.msra.gmra.mxu0 %vm300_vm4, %v4991_v27  ;;  %14909 = vmatpush3.msra.mxu1 %v5727_v28  ;;  %v5708_v27 = vsel %vm5706_vm6, %v5699_v23, %v5645_v47 }
 0xa39   :  { %v15607_v10 = vpop.eup %15606  ;;  %14904 = vmatpush3.msra.mxu0 %v5527_v9  ;;  %14905 = vmatprep.mubr.msk.f32.mxu0 %vm15913_vm3, %v18743_v7  ;;  %v5643_v55 = vpop.permute.xlu0 %5642 }
 0xa3a   :  { %v4993_v6 = vmul.f32 %v15607_v10, %v16802_v35  ;;  %14910 = vmatprep.subr.mxu1 %v5726_v56  ;;  %v5649_v57 = vpop.permute.xlu1 %5648  ;;  %v5707_v51 = vsel %vm5706_vm6, %v5698_v11, %v5643_v55 }
 0xa3b   :  { %14911 = vmatpush3.msra.mxu1 %v5726_v56  ;;  %v5710_v56 = vsel %vm5706_vm6, %v5701_v16, %v5649_v57 }
 0xa3c   :  { %14906 = vmatmul.mubr.msk.f32.vlgmr.msra.gmra.mxu0 %vm300_vm4, %v4993_v6  ;;  %14912 = vmatprep.subr.mxu1 %v5725_v4 }
 0xa3d   :  { %14913 = vmatpush3.msra.mxu1 %v5725_v4  ;;  %v5615_v58 = vpop.permute.xlu0 %5614 }
 0xa3e   :  { %14914 = vmatprep.subr.mxu1 %v5724_v61  ;;  %v5621_v0 = vpop.permute.xlu1 %5620  ;;  %v5700_v37 = vsel %vm300_vm4, %v16327_v26, %v5615_v58 }
 0xa3f   :  { %14915 = vmatpush3.msra.mxu1 %v5724_v61 }
 0xa41   :  { %v5647_v2 = vpop.permute.xlu0 %5646 }
 0xa42   :  { %v5653_v13 = vpop.permute.xlu1 %5652  ;;  %v5709_v49 = vsel %vm5706_vm6, %v5700_v37, %v5647_v2 }
 0xa45   :  { %v5619_v63 = vpop.permute.xlu0 %5618 }
 0xa46   :  { %v5625_v59 = vpop.permute.xlu1 %5624  ;;  %v5702_v6 = vsel %vm300_vm4, %v16329_v30, %v5619_v63  ;;  %v5703_v30 = vsel %vm300_vm4, %v16335_v39, %v5621_v0 }
 0xa49   :  { %v5651_v15 = vpop.permute.xlu0 %5650 }
 0xa4a   :  { %v5657_v25 = vpop.permute.xlu1 %5656  ;;  %v5711_v26 = vsel %vm5706_vm6, %v5702_v6, %v5651_v15 }
 0xa4d   :  { %v5623_v53 = vpop.permute.xlu0 %5622 }
 0xa51   :  { %v5655_v62 = vpop.permute.xlu0 %5654 }
 0xaea   :  { %v5066_v3 = vpop.f32.mrf.mxu1 }
 0xaeb   :  { %5674 = vrot.lane.b32.xlu0 %v5066_v3, %s15927_s9 }
 0xaec   :  { %v14872_v44 = vpop.f32.mrf.mxu1 }
 0xaed   :  { %v5704_v44 = vsel %vm300_vm4, %v16333_v38, %v5623_v53  ;;  %v5705_v38 = vsel %vm300_vm4, %v16337_v46, %v5625_v59 }
 0xaee   :  { %v5218_v45 = vpop.f32.mrf.mxu1  ;;  %v5713_v31 = vsel %vm5706_vm6, %v5704_v44, %v5655_v62  ;;  %v5714_v39 = vsel %vm5706_vm6, %v5705_v38, %v5657_v25 }
 0xaef   :  { %v5142_v43 = vpop.f32.mrf.mxu0  ;;  %5678 = vrot.lane.b32.xlu0 %v5218_v45, %s15927_s9 }
 0xaf0   :  { %5676 = vrot.lane.b32.xlu1 %v5142_v43, %s15927_s9  ;;  %v14882_v48 = vpop.f32.mrf.mxu1  ;;  %v5712_v43 = vsel %vm5706_vm6, %v5703_v30, %v5653_v13 }
 0xaf1   :  { %v14877_v60 = vpop.f32.mrf.mxu0 }
 0xaf3   :  { %v5370_v29 = vpop.f32.mrf.mxu1 }
 0xaf4   :  { %v5294_v1 = vpop.f32.mrf.mxu0  ;;  %5682 = vrot.lane.b32.xlu0 %v5370_v29, %s15927_s9 }
 0xaf5   :  { %5680 = vrot.lane.b32.xlu1 %v5294_v1, %s15927_s9  ;;  %v14892_v33 = vpop.f32.mrf.mxu1 }
 0xaf6   :  { %v14887_v8 = vpop.f32.mrf.mxu0 }
 0xaf7   :  { %v5522_v34 = vpop.f32.mrf.mxu1  ;;  %v13923_v8 = vld [vmem:[%s18736_s1 + $0x70] ss:$0 sm:$0xff] }
 0xaf8   :  { %v5446_v36 = vpop.f32.mrf.mxu0  ;;  %5686 = vrot.lane.b32.xlu0 %v5522_v34, %s15927_s9 }
 0xaf9   :  { %5684 = vrot.lane.b32.xlu1 %v5446_v36, %s15927_s9  ;;  %v14902_v35 = vpop.f32.mrf.mxu1 }
 0xafa   :  { %v14897_v32 = vpop.f32.mrf.mxu0 }
 0xafc   :  { %v5598_v41 = vpop.f32.mrf.mxu0 }
 0xafd   :  { %5688 = vrot.lane.b32.xlu1 %v5598_v41, %s15927_s9 }
 0xafe   :  { %v14907_v42 = vpop.f32.mrf.mxu0 }
 0xb5d   :  { %v5675_v40 = vpop.permute.xlu0 %5674 }
 0xb5e   :  { %v5716_v5 = vsel %vm5715_vm5, %v5707_v51, %v5675_v40  ;;  %v18744_v40 = vld [vmem:[#allocation2_spill] sm:$0xff] }
 0xb5f   :  { %14916 = vmatprep.mubr.msk.f32.mxu1 %vm167_vm2, %v5716_v5 }
 0xb61   :  { %v5679_v12 = vpop.permute.xlu0 %5678 }
 0xb62   :  { %v5677_v14 = vpop.permute.xlu1 %5676  ;;  %v5718_v9 = vsel %vm5715_vm5, %v5709_v49, %v5679_v12 }
 0xb63   :  { %v5717_v10 = vsel %vm5715_vm5, %v5708_v27, %v5677_v14 }
 0xb64   :  { %14917 = vmatmul.mubr.msk.f32.vlgmr.msra.gmra.mxu1 %vm167_vm2, %v5717_v10 }
 0xb65   :  { %14919 = vmatprep.mubr.msk.f32.mxu1 %vm167_vm2, %v5718_v9 }
 0xb66   :  { %v5683_v28 = vpop.permute.xlu0 %5682 }
 0xb67   :  { %v5681_v4 = vpop.permute.xlu1 %5680  ;;  %v5720_v61 = vsel %vm5715_vm5, %v5711_v26, %v5683_v28 }
 0xb68   :  { %v5719_v3 = vsel %vm5715_vm5, %v5710_v56, %v5681_v4 }
 0xb69   :  { %14920 = vmatmul.mubr.msk.f32.gmra.mxu1 %vm167_vm2, %v5719_v3 }
 0xb6a   :  { %14922 = vmatprep.mubr.msk.f32.mxu1 %vm167_vm2, %v5720_v61  ;;  %v5687_v45 = vpop.permute.xlu0 %5686 }
 0xb6b   :  { %v5685_v48 = vpop.permute.xlu1 %5684  ;;  %v5722_v60 = vsel %vm5715_vm5, %v5713_v31, %v5687_v45 }
 0xb6c   :  { %v5721_v29 = vsel %vm5715_vm5, %v5712_v43, %v5685_v48 }
 0xb6d   :  { %14923 = vmatmul.mubr.msk.f32.gmra.mxu1 %vm167_vm2, %v5721_v29 }
 0xb6e   :  { %14925 = vmatprep.mubr.msk.f32.mxu1 %vm167_vm2, %v5722_v60 }
 0xb6f   :  { %v5689_v1 = vpop.permute.xlu1 %5688 }
 0xb70   :  { %v5723_v33 = vsel %vm5715_vm5, %v5714_v39, %v5689_v1 }
 0xb71   :  { %14926 = vmatmul.mubr.msk.f32.gmra.mxu1 %vm167_vm2, %v5723_v33 }
 0xc24   :  { %v14918_v34 = vpop.f32.mrf.mxu1 }
 0xc25   :  { %v5829_v36 = vadd.f32 %v14918_v34, %v13923_v8 }
 0xc26   :  { %v5823_v35 = vpop.f32.mrf.mxu1 }
 0xc27   :  { %v5863_v32 = vadd.f32 %v16004_v17, %v5829_v36  ;;  %v5824_v41 = vadd.f32 %v13923_v8, %v5823_v35 }
 0xc29   :  { %v5862_v46 = vadd.f32 %v5824_v41, %v16006_v18  ;;  %v14921_v42 = vpop.f32.mrf.mxu1  ;;  %v5875_v50 = vsel %vm167_vm2, %v5863_v32, 0.0 }
 0xc2a   :  { %5876 = vadd.xlane.f32.xlu1 %v5875_v50  ;;  %v5839_v52 = vadd.f32 %v14921_v42, %v13923_v8 }
 0xc2b   :  { %v5833_v55 = vpop.f32.mrf.mxu1  ;;  %v5872_v47 = vsel %vm167_vm2, %v5862_v46, 0.0 }
 0xc2c   :  { %v5834_v58 = vadd.f32 %v13923_v8, %v5833_v55  ;;  %5873 = vadd.xlane.f32.xlu0 %v5872_v47  ;;  %v5865_v57 = vadd.f32 %v16010_v19, %v5839_v52  ;;  %v6004_v47 = vld [vmem:[%s18736_s1 + $0xb0] sm:$0xff] }
 0xc2d   :  { %v14924_v54 = vpop.f32.mrf.mxu1  ;;  %14928 = vmatprep.subr.mxu0 %v6004_v47 }
 0xc2e   :  { %v5864_v2 = vadd.f32 %v5834_v58, %v16014_v20  ;;  %v5849_v17 = vadd.f32 %v14924_v54, %v13923_v8  ;;  %v5881_v59 = vsel %vm167_vm2, %v5865_v57, 0.0  ;;  %14929 = vmatpush3.msra.mxu0 %v6004_v47  ;;  %v6003_v58 = vld [vmem:[%s18736_s1 + $0xa8] sm:$0xff]  ;;  %v6002_v54 = vld [vmem:[%s18736_s1 + $0xa0] sm:$0xff]  ;;  %v6218_v47 = vld [vmem:[%s18736_s1 + $0xf8] sm:$0xff] }
 0xc2f   :  { %v5843_v63 = vpop.f32.mrf.mxu1  ;;  %14930 = vmatprep.subr.mxu0 %v6003_v58  ;;  %14948 = vmatprep.subr.mxu1 %v6218_v47 }
 0xc30   :  { %v5844_v0 = vadd.f32 %v13923_v8, %v5843_v63  ;;  %v5878_v18 = vsel %vm167_vm2, %v5864_v2, 0.0  ;;  %v5867_v62 = vadd.f32 %v16018_v21, %v5849_v17  ;;  %14931 = vmatpush3.msra.mxu0 %v6003_v58  ;;  %14949 = vmatpush3.msra.mxu1 %v6218_v47  ;;  %v6216_v58 = vld [vmem:[%s18736_s1 + $0xe8] sm:$0xff] }
 0xc31   :  { %5879 = vadd.xlane.f32.xlu0 %v5878_v18  ;;  %v14927_v15 = vpop.f32.mrf.mxu1  ;;  %14932 = vmatprep.subr.mxu0 %v6002_v54 }
 0xc32   :  { %v5866_v13 = vadd.f32 %v5844_v0, %v16022_v22  ;;  %v5859_v11 = vadd.f32 %v14927_v15, %v13923_v8  ;;  %v5887_v5 = vsel %vm167_vm2, %v5867_v62, 0.0  ;;  %14933 = vmatpush3.msra.mxu0 %v6002_v54  ;;  %v6215_v54 = vld [vmem:[%s18736_s1 + $0xe0] sm:$0xff] }
 0xc33   :  { %v5853_v53 = vpop.f32.mrf.mxu1 }
 0xc34   :  { %v5854_v51 = vadd.f32 %v13923_v8, %v5853_v53  ;;  %v5884_v20 = vsel %vm167_vm2, %v5866_v13, 0.0  ;;  %v5869_v25 = vadd.f32 %v18744_v40, %v5859_v11 }
 0xc35   :  { %5882 = vadd.xlane.f32.xlu0 %v5881_v59  ;;  %5885 = vadd.xlane.f32.xlu1 %v5884_v20 }
 0xc36   :  { %v5868_v19 = vadd.f32 %v5854_v51, %v16030_v24  ;;  %v5893_v22 = vsel %vm167_vm2, %v5869_v25, 0.0 }
 0xc38   :  { %v5890_v37 = vsel %vm167_vm2, %v5868_v19, 0.0 }
 0xc39   :  { %5888 = vadd.xlane.f32.xlu0 %v5887_v5  ;;  %5891 = vadd.xlane.f32.xlu1 %v5890_v37 }
 0xc3d   :  { %5894 = vadd.xlane.f32.xlu0 %v5893_v22 }
 0xcb3   :  { %v5877_v21 = vpop.xlane.xlu1 %5876 }
 0xcb4   :  { %v5898_v23 = vmul.f32 0.03125, %v5877_v21 }
 0xcb5   :  { %v5874_v49 = vpop.xlane.xlu0 %5873 }
 0xcb6   :  { %v16953_v12 = vsub.f32 %v5863_v32, %v5898_v23  ;;  %v5897_v27 = vmul.f32 0.03125, %v5874_v49 }
 0xcb8   :  { %v16955_v14 = vsub.f32 %v5862_v46, %v5897_v27  ;;  %v5914_v24 = vmul.f32 %v16953_v12, %v16953_v12 }
 0xcba   :  { %v5880_v9 = vpop.xlane.xlu0 %5879  ;;  %v5924_v10 = vsel %vm167_vm2, %v5914_v24, 0.0  ;;  %v5913_v6 = vmul.f32 %v16955_v14, %v16955_v14  ;;  %v13932_v24 = vld [vmem:[%s18736_s1 + $0x78] ss:$0 sm:$0xff] }
 0xcbb   :  { %v5899_v16 = vmul.f32 0.03125, %v5880_v9  ;;  %5925 = vadd.xlane.f32.xlu0 %v5924_v10 }
 0xcbc   :  { %v5921_v26 = vsel %vm167_vm2, %v5913_v6, 0.0 }
 0xcbd   :  { %v16963_v28 = vsub.f32 %v5864_v2, %v5899_v16  ;;  %5922 = vadd.xlane.f32.xlu1 %v5921_v26  ;;  %v6001_v2 = vld [vmem:[%s18736_s1 + $0x98] sm:$0xff] }
 0xcbe   :  { %v5886_v56 = vpop.xlane.xlu1 %5885  ;;  %v5883_v4 = vpop.xlane.xlu0 %5882  ;;  %14934 = vmatprep.subr.mxu0 %v6001_v2 }
 0xcbf   :  { %v5901_v61 = vmul.f32 0.03125, %v5886_v56  ;;  %v5900_v3 = vmul.f32 0.03125, %v5883_v4  ;;  %v5915_v44 = vmul.f32 %v16963_v28, %v16963_v28  ;;  %14935 = vmatpush3.msra.mxu0 %v6001_v2  ;;  %v13933_v4 = vld [vmem:[%s18736_s1 + $0x80] ss:$0 sm:$0xff]  ;;  %v6214_v2 = vld [vmem:[%s18736_s1 + $0xd8] sm:$0xff] }
 0xcc1   :  { %v16967_v30 = vsub.f32 %v5866_v13, %v5901_v61  ;;  %v16969_v31 = vsub.f32 %v5865_v57, %v5900_v3  ;;  %v5927_v45 = vsel %vm167_vm2, %v5915_v44, 0.0 }
 0xcc2   :  { %v5892_v43 = vpop.xlane.xlu1 %5891  ;;  %5928 = vadd.xlane.f32.xlu1 %v5927_v45  ;;  %v5889_v48 = vpop.xlane.xlu0 %5888 }
 0xcc3   :  { %v5903_v60 = vmul.f32 0.03125, %v5892_v43  ;;  %v5902_v29 = vmul.f32 0.03125, %v5889_v48  ;;  %v5917_v38 = vmul.f32 %v16967_v30, %v16967_v30  ;;  %v5916_v39 = vmul.f32 %v16969_v31, %v16969_v31 }
 0xcc5   :  { %v16976_v1 = vsub.f32 %v5868_v19, %v5903_v60  ;;  %v16978_v33 = vsub.f32 %v5867_v62, %v5902_v29  ;;  %v5933_v8 = vsel %vm167_vm2, %v5917_v38, 0.0  ;;  %v5930_v34 = vsel %vm167_vm2, %v5916_v39, 0.0 }
 0xcc6   :  { %5934 = vadd.xlane.f32.xlu1 %v5933_v8  ;;  %5931 = vadd.xlane.f32.xlu0 %v5930_v34  ;;  %v5895_v36 = vpop.xlane.xlu0 %5894 }
 0xcc7   :  { %v5904_v35 = vmul.f32 0.03125, %v5895_v36  ;;  %v5919_v32 = vmul.f32 %v16976_v1, %v16976_v1  ;;  %v5918_v41 = vmul.f32 %v16978_v33, %v16978_v33 }
 0xcc9   :  { %v16986_v46 = vsub.f32 %v5869_v25, %v5904_v35  ;;  %v5939_v42 = vsel %vm167_vm2, %v5919_v32, 0.0  ;;  %v5936_v50 = vsel %vm167_vm2, %v5918_v41, 0.0 }
 0xcca   :  { %5940 = vadd.xlane.f32.xlu1 %v5939_v42  ;;  %5937 = vadd.xlane.f32.xlu0 %v5936_v50 }
 0xccb   :  { %v5920_v52 = vmul.f32 %v16986_v46, %v16986_v46 }
 0xccd   :  { %v5942_v55 = vsel %vm167_vm2, %v5920_v52, 0.0 }
 0xcce   :  { %5943 = vadd.xlane.f32.xlu0 %v5942_v55 }
 0xd44   :  { %v5926_v57 = vpop.xlane.xlu0 %5925 }
 0xd45   :  { %v5946_v63 = vmul.f32 0.03125, %v5926_v57  ;;  %v6213_v57 = vld [vmem:[%s18736_s1 + $0xd0] sm:$0xff] }
 0xd46   :  { %v5923_v17 = vpop.xlane.xlu1 %5922 }
 0xd47   :  { %v5954_v0 = vadd.f32 1e-05, %v5946_v63  ;;  %v5945_v18 = vmul.f32 0.03125, %v5923_v17  ;;  %v6212_v63 = vld [vmem:[%s18736_s1 + $0xc8] sm:$0xff]  ;;  %v6211_v17 = vld [vmem:[%s18736_s1 + $0xc0] sm:$0xff] }
 0xd49   :  { %15608 = vrsqrt.f32 %v5954_v0  ;;  %v5953_v15 = vadd.f32 1e-05, %v5945_v18  ;;  %v13934_v0 = vld [vmem:[%s18736_s1 + $0xb8] ss:$0 sm:$0xff] }
 0xd4b   :  { %15610 = vrsqrt.f32 %v5953_v15  ;;  %v5929_v13 = vpop.xlane.xlu1 %5928 }
 0xd4c   :  { %v5947_v53 = vmul.f32 0.03125, %v5929_v13 }
 0xd4e   :  { %v5955_v59 = vadd.f32 1e-05, %v5947_v53 }
 0xd4f   :  { %v5935_v62 = vpop.xlane.xlu1 %5934  ;;  %v5932_v11 = vpop.xlane.xlu0 %5931 }
 0xd50   :  { %15612 = vrsqrt.f32 %v5955_v59  ;;  %v5949_v51 = vmul.f32 0.03125, %v5935_v62  ;;  %v5948_v20 = vmul.f32 0.03125, %v5932_v11 }
 0xd52   :  { %v5957_v19 = vadd.f32 1e-05, %v5949_v51  ;;  %v5956_v40 = vadd.f32 1e-05, %v5948_v20 }
 0xd53   :  { %v5941_v25 = vpop.xlane.xlu1 %5940  ;;  %v5938_v5 = vpop.xlane.xlu0 %5937 }
 0xd54   :  { %15614 = vrsqrt.f32 %v5957_v19  ;;  %v5951_v37 = vmul.f32 0.03125, %v5941_v25  ;;  %v5950_v22 = vmul.f32 0.03125, %v5938_v5 }
 0xd55   :  { %15616 = vrsqrt.f32 %v5956_v40 }
 0xd56   :  { %v15609_v21 = vpop.eup %15608  ;;  %v5959_v23 = vadd.f32 1e-05, %v5951_v37  ;;  %v5958_v49 = vadd.f32 1e-05, %v5950_v22 }
 0xd57   :  { %v5944_v27 = vpop.xlane.xlu0 %5943  ;;  %v5970_v9 = vmul.f32 %v15609_v21, %v16953_v12 }
 0xd58   :  { %v15611_v10 = vpop.eup %15610  ;;  %15618 = vrsqrt.f32 %v5959_v23  ;;  %v5952_v6 = vmul.f32 0.03125, %v5944_v27 }
 0xd59   :  { %15620 = vrsqrt.f32 %v5958_v49  ;;  %v5969_v16 = vmul.f32 %v15611_v10, %v16955_v14  ;;  %v5982_v56 = vmul.f32 %v13932_v24, %v5970_v9 }
 0xd5a   :  { %v5960_v26 = vadd.f32 1e-05, %v5952_v6 }
 0xd5b   :  { %v5981_v61 = vmul.f32 %v13932_v24, %v5969_v16  ;;  %v17015_v45 = vadd.f32 %v13933_v4, %v5982_v56 }
 0xd5c   :  { %15622 = vrsqrt.f32 %v5960_v26 }
 0xd5d   :  { %v15613_v3 = vpop.eup %15612  ;;  %v17013_v44 = vadd.f32 %v13933_v4, %v5981_v61 }
 0xd5e   :  { %v5971_v12 = vmul.f32 %v15613_v3, %v16963_v28 }
 0xd5f   :  { %14936 = vmatprep.mubr.msk.f32.mxu0 %vm167_vm2, %v17013_v44 }
 0xd60   :  { %14937 = vmatmul.mubr.msk.f32.vlgmr.msra.gmra.mxu0 %vm167_vm2, %v17015_v45  ;;  %v5983_v14 = vmul.f32 %v13932_v24, %v5971_v12 }
 0xd61   :  { %v15615_v43 = vpop.eup %15614 }
 0xd62   :  { %v15617_v48 = vpop.eup %15616  ;;  %v17022_v60 = vadd.f32 %v13933_v4, %v5983_v14  ;;  %v5973_v29 = vmul.f32 %v15615_v43, %v16967_v30 }
 0xd63   :  { %v5972_v38 = vmul.f32 %v15617_v48, %v16969_v31 }
 0xd64   :  { %14939 = vmatprep.mubr.msk.f32.mxu0 %vm167_vm2, %v17022_v60  ;;  %v5985_v39 = vmul.f32 %v13932_v24, %v5973_v29 }
 0xd65   :  { %v15619_v28 = vpop.eup %15618  ;;  %v5984_v8 = vmul.f32 %v13932_v24, %v5972_v38 }
 0xd66   :  { %v15621_v34 = vpop.eup %15620  ;;  %v17028_v36 = vadd.f32 %v13933_v4, %v5985_v39  ;;  %v5975_v35 = vmul.f32 %v15619_v28, %v16976_v1 }
 0xd67   :  { %v17031_v32 = vadd.f32 %v13933_v4, %v5984_v8  ;;  %v5974_v41 = vmul.f32 %v15621_v34, %v16978_v33 }
 0xd68   :  { %v5987_v42 = vmul.f32 %v13932_v24, %v5975_v35 }
 0xd69   :  { %v15623_v50 = vpop.eup %15622  ;;  %14940 = vmatmul.mubr.msk.f32.gmra.mxu0 %vm167_vm2, %v17031_v32  ;;  %v5986_v30 = vmul.f32 %v13932_v24, %v5974_v41 }
 0xd6a   :  { %14942 = vmatprep.mubr.msk.f32.mxu0 %vm167_vm2, %v17028_v36  ;;  %v17038_v31 = vadd.f32 %v13933_v4, %v5987_v42  ;;  %v5976_v52 = vmul.f32 %v15623_v50, %v16986_v46  ;;  %v6217_v46 = vld [vmem:[%s18736_s1 + $0xf0] sm:$0xff] }
 0xd6b   :  { %v17041_v55 = vadd.f32 %v13933_v4, %v5986_v30  ;;  %14950 = vmatprep.subr.mxu1 %v6217_v46 }
 0xd6c   :  { %v5988_v1 = vmul.f32 %v13932_v24, %v5976_v52  ;;  %14951 = vmatpush3.msra.mxu1 %v6217_v46 }
 0xd6d   :  { %14943 = vmatmul.mubr.msk.f32.gmra.mxu0 %vm167_vm2, %v17041_v55  ;;  %14952 = vmatprep.subr.mxu1 %v6216_v58 }
 0xd6e   :  { %14945 = vmatprep.mubr.msk.f32.mxu0 %vm167_vm2, %v17038_v31  ;;  %v17047_v33 = vadd.f32 %v13933_v4, %v5988_v1  ;;  %14953 = vmatpush3.msra.mxu1 %v6216_v58 }
 0xd6f   :  { %14954 = vmatprep.subr.mxu1 %v6215_v54 }
 0xd70   :  { %14955 = vmatpush3.msra.mxu1 %v6215_v54 }
 0xd71   :  { %14946 = vmatmul.mubr.msk.f32.gmra.mxu0 %vm167_vm2, %v17047_v33  ;;  %14956 = vmatprep.subr.mxu1 %v6214_v2 }
 0xd72   :  { %14957 = vmatpush3.msra.mxu1 %v6214_v2 }
 0xd73   :  { %14958 = vmatprep.subr.mxu1 %v6213_v57 }
 0xd74   :  { %14959 = vmatpush3.msra.mxu1 %v6213_v57 }
 0xd75   :  { %14960 = vmatprep.subr.mxu1 %v6212_v63 }
 0xd76   :  { %14961 = vmatpush3.msra.mxu1 %v6212_v63 }
 0xd77   :  { %14962 = vmatprep.subr.mxu1 %v6211_v17 }
 0xd78   :  { %14963 = vmatpush3.msra.mxu1 %v6211_v17 }
 0xd79   :  { %14996 = vmatprep.subr.mxu1 %v18743_v7 }
 0xe20   :  { %v14938_v18 = vpop.f32.mrf.mxu0 }
 0xe21   :  { %v17079_v15 = vadd.f32 %v14938_v18, %v13934_v0 }
 0xe22   :  { %v6100_v13 = vpop.f32.mrf.mxu0 }
 0xe23   :  { %v6148_v53 = vmul.f32 0.044715, %v17079_v15  ;;  %v6101_v59 = vadd.f32 %v13934_v0, %v6100_v13 }
 0xe25   :  { %v6156_v62 = vmul.f32 %v6148_v53, %v17079_v15  ;;  %v6147_v11 = vmul.f32 0.044715, %v6101_v59  ;;  %v6139_v53 = vmul.f32 0.5, %v6101_v59 }
 0xe27   :  { %v6164_v51 = vmul.f32 %v6156_v62, %v17079_v15  ;;  %v6155_v20 = vmul.f32 %v6147_v11, %v6101_v59 }
 0xe29   :  { %v6172_v19 = vadd.f32 %v6164_v51, %v17079_v15  ;;  %v6163_v40 = vmul.f32 %v6155_v20, %v6101_v59  ;;  %v14941_v25 = vpop.f32.mrf.mxu0  ;;  %v6140_v51 = vmul.f32 0.5, %v17079_v15 }
 0xe2a   :  { %v17085_v5 = vadd.f32 %v14941_v25, %v13934_v0 }
 0xe2b   :  { %v6180_v37 = vmul.f32 0.7978846, %v6172_v19  ;;  %v6171_v22 = vadd.f32 %v6163_v40, %v6101_v59  ;;  %v6110_v21 = vpop.f32.mrf.mxu0 }
 0xe2c   :  { %v6150_v23 = vmul.f32 0.044715, %v17085_v5  ;;  %v6111_v49 = vadd.f32 %v13934_v0, %v6110_v21 }
 0xe2d   :  { %15624 = vtanh.f32 %v6180_v37  ;;  %v14944_v27 = vpop.f32.mrf.mxu0  ;;  %v6179_v24 = vmul.f32 0.7978846, %v6171_v22 }
 0xe2e   :  { %v6158_v9 = vmul.f32 %v6150_v23, %v17085_v5  ;;  %v6149_v10 = vmul.f32 0.044715, %v6111_v49  ;;  %v17089_v6 = vadd.f32 %v14944_v27, %v13934_v0  ;;  %v6141_v21 = vmul.f32 0.5, %v6111_v49 }
 0xe2f   :  { %v6120_v16 = vpop.f32.mrf.mxu0  ;;  %15626 = vtanh.f32 %v6179_v24  ;;  %v6142_v27 = vmul.f32 0.5, %v17085_v5 }
 0xe30   :  { %v6166_v26 = vmul.f32 %v6158_v9, %v17085_v5  ;;  %v6157_v56 = vmul.f32 %v6149_v10, %v6111_v49  ;;  %v6152_v4 = vmul.f32 0.044715, %v17089_v6  ;;  %v6121_v61 = vadd.f32 %v13934_v0, %v6120_v16 }
 0xe31   :  { %v14947_v3 = vpop.f32.mrf.mxu0 }
 0xe32   :  { %v6174_v12 = vadd.f32 %v6166_v26, %v17085_v5  ;;  %v6165_v14 = vmul.f32 %v6157_v56, %v6111_v49  ;;  %v6160_v43 = vmul.f32 %v6152_v4, %v17089_v6  ;;  %v6151_v48 = vmul.f32 0.044715, %v6121_v61 }
 0xe33   :  { %v17095_v29 = vadd.f32 %v14947_v3, %v13934_v0  ;;  %v6130_v38 = vpop.f32.mrf.mxu0  ;;  %v6143_v16 = vmul.f32 0.5, %v6121_v61  ;;  %v6144_v56 = vmul.f32 0.5, %v17089_v6 }
 0xe34   :  { %v6173_v39 = vadd.f32 %v6165_v14, %v6111_v49  ;;  %v6168_v28 = vmul.f32 %v6160_v43, %v17089_v6  ;;  %v6159_v8 = vmul.f32 %v6151_v48, %v6121_v61  ;;  %v6131_v34 = vadd.f32 %v13934_v0, %v6130_v38 }
 0xe35   :  { %v6154_v35 = vmul.f32 0.044715, %v17095_v29  ;;  %v6182_v41 = vmul.f32 0.7978846, %v6174_v12  ;;  %v6146_v48 = vmul.f32 0.5, %v17095_v29 }
 0xe36   :  { %v6176_v42 = vadd.f32 %v6168_v28, %v17089_v6  ;;  %v6167_v50 = vmul.f32 %v6159_v8, %v6121_v61  ;;  %v6153_v30 = vmul.f32 0.044715, %v6131_v34  ;;  %v6181_v52 = vmul.f32 0.7978846, %v6173_v39  ;;  %v13943_v6 = vld [vmem:[%s18736_s1 + $0x100] ss:$0 sm:$0xff] }
 0xe37   :  { %v6162_v1 = vmul.f32 %v6154_v35, %v17095_v29  ;;  %15628 = vtanh.f32 %v6182_v41  ;;  %v6145_v5 = vmul.f32 0.5, %v6131_v34 }
 0xe38   :  { %v6175_v47 = vadd.f32 %v6167_v50, %v6121_v61  ;;  %v6161_v46 = vmul.f32 %v6153_v30, %v6131_v34  ;;  %15630 = vtanh.f32 %v6181_v52  ;;  %v6184_v58 = vmul.f32 0.7978846, %v6176_v42 }
 0xe39   :  { %v6170_v54 = vmul.f32 %v6162_v1, %v17095_v29 }
 0xe3a   :  { %v15625_v2 = vpop.eup %15624  ;;  %v6169_v57 = vmul.f32 %v6161_v46, %v6131_v34  ;;  %v6183_v63 = vmul.f32 0.7978846, %v6175_v47  ;;  %15632 = vtanh.f32 %v6184_v58 }
 0xe3b   :  { %v6178_v17 = vadd.f32 %v6170_v54, %v17095_v29  ;;  %v6196_v18 = vadd.f32 1.0, %v15625_v2 }
 0xe3c   :  { %v15627_v0 = vpop.eup %15626  ;;  %v6177_v13 = vadd.f32 %v6169_v57, %v6131_v34  ;;  %15634 = vtanh.f32 %v6183_v63 }
 0xe3d   :  { %v6195_v62 = vadd.f32 1.0, %v15627_v0  ;;  %v6186_v11 = vmul.f32 0.7978846, %v6178_v17  ;;  %v6204_v40 = vmul.f32 %v6196_v18, %v6140_v51 }
 0xe3e   :  { %v6185_v20 = vmul.f32 0.7978846, %v6177_v13 }
 0xe3f   :  { %v6203_v19 = vmul.f32 %v6195_v62, %v6139_v53  ;;  %15636 = vtanh.f32 %v6186_v11 }
 0xe40   :  { %15638 = vtanh.f32 %v6185_v20 }
 0xe41   :  { %14964 = vmatprep.mubr.msk.f32.mxu1 %vm6224_vm7, %v6203_v19 }
 0xe42   :  { %14965 = vmatmul.mubr.msk.f32.vlgmr.msra.gmra.mxu1 %vm6224_vm7, %v6204_v40 }
 0xe44   :  { %v15629_v25 = vpop.eup %15628 }
 0xe45   :  { %v15631_v37 = vpop.eup %15630  ;;  %v6198_v22 = vadd.f32 1.0, %v15629_v25 }
 0xe46   :  { %v6197_v23 = vadd.f32 1.0, %v15631_v37 }
 0xe47   :  { %v15633_v59 = vpop.eup %15632  ;;  %v6206_v9 = vmul.f32 %v6198_v22, %v6142_v27 }
 0xe48   :  { %v6205_v24 = vmul.f32 %v6197_v23, %v6141_v21  ;;  %v6200_v10 = vadd.f32 1.0, %v15633_v59 }
 0xe49   :  { %v15635_v15 = vpop.eup %15634 }
 0xe4a   :  { %14967 = vmatprep.mubr.msk.f32.mxu1 %vm6224_vm7, %v6205_v24  ;;  %v6199_v26 = vadd.f32 1.0, %v15635_v15  ;;  %v6208_v49 = vmul.f32 %v6200_v10, %v6144_v56 }
 0xe4b   :  { %14968 = vmatmul.mubr.msk.f32.gmra.mxu1 %vm6224_vm7, %v6206_v9 }
 0xe4c   :  { %v15637_v4 = vpop.eup %15636  ;;  %v6207_v3 = vmul.f32 %v6199_v26, %v6143_v16 }
 0xe4d   :  { %v15639_v12 = vpop.eup %15638  ;;  %v6202_v14 = vadd.f32 1.0, %v15637_v4 }
 0xe4e   :  { %14970 = vmatprep.mubr.msk.f32.mxu1 %vm6224_vm7, %v6207_v3  ;;  %v6201_v43 = vadd.f32 1.0, %v15639_v12 }
 0xe4f   :  { %14971 = vmatmul.mubr.msk.f32.gmra.mxu1 %vm6224_vm7, %v6208_v49  ;;  %v6210_v61 = vmul.f32 %v6202_v14, %v6146_v48 }
 0xe50   :  { %v6209_v38 = vmul.f32 %v6201_v43, %v6145_v5 }
 0xe52   :  { %14973 = vmatprep.mubr.msk.f32.mxu1 %vm6224_vm7, %v6209_v38 }
 0xe53   :  { %14974 = vmatmul.mubr.msk.f32.gmra.mxu1 %vm6224_vm7, %v6210_v61 }
 0xe54   :  { %14998 = vmatprep.mubr.msk.f32.mxu1 %vm15913_vm3, %v18743_v7 }
 0xf02   :  { %v14966_v39 = vpop.f32.mrf.mxu1 }
 0xf03   :  { %v6321_v28 = vadd.f32 %v14966_v39, %v13943_v6 }
 0xf04   :  { %v6315_v8 = vpop.f32.mrf.mxu1 }
 0xf05   :  { %v6355_v34 = vadd.f32 %v6321_v28, %v17015_v45  ;;  %v6316_v35 = vadd.f32 %v13943_v6, %v6315_v8 }
 0xf07   :  { %v6354_v29 = vadd.f32 %v6316_v35, %v17013_v44  ;;  %v6367_v41 = vsel %vm167_vm2, %v6355_v34, 0.0 }
 0xf08   :  { %6368 = vadd.xlane.f32.xlu0 %v6367_v41 }
 0xf09   :  { %v6364_v42 = vsel %vm167_vm2, %v6354_v29, 0.0 }
 0xf0a   :  { %6365 = vadd.xlane.f32.xlu1 %v6364_v42 }
 0xf0b   :  { %v14969_v50 = vpop.f32.mrf.mxu1 }
 0xf0c   :  { %v6331_v30 = vadd.f32 %v14969_v50, %v13943_v6 }
 0xf0d   :  { %v6325_v52 = vpop.f32.mrf.mxu1 }
 0xf0e   :  { %v6357_v1 = vadd.f32 %v6331_v30, %v17031_v32  ;;  %v6326_v47 = vadd.f32 %v13943_v6, %v6325_v52  ;;  %v6495_v30 = vld [vmem:[%s18736_s1 + $0x120] sm:$0xff]  ;;  %v6494_v52 = vld [vmem:[%s18736_s1 + $0x118] sm:$0xff] }
 0xf0f   :  { %v14972_v46 = vpop.f32.mrf.mxu1  ;;  %14976 = vmatprep.subr.mxu0 %v6495_v30 }
 0xf10   :  { %v6356_v58 = vadd.f32 %v6326_v47, %v17022_v60  ;;  %v6341_v54 = vadd.f32 %v14972_v46, %v13943_v6  ;;  %v6373_v45 = vsel %vm167_vm2, %v6357_v1, 0.0  ;;  %14977 = vmatpush3.msra.mxu0 %v6495_v30  ;;  %v6492_v47 = vld [vmem:[%s18736_s1 + $0x108] sm:$0xff] }
 0xf11   :  { %6374 = vadd.xlane.f32.xlu0 %v6373_v45  ;;  %v6335_v44 = vpop.f32.mrf.mxu1  ;;  %14978 = vmatprep.subr.mxu0 %v6494_v52 }
 0xf12   :  { %v6359_v2 = vadd.f32 %v6341_v54, %v17041_v55  ;;  %v6336_v57 = vadd.f32 %v13943_v6, %v6335_v44  ;;  %v6370_v63 = vsel %vm167_vm2, %v6356_v58, 0.0  ;;  %14979 = vmatpush3.msra.mxu0 %v6494_v52 }
 0xf13   :  { %6371 = vadd.xlane.f32.xlu1 %v6370_v63  ;;  %v14975_v17 = vpop.f32.mrf.mxu1 }
 0xf14   :  { %v6358_v0 = vadd.f32 %v6336_v57, %v17028_v36  ;;  %v6351_v18 = vadd.f32 %v14975_v17, %v13943_v6  ;;  %v6379_v32 = vsel %vm167_vm2, %v6359_v2, 0.0 }
 0xf15   :  { %6380 = vadd.xlane.f32.xlu0 %v6379_v32  ;;  %v6345_v13 = vpop.f32.mrf.mxu1 }
 0xf16   :  { %v6361_v60 = vadd.f32 %v6351_v18, %v17047_v33  ;;  %v6346_v53 = vadd.f32 %v13943_v6, %v6345_v13  ;;  %v6376_v62 = vsel %vm167_vm2, %v6358_v0, 0.0 }
 0xf17   :  { %6377 = vadd.xlane.f32.xlu1 %v6376_v62 }
 0xf18   :  { %v6360_v55 = vadd.f32 %v6346_v53, %v17038_v31  ;;  %v6385_v11 = vsel %vm167_vm2, %v6361_v60, 0.0 }
 0xf19   :  { %6386 = vadd.xlane.f32.xlu0 %v6385_v11 }
 0xf1a   :  { %v6382_v51 = vsel %vm167_vm2, %v6360_v55, 0.0 }
 0xf1b   :  { %6383 = vadd.xlane.f32.xlu1 %v6382_v51 }
 0xf91   :  { %v6369_v36 = vpop.xlane.xlu0 %6368 }
 0xf92   :  { %v6389_v20 = vmul.f32 0.03125, %v6369_v36 }
 0xf93   :  { %v6366_v19 = vpop.xlane.xlu1 %6365 }
 0xf94   :  { %v17136_v40 = vsub.f32 %v6355_v34, %v6389_v20  ;;  %v6388_v25 = vmul.f32 0.03125, %v6366_v19  ;;  %v13952_v19 = vld [vmem:[%s18736_s1 + $0x88] ss:$0 sm:$0xff] }
 0xf96   :  { %v17138_v37 = vsub.f32 %v6354_v29, %v6388_v25  ;;  %v6405_v33 = vmul.f32 %v17136_v40, %v17136_v40 }
 0xf98   :  { %v6415_v22 = vsel %vm167_vm2, %v6405_v33, 0.0  ;;  %v6404_v31 = vmul.f32 %v17138_v37, %v17138_v37 }
 0xf99   :  { %6416 = vadd.xlane.f32.xlu0 %v6415_v22 }
 0xf9a   :  { %v6375_v21 = vpop.xlane.xlu0 %6374  ;;  %v6412_v23 = vsel %vm167_vm2, %v6404_v31, 0.0 }
 0xf9b   :  { %v6391_v59 = vmul.f32 0.03125, %v6375_v21  ;;  %6413 = vadd.xlane.f32.xlu1 %v6412_v23 }
 0xf9c   :  { %v6372_v27 = vpop.xlane.xlu1 %6371 }
 0xf9d   :  { %v17146_v24 = vsub.f32 %v6357_v1, %v6391_v59  ;;  %v6390_v15 = vmul.f32 0.03125, %v6372_v27  ;;  %v6493_v1 = vld [vmem:[%s18736_s1 + $0x110] sm:$0xff] }
 0xf9e   :  { %v6381_v9 = vpop.xlane.xlu0 %6380  ;;  %14980 = vmatprep.subr.mxu0 %v6493_v1 }
 0xf9f   :  { %v17148_v10 = vsub.f32 %v6356_v58, %v6390_v15  ;;  %v6393_v16 = vmul.f32 0.03125, %v6381_v9  ;;  %v6407_v26 = vmul.f32 %v17146_v24, %v17146_v24  ;;  %14981 = vmatpush3.msra.mxu0 %v6493_v1  ;;  %v13953_v15 = vld [vmem:[%s18736_s1 + $0x90] ss:$0 sm:$0xff] }
 0xfa0   :  { %v6378_v56 = vpop.xlane.xlu1 %6377  ;;  %14982 = vmatprep.subr.mxu0 %v6492_v47 }
 0xfa1   :  { %v17152_v4 = vsub.f32 %v6359_v2, %v6393_v16  ;;  %v6392_v3 = vmul.f32 0.03125, %v6378_v56  ;;  %v6421_v12 = vsel %vm167_vm2, %v6407_v26, 0.0  ;;  %v6406_v49 = vmul.f32 %v17148_v10, %v17148_v10  ;;  %14983 = vmatpush3.msra.mxu0 %v6492_v47 }
 0xfa2   :  { %6422 = vadd.xlane.f32.xlu0 %v6421_v12  ;;  %v6387_v14 = vpop.xlane.xlu0 %6386  ;;  %15001 = vmatprep.subr.mxu0 %v18743_v7 }
 0xfa3   :  { %v17157_v5 = vsub.f32 %v6358_v0, %v6392_v3  ;;  %v6395_v43 = vmul.f32 0.03125, %v6387_v14  ;;  %v6418_v48 = vsel %vm167_vm2, %v6406_v49, 0.0  ;;  %v6409_v38 = vmul.f32 %v17152_v4, %v17152_v4 }
 0xfa4   :  { %6419 = vadd.xlane.f32.xlu1 %v6418_v48  ;;  %v6384_v61 = vpop.xlane.xlu1 %6383 }
 0xfa5   :  { %v17162_v6 = vsub.f32 %v6361_v60, %v6395_v43  ;;  %v6394_v39 = vmul.f32 0.03125, %v6384_v61  ;;  %v6427_v28 = vsel %vm167_vm2, %v6409_v38, 0.0  ;;  %v6408_v8 = vmul.f32 %v17157_v5, %v17157_v5 }
 0xfa6   :  { %6428 = vadd.xlane.f32.xlu0 %v6427_v28 }
 0xfa7   :  { %v17167_v34 = vsub.f32 %v6360_v55, %v6394_v39  ;;  %v6424_v35 = vsel %vm167_vm2, %v6408_v8, 0.0  ;;  %v6411_v29 = vmul.f32 %v17162_v6, %v17162_v6 }
 0xfa8   :  { %6425 = vadd.xlane.f32.xlu1 %v6424_v35 }
 0xfa9   :  { %v6433_v41 = vsel %vm167_vm2, %v6411_v29, 0.0  ;;  %v6410_v42 = vmul.f32 %v17167_v34, %v17167_v34 }
 0xfaa   :  { %6434 = vadd.xlane.f32.xlu0 %v6433_v41 }
 0xfab   :  { %v6430_v50 = vsel %vm167_vm2, %v6410_v42, 0.0 }
 0xfac   :  { %6431 = vadd.xlane.f32.xlu1 %v6430_v50 }
0x1022   :  { %v6417_v46 = vpop.xlane.xlu0 %6416 }
0x1023   :  { %v6437_v58 = vmul.f32 0.03125, %v6417_v46 }
0x1024   :  { %v6414_v54 = vpop.xlane.xlu1 %6413 }
0x1025   :  { %v6445_v45 = vadd.f32 1e-05, %v6437_v58  ;;  %v6436_v44 = vmul.f32 0.03125, %v6414_v54 }
0x1027   :  { %15640 = vrsqrt.f32 %v6445_v45  ;;  %v6444_v2 = vadd.f32 1e-05, %v6436_v44 }
0x1029   :  { %15642 = vrsqrt.f32 %v6444_v2 }
0x102b   :  { %v6423_v57 = vpop.xlane.xlu0 %6422 }
0x102c   :  { %v6439_v63 = vmul.f32 0.03125, %v6423_v57 }
0x102d   :  { %v6420_v17 = vpop.xlane.xlu1 %6419 }
0x102e   :  { %v6447_v0 = vadd.f32 1e-05, %v6439_v63  ;;  %v6438_v18 = vmul.f32 0.03125, %v6420_v17 }
0x102f   :  { %v6429_v32 = vpop.xlane.xlu0 %6428 }
0x1030   :  { %15644 = vrsqrt.f32 %v6447_v0  ;;  %v6446_v13 = vadd.f32 1e-05, %v6438_v18  ;;  %v6441_v60 = vmul.f32 0.03125, %v6429_v32 }
0x1031   :  { %v6426_v53 = vpop.xlane.xlu1 %6425 }
0x1032   :  { %15646 = vrsqrt.f32 %v6446_v13  ;;  %v6449_v62 = vadd.f32 1e-05, %v6441_v60  ;;  %v6440_v55 = vmul.f32 0.03125, %v6426_v53 }
0x1033   :  { %v6435_v11 = vpop.xlane.xlu0 %6434 }
0x1034   :  { %v15641_v51 = vpop.eup %15640  ;;  %15648 = vrsqrt.f32 %v6449_v62  ;;  %v6448_v36 = vadd.f32 1e-05, %v6440_v55  ;;  %v6443_v20 = vmul.f32 0.03125, %v6435_v11 }
0x1035   :  { %v6461_v25 = vmul.f32 %v15641_v51, %v17136_v40  ;;  %v6432_v33 = vpop.xlane.xlu1 %6431 }
0x1036   :  { %v15643_v22 = vpop.eup %15642  ;;  %15650 = vrsqrt.f32 %v6448_v36  ;;  %v6451_v31 = vadd.f32 1e-05, %v6443_v20  ;;  %v6442_v21 = vmul.f32 0.03125, %v6432_v33 }
0x1037   :  { %v6460_v23 = vmul.f32 %v15643_v22, %v17138_v37  ;;  %v6473_v59 = vmul.f32 %v13952_v19, %v6461_v25 }
0x1038   :  { %15652 = vrsqrt.f32 %v6451_v31  ;;  %v6450_v27 = vadd.f32 1e-05, %v6442_v21 }
0x1039   :  { %v6472_v9 = vmul.f32 %v13952_v19, %v6460_v23  ;;  %v17199_v26 = vadd.f32 %v13953_v15, %v6473_v59 }
0x103a   :  { %15654 = vrsqrt.f32 %v6450_v27 }
0x103b   :  { %v17197_v16 = vadd.f32 %v13953_v15, %v6472_v9 }
0x103d   :  { %v15645_v40 = vpop.eup %15644  ;;  %14984 = vmatprep.mubr.msk.f32.mxu0 %vm167_vm2, %v17197_v16 }
0x103e   :  { %14985 = vmatmul.mubr.msk.f32.vlgmr.msra.gmra.mxu0 %vm167_vm2, %v17199_v26  ;;  %v6463_v37 = vmul.f32 %v15645_v40, %v17146_v24 }
0x103f   :  { %v15647_v56 = vpop.eup %15646 }
0x1040   :  { %v6462_v3 = vmul.f32 %v15647_v56, %v17148_v10  ;;  %v6475_v49 = vmul.f32 %v13952_v19, %v6463_v37 }
0x1041   :  { %v15649_v12 = vpop.eup %15648 }
0x1042   :  { %v6474_v14 = vmul.f32 %v13952_v19, %v6462_v3  ;;  %v6465_v43 = vmul.f32 %v15649_v12, %v17152_v4  ;;  %v17211_v28 = vadd.f32 %v13953_v15, %v6475_v49 }
0x1043   :  { %v15651_v48 = vpop.eup %15650 }
0x1044   :  { %v17208_v38 = vadd.f32 %v13953_v15, %v6474_v14  ;;  %v6464_v61 = vmul.f32 %v15651_v48, %v17157_v5  ;;  %v6477_v8 = vmul.f32 %v13952_v19, %v6465_v43 }
0x1045   :  { %v15653_v39 = vpop.eup %15652 }
0x1046   :  { %14987 = vmatprep.mubr.msk.f32.mxu0 %vm167_vm2, %v17208_v38  ;;  %v6476_v24 = vmul.f32 %v13952_v19, %v6464_v61  ;;  %v6467_v10 = vmul.f32 %v15653_v39, %v17162_v6  ;;  %v17221_v41 = vadd.f32 %v13953_v15, %v6477_v8 }
0x1047   :  { %v15655_v35 = vpop.eup %15654  ;;  %14988 = vmatmul.mubr.msk.f32.gmra.mxu0 %vm167_vm2, %v17211_v28 }
0x1048   :  { %v17218_v4 = vadd.f32 %v13953_v15, %v6476_v24  ;;  %v6466_v29 = vmul.f32 %v15655_v35, %v17167_v34  ;;  %v6479_v5 = vmul.f32 %v13952_v19, %v6467_v10  ;;  %v13954_v34 = vld [vmem:[%s18736_s1 + $0x128] ss:$0 sm:$0xff] }
0x104a   :  { %14990 = vmatprep.mubr.msk.f32.mxu0 %vm167_vm2, %v17218_v4  ;;  %v6478_v42 = vmul.f32 %v13952_v19, %v6466_v29  ;;  %v17229_v6 = vadd.f32 %v13953_v15, %v6479_v5 }
0x104b   :  { %14991 = vmatmul.mubr.msk.f32.gmra.mxu0 %vm167_vm2, %v17221_v41 }
0x104c   :  { %v17227_v50 = vadd.f32 %v13953_v15, %v6478_v42 }
0x104e   :  { %14993 = vmatprep.mubr.msk.f32.mxu0 %vm167_vm2, %v17227_v50 }
0x104f   :  { %14994 = vmatmul.mubr.msk.f32.gmra.mxu0 %vm167_vm2, %v17229_v6 }
0x1050   :  { %15003 = vmatprep.mubr.msk.f32.mxu0 %vm15913_vm3, %v18743_v7 }
0x10fe   :  { %v14986_v30 = vpop.f32.mrf.mxu0 }
0x10ff   :  { %v17240_v52 = vadd.f32 %v14986_v30, %v13954_v34 }
0x1100   :  { %v6591_v1 = vpop.f32.mrf.mxu0 }
0x1101   :  { %v17242_v47 = vadd.f32 %v13954_v34, %v6591_v1  ;;  %6708 = vrot.lane.b32.xlu0 %v17240_v52, %s15914_s16 }
0x1103   :  { %6631 = vrot.lane.b32.xlu1 %v17242_v47, %s15914_s16 }
0x1107   :  { %v14989_v46 = vpop.f32.mrf.mxu0 }
0x1108   :  { %v17252_v2 = vadd.f32 %v14989_v46, %v13954_v34 }
0x1109   :  { %v6601_v58 = vpop.f32.mrf.mxu0 }
0x110a   :  { %v17248_v54 = vadd.f32 %v13954_v34, %v6601_v58 }
0x110b   :  { %v14992_v45 = vpop.f32.mrf.mxu0 }
0x110c   :  { %6785 = vrot.lane.b32.xlu1 %v17248_v54, %s15914_s16  ;;  %v17260_v0 = vadd.f32 %v14992_v45, %v13954_v34 }
0x110d   :  { %v6611_v44 = vpop.f32.mrf.mxu0 }
0x110e   :  { %v17254_v57 = vadd.f32 %v13954_v34, %v6611_v44 }
0x110f   :  { %v14995_v63 = vpop.f32.mrf.mxu0 }
0x1110   :  { %6862 = vrot.lane.b32.xlu1 %v17252_v2, %s15914_s16  ;;  %6939 = vrot.lane.b32.xlu0 %v17254_v57, %s15914_s16  ;;  %v17268_v32 = vadd.f32 %v14995_v63, %v13954_v34 }
0x1111   :  { %v6621_v17 = vpop.f32.mrf.mxu0 }
0x1112   :  { %v17262_v18 = vadd.f32 %v13954_v34, %v6621_v17 }
0x1114   :  { %7016 = vrot.lane.b32.xlu1 %v17260_v0, %s15914_s16  ;;  %7093 = vrot.lane.b32.xlu0 %v17262_v18, %s15914_s16 }
0x1118   :  { %7170 = vrot.lane.b32.xlu1 %v17268_v32, %s15914_s16 }
0x1173   :  { %v6709_v13 = vpop.permute.xlu0 %6708 }
0x1174   :  { %15002 = vmatpush3.xpose.msk.msra.mxu0 %vm300_vm4, %v6709_v13 }
0x1175   :  { %v6632_v60 = vpop.permute.xlu1 %6631  ;;  %15011 = vmatprep.subr.mxu0 %v18743_v7 }
0x1176   :  { %14997 = vmatpush3.xpose.msk.msra.mxu1 %vm300_vm4, %v6632_v60 }
0x1177   :  { %15004 = vmatmul.mubr.msk.f32.vlgmr.msra.gmra.mxu0 %vm300_vm4, %v17240_v52  ;;  %15006 = vmatprep.subr.mxu1 %v18743_v7 }
0x1178   :  { %15013 = vmatprep.mubr.msk.f32.mxu0 %vm15913_vm3, %v18743_v7 }
0x1179   :  { %14999 = vmatmul.mubr.msk.f32.vlgmr.msra.gmra.mxu1 %vm300_vm4, %v17242_v47 }
0x117a   :  { %15008 = vmatprep.mubr.msk.f32.mxu1 %vm15913_vm3, %v18743_v7 }
0x117e   :  { %v6786_v53 = vpop.permute.xlu1 %6785 }
0x117f   :  { %15007 = vmatpush3.xpose.msk.msra.mxu1 %vm300_vm4, %v6786_v53 }
0x1180   :  { %15016 = vmatprep.subr.mxu1 %v18743_v7 }
0x1182   :  { %15009 = vmatmul.mubr.msk.f32.vlgmr.msra.gmra.mxu1 %vm300_vm4, %v17248_v54  ;;  %v6863_v62 = vpop.permute.xlu1 %6862  ;;  %v6940_v55 = vpop.permute.xlu0 %6939 }
0x1183   :  { %15012 = vmatpush3.xpose.msk.msra.mxu0 %vm300_vm4, %v6863_v62  ;;  %15017 = vmatpush3.xpose.msk.msra.mxu1 %vm300_vm4, %v6940_v55 }
0x1184   :  { %15018 = vmatprep.mubr.msk.f32.mxu1 %vm15913_vm3, %v18743_v7  ;;  %15021 = vmatprep.subr.mxu0 %v18743_v7 }
0x1185   :  { %15026 = vmatprep.subr.mxu1 %v18743_v7 }
0x1186   :  { %v7017_v11 = vpop.permute.xlu1 %7016  ;;  %15014 = vmatmul.mubr.msk.f32.vlgmr.msra.gmra.mxu0 %vm300_vm4, %v17252_v2  ;;  %15019 = vmatmul.mubr.msk.f32.vlgmr.msra.gmra.mxu1 %vm300_vm4, %v17254_v57  ;;  %v7094_v51 = vpop.permute.xlu0 %7093 }
0x1187   :  { %15022 = vmatpush3.xpose.msk.msra.mxu0 %vm300_vm4, %v7017_v11  ;;  %15027 = vmatpush3.xpose.msk.msra.mxu1 %vm300_vm4, %v7094_v51 }
0x1188   :  { %15023 = vmatprep.mubr.msk.f32.mxu0 %vm15913_vm3, %v18743_v7  ;;  %15028 = vmatprep.mubr.msk.f32.mxu1 %vm15913_vm3, %v18743_v7 }
0x1189   :  { %15031 = vmatprep.subr.mxu0 %v18743_v7  ;;  %15036 = vmatprep.subr.mxu1 %v18743_v7 }
0x118a   :  { %v7171_v36 = vpop.permute.xlu1 %7170  ;;  %15024 = vmatmul.mubr.msk.f32.vlgmr.msra.gmra.mxu0 %vm300_vm4, %v17260_v0  ;;  %15029 = vmatmul.mubr.msk.f32.vlgmr.msra.gmra.mxu1 %vm300_vm4, %v17262_v18 }
0x118b   :  { %15032 = vmatpush3.xpose.msk.msra.mxu0 %vm300_vm4, %v7171_v36  ;;  %15033 = vmatprep.mubr.msk.f32.mxu0 %vm15913_vm3, %v18743_v7 }
0x118c   :  { %15041 = vmatprep.subr.mxu0 %v18743_v7  ;;  %15038 = vmatprep.mubr.msk.f32.mxu1 %vm15913_vm3, %v18743_v7 }
0x118e   :  { %15034 = vmatmul.mubr.msk.f32.vlgmr.msra.gmra.mxu0 %vm300_vm4, %v17268_v32 }
0x118f   :  { %15043 = vmatprep.mubr.msk.f32.mxu0 %vm15913_vm3, %v18743_v7 }
0x1237   :  { %v6780_v20 = vpop.f32.mrf.mxu0 }
0x1238   :  { %v7247_v19 = vmul.f32 0.35355338, %v6780_v20 }
0x1239   :  { %v6703_v25 = vpop.f32.mrf.mxu1  ;;  %v15005_v33 = vpop.f32.mrf.mxu0 }
0x123a   :  { %v17320_v22 = vmul.f32 0.35355338, %v6703_v25  ;;  %v7257_v31 = vsel %vm300_vm4, %v7247_v19, -inf }
0x123b   :  { %v15000_v21 = vpop.f32.mrf.mxu1  ;;  %7258 = vmax.xlane.f32.xlu1 %v7257_v31 }
0x123c   :  { %v7254_v23 = vsel %vm300_vm4, %v17320_v22, -inf }
0x123d   :  { %7255 = vmax.xlane.f32.xlu0 %v7254_v23 }
0x1242   :  { %v6857_v59 = vpop.f32.mrf.mxu1 }
0x1243   :  { %v17325_v27 = vmul.f32 0.35355338, %v6857_v59 }
0x1244   :  { %v15010_v15 = vpop.f32.mrf.mxu1 }
0x1245   :  { %v7260_v9 = vsel %vm300_vm4, %v17325_v27, -inf }
0x1246   :  { %7261 = vmax.xlane.f32.xlu0 %v7260_v9  ;;  %v6934_v40 = vpop.f32.mrf.mxu0  ;;  %v7011_v37 = vpop.f32.mrf.mxu1 }
0x1247   :  { %v7249_v56 = vmul.f32 0.35355338, %v6934_v40  ;;  %v17336_v5 = vmul.f32 0.35355338, %v7011_v37 }
0x1248   :  { %v15015_v3 = vpop.f32.mrf.mxu0  ;;  %v15020_v12 = vpop.f32.mrf.mxu1 }
0x1249   :  { %v7263_v49 = vsel %vm300_vm4, %v7249_v56, -inf  ;;  %v7266_v42 = vsel %vm300_vm4, %v17336_v5, -inf }
0x124a   :  { %7264 = vmax.xlane.f32.xlu0 %v7263_v49  ;;  %v7088_v14 = vpop.f32.mrf.mxu0  ;;  %v7165_v43 = vpop.f32.mrf.mxu1 }
0x124b   :  { %v7251_v48 = vmul.f32 0.35355338, %v7088_v14  ;;  %v17354_v34 = vmul.f32 0.35355338, %v7165_v43 }
0x124c   :  { %v15025_v61 = vpop.f32.mrf.mxu0  ;;  %v15030_v39 = vpop.f32.mrf.mxu1  ;;  %7342 = vrot.lane.b32.xlu1 %v17242_v47, %s15915_s17 }
0x124d   :  { %v7269_v8 = vsel %vm300_vm4, %v7251_v48, -inf  ;;  %v7272_v30 = vsel %vm300_vm4, %v17354_v34, -inf }
0x124e   :  { %7270 = vmax.xlane.f32.xlu0 %v7269_v8  ;;  %v7242_v24 = vpop.f32.mrf.mxu0 }
0x124f   :  { %v7253_v10 = vmul.f32 0.35355338, %v7242_v24 }
0x1250   :  { %v15035_v35 = vpop.f32.mrf.mxu0 }
0x1251   :  { %v7275_v29 = vsel %vm300_vm4, %v7253_v10, -inf }
0x1252   :  { %7276 = vmax.xlane.f32.xlu0 %v7275_v29 }
0x1268   :  { %7418 = vrot.lane.b32.xlu0 %v17240_v52, %s15915_s17 }
0x126c   :  { %7646 = vrot.lane.b32.xlu0 %v17254_v57, %s15915_s17 }
0x1270   :  { %7798 = vrot.lane.b32.xlu0 %v17262_v18, %s15915_s17  ;;  %7267 = vmax.xlane.f32.xlu1 %v7266_v42 }
0x1274   :  { %7952 = vrot.lane.b32.xlu0 %v17242_v47, %s15916_s18 }
0x1278   :  { %7950 = vrot.lane.b32.xlu0 %v17242_v47, %s15917_s19 }
0x127c   :  { %8108 = vrot.lane.b32.xlu0 %v17248_v54, %s15916_s18 }
0x1280   :  { %8106 = vrot.lane.b32.xlu0 %v17248_v54, %s15917_s19 }
0x1281   :  { %7494 = vrot.lane.b32.xlu1 %v17248_v54, %s15915_s17 }
0x12a5   :  { %7273 = vmax.xlane.f32.xlu1 %v7272_v30 }
0x12b6   :  { %7570 = vrot.lane.b32.xlu1 %v17252_v2, %s15915_s17 }
0x12ba   :  { %7722 = vrot.lane.b32.xlu1 %v17260_v0, %s15915_s17 }
0x12be   :  { %7874 = vrot.lane.b32.xlu1 %v17268_v32, %s15915_s17 }
0x12c2   :  { %8030 = vrot.lane.b32.xlu1 %v17240_v52, %s15916_s18 }
0x12c4   :  { %v7259_v1 = vpop.xlane.xlu1 %7258 }
0x12c5   :  { %v7279_v46 = vsub.f32 %v7247_v19, %v7259_v1 }
0x12c6   :  { %8028 = vrot.lane.b32.xlu1 %v17240_v52, %s15917_s19  ;;  %v7256_v44 = vpop.xlane.xlu0 %7255 }
0x12c7   :  { %v7288_v58 = vmul.f32 1.442695, %v7279_v46  ;;  %v7278_v51 = vsub.f32 %v17320_v22, %v7256_v44 }
0x12c8   :  { %v7343_v45 = vpop.permute.xlu1 %7342 }
0x12c9   :  { %15656 = vpow2.f32 %v7288_v58  ;;  %15037 = vmatpush3.msra.mxu1 %v7343_v45  ;;  %v7286_v25 = vmul.f32 1.442695, %v7278_v51 }
0x12ca   :  { %8186 = vrot.lane.b32.xlu1 %v17252_v2, %s15916_s18  ;;  %15046 = vmatprep.subr.mxu1 %v18743_v7 }
0x12ce   :  { %8184 = vrot.lane.b32.xlu1 %v17252_v2, %s15917_s19 }
0x12cf   :  { %v7262_v63 = vpop.xlane.xlu0 %7261 }
0x12d0   :  { %v7280_v33 = vsub.f32 %v17325_v27, %v7262_v63 }
0x12d2   :  { %v7290_v23 = vmul.f32 1.442695, %v7280_v33 }
0x12d3   :  { %v7265_v17 = vpop.xlane.xlu0 %7264 }
0x12d4   :  { %v7281_v13 = vsub.f32 %v7249_v56, %v7265_v17 }
0x12d6   :  { %v17373_v60 = vpop.eup %15656  ;;  %v7292_v53 = vmul.f32 1.442695, %v7281_v13 }
0x12d7   :  { %v7271_v62 = vpop.xlane.xlu0 %7270  ;;  %v7305_v55 = vsel %vm300_vm4, %v17373_v60, 0.0 }
0x12d8   :  { %15658 = vpow2.f32 %v7292_v53  ;;  %v7283_v11 = vsub.f32 %v7251_v48, %v7271_v62  ;;  %7306 = vadd.xlane.f32.xlu0 %v7305_v55 }
0x12da   :  { %v7296_v36 = vmul.f32 1.442695, %v7283_v11 }
0x12db   :  { %v7277_v20 = vpop.xlane.xlu0 %7276 }
0x12dc   :  { %15660 = vpow2.f32 %v7296_v36  ;;  %v7285_v19 = vsub.f32 %v7253_v10, %v7277_v20 }
0x12de   :  { %v7300_v31 = vmul.f32 1.442695, %v7285_v19 }
0x12df   :  { %v7419_v21 = vpop.permute.xlu0 %7418 }
0x12e0   :  { %15662 = vpow2.f32 %v7300_v31  ;;  %15042 = vmatpush3.msra.mxu0 %v7419_v21 }
0x12e1   :  { %15664 = vpow2.f32 %v7286_v25  ;;  %15051 = vmatprep.subr.mxu0 %v18743_v7 }
0x12e2   :  { %15666 = vpow2.f32 %v7290_v23 }
0x12e3   :  { %v17416_v35 = vpop.permute.xlu0 %7646 }
0x12e5   :  { %v17380_v59 = vpop.eup %15658 }
0x12e6   :  { %v7311_v22 = vsel %vm300_vm4, %v17380_v59, 0.0 }
0x12e7   :  { %7312 = vadd.xlane.f32.xlu0 %v7311_v22  ;;  %v17422_v42 = vpop.permute.xlu0 %7798 }
0x12e9   :  { %v17384_v15 = vpop.eup %15660 }
0x12ea   :  { %v7317_v27 = vsel %vm300_vm4, %v17384_v15, 0.0 }
0x12eb   :  { %7318 = vadd.xlane.f32.xlu0 %v7317_v27  ;;  %v17424_v30 = vpop.permute.xlu0 %7952 }
0x12ed   :  { %v17388_v9 = vpop.eup %15662 }
0x12ee   :  { %v17390_v40 = vpop.eup %15664  ;;  %v7323_v37 = vsel %vm300_vm4, %v17388_v9, 0.0 }
0x12ef   :  { %7324 = vadd.xlane.f32.xlu0 %v7323_v37  ;;  %v7302_v56 = vsel %vm300_vm4, %v17390_v40, 0.0  ;;  %v17396_v3 = vpop.eup %15666  ;;  %v17426_v1 = vpop.permute.xlu0 %7950 }
0x12f0   :  { %v7308_v12 = vsel %vm300_vm4, %v17396_v3, 0.0 }
0x12f2   :  { %7303 = vadd.xlane.f32.xlu1 %v7302_v56 }
0x12f6   :  { %7309 = vadd.xlane.f32.xlu1 %v7308_v12 }
0x12f9   :  { %v7268_v49 = vpop.xlane.xlu1 %7267 }
0x12fa   :  { %v7282_v14 = vsub.f32 %v17336_v5, %v7268_v49 }
0x12fc   :  { %v7294_v43 = vmul.f32 1.442695, %v7282_v14 }
0x12fd   :  { %v17413_v39 = vpop.permute.xlu1 %7494 }
0x12fe   :  { %15668 = vpow2.f32 %v7294_v43 }
0x1305   :  { %8264 = vrot.lane.b32.xlu0 %v17254_v57, %s15916_s18 }
0x1309   :  { %8262 = vrot.lane.b32.xlu0 %v17254_v57, %s15917_s19 }
0x130b   :  { %v17405_v48 = vpop.eup %15668 }
0x130c   :  { %v7314_v61 = vsel %vm300_vm4, %v17405_v48, 0.0 }
0x130d   :  { %8420 = vrot.lane.b32.xlu0 %v17262_v18, %s15916_s18  ;;  %7315 = vadd.xlane.f32.xlu1 %v7314_v61 }
0x1311   :  { %8418 = vrot.lane.b32.xlu0 %v17262_v18, %s15917_s19 }
0x132e   :  { %v7274_v8 = vpop.xlane.xlu1 %7273 }
0x132f   :  { %v7284_v24 = vsub.f32 %v17354_v34, %v7274_v8  ;;  %v17430_v34 = vpop.permute.xlu0 %8108 }
0x1331   :  { %v7298_v10 = vmul.f32 1.442695, %v7284_v24 }
0x1332   :  { %v7571_v46 = vpop.permute.xlu1 %7570 }
0x1333   :  { %15670 = vpow2.f32 %v7298_v10  ;;  %v17436_v45 = vpop.permute.xlu0 %8106 }
0x1336   :  { %v7723_v58 = vpop.permute.xlu1 %7722 }
0x133a   :  { %v7875_v44 = vpop.permute.xlu1 %7874 }
0x133e   :  { %v8031_v17 = vpop.permute.xlu1 %8030 }
0x1340   :  { %v17418_v29 = vpop.eup %15670 }
0x1341   :  { %v7320_v5 = vsel %vm300_vm4, %v17418_v29, 0.0 }
0x1342   :  { %7321 = vadd.xlane.f32.xlu1 %v7320_v5  ;;  %v8029_v13 = vpop.permute.xlu1 %8028 }
0x1346   :  { %v8187_v11 = vpop.permute.xlu1 %8186 }
0x134a   :  { %v8185_v36 = vpop.permute.xlu1 %8184 }
0x1353   :  { %8342 = vrot.lane.b32.xlu1 %v17260_v0, %s15916_s18 }
0x1357   :  { %8340 = vrot.lane.b32.xlu1 %v17260_v0, %s15917_s19 }
0x135b   :  { %8498 = vrot.lane.b32.xlu1 %v17268_v32, %s15916_s18 }
0x135f   :  { %8496 = vrot.lane.b32.xlu1 %v17268_v32, %s15917_s19 }
0x1361   :  { %v7307_v63 = vpop.xlane.xlu0 %7306 }
0x1362   :  { %15672 = vrcp.f32 %v7307_v63 }
0x136f   :  { %v15673_v53 = vpop.eup %15672 }
0x1370   :  { %v7313_v62 = vpop.xlane.xlu0 %7312  ;;  %v7335_v55 = vmul.f32 %v15673_v53, %v17373_v60 }
0x1371   :  { %15674 = vrcp.f32 %v7313_v62 }
0x1372   :  { %15044 = vmatmul.mubr.msk.f32.vlgmr.msra.gmra.mxu0 %vm300_vm4, %v7335_v55 }
0x1373   :  { %15052 = vmatpush3.msra.mxu0 %v7571_v46  ;;  %15053 = vmatprep.mubr.msk.f32.mxu0 %vm15913_vm3, %v18743_v7 }
0x1374   :  { %v7319_v51 = vpop.xlane.xlu0 %7318  ;;  %15061 = vmatprep.subr.mxu0 %v18743_v7 }
0x1375   :  { %15676 = vrcp.f32 %v7319_v51 }
0x1378   :  { %v7325_v20 = vpop.xlane.xlu0 %7324 }
0x1379   :  { %15678 = vrcp.f32 %v7325_v20 }
0x137b   :  { %v7304_v19 = vpop.xlane.xlu1 %7303 }
0x137c   :  { %15680 = vrcp.f32 %v7304_v19 }
0x137e   :  { %v15675_v25 = vpop.eup %15674 }
0x137f   :  { %v7310_v33 = vpop.xlane.xlu1 %7309  ;;  %v7337_v60 = vmul.f32 %v15675_v25, %v17380_v59 }
0x1380   :  { %15682 = vrcp.f32 %v7310_v33 }
0x1381   :  { %15054 = vmatmul.mubr.msk.f32.vlgmr.msra.gmra.mxu0 %vm300_vm4, %v7337_v60 }
0x1382   :  { %v15677_v31 = vpop.eup %15676  ;;  %15062 = vmatpush3.msra.mxu0 %v7723_v58  ;;  %15063 = vmatprep.mubr.msk.f32.mxu0 %vm15913_vm3, %v18743_v7 }
0x1383   :  { %15071 = vmatprep.subr.mxu0 %v18743_v7  ;;  %v7339_v21 = vmul.f32 %v15677_v31, %v17384_v15 }
0x1385   :  { %15064 = vmatmul.mubr.msk.f32.vlgmr.msra.gmra.mxu0 %vm300_vm4, %v7339_v21 }
0x1386   :  { %v15679_v23 = vpop.eup %15678  ;;  %15072 = vmatpush3.msra.mxu0 %v7875_v44  ;;  %15073 = vmatprep.mubr.msk.f32.mxu0 %vm15913_vm3, %v18743_v7 }
0x1387   :  { %15081 = vmatprep.subr.mxu0 %v18743_v7  ;;  %v7341_v59 = vmul.f32 %v15679_v23, %v17388_v9 }
0x1389   :  { %v15681_v22 = vpop.eup %15680  ;;  %15074 = vmatmul.mubr.msk.f32.vlgmr.msra.gmra.mxu0 %vm300_vm4, %v7341_v59 }
0x138a   :  { %15082 = vmatpush3.xpose.msk.msra.mxu0 %vm300_vm4, %v8031_v17  ;;  %15083 = vmatprep.mubr.msk.f32.mxu0 %vm15913_vm3, %v18743_v7  ;;  %v7334_v15 = vmul.f32 %v15681_v22, %v17390_v40 }
0x138b   :  { %15091 = vmatprep.subr.mxu0 %v18743_v7 }
0x138c   :  { %15039 = vmatmul.mubr.msk.f32.vlgmr.msra.gmra.mxu1 %vm300_vm4, %v7334_v15 }
0x138d   :  { %v15683_v27 = vpop.eup %15682  ;;  %15084 = vmatmul.mubr.msk.f32.vlgmr.msra.gmra.mxu0 %vm300_vm4, %v8029_v13  ;;  %15047 = vmatpush3.msra.mxu1 %v17413_v39 }
0x138e   :  { %15092 = vmatpush3.xpose.msk.msra.mxu0 %vm300_vm4, %v8187_v11  ;;  %15093 = vmatprep.mubr.msk.f32.mxu0 %vm15913_vm3, %v18743_v7  ;;  %v7336_v9 = vmul.f32 %v15683_v27, %v17396_v3 }
0x138f   :  { %15048 = vmatprep.mubr.msk.f32.mxu1 %vm15913_vm3, %v18743_v7  ;;  %15056 = vmatprep.subr.mxu1 %v18743_v7 }
0x1390   :  { %15049 = vmatmul.mubr.msk.f32.vlgmr.msra.gmra.mxu1 %vm300_vm4, %v7336_v9  ;;  %15101 = vmatprep.subr.mxu0 %v18743_v7 }
0x1391   :  { %15094 = vmatmul.mubr.msk.f32.vlgmr.msra.gmra.mxu0 %vm300_vm4, %v8185_v36  ;;  %15057 = vmatpush3.msra.mxu1 %v17416_v35 }
0x1392   :  { %15058 = vmatprep.mubr.msk.f32.mxu1 %vm15913_vm3, %v18743_v7  ;;  %15066 = vmatprep.subr.mxu1 %v18743_v7 }
0x1393   :  { %15103 = vmatprep.mubr.msk.f32.mxu0 %vm15913_vm3, %v18743_v7 }
0x1396   :  { %v7316_v40 = vpop.xlane.xlu1 %7315 }
0x1397   :  { %15684 = vrcp.f32 %v7316_v40 }
0x13a4   :  { %v15685_v37 = vpop.eup %15684 }
0x13a5   :  { %v7338_v56 = vmul.f32 %v15685_v37, %v17405_v48  ;;  %v8265_v48 = vpop.permute.xlu0 %8264 }
0x13a7   :  { %15059 = vmatmul.mubr.msk.f32.vlgmr.msra.gmra.mxu1 %vm300_vm4, %v7338_v56 }
0x13a8   :  { %15067 = vmatpush3.msra.mxu1 %v17422_v42  ;;  %15068 = vmatprep.mubr.msk.f32.mxu1 %vm15913_vm3, %v18743_v7 }
0x13a9   :  { %15076 = vmatprep.subr.mxu1 %v18743_v7  ;;  %v8263_v8 = vpop.permute.xlu0 %8262 }
0x13ad   :  { %v8421_v24 = vpop.permute.xlu0 %8420 }
0x13b1   :  { %v8419_v10 = vpop.permute.xlu0 %8418 }
0x13cb   :  { %v7322_v3 = vpop.xlane.xlu1 %7321 }
0x13cc   :  { %15686 = vrcp.f32 %v7322_v3 }
0x13cf   :  { %v8343_v12 = vpop.permute.xlu1 %8342 }
0x13d0   :  { %15102 = vmatpush3.xpose.msk.msra.mxu0 %vm300_vm4, %v8343_v12 }
0x13d1   :  { %15111 = vmatprep.subr.mxu0 %v18743_v7 }
0x13d3   :  { %v8341_v49 = vpop.permute.xlu1 %8340 }
0x13d4   :  { %15104 = vmatmul.mubr.msk.f32.vlgmr.msra.gmra.mxu0 %vm300_vm4, %v8341_v49 }
0x13d5   :  { %15113 = vmatprep.mubr.msk.f32.mxu0 %vm15913_vm3, %v18743_v7 }
0x13d7   :  { %v8499_v14 = vpop.permute.xlu1 %8498 }
0x13d8   :  { %15112 = vmatpush3.xpose.msk.msra.mxu0 %vm300_vm4, %v8499_v14 }
0x13d9   :  { %v15687_v43 = vpop.eup %15686  ;;  %15121 = vmatprep.subr.mxu0 %v18743_v7 }
0x13da   :  { %v7340_v61 = vmul.f32 %v15687_v43, %v17418_v29 }
0x13db   :  { %v8497_v39 = vpop.permute.xlu1 %8496 }
0x13dc   :  { %15069 = vmatmul.mubr.msk.f32.vlgmr.msra.gmra.mxu1 %vm300_vm4, %v7340_v61  ;;  %15114 = vmatmul.mubr.msk.f32.vlgmr.msra.gmra.mxu0 %vm300_vm4, %v8497_v39 }
0x13dd   :  { %15077 = vmatpush3.xpose.msk.msra.mxu1 %vm300_vm4, %v17424_v30  ;;  %15078 = vmatprep.mubr.msk.f32.mxu1 %vm15913_vm3, %v18743_v7 }
0x13de   :  { %15086 = vmatprep.subr.mxu1 %v18743_v7  ;;  %15123 = vmatprep.mubr.msk.f32.mxu0 %vm15913_vm3, %v18743_v7 }
0x13e0   :  { %15079 = vmatmul.mubr.msk.f32.vlgmr.msra.gmra.mxu1 %vm300_vm4, %v17426_v1 }
0x13e1   :  { %15087 = vmatpush3.xpose.msk.msra.mxu1 %vm300_vm4, %v17430_v34  ;;  %15088 = vmatprep.mubr.msk.f32.mxu1 %vm15913_vm3, %v18743_v7 }
0x13e2   :  { %15096 = vmatprep.subr.mxu1 %v18743_v7 }
0x13e4   :  { %15089 = vmatmul.mubr.msk.f32.vlgmr.msra.gmra.mxu1 %vm300_vm4, %v17436_v45 }
0x13e5   :  { %15097 = vmatpush3.xpose.msk.msra.mxu1 %vm300_vm4, %v8265_v48  ;;  %15098 = vmatprep.mubr.msk.f32.mxu1 %vm15913_vm3, %v18743_v7 }
0x13e6   :  { %15106 = vmatprep.subr.mxu1 %v18743_v7 }
0x13e8   :  { %15099 = vmatmul.mubr.msk.f32.vlgmr.msra.gmra.mxu1 %vm300_vm4, %v8263_v8 }
0x13e9   :  { %15107 = vmatpush3.xpose.msk.msra.mxu1 %vm300_vm4, %v8421_v24  ;;  %15108 = vmatprep.mubr.msk.f32.mxu1 %vm15913_vm3, %v18743_v7 }
0x13ea   :  { %15116 = vmatprep.subr.mxu1 %v18743_v7 }
0x13ec   :  { %15109 = vmatmul.mubr.msk.f32.vlgmr.msra.gmra.mxu1 %vm300_vm4, %v8419_v10 }
0x13ed   :  { %15118 = vmatprep.mubr.msk.f32.mxu1 %vm15913_vm3, %v18743_v7 }
0x1432   :  { %v17525_v35 = vpop.f32.mrf.mxu0 }
0x1434   :  { %v15045_v29 = vpop.f32.mrf.mxu0 }
0x1441   :  { %v17527_v5 = vpop.f32.mrf.mxu0 }
0x1443   :  { %v15055_v42 = vpop.f32.mrf.mxu0 }
0x1445   :  { %v17529_v30 = vpop.f32.mrf.mxu0 }
0x1447   :  { %v15065_v1 = vpop.f32.mrf.mxu0 }
0x1449   :  { %v17531_v46 = vpop.f32.mrf.mxu0 }
0x144b   :  { %v15075_v34 = vpop.f32.mrf.mxu0 }
0x144c   :  { %v17533_v58 = vpop.f32.mrf.mxu1 }
0x144d   :  { %v8102_v45 = vpop.f32.mrf.mxu0 }
0x144e   :  { %v8575_v44 = vmul.f32 0.35355338, %v8102_v45  ;;  %v15040_v63 = vpop.f32.mrf.mxu1 }
0x144f   :  { %v15085_v17 = vpop.f32.mrf.mxu0 }
0x1450   :  { %v8585_v13 = vsel %vm300_vm4, %v8575_v44, -inf  ;;  %v17536_v53 = vpop.f32.mrf.mxu1 }
0x1451   :  { %8586 = vmax.xlane.f32.xlu1 %v8585_v13  ;;  %v8258_v62 = vpop.f32.mrf.mxu0 }
0x1452   :  { %v15050_v55 = vpop.f32.mrf.mxu1  ;;  %v8577_v40 = vmul.f32 0.35355338, %v8258_v62 }
0x1453   :  { %v15095_v11 = vpop.f32.mrf.mxu0 }
0x1454   :  { %v8591_v14 = vsel %vm300_vm4, %v8577_v40, -inf }
0x1462   :  { %8670 = vrot.lane.b32.xlu1 %v17242_v47, %s15918_s20 }
0x1467   :  { %v17540_v51 = vpop.f32.mrf.mxu1 }
0x1469   :  { %v15060_v36 = vpop.f32.mrf.mxu1 }
0x1494   :  { %v8414_v20 = vpop.f32.mrf.mxu0 }
0x1495   :  { %v8579_v49 = vmul.f32 0.35355338, %v8414_v20 }
0x1496   :  { %v15105_v19 = vpop.f32.mrf.mxu0 }
0x1497   :  { %v8597_v8 = vsel %vm300_vm4, %v8579_v49, -inf }
0x149c   :  { %v17542_v25 = vpop.f32.mrf.mxu1  ;;  %v8570_v33 = vpop.f32.mrf.mxu0 }
0x149d   :  { %v8581_v39 = vmul.f32 0.35355338, %v8570_v33 }
0x149e   :  { %v15070_v60 = vpop.f32.mrf.mxu1  ;;  %v15115_v31 = vpop.f32.mrf.mxu0 }
0x149f   :  { %v8603_v24 = vsel %vm300_vm4, %v8581_v39, -inf }
0x14a0   :  { %v8024_v21 = vpop.f32.mrf.mxu1 }
0x14a1   :  { %v8574_v23 = vmul.f32 0.35355338, %v8024_v21 }
0x14a2   :  { %v15080_v59 = vpop.f32.mrf.mxu1 }
0x14a3   :  { %v8582_v22 = vsel %vm300_vm4, %v8574_v23, -inf }
0x14a4   :  { %8583 = vmax.xlane.f32.xlu0 %v8582_v22  ;;  %v8180_v15 = vpop.f32.mrf.mxu1 }
0x14a5   :  { %v8576_v27 = vmul.f32 0.35355338, %v8180_v15 }
0x14a6   :  { %v15090_v9 = vpop.f32.mrf.mxu1 }
0x14a7   :  { %v8588_v37 = vsel %vm300_vm4, %v8576_v27, -inf }
0x14a8   :  { %8589 = vmax.xlane.f32.xlu0 %v8588_v37  ;;  %v8336_v56 = vpop.f32.mrf.mxu1 }
0x14a9   :  { %v8578_v3 = vmul.f32 0.35355338, %v8336_v56 }
0x14aa   :  { %v15100_v12 = vpop.f32.mrf.mxu1 }
0x14ab   :  { %v8594_v43 = vsel %vm300_vm4, %v8578_v3, -inf }
0x14ac   :  { %8592 = vmax.xlane.f32.xlu0 %v8591_v14  ;;  %8595 = vmax.xlane.f32.xlu1 %v8594_v43  ;;  %v8492_v48 = vpop.f32.mrf.mxu1 }
0x14ad   :  { %v17562_v29 = vmul.f32 0.35355338, %v8492_v48 }
0x14ae   :  { %v15110_v61 = vpop.f32.mrf.mxu1 }
0x14af   :  { %v8600_v1 = vsel %vm300_vm4, %v17562_v29, -inf }
0x14b0   :  { %8598 = vmax.xlane.f32.xlu0 %v8597_v8 }
0x14b4   :  { %8604 = vmax.xlane.f32.xlu0 %v8603_v24 }
0x14bd   :  { %8822 = vrot.lane.b32.xlu1 %v17248_v54, %s15918_s20 }
0x14ca   :  { %8746 = vrot.lane.b32.xlu0 %v17240_v52, %s15918_s20 }
0x14ce   :  { %8974 = vrot.lane.b32.xlu0 %v17254_v57, %s15918_s20 }
0x14d2   :  { %9126 = vrot.lane.b32.xlu0 %v17262_v18, %s15918_s20 }
0x14d6   :  { %9280 = vrot.lane.b32.xlu0 %v17242_v47, %s15919_s21 }
0x14da   :  { %v8587_v10 = vpop.xlane.xlu1 %8586  ;;  %9278 = vrot.lane.b32.xlu0 %v17242_v47, %s15920_s22 }
0x14db   :  { %v8607_v34 = vsub.f32 %v8575_v44, %v8587_v10 }
0x14dd   :  { %v8616_v45 = vmul.f32 1.442695, %v8607_v34 }
0x14de   :  { %v8671_v42 = vpop.permute.xlu1 %8670  ;;  %9436 = vrot.lane.b32.xlu0 %v17248_v54, %s15919_s21 }
0x14df   :  { %15117 = vmatpush3.msra.mxu1 %v8671_v42  ;;  %15688 = vpow2.f32 %v8616_v45 }
0x14e0   :  { %15126 = vmatprep.subr.mxu1 %v18743_v7 }
0x14e1   :  { %8601 = vmax.xlane.f32.xlu1 %v8600_v1 }
0x14e2   :  { %9434 = vrot.lane.b32.xlu0 %v17248_v54, %s15920_s22 }
0x14ec   :  { %v17577_v63 = vpop.eup %15688 }
0x14ed   :  { %v8633_v17 = vsel %vm300_vm4, %v17577_v63, 0.0 }
0x14f2   :  { %8898 = vrot.lane.b32.xlu1 %v17252_v2, %s15918_s20 }
0x14f6   :  { %9050 = vrot.lane.b32.xlu1 %v17260_v0, %s15918_s20 }
0x14fa   :  { %9202 = vrot.lane.b32.xlu1 %v17268_v32, %s15918_s20 }
0x14fe   :  { %9358 = vrot.lane.b32.xlu1 %v17240_v52, %s15919_s21 }
0x1501   :  { %8634 = vadd.xlane.f32.xlu0 %v8633_v17 }
0x1502   :  { %9356 = vrot.lane.b32.xlu1 %v17240_v52, %s15920_s22 }
0x1506   :  { %9514 = vrot.lane.b32.xlu1 %v17252_v2, %s15919_s21 }
0x150a   :  { %9512 = vrot.lane.b32.xlu1 %v17252_v2, %s15920_s22 }
0x152d   :  { %v8584_v44 = vpop.xlane.xlu0 %8583 }
0x152e   :  { %v8606_v13 = vsub.f32 %v8574_v23, %v8584_v44 }
0x1530   :  { %v8614_v62 = vmul.f32 1.442695, %v8606_v13 }
0x1531   :  { %v8590_v55 = vpop.xlane.xlu0 %8589 }
0x1532   :  { %15690 = vpow2.f32 %v8614_v62  ;;  %v8608_v11 = vsub.f32 %v8576_v27, %v8590_v55 }
0x1534   :  { %v8618_v36 = vmul.f32 1.442695, %v8608_v11 }
0x1535   :  { %v8596_v20 = vpop.xlane.xlu1 %8595  ;;  %v8593_v19 = vpop.xlane.xlu0 %8592 }
0x1536   :  { %15692 = vpow2.f32 %v8618_v36  ;;  %v8610_v33 = vsub.f32 %v8578_v3, %v8596_v20  ;;  %v8609_v60 = vsub.f32 %v8577_v40, %v8593_v19 }
0x1538   :  { %v8622_v31 = vmul.f32 1.442695, %v8610_v33  ;;  %v8620_v21 = vmul.f32 1.442695, %v8609_v60 }
0x1539   :  { %v8599_v59 = vpop.xlane.xlu0 %8598  ;;  %v8823_v10 = vpop.permute.xlu1 %8822 }
0x153a   :  { %15694 = vpow2.f32 %v8622_v31  ;;  %v8611_v22 = vsub.f32 %v8579_v49, %v8599_v59 }
0x153b   :  { %15696 = vpow2.f32 %v8620_v21 }
0x153c   :  { %v8624_v15 = vmul.f32 1.442695, %v8611_v22 }
0x153d   :  { %v8605_v9 = vpop.xlane.xlu0 %8604 }
0x153e   :  { %15698 = vpow2.f32 %v8624_v15  ;;  %v8613_v23 = vsub.f32 %v8581_v39, %v8605_v9 }
0x153f   :  { %v17589_v37 = vpop.eup %15690 }
0x1540   :  { %v8628_v56 = vmul.f32 1.442695, %v8613_v23  ;;  %v8630_v27 = vsel %vm300_vm4, %v17589_v37, 0.0 }
0x1541   :  { %8631 = vadd.xlane.f32.xlu1 %v8630_v27  ;;  %v8747_v12 = vpop.permute.xlu0 %8746 }
0x1542   :  { %15700 = vpow2.f32 %v8628_v56  ;;  %15122 = vmatpush3.msra.mxu0 %v8747_v12 }
0x1543   :  { %v17593_v40 = vpop.eup %15692  ;;  %15131 = vmatprep.subr.mxu0 %v18743_v7 }
0x1544   :  { %v8636_v3 = vsel %vm300_vm4, %v17593_v40, 0.0 }
0x1545   :  { %8637 = vadd.xlane.f32.xlu1 %v8636_v3  ;;  %v8975_v42 = vpop.permute.xlu0 %8974 }
0x1547   :  { %v17598_v49 = vpop.eup %15694 }
0x1548   :  { %v17600_v14 = vpop.eup %15696  ;;  %v8642_v43 = vsel %vm300_vm4, %v17598_v49, 0.0 }
0x1549   :  { %8643 = vadd.xlane.f32.xlu1 %v8642_v43  ;;  %v8639_v48 = vsel %vm300_vm4, %v17600_v14, 0.0  ;;  %v9127_v17 = vpop.permute.xlu0 %9126 }
0x154a   :  { %8640 = vadd.xlane.f32.xlu0 %v8639_v48 }
0x154b   :  { %v17606_v61 = vpop.eup %15698 }
0x154c   :  { %v8645_v39 = vsel %vm300_vm4, %v17606_v61, 0.0 }
0x154d   :  { %v17621_v44 = vpop.permute.xlu0 %9280 }
0x154e   :  { %8646 = vadd.xlane.f32.xlu0 %v8645_v39 }
0x154f   :  { %v17610_v8 = vpop.eup %15700 }
0x1550   :  { %v8651_v24 = vsel %vm300_vm4, %v17610_v8, 0.0 }
0x1551   :  { %v17625_v13 = vpop.permute.xlu0 %9278 }
0x1552   :  { %8652 = vadd.xlane.f32.xlu0 %v8651_v24 }
0x1555   :  { %v17631_v55 = vpop.permute.xlu0 %9436 }
0x1559   :  { %v17633_v11 = vpop.permute.xlu0 %9434 }
0x1568   :  { %9592 = vrot.lane.b32.xlu0 %v17254_v57, %s15919_s21 }
0x156a   :  { %v8602_v1 = vpop.xlane.xlu1 %8601 }
0x156b   :  { %v8612_v34 = vsub.f32 %v17562_v29, %v8602_v1 }
0x156c   :  { %9590 = vrot.lane.b32.xlu0 %v17254_v57, %s15920_s22 }
0x156d   :  { %v8626_v45 = vmul.f32 1.442695, %v8612_v34 }
0x156e   :  { %v8899_v33 = vpop.permute.xlu1 %8898 }
0x156f   :  { %15702 = vpow2.f32 %v8626_v45 }
0x1570   :  { %9748 = vrot.lane.b32.xlu0 %v17262_v18, %s15919_s21 }
0x1572   :  { %v9051_v60 = vpop.permute.xlu1 %9050 }
0x1574   :  { %9746 = vrot.lane.b32.xlu0 %v17262_v18, %s15920_s22 }
0x1576   :  { %v9203_v31 = vpop.permute.xlu1 %9202 }
0x157a   :  { %v9359_v21 = vpop.permute.xlu1 %9358 }
0x157c   :  { %v17627_v62 = vpop.eup %15702 }
0x157d   :  { %v8648_v29 = vsel %vm300_vm4, %v17627_v62, 0.0 }
0x157e   :  { %8649 = vadd.xlane.f32.xlu1 %v8648_v29  ;;  %v9357_v59 = vpop.permute.xlu1 %9356 }
0x1582   :  { %v9515_v22 = vpop.permute.xlu1 %9514 }
0x1586   :  { %v9513_v15 = vpop.permute.xlu1 %9512 }
0x158a   :  { %v8635_v36 = vpop.xlane.xlu0 %8634 }
0x158b   :  { %15704 = vrcp.f32 %v8635_v36 }
0x158f   :  { %9670 = vrot.lane.b32.xlu1 %v17260_v0, %s15919_s21 }
0x1593   :  { %9668 = vrot.lane.b32.xlu1 %v17260_v0, %s15920_s22 }
0x1597   :  { %9826 = vrot.lane.b32.xlu1 %v17268_v32, %s15919_s21 }
0x1598   :  { %v15705_v20 = vpop.eup %15704 }
0x1599   :  { %v8663_v19 = vmul.f32 %v15705_v20, %v17577_v63 }
0x159b   :  { %9824 = vrot.lane.b32.xlu1 %v17268_v32, %s15920_s22  ;;  %15124 = vmatmul.mubr.msk.f32.vlgmr.msra.gmra.mxu0 %vm300_vm4, %v8663_v19 }
0x159c   :  { %15132 = vmatpush3.msra.mxu0 %v8899_v33  ;;  %15133 = vmatprep.mubr.msk.f32.mxu0 %vm15913_vm3, %v18743_v7 }
0x159d   :  { %15141 = vmatprep.subr.mxu0 %v18743_v7 }
0x15ca   :  { %v8632_v9 = vpop.xlane.xlu1 %8631 }
0x15cb   :  { %15706 = vrcp.f32 %v8632_v9 }
0x15ce   :  { %v8638_v63 = vpop.xlane.xlu1 %8637 }
0x15cf   :  { %15708 = vrcp.f32 %v8638_v63 }
0x15d2   :  { %v8644_v23 = vpop.xlane.xlu1 %8643 }
0x15d3   :  { %15710 = vrcp.f32 %v8644_v23  ;;  %v8641_v56 = vpop.xlane.xlu0 %8640 }
0x15d4   :  { %15712 = vrcp.f32 %v8641_v56 }
0x15d7   :  { %v8647_v27 = vpop.xlane.xlu0 %8646 }
0x15d8   :  { %v15707_v12 = vpop.eup %15706  ;;  %15714 = vrcp.f32 %v8647_v27 }
0x15d9   :  { %v8662_v3 = vmul.f32 %v15707_v12, %v17589_v37 }
0x15db   :  { %v8653_v43 = vpop.xlane.xlu0 %8652  ;;  %15119 = vmatmul.mubr.msk.f32.vlgmr.msra.gmra.mxu1 %vm300_vm4, %v8662_v3 }
0x15dc   :  { %v15709_v48 = vpop.eup %15708  ;;  %15716 = vrcp.f32 %v8653_v43  ;;  %15127 = vmatpush3.msra.mxu1 %v8823_v10  ;;  %15128 = vmatprep.mubr.msk.f32.mxu1 %vm15913_vm3, %v18743_v7 }
0x15dd   :  { %15136 = vmatprep.subr.mxu1 %v18743_v7  ;;  %v8664_v39 = vmul.f32 %v15709_v48, %v17593_v40 }
0x15df   :  { %15129 = vmatmul.mubr.msk.f32.vlgmr.msra.gmra.mxu1 %vm300_vm4, %v8664_v39  ;;  %v9593_v29 = vpop.permute.xlu0 %9592 }
0x15e0   :  { %v15711_v24 = vpop.eup %15710  ;;  %15137 = vmatpush3.msra.mxu1 %v8975_v42  ;;  %15138 = vmatprep.mubr.msk.f32.mxu1 %vm15913_vm3, %v18743_v7 }
0x15e1   :  { %v15713_v37 = vpop.eup %15712  ;;  %v8666_v1 = vmul.f32 %v15711_v24, %v17598_v49  ;;  %15146 = vmatprep.subr.mxu1 %v18743_v7 }
0x15e2   :  { %v8665_v10 = vmul.f32 %v15713_v37, %v17600_v14 }
0x15e3   :  { %15139 = vmatmul.mubr.msk.f32.vlgmr.msra.gmra.mxu1 %vm300_vm4, %v8666_v1  ;;  %v9591_v19 = vpop.permute.xlu0 %9590 }
0x15e4   :  { %15134 = vmatmul.mubr.msk.f32.vlgmr.msra.gmra.mxu0 %vm300_vm4, %v8665_v10  ;;  %15147 = vmatpush3.msra.mxu1 %v9127_v17 }
0x15e5   :  { %v15715_v40 = vpop.eup %15714  ;;  %15142 = vmatpush3.msra.mxu0 %v9051_v60  ;;  %15143 = vmatprep.mubr.msk.f32.mxu0 %vm15913_vm3, %v18743_v7 }
0x15e6   :  { %v8667_v42 = vmul.f32 %v15715_v40, %v17606_v61  ;;  %15151 = vmatprep.subr.mxu0 %v18743_v7  ;;  %15148 = vmatprep.mubr.msk.f32.mxu1 %vm15913_vm3, %v18743_v7 }
0x15e7   :  { %15156 = vmatprep.subr.mxu1 %v18743_v7 }
0x15e8   :  { %15144 = vmatmul.mubr.msk.f32.vlgmr.msra.gmra.mxu0 %vm300_vm4, %v8667_v42 }
0x15e9   :  { %v15717_v49 = vpop.eup %15716  ;;  %15152 = vmatpush3.msra.mxu0 %v9203_v31  ;;  %15153 = vmatprep.mubr.msk.f32.mxu0 %vm15913_vm3, %v18743_v7 }
0x15ea   :  { %v8669_v14 = vmul.f32 %v15717_v49, %v17610_v8  ;;  %15161 = vmatprep.subr.mxu0 %v18743_v7 }
0x15ec   :  { %15154 = vmatmul.mubr.msk.f32.vlgmr.msra.gmra.mxu0 %vm300_vm4, %v8669_v14 }
0x15ed   :  { %15162 = vmatpush3.xpose.msk.msra.mxu0 %vm300_vm4, %v9359_v21  ;;  %15163 = vmatprep.mubr.msk.f32.mxu0 %vm15913_vm3, %v18743_v7 }
0x15ee   :  { %15171 = vmatprep.subr.mxu0 %v18743_v7 }
0x15f0   :  { %15164 = vmatmul.mubr.msk.f32.vlgmr.msra.gmra.mxu0 %vm300_vm4, %v9357_v59 }
0x15f1   :  { %15172 = vmatpush3.xpose.msk.msra.mxu0 %vm300_vm4, %v9515_v22  ;;  %15173 = vmatprep.mubr.msk.f32.mxu0 %vm15913_vm3, %v18743_v7 }
0x15f2   :  { %15181 = vmatprep.subr.mxu0 %v18743_v7 }
0x15f4   :  { %15174 = vmatmul.mubr.msk.f32.vlgmr.msra.gmra.mxu0 %vm300_vm4, %v9513_v15 }
0x15f5   :  { %15183 = vmatprep.mubr.msk.f32.mxu0 %vm15913_vm3, %v18743_v7 }
0x1607   :  { %v8650_v61 = vpop.xlane.xlu1 %8649 }
0x1608   :  { %15718 = vrcp.f32 %v8650_v61 }
0x160b   :  { %v9671_v8 = vpop.permute.xlu1 %9670 }
0x160c   :  { %15182 = vmatpush3.xpose.msk.msra.mxu0 %vm300_vm4, %v9671_v8 }
0x160d   :  { %15191 = vmatprep.subr.mxu0 %v18743_v7 }
0x160f   :  { %v9669_v34 = vpop.permute.xlu1 %9668 }
0x1610   :  { %15184 = vmatmul.mubr.msk.f32.vlgmr.msra.gmra.mxu0 %vm300_vm4, %v9669_v34 }
0x1611   :  { %15193 = vmatprep.mubr.msk.f32.mxu0 %vm15913_vm3, %v18743_v7 }
0x1613   :  { %v9827_v45 = vpop.permute.xlu1 %9826 }
0x1614   :  { %15192 = vmatpush3.xpose.msk.msra.mxu0 %vm300_vm4, %v9827_v45 }
0x1615   :  { %v15719_v17 = vpop.eup %15718  ;;  %15201 = vmatprep.subr.mxu0 %v18743_v7 }
0x1616   :  { %v8668_v36 = vmul.f32 %v15719_v17, %v17627_v62 }
0x1617   :  { %v9825_v20 = vpop.permute.xlu1 %9824 }
0x1618   :  { %15149 = vmatmul.mubr.msk.f32.vlgmr.msra.gmra.mxu1 %vm300_vm4, %v8668_v36  ;;  %15194 = vmatmul.mubr.msk.f32.vlgmr.msra.gmra.mxu0 %vm300_vm4, %v9825_v20 }
0x1619   :  { %15157 = vmatpush3.xpose.msk.msra.mxu1 %vm300_vm4, %v17621_v44  ;;  %15158 = vmatprep.mubr.msk.f32.mxu1 %vm15913_vm3, %v18743_v7  ;;  %v9749_v44 = vpop.permute.xlu0 %9748 }
0x161a   :  { %15166 = vmatprep.subr.mxu1 %v18743_v7  ;;  %15203 = vmatprep.mubr.msk.f32.mxu0 %vm15913_vm3, %v18743_v7 }
0x161c   :  { %15159 = vmatmul.mubr.msk.f32.vlgmr.msra.gmra.mxu1 %vm300_vm4, %v17625_v13 }
0x161d   :  { %15167 = vmatpush3.xpose.msk.msra.mxu1 %vm300_vm4, %v17631_v55  ;;  %15168 = vmatprep.mubr.msk.f32.mxu1 %vm15913_vm3, %v18743_v7  ;;  %v9747_v13 = vpop.permute.xlu0 %9746 }
0x161e   :  { %15176 = vmatprep.subr.mxu1 %v18743_v7 }
0x1620   :  { %15169 = vmatmul.mubr.msk.f32.vlgmr.msra.gmra.mxu1 %vm300_vm4, %v17633_v11 }
0x1621   :  { %15177 = vmatpush3.xpose.msk.msra.mxu1 %vm300_vm4, %v9593_v29  ;;  %15178 = vmatprep.mubr.msk.f32.mxu1 %vm15913_vm3, %v18743_v7 }
0x1622   :  { %15186 = vmatprep.subr.mxu1 %v18743_v7 }
0x1624   :  { %15179 = vmatmul.mubr.msk.f32.vlgmr.msra.gmra.mxu1 %vm300_vm4, %v9591_v19 }
0x1625   :  { %15187 = vmatpush3.xpose.msk.msra.mxu1 %vm300_vm4, %v9749_v44  ;;  %15188 = vmatprep.mubr.msk.f32.mxu1 %vm15913_vm3, %v18743_v7 }
0x1626   :  { %15196 = vmatprep.subr.mxu1 %v18743_v7 }
0x1628   :  { %15189 = vmatmul.mubr.msk.f32.vlgmr.msra.gmra.mxu1 %vm300_vm4, %v9747_v13 }
0x1629   :  { %15198 = vmatprep.mubr.msk.f32.mxu1 %vm15913_vm3, %v18743_v7 }
0x165b   :  { %v17725_v62 = vpop.f32.mrf.mxu0 }
0x165d   :  { %v15125_v55 = vpop.f32.mrf.mxu0 }
0x169b   :  { %v17727_v11 = vpop.f32.mrf.mxu1 }
0x169d   :  { %v15120_v33 = vpop.f32.mrf.mxu1 }
0x169f   :  { %v17729_v60 = vpop.f32.mrf.mxu1 }
0x16a1   :  { %v15130_v31 = vpop.f32.mrf.mxu1 }
0x16a3   :  { %v17731_v21 = vpop.f32.mrf.mxu1 }
0x16a4   :  { %v17733_v59 = vpop.f32.mrf.mxu0 }
0x16a5   :  { %v15140_v22 = vpop.f32.mrf.mxu1 }
0x16a6   :  { %v15135_v15 = vpop.f32.mrf.mxu0 }
0x16a8   :  { %v17735_v9 = vpop.f32.mrf.mxu0 }
0x16aa   :  { %v15145_v63 = vpop.f32.mrf.mxu0 }
0x16ac   :  { %v17737_v23 = vpop.f32.mrf.mxu0 }
0x16ae   :  { %v15155_v56 = vpop.f32.mrf.mxu0 }
0x16b0   :  { %v9430_v27 = vpop.f32.mrf.mxu0 }
0x16b1   :  { %v9903_v12 = vmul.f32 0.35355338, %v9430_v27 }
0x16b2   :  { %v15165_v3 = vpop.f32.mrf.mxu0 }
0x16b3   :  { %v9913_v43 = vsel %vm300_vm4, %v9903_v12, -inf }
0x16b4   :  { %9914 = vmax.xlane.f32.xlu1 %v9913_v43  ;;  %v9586_v48 = vpop.f32.mrf.mxu0 }
0x16b5   :  { %v9905_v29 = vmul.f32 0.35355338, %v9586_v48 }
0x16b6   :  { %v15175_v39 = vpop.f32.mrf.mxu0 }
0x16b7   :  { %v9919_v55 = vsel %vm300_vm4, %v9905_v29, -inf }
0x16c5   :  { %9998 = vrot.lane.b32.xlu1 %v17242_v47, %s15921_s23 }
0x16d0   :  { %v9742_v24 = vpop.f32.mrf.mxu0 }
0x16d1   :  { %v9907_v13 = vmul.f32 0.35355338, %v9742_v24 }
0x16d2   :  { %v15185_v37 = vpop.f32.mrf.mxu0 }
0x16d3   :  { %v9925_v63 = vsel %vm300_vm4, %v9907_v13, -inf }
0x16d8   :  { %v17742_v1 = vpop.f32.mrf.mxu1  ;;  %v9898_v10 = vpop.f32.mrf.mxu0 }
0x16d9   :  { %v9909_v15 = vmul.f32 0.35355338, %v9898_v10 }
0x16da   :  { %v15150_v40 = vpop.f32.mrf.mxu1  ;;  %v15195_v42 = vpop.f32.mrf.mxu0 }
0x16db   :  { %v9931_v56 = vsel %vm300_vm4, %v9909_v15, -inf }
0x16dc   :  { %v9352_v49 = vpop.f32.mrf.mxu1 }
0x16dd   :  { %v9902_v14 = vmul.f32 0.35355338, %v9352_v49 }
0x16de   :  { %v15160_v61 = vpop.f32.mrf.mxu1 }
0x16df   :  { %v9910_v8 = vsel %vm300_vm4, %v9902_v14, -inf }
0x16e0   :  { %9911 = vmax.xlane.f32.xlu0 %v9910_v8  ;;  %v9508_v34 = vpop.f32.mrf.mxu1 }
0x16e1   :  { %v9904_v45 = vmul.f32 0.35355338, %v9508_v34 }
0x16e2   :  { %v15170_v17 = vpop.f32.mrf.mxu1 }
0x16e3   :  { %v9916_v36 = vsel %vm300_vm4, %v9904_v45, -inf }
0x16e4   :  { %9917 = vmax.xlane.f32.xlu0 %v9916_v36  ;;  %v9664_v20 = vpop.f32.mrf.mxu1 }
0x16e5   :  { %v9906_v19 = vmul.f32 0.35355338, %v9664_v20 }
0x16e6   :  { %v15180_v44 = vpop.f32.mrf.mxu1 }
0x16e7   :  { %v9922_v33 = vsel %vm300_vm4, %v9906_v19, -inf }
0x16e8   :  { %9920 = vmax.xlane.f32.xlu0 %v9919_v55  ;;  %v9820_v31 = vpop.f32.mrf.mxu1 }
0x16e9   :  { %9923 = vmax.xlane.f32.xlu1 %v9922_v33  ;;  %v17762_v27 = vmul.f32 0.35355338, %v9820_v31 }
0x16ea   :  { %v15190_v22 = vpop.f32.mrf.mxu1 }
0x16eb   :  { %v9928_v3 = vsel %vm300_vm4, %v17762_v27, -inf }
0x16ec   :  { %9926 = vmax.xlane.f32.xlu0 %v9925_v63 }
0x16f0   :  { %9932 = vmax.xlane.f32.xlu0 %v9931_v56 }
0x16fa   :  { %10150 = vrot.lane.b32.xlu1 %v17248_v54, %s15921_s23 }
0x1706   :  { %10074 = vrot.lane.b32.xlu0 %v17240_v52, %s15921_s23 }
0x170a   :  { %10302 = vrot.lane.b32.xlu0 %v17254_v57, %s15921_s23 }
0x170e   :  { %10454 = vrot.lane.b32.xlu0 %v17262_v18, %s15921_s23 }
0x1712   :  { %10608 = vrot.lane.b32.xlu0 %v17242_v47, %s15922_s24 }
0x1716   :  { %10606 = vrot.lane.b32.xlu0 %v17242_v47, %s15923_s25 }
0x171a   :  { %10764 = vrot.lane.b32.xlu0 %v17248_v54, %s15922_s24 }
0x171e   :  { %9929 = vmax.xlane.f32.xlu1 %v9928_v3  ;;  %10762 = vrot.lane.b32.xlu0 %v17248_v54, %s15923_s25 }
0x172f   :  { %10226 = vrot.lane.b32.xlu1 %v17252_v2, %s15921_s23 }
0x1733   :  { %10378 = vrot.lane.b32.xlu1 %v17260_v0, %s15921_s23 }
0x1737   :  { %10530 = vrot.lane.b32.xlu1 %v17268_v32, %s15921_s23 }
0x173b   :  { %10686 = vrot.lane.b32.xlu1 %v17240_v52, %s15922_s24 }
0x173d   :  { %v9915_v43 = vpop.xlane.xlu1 %9914 }
0x173e   :  { %v9935_v48 = vsub.f32 %v9903_v12, %v9915_v43 }
0x173f   :  { %10684 = vrot.lane.b32.xlu1 %v17240_v52, %s15923_s25 }
0x1740   :  { %v9944_v39 = vmul.f32 1.442695, %v9935_v48 }
0x1741   :  { %v9999_v24 = vpop.permute.xlu1 %9998 }
0x1742   :  { %15720 = vpow2.f32 %v9944_v39  ;;  %15197 = vmatpush3.msra.mxu1 %v9999_v24 }
0x1743   :  { %10842 = vrot.lane.b32.xlu1 %v17252_v2, %s15922_s24  ;;  %15206 = vmatprep.subr.mxu1 %v18743_v7 }
0x1747   :  { %10840 = vrot.lane.b32.xlu1 %v17252_v2, %s15923_s25 }
0x174f   :  { %v17785_v37 = vpop.eup %15720 }
0x1750   :  { %v9961_v12 = vsel %vm300_vm4, %v17785_v37, 0.0 }
0x1751   :  { %9962 = vadd.xlane.f32.xlu0 %v9961_v12 }
0x1769   :  { %v9912_v10 = vpop.xlane.xlu0 %9911 }
0x176a   :  { %v9934_v40 = vsub.f32 %v9902_v14, %v9912_v10 }
0x176c   :  { %v9942_v42 = vmul.f32 1.442695, %v9934_v40 }
0x176d   :  { %v9918_v49 = vpop.xlane.xlu0 %9917 }
0x176e   :  { %15722 = vpow2.f32 %v9942_v42  ;;  %v9936_v61 = vsub.f32 %v9904_v45, %v9918_v49 }
0x1770   :  { %v9946_v8 = vmul.f32 1.442695, %v9936_v61 }
0x1771   :  { %v9921_v34 = vpop.xlane.xlu0 %9920 }
0x1772   :  { %15724 = vpow2.f32 %v9946_v8  ;;  %v9924_v17 = vpop.xlane.xlu1 %9923  ;;  %v9937_v36 = vsub.f32 %v9905_v29, %v9921_v34 }
0x1773   :  { %v9938_v20 = vsub.f32 %v9906_v19, %v9924_v17 }
0x1774   :  { %v9948_v44 = vmul.f32 1.442695, %v9937_v36 }
0x1775   :  { %v9950_v55 = vmul.f32 1.442695, %v9938_v20  ;;  %v9927_v33 = vpop.xlane.xlu0 %9926 }
0x1776   :  { %15726 = vpow2.f32 %v9948_v44  ;;  %v9939_v31 = vsub.f32 %v9907_v13, %v9927_v33  ;;  %v10151_v42 = vpop.permute.xlu1 %10150 }
0x1777   :  { %15728 = vpow2.f32 %v9950_v55 }
0x1778   :  { %v9952_v22 = vmul.f32 1.442695, %v9939_v31 }
0x1779   :  { %v9933_v63 = vpop.xlane.xlu0 %9932 }
0x177a   :  { %15730 = vpow2.f32 %v9952_v22  ;;  %v9941_v14 = vsub.f32 %v9909_v15, %v9933_v63 }
0x177b   :  { %v17789_v56 = vpop.eup %15722 }
0x177c   :  { %v9956_v3 = vmul.f32 1.442695, %v9941_v14  ;;  %v9958_v45 = vsel %vm300_vm4, %v17789_v56, 0.0 }
0x177d   :  { %9959 = vadd.xlane.f32.xlu1 %v9958_v45  ;;  %v10075_v43 = vpop.permute.xlu0 %10074 }
0x177e   :  { %15732 = vpow2.f32 %v9956_v3  ;;  %15202 = vmatpush3.msra.mxu0 %v10075_v43 }
0x177f   :  { %v17793_v29 = vpop.eup %15724  ;;  %15211 = vmatprep.subr.mxu0 %v18743_v7 }
0x1780   :  { %v9964_v19 = vsel %vm300_vm4, %v17793_v29, 0.0 }
0x1781   :  { %9965 = vadd.xlane.f32.xlu1 %v9964_v19  ;;  %v10303_v34 = vpop.permute.xlu0 %10302 }
0x1783   :  { %v17798_v13 = vpop.eup %15726 }
0x1784   :  { %v17800_v15 = vpop.eup %15728  ;;  %v9967_v48 = vsel %vm300_vm4, %v17798_v13, 0.0 }
0x1785   :  { %v9970_v39 = vsel %vm300_vm4, %v17800_v15, 0.0  ;;  %9968 = vadd.xlane.f32.xlu0 %v9967_v48  ;;  %v10455_v20 = vpop.permute.xlu0 %10454 }
0x1786   :  { %9971 = vadd.xlane.f32.xlu1 %v9970_v39 }
0x1787   :  { %v17806_v24 = vpop.eup %15730 }
0x1788   :  { %v9973_v12 = vsel %vm300_vm4, %v17806_v24, 0.0 }
0x1789   :  { %9974 = vadd.xlane.f32.xlu0 %v9973_v12  ;;  %v17827_v44 = vpop.permute.xlu0 %10608 }
0x178b   :  { %v17810_v10 = vpop.eup %15732 }
0x178c   :  { %v9979_v40 = vsel %vm300_vm4, %v17810_v10, 0.0 }
0x178d   :  { %9980 = vadd.xlane.f32.xlu0 %v9979_v40  ;;  %v17829_v55 = vpop.permute.xlu0 %10606 }
0x17a3   :  { %10920 = vrot.lane.b32.xlu0 %v17254_v57, %s15922_s24 }
0x17a7   :  { %v9930_v49 = vpop.xlane.xlu1 %9929  ;;  %10918 = vrot.lane.b32.xlu0 %v17254_v57, %s15923_s25 }
0x17a8   :  { %v9940_v61 = vsub.f32 %v17762_v27, %v9930_v49  ;;  %v17833_v27 = vpop.permute.xlu0 %10764 }
0x17aa   :  { %v9954_v8 = vmul.f32 1.442695, %v9940_v61 }
0x17ab   :  { %11076 = vrot.lane.b32.xlu0 %v17262_v18, %s15922_s24  ;;  %v10227_v22 = vpop.permute.xlu1 %10226 }
0x17ac   :  { %15734 = vpow2.f32 %v9954_v8  ;;  %v17839_v33 = vpop.permute.xlu0 %10762 }
0x17af   :  { %11074 = vrot.lane.b32.xlu0 %v17262_v18, %s15923_s25  ;;  %v10379_v63 = vpop.permute.xlu1 %10378 }
0x17b3   :  { %v10531_v45 = vpop.permute.xlu1 %10530 }
0x17b7   :  { %v10687_v43 = vpop.permute.xlu1 %10686 }
0x17b9   :  { %v17823_v17 = vpop.eup %15734 }
0x17ba   :  { %v9976_v36 = vsel %vm300_vm4, %v17823_v17, 0.0 }
0x17bb   :  { %9977 = vadd.xlane.f32.xlu1 %v9976_v36  ;;  %v10685_v19 = vpop.permute.xlu1 %10684 }
0x17bf   :  { %v10843_v48 = vpop.permute.xlu1 %10842 }
0x17c3   :  { %v10841_v39 = vpop.permute.xlu1 %10840 }
0x17cc   :  { %10998 = vrot.lane.b32.xlu1 %v17260_v0, %s15922_s24 }
0x17d0   :  { %10996 = vrot.lane.b32.xlu1 %v17260_v0, %s15923_s25 }
0x17d4   :  { %11154 = vrot.lane.b32.xlu1 %v17268_v32, %s15922_s24 }
0x17d8   :  { %11152 = vrot.lane.b32.xlu1 %v17268_v32, %s15923_s25 }
0x17da   :  { %v9963_v31 = vpop.xlane.xlu0 %9962 }
0x17db   :  { %15736 = vrcp.f32 %v9963_v31 }
0x17e8   :  { %v15737_v14 = vpop.eup %15736 }
0x17e9   :  { %v9991_v3 = vmul.f32 %v15737_v14, %v17785_v37 }
0x17eb   :  { %15204 = vmatmul.mubr.msk.f32.vlgmr.msra.gmra.mxu0 %vm300_vm4, %v9991_v3 }
0x17ec   :  { %15212 = vmatpush3.msra.mxu0 %v10227_v22  ;;  %15213 = vmatprep.mubr.msk.f32.mxu0 %vm15913_vm3, %v18743_v7 }
0x17ed   :  { %15221 = vmatprep.subr.mxu0 %v18743_v7 }
0x1806   :  { %v9960_v12 = vpop.xlane.xlu1 %9959 }
0x1807   :  { %15738 = vrcp.f32 %v9960_v12 }
0x180a   :  { %v9966_v40 = vpop.xlane.xlu1 %9965 }
0x180b   :  { %15740 = vrcp.f32 %v9966_v40 }
0x180e   :  { %v9969_v49 = vpop.xlane.xlu0 %9968 }
0x180f   :  { %v9972_v61 = vpop.xlane.xlu1 %9971  ;;  %15742 = vrcp.f32 %v9969_v49 }
0x1810   :  { %15744 = vrcp.f32 %v9972_v61 }
0x1812   :  { %v9975_v37 = vpop.xlane.xlu0 %9974 }
0x1813   :  { %15746 = vrcp.f32 %v9975_v37 }
0x1814   :  { %v15739_v8 = vpop.eup %15738 }
0x1815   :  { %v9990_v36 = vmul.f32 %v15739_v8, %v17789_v56 }
0x1816   :  { %v9981_v31 = vpop.xlane.xlu0 %9980 }
0x1817   :  { %15748 = vrcp.f32 %v9981_v31  ;;  %15199 = vmatmul.mubr.msk.f32.vlgmr.msra.gmra.mxu1 %vm300_vm4, %v9990_v36 }
0x1818   :  { %v15741_v22 = vpop.eup %15740  ;;  %15207 = vmatpush3.msra.mxu1 %v10151_v42  ;;  %15208 = vmatprep.mubr.msk.f32.mxu1 %vm15913_vm3, %v18743_v7 }
0x1819   :  { %v9992_v14 = vmul.f32 %v15741_v22, %v17793_v29  ;;  %15216 = vmatprep.subr.mxu1 %v18743_v7 }
0x181b   :  { %15209 = vmatmul.mubr.msk.f32.vlgmr.msra.gmra.mxu1 %vm300_vm4, %v9992_v14 }
0x181c   :  { %v15743_v3 = vpop.eup %15742  ;;  %15217 = vmatpush3.msra.mxu1 %v10303_v34  ;;  %15218 = vmatprep.mubr.msk.f32.mxu1 %vm15913_vm3, %v18743_v7 }
0x181d   :  { %v15745_v56 = vpop.eup %15744  ;;  %v9993_v12 = vmul.f32 %v15743_v3, %v17798_v13  ;;  %15226 = vmatprep.subr.mxu1 %v18743_v7 }
0x181e   :  { %v9994_v42 = vmul.f32 %v15745_v56, %v17800_v15 }
0x181f   :  { %15214 = vmatmul.mubr.msk.f32.vlgmr.msra.gmra.mxu0 %vm300_vm4, %v9993_v12 }
0x1820   :  { %v15747_v40 = vpop.eup %15746  ;;  %15219 = vmatmul.mubr.msk.f32.vlgmr.msra.gmra.mxu1 %vm300_vm4, %v9994_v42  ;;  %15222 = vmatpush3.msra.mxu0 %v10379_v63 }
0x1821   :  { %v9995_v29 = vmul.f32 %v15747_v40, %v17806_v24  ;;  %15227 = vmatpush3.msra.mxu1 %v10455_v20  ;;  %15223 = vmatprep.mubr.msk.f32.mxu0 %vm15913_vm3, %v18743_v7 }
0x1822   :  { %15231 = vmatprep.subr.mxu0 %v18743_v7  ;;  %15228 = vmatprep.mubr.msk.f32.mxu1 %vm15913_vm3, %v18743_v7 }
0x1823   :  { %15224 = vmatmul.mubr.msk.f32.vlgmr.msra.gmra.mxu0 %vm300_vm4, %v9995_v29  ;;  %15236 = vmatprep.subr.mxu1 %v18743_v7 }
0x1824   :  { %v15749_v13 = vpop.eup %15748  ;;  %15232 = vmatpush3.msra.mxu0 %v10531_v45  ;;  %15233 = vmatprep.mubr.msk.f32.mxu0 %vm15913_vm3, %v18743_v7  ;;  %v10921_v45 = vpop.permute.xlu0 %10920 }
0x1825   :  { %v9997_v15 = vmul.f32 %v15749_v13, %v17810_v10  ;;  %15241 = vmatprep.subr.mxu0 %v18743_v7 }
0x1827   :  { %15234 = vmatmul.mubr.msk.f32.vlgmr.msra.gmra.mxu0 %vm300_vm4, %v9997_v15 }
0x1828   :  { %15242 = vmatpush3.xpose.msk.msra.mxu0 %vm300_vm4, %v10687_v43  ;;  %15243 = vmatprep.mubr.msk.f32.mxu0 %vm15913_vm3, %v18743_v7 }
0x1829   :  { %15251 = vmatprep.subr.mxu0 %v18743_v7 }
0x182b   :  { %15244 = vmatmul.mubr.msk.f32.vlgmr.msra.gmra.mxu0 %vm300_vm4, %v10685_v19 }
0x182c   :  { %15252 = vmatpush3.xpose.msk.msra.mxu0 %vm300_vm4, %v10843_v48  ;;  %15253 = vmatprep.mubr.msk.f32.mxu0 %vm15913_vm3, %v18743_v7  ;;  %v10919_v48 = vpop.permute.xlu0 %10918 }
0x182d   :  { %15261 = vmatprep.subr.mxu0 %v18743_v7 }
0x182f   :  { %15254 = vmatmul.mubr.msk.f32.vlgmr.msra.gmra.mxu0 %vm300_vm4, %v10841_v39 }
0x1830   :  { %15263 = vmatprep.mubr.msk.f32.mxu0 %vm15913_vm3, %v18743_v7 }
0x1844   :  { %v9978_v24 = vpop.xlane.xlu1 %9977 }
0x1845   :  { %15750 = vrcp.f32 %v9978_v24 }
0x1848   :  { %v10999_v10 = vpop.permute.xlu1 %10998 }
0x1849   :  { %15262 = vmatpush3.xpose.msk.msra.mxu0 %vm300_vm4, %v10999_v10 }
0x184a   :  { %15271 = vmatprep.subr.mxu0 %v18743_v7 }
0x184c   :  { %v10997_v34 = vpop.permute.xlu1 %10996 }
0x184d   :  { %15264 = vmatmul.mubr.msk.f32.vlgmr.msra.gmra.mxu0 %vm300_vm4, %v10997_v34 }
0x184e   :  { %15273 = vmatprep.mubr.msk.f32.mxu0 %vm15913_vm3, %v18743_v7 }
0x1850   :  { %v11155_v20 = vpop.permute.xlu1 %11154 }
0x1851   :  { %15272 = vmatpush3.xpose.msk.msra.mxu0 %vm300_vm4, %v11155_v20 }
0x1852   :  { %v15751_v63 = vpop.eup %15750  ;;  %15281 = vmatprep.subr.mxu0 %v18743_v7 }
0x1853   :  { %v9996_v43 = vmul.f32 %v15751_v63, %v17823_v17  ;;  %v11077_v17 = vpop.permute.xlu0 %11076 }
0x1854   :  { %v11153_v19 = vpop.permute.xlu1 %11152 }
0x1855   :  { %15229 = vmatmul.mubr.msk.f32.vlgmr.msra.gmra.mxu1 %vm300_vm4, %v9996_v43  ;;  %15274 = vmatmul.mubr.msk.f32.vlgmr.msra.gmra.mxu0 %vm300_vm4, %v11153_v19 }
0x1856   :  { %15237 = vmatpush3.xpose.msk.msra.mxu1 %vm300_vm4, %v17827_v44  ;;  %15238 = vmatprep.mubr.msk.f32.mxu1 %vm15913_vm3, %v18743_v7 }
0x1857   :  { %15246 = vmatprep.subr.mxu1 %v18743_v7  ;;  %15283 = vmatprep.mubr.msk.f32.mxu0 %vm15913_vm3, %v18743_v7  ;;  %v11075_v44 = vpop.permute.xlu0 %11074 }
0x1859   :  { %15239 = vmatmul.mubr.msk.f32.vlgmr.msra.gmra.mxu1 %vm300_vm4, %v17829_v55 }
0x185a   :  { %15247 = vmatpush3.xpose.msk.msra.mxu1 %vm300_vm4, %v17833_v27  ;;  %15248 = vmatprep.mubr.msk.f32.mxu1 %vm15913_vm3, %v18743_v7 }
0x185b   :  { %15256 = vmatprep.subr.mxu1 %v18743_v7 }
0x185d   :  { %15249 = vmatmul.mubr.msk.f32.vlgmr.msra.gmra.mxu1 %vm300_vm4, %v17839_v33 }
0x185e   :  { %15257 = vmatpush3.xpose.msk.msra.mxu1 %vm300_vm4, %v10921_v45  ;;  %15258 = vmatprep.mubr.msk.f32.mxu1 %vm15913_vm3, %v18743_v7 }
0x185f   :  { %15266 = vmatprep.subr.mxu1 %v18743_v7 }
0x1861   :  { %15259 = vmatmul.mubr.msk.f32.vlgmr.msra.gmra.mxu1 %vm300_vm4, %v10919_v48 }
0x1862   :  { %15267 = vmatpush3.xpose.msk.msra.mxu1 %vm300_vm4, %v11077_v17  ;;  %15268 = vmatprep.mubr.msk.f32.mxu1 %vm15913_vm3, %v18743_v7 }
0x1863   :  { %15276 = vmatprep.subr.mxu1 %v18743_v7 }
0x1865   :  { %15269 = vmatmul.mubr.msk.f32.vlgmr.msra.gmra.mxu1 %vm300_vm4, %v11075_v44 }
0x1866   :  { %15278 = vmatprep.mubr.msk.f32.mxu1 %vm15913_vm3, %v18743_v7 }
0x18ab   :  { %v17925_v55 = vpop.f32.mrf.mxu0 }
0x18ad   :  { %v15205_v27 = vpop.f32.mrf.mxu0 }
0x18d7   :  { %v17927_v33 = vpop.f32.mrf.mxu1 }
0x18d9   :  { %v15200_v39 = vpop.f32.mrf.mxu1 }
0x18db   :  { %v17929_v49 = vpop.f32.mrf.mxu1 }
0x18dd   :  { %v15210_v61 = vpop.f32.mrf.mxu1 }
0x18df   :  { %v17931_v37 = vpop.f32.mrf.mxu0 }
0x18e0   :  { %v17933_v8 = vpop.f32.mrf.mxu1 }
0x18e1   :  { %v15215_v36 = vpop.f32.mrf.mxu0 }
0x18e2   :  { %v15220_v31 = vpop.f32.mrf.mxu1 }
0x18e3   :  { %v17935_v22 = vpop.f32.mrf.mxu0 }
0x18e5   :  { %v15225_v14 = vpop.f32.mrf.mxu0 }
0x18e7   :  { %v17937_v3 = vpop.f32.mrf.mxu0 }
0x18e9   :  { %v15235_v56 = vpop.f32.mrf.mxu0 }
0x18eb   :  { %v10758_v12 = vpop.f32.mrf.mxu0 }
0x18ec   :  { %v11231_v42 = vmul.f32 0.35355338, %v10758_v12 }
0x18ed   :  { %v15245_v40 = vpop.f32.mrf.mxu0 }
0x18ee   :  { %v11241_v29 = vsel %vm300_vm4, %v11231_v42, -inf }
0x18ef   :  { %11242 = vmax.xlane.f32.xlu1 %v11241_v29  ;;  %v10914_v13 = vpop.f32.mrf.mxu0 }
0x18f0   :  { %v11233_v61 = vmul.f32 0.35355338, %v10914_v13 }
0x18f1   :  { %v15255_v15 = vpop.f32.mrf.mxu0 }
0x18f2   :  { %v11247_v40 = vsel %vm300_vm4, %v11233_v61, -inf }
0x190d   :  { %v11070_v24 = vpop.f32.mrf.mxu0 }
0x190e   :  { %v11235_v12 = vmul.f32 0.35355338, %v11070_v24 }
0x190f   :  { %v15265_v10 = vpop.f32.mrf.mxu0 }
0x1915   :  { %v17940_v34 = vpop.f32.mrf.mxu1  ;;  %v11226_v20 = vpop.f32.mrf.mxu0 }
0x1917   :  { %v15230_v63 = vpop.f32.mrf.mxu1  ;;  %v15275_v45 = vpop.f32.mrf.mxu0 }
0x1918   :  { %v11237_v45 = vmul.f32 0.35355338, %v11226_v20 }
0x1919   :  { %v10680_v43 = vpop.f32.mrf.mxu1 }
0x191a   :  { %v11230_v19 = vmul.f32 0.35355338, %v10680_v43  ;;  %v11253_v43 = vsel %vm300_vm4, %v11235_v12, -inf }
0x191b   :  { %v15240_v48 = vpop.f32.mrf.mxu1 }
0x191c   :  { %v11238_v17 = vsel %vm300_vm4, %v11230_v19, -inf  ;;  %v11259_v48 = vsel %vm300_vm4, %v11237_v45, -inf }
0x191d   :  { %11239 = vmax.xlane.f32.xlu0 %v11238_v17  ;;  %v10836_v44 = vpop.f32.mrf.mxu1 }
0x191e   :  { %v11232_v27 = vmul.f32 0.35355338, %v10836_v44 }
0x191f   :  { %v15250_v39 = vpop.f32.mrf.mxu1 }
0x1920   :  { %v11244_v36 = vsel %vm300_vm4, %v11232_v27, -inf }
0x1921   :  { %11245 = vmax.xlane.f32.xlu0 %v11244_v36  ;;  %v10992_v31 = vpop.f32.mrf.mxu1 }
0x1922   :  { %v11234_v14 = vmul.f32 0.35355338, %v10992_v31 }
0x1923   :  { %v15260_v56 = vpop.f32.mrf.mxu1 }
0x1924   :  { %v11250_v29 = vsel %vm300_vm4, %v11234_v14, -inf }
0x1925   :  { %11248 = vmax.xlane.f32.xlu0 %v11247_v40  ;;  %11251 = vmax.xlane.f32.xlu1 %v11250_v29  ;;  %v11148_v15 = vpop.f32.mrf.mxu1 }
0x1926   :  { %v11236_v10 = vmul.f32 0.35355338, %v11148_v15 }
0x1927   :  { %v15270_v63 = vpop.f32.mrf.mxu1 }
0x1928   :  { %v11256_v13 = vsel %vm300_vm4, %v11236_v10, -inf }
0x1929   :  { %11254 = vmax.xlane.f32.xlu0 %v11253_v43  ;;  %11257 = vmax.xlane.f32.xlu1 %v11256_v13 }
0x192d   :  { %11260 = vmax.xlane.f32.xlu0 %v11259_v48 }
0x193a   :  { %11326 = vrot.lane.b32.xlu1 %v17242_v47, %s15924_s26 }
0x193e   :  { %11478 = vrot.lane.b32.xlu1 %v17248_v54, %s15924_s26 }
0x1942   :  { %11554 = vrot.lane.b32.xlu1 %v17252_v2, %s15924_s26 }
0x1943   :  { %11402 = vrot.lane.b32.xlu0 %v17240_v52, %s15924_s26 }
0x1946   :  { %11706 = vrot.lane.b32.xlu1 %v17260_v0, %s15924_s26 }
0x1947   :  { %11630 = vrot.lane.b32.xlu0 %v17254_v57, %s15924_s26 }
0x1978   :  { %v11243_v24 = vpop.xlane.xlu1 %11242 }
0x1979   :  { %v11263_v20 = vsub.f32 %v11231_v42, %v11243_v24 }
0x197b   :  { %v11272_v17 = vmul.f32 1.442695, %v11263_v20 }
0x197d   :  { %15752 = vpow2.f32 %v11272_v17 }
0x198a   :  { %v17961_v47 = vpop.eup %15752 }
0x198b   :  { %v11289_v54 = vsel %vm300_vm4, %v17961_v47, 0.0 }
0x198c   :  { %11290 = vadd.xlane.f32.xlu0 %v11289_v54 }
0x19a6   :  { %v11240_v2 = vpop.xlane.xlu0 %11239 }
0x19a7   :  { %v11262_v44 = vsub.f32 %v11230_v19, %v11240_v2 }
0x19a9   :  { %v11270_v39 = vmul.f32 1.442695, %v11262_v44 }
0x19aa   :  { %v11246_v52 = vpop.xlane.xlu0 %11245 }
0x19ab   :  { %15754 = vpow2.f32 %v11270_v39  ;;  %v11264_v36 = vsub.f32 %v11232_v27, %v11246_v52 }
0x19ad   :  { %v11274_v0 = vmul.f32 1.442695, %v11264_v36 }
0x19ae   :  { %v11252_v31 = vpop.xlane.xlu1 %11251  ;;  %v11249_v56 = vpop.xlane.xlu0 %11248 }
0x19af   :  { %15756 = vpow2.f32 %v11274_v0  ;;  %v11266_v57 = vsub.f32 %v11234_v14, %v11252_v31  ;;  %v11265_v42 = vsub.f32 %v11233_v61, %v11249_v56 }
0x19b1   :  { %v11278_v40 = vmul.f32 1.442695, %v11266_v57  ;;  %v11276_v29 = vmul.f32 1.442695, %v11265_v42 }
0x19b2   :  { %v11258_v15 = vpop.xlane.xlu1 %11257  ;;  %v11255_v63 = vpop.xlane.xlu0 %11254 }
0x19b3   :  { %15758 = vpow2.f32 %v11278_v40  ;;  %v11268_v43 = vsub.f32 %v11236_v10, %v11258_v15  ;;  %v11267_v13 = vsub.f32 %v11235_v12, %v11255_v63 }
0x19b4   :  { %15760 = vpow2.f32 %v11276_v29 }
0x19b5   :  { %v11282_v48 = vmul.f32 1.442695, %v11268_v43  ;;  %v11280_v19 = vmul.f32 1.442695, %v11267_v13 }
0x19b6   :  { %v11327_v24 = vpop.permute.xlu1 %11326  ;;  %v11261_v20 = vpop.xlane.xlu0 %11260 }
0x19b7   :  { %15762 = vpow2.f32 %v11282_v48  ;;  %v11269_v27 = vsub.f32 %v11237_v45, %v11261_v20  ;;  %15277 = vmatpush3.msra.mxu1 %v11327_v24 }
0x19b8   :  { %v17965_v17 = vpop.eup %15754  ;;  %15764 = vpow2.f32 %v11280_v19  ;;  %15286 = vmatprep.subr.mxu1 %v18743_v7 }
0x19b9   :  { %v11284_v61 = vmul.f32 1.442695, %v11269_v27  ;;  %v11286_v14 = vsel %vm300_vm4, %v17965_v17, 0.0  ;;  %v12057_v27 = vld [vmem:[%s18736_s1 + $0x148] sm:$0xff] }
0x19ba   :  { %11287 = vadd.xlane.f32.xlu1 %v11286_v14  ;;  %v11403_v10 = vpop.permute.xlu0 %11402 }
0x19bb   :  { %15766 = vpow2.f32 %v11284_v61  ;;  %15282 = vmatpush3.msra.mxu0 %v11403_v10  ;;  %v12055_v61 = vld [vmem:[%s18736_s1 + $0x138] sm:$0xff]  ;;  %v12054_v10 = vld [vmem:[%s18736_s1 + $0x130] sm:$0xff] }
0x19bc   :  { %v17970_v12 = vpop.eup %15756  ;;  %15291 = vmatprep.subr.mxu0 %v18743_v7 }
0x19bd   :  { %v11292_v45 = vsel %vm300_vm4, %v17970_v12, 0.0 }
0x19be   :  { %11293 = vadd.xlane.f32.xlu1 %v11292_v45 }
0x19c0   :  { %v17975_v54 = vpop.eup %15758 }
0x19c1   :  { %v17977_v2 = vpop.eup %15760  ;;  %v11298_v44 = vsel %vm300_vm4, %v17975_v54, 0.0 }
0x19c2   :  { %11299 = vadd.xlane.f32.xlu1 %v11298_v44  ;;  %v11295_v39 = vsel %vm300_vm4, %v17977_v2, 0.0 }
0x19c3   :  { %11296 = vadd.xlane.f32.xlu0 %v11295_v39 }
0x19c4   :  { %v17983_v52 = vpop.eup %15762 }
0x19c5   :  { %v17985_v36 = vpop.eup %15764  ;;  %v11304_v0 = vsel %vm300_vm4, %v17983_v52, 0.0 }
0x19c6   :  { %11305 = vadd.xlane.f32.xlu1 %v11304_v0  ;;  %v11301_v31 = vsel %vm300_vm4, %v17985_v36, 0.0 }
0x19c7   :  { %11302 = vadd.xlane.f32.xlu0 %v11301_v31 }
0x19c8   :  { %v17991_v56 = vpop.eup %15766 }
0x19c9   :  { %v11307_v57 = vsel %vm300_vm4, %v17991_v56, 0.0 }
0x19cb   :  { %11308 = vadd.xlane.f32.xlu0 %v11307_v57 }
0x19d7   :  { %11858 = vrot.lane.b32.xlu1 %v17268_v32, %s15924_s26 }
0x19db   :  { %11944 = vrot.lane.b32.xlu1 %v17725_v62, %s15925_s27  ;;  %v11479_v62 = vpop.permute.xlu1 %11478 }
0x19df   :  { %11976 = vrot.lane.b32.xlu1 %v17925_v55, %s15926_s28 }
0x19e1   :  { %11782 = vrot.lane.b32.xlu0 %v17262_v18, %s15924_s26  ;;  %v11631_v18 = vpop.permute.xlu0 %11630 }
0x19e3   :  { %11948 = vrot.lane.b32.xlu1 %v17733_v59, %s15925_s27 }
0x19e5   :  { %11942 = vrot.lane.b32.xlu0 %v17727_v11, %s15925_s27 }
0x19e7   :  { %11980 = vrot.lane.b32.xlu1 %v17931_v37, %s15926_s28 }
0x19e9   :  { %11974 = vrot.lane.b32.xlu0 %v17927_v33, %s15926_s28 }
0x19eb   :  { %11952 = vrot.lane.b32.xlu1 %v17735_v9, %s15925_s27 }
0x19ed   :  { %11946 = vrot.lane.b32.xlu0 %v17729_v60, %s15925_s27 }
0x19ef   :  { %11984 = vrot.lane.b32.xlu1 %v17935_v22, %s15926_s28 }
0x19f1   :  { %11978 = vrot.lane.b32.xlu0 %v17929_v49, %s15926_s28 }
0x19f3   :  { %11956 = vrot.lane.b32.xlu1 %v17737_v23, %s15925_s27 }
0x19f5   :  { %11950 = vrot.lane.b32.xlu0 %v17731_v21, %s15925_s27  ;;  %v11555_v21 = vpop.permute.xlu1 %11554 }
0x19f7   :  { %11988 = vrot.lane.b32.xlu1 %v17937_v3, %s15926_s28 }
0x19f9   :  { %11982 = vrot.lane.b32.xlu0 %v17933_v8, %s15926_s28  ;;  %v11707_v59 = vpop.permute.xlu1 %11706 }
0x19fd   :  { %11954 = vrot.lane.b32.xlu0 %v17742_v1, %s15925_s27 }
0x1a01   :  { %11986 = vrot.lane.b32.xlu0 %v17940_v34, %s15926_s28 }
0x1a15   :  { %v11291_v32 = vpop.xlane.xlu0 %11290 }
0x1a16   :  { %15768 = vrcp.f32 %v11291_v32 }
0x1a23   :  { %v15769_v11 = vpop.eup %15768 }
0x1a24   :  { %v11319_v60 = vmul.f32 %v15769_v11, %v17961_v47 }
0x1a26   :  { %15284 = vmatmul.mubr.msk.f32.vlgmr.msra.gmra.mxu0 %vm300_vm4, %v11319_v60 }
0x1a27   :  { %15292 = vmatpush3.msra.mxu0 %v11555_v21  ;;  %15293 = vmatprep.mubr.msk.f32.mxu0 %vm15913_vm3, %v18743_v7 }
0x1a28   :  { %15301 = vmatprep.subr.mxu0 %v18743_v7 }
0x1a43   :  { %v11288_v9 = vpop.xlane.xlu1 %11287 }
0x1a44   :  { %15770 = vrcp.f32 %v11288_v9 }
0x1a47   :  { %v11294_v23 = vpop.xlane.xlu1 %11293 }
0x1a48   :  { %15772 = vrcp.f32 %v11294_v23 }
0x1a4b   :  { %v11300_v1 = vpop.xlane.xlu1 %11299 }
0x1a4c   :  { %15774 = vrcp.f32 %v11300_v1  ;;  %v11297_v55 = vpop.xlane.xlu0 %11296 }
0x1a4d   :  { %15776 = vrcp.f32 %v11297_v55 }
0x1a4f   :  { %v11306_v33 = vpop.xlane.xlu1 %11305 }
0x1a50   :  { %15778 = vrcp.f32 %v11306_v33  ;;  %v11303_v49 = vpop.xlane.xlu0 %11302 }
0x1a51   :  { %v15771_v37 = vpop.eup %15770  ;;  %15780 = vrcp.f32 %v11303_v49 }
0x1a52   :  { %v11318_v8 = vmul.f32 %v15771_v37, %v17965_v17  ;;  %v12056_v17 = vld [vmem:[%s18736_s1 + $0x140] sm:$0xff] }
0x1a53   :  { %v11859_v19 = vpop.permute.xlu1 %11858 }
0x1a54   :  { %v11309_v22 = vpop.xlane.xlu0 %11308  ;;  %15279 = vmatmul.mubr.msk.f32.vlgmr.msra.gmra.mxu1 %vm300_vm4, %v11318_v8 }
0x1a55   :  { %v15773_v3 = vpop.eup %15772  ;;  %15782 = vrcp.f32 %v11309_v22  ;;  %15287 = vmatpush3.msra.mxu1 %v11479_v62  ;;  %15288 = vmatprep.mubr.msk.f32.mxu1 %vm15913_vm3, %v18743_v7 }
0x1a56   :  { %v11320_v34 = vmul.f32 %v15773_v3, %v17970_v12  ;;  %15296 = vmatprep.subr.mxu1 %v18743_v7 }
0x1a57   :  { %v11945_v62 = vpop.permute.xlu1 %11944 }
0x1a58   :  { %15289 = vmatmul.mubr.msk.f32.vlgmr.msra.gmra.mxu1 %vm300_vm4, %v11320_v34  ;;  %v11783_v15 = vpop.permute.xlu0 %11782 }
0x1a59   :  { %v15775_v47 = vpop.eup %15774  ;;  %15297 = vmatpush3.msra.mxu1 %v11631_v18  ;;  %15298 = vmatprep.mubr.msk.f32.mxu1 %vm15913_vm3, %v18743_v7 }
0x1a5a   :  { %v15777_v42 = vpop.eup %15776  ;;  %v11322_v40 = vmul.f32 %v15775_v47, %v17975_v54  ;;  %15306 = vmatprep.subr.mxu1 %v18743_v7 }
0x1a5b   :  { %v11321_v29 = vmul.f32 %v15777_v42, %v17977_v2  ;;  %v11977_v60 = vpop.permute.xlu1 %11976 }
0x1a5c   :  { %15299 = vmatmul.mubr.msk.f32.vlgmr.msra.gmra.mxu1 %vm300_vm4, %v11322_v40  ;;  %v11943_v11 = vpop.permute.xlu0 %11942  ;;  %v12031_v40 = vsel %vm300_vm4, %v17525_v35, %v11945_v62 }
0x1a5d   :  { %v15779_v63 = vpop.eup %15778  ;;  %15294 = vmatmul.mubr.msk.f32.vlgmr.msra.gmra.mxu0 %vm300_vm4, %v11321_v29  ;;  %15307 = vmatpush3.msra.mxu1 %v11783_v15  ;;  %v12030_v47 = vsel %vm300_vm4, %v17533_v58, %v11943_v11 }
0x1a5e   :  { %v15781_v43 = vpop.eup %15780  ;;  %v11324_v13 = vmul.f32 %v15779_v63, %v17983_v52  ;;  %15302 = vmatpush3.msra.mxu0 %v11707_v59  ;;  %15303 = vmatprep.mubr.msk.f32.mxu0 %vm15913_vm3, %v18743_v7  ;;  %v12039_v63 = vsel %vm5706_vm6, %v12031_v40, %v11977_v60 }
0x1a5f   :  { %v11323_v48 = vmul.f32 %v15781_v43, %v17985_v36  ;;  %15308 = vmatprep.mubr.msk.f32.mxu1 %vm15913_vm3, %v18743_v7  ;;  %15311 = vmatprep.subr.mxu0 %v18743_v7  ;;  %v11949_v59 = vpop.permute.xlu1 %11948 }
0x1a60   :  { %15309 = vmatmul.mubr.msk.f32.vlgmr.msra.gmra.mxu1 %vm300_vm4, %v11324_v13  ;;  %15316 = vmatprep.subr.mxu1 %v12057_v27  ;;  %v11975_v21 = vpop.permute.xlu0 %11974 }
0x1a61   :  { %15304 = vmatmul.mubr.msk.f32.vlgmr.msra.gmra.mxu0 %vm300_vm4, %v11323_v48  ;;  %15317 = vmatpush3.msra.mxu1 %v12057_v27  ;;  %v12038_v29 = vsel %vm5706_vm6, %v12030_v47, %v11975_v21 }
0x1a62   :  { %v15783_v24 = vpop.eup %15782  ;;  %15312 = vmatpush3.msra.mxu0 %v11859_v19  ;;  %15313 = vmatprep.mubr.msk.f32.mxu0 %vm15913_vm3, %v18743_v7 }
0x1a63   :  { %v11325_v20 = vmul.f32 %v15783_v24, %v17991_v56  ;;  %15318 = vmatprep.subr.mxu1 %v12056_v17  ;;  %v11981_v23 = vpop.permute.xlu1 %11980 }
0x1a64   :  { %15319 = vmatpush3.msra.mxu1 %v12056_v17  ;;  %v11947_v9 = vpop.permute.xlu0 %11946 }
0x1a65   :  { %15314 = vmatmul.mubr.msk.f32.vlgmr.msra.gmra.mxu0 %vm300_vm4, %v11325_v20  ;;  %15320 = vmatprep.subr.mxu1 %v12055_v61  ;;  %v12032_v48 = vsel %vm300_vm4, %v17536_v53, %v11947_v9  ;;  %v12033_v20 = vsel %vm300_vm4, %v17527_v5, %v11949_v59 }
0x1a66   :  { %15321 = vmatpush3.msra.mxu1 %v12055_v61  ;;  %v12041_v53 = vsel %vm5706_vm6, %v12033_v20, %v11981_v23 }
0x1a67   :  { %15322 = vmatprep.subr.mxu1 %v12054_v10  ;;  %v11953_v55 = vpop.permute.xlu1 %11952 }
0x1a68   :  { %15323 = vmatpush3.msra.mxu1 %v12054_v10  ;;  %v11979_v1 = vpop.permute.xlu0 %11978 }
0x1a69   :  { %v12040_v58 = vsel %vm5706_vm6, %v12032_v48, %v11979_v1 }
0x1a6b   :  { %v11985_v49 = vpop.permute.xlu1 %11984 }
0x1a6c   :  { %v11951_v33 = vpop.permute.xlu0 %11950 }
0x1a6d   :  { %v12034_v24 = vsel %vm300_vm4, %v17540_v51, %v11951_v33  ;;  %v12035_v51 = vsel %vm300_vm4, %v17529_v30, %v11953_v55 }
0x1a6f   :  { %v11957_v8 = vpop.permute.xlu1 %11956 }
0x1a70   :  { %v11983_v37 = vpop.permute.xlu0 %11982 }
0x1a71   :  { %v12042_v27 = vsel %vm5706_vm6, %v12034_v24, %v11983_v37 }
0x1a73   :  { %v11989_v3 = vpop.permute.xlu1 %11988 }
0x1a74   :  { %v11955_v22 = vpop.permute.xlu0 %11954 }
0x1a75   :  { %v12036_v10 = vsel %vm300_vm4, %v17542_v25, %v11955_v22  ;;  %v12037_v25 = vsel %vm300_vm4, %v17531_v46, %v11957_v8 }
0x1a76   :  { %v12045_v30 = vsel %vm5706_vm6, %v12037_v25, %v11989_v3 }
0x1a78   :  { %v11987_v34 = vpop.permute.xlu0 %11986 }
0x1a79   :  { %v12044_v5 = vsel %vm5706_vm6, %v12036_v10, %v11987_v34 }
0x1ae6   :  { %v11474_v7 = vpop.f32.mrf.mxu0 }
0x1ae7   :  { %12008 = vrot.lane.b32.xlu1 %v11474_v7, %s15927_s9 }
0x1ae8   :  { %v15285_v14 = vpop.f32.mrf.mxu0 }
0x1b14   :  { %v11398_v12 = vpop.f32.mrf.mxu1 }
0x1b15   :  { %12006 = vrot.lane.b32.xlu0 %v11398_v12, %s15927_s9 }
0x1b16   :  { %v15280_v45 = vpop.f32.mrf.mxu1 }
0x1b17   :  { %v12043_v45 = vsel %vm5706_vm6, %v12035_v51, %v11985_v49 }
0x1b18   :  { %v11550_v54 = vpop.f32.mrf.mxu1 }
0x1b19   :  { %12010 = vrot.lane.b32.xlu0 %v11550_v54, %s15927_s9 }
0x1b1a   :  { %v15290_v2 = vpop.f32.mrf.mxu1 }
0x1b1c   :  { %v11702_v44 = vpop.f32.mrf.mxu1 }
0x1b1d   :  { %v11626_v39 = vpop.f32.mrf.mxu0  ;;  %12014 = vrot.lane.b32.xlu0 %v11702_v44, %s15927_s9 }
0x1b1e   :  { %12012 = vrot.lane.b32.xlu1 %v11626_v39, %s15927_s9  ;;  %v15300_v52 = vpop.f32.mrf.mxu1 }
0x1b1f   :  { %v15295_v36 = vpop.f32.mrf.mxu0 }
0x1b20   :  { %v11854_v0 = vpop.f32.mrf.mxu1  ;;  %v14059_v36 = vld [vmem:[%s18736_s1 + $0x150] ss:$0 sm:$0xff] }
0x1b21   :  { %v11778_v31 = vpop.f32.mrf.mxu0  ;;  %12018 = vrot.lane.b32.xlu0 %v11854_v0, %s15927_s9 }
0x1b22   :  { %12016 = vrot.lane.b32.xlu1 %v11778_v31, %s15927_s9  ;;  %v15310_v56 = vpop.f32.mrf.mxu1 }
0x1b23   :  { %v15305_v57 = vpop.f32.mrf.mxu0 }
0x1b25   :  { %v11930_v18 = vpop.f32.mrf.mxu0 }
0x1b26   :  { %12020 = vrot.lane.b32.xlu1 %v11930_v18, %s15927_s9 }
0x1b27   :  { %v15315_v32 = vpop.f32.mrf.mxu0 }
0x1b59   :  { %v12009_v42 = vpop.permute.xlu1 %12008 }
0x1b5a   :  { %v12047_v13 = vsel %vm5715_vm5, %v12039_v63, %v12009_v42 }
0x1b87   :  { %v12007_v15 = vpop.permute.xlu0 %12006 }
0x1b88   :  { %v12046_v43 = vsel %vm5715_vm5, %v12038_v29, %v12007_v15 }
0x1b89   :  { %15324 = vmatprep.mubr.msk.f32.mxu1 %vm167_vm2, %v12046_v43 }
0x1b8a   :  { %15325 = vmatmul.mubr.msk.f32.vlgmr.msra.gmra.mxu1 %vm167_vm2, %v12047_v13 }
0x1b8b   :  { %v12011_v19 = vpop.permute.xlu0 %12010 }
0x1b8c   :  { %v12048_v35 = vsel %vm5715_vm5, %v12040_v58, %v12011_v19 }
0x1b8d   :  { %15327 = vmatprep.mubr.msk.f32.mxu1 %vm167_vm2, %v12048_v35 }
0x1b8f   :  { %v12015_v17 = vpop.permute.xlu0 %12014 }
0x1b90   :  { %v12013_v61 = vpop.permute.xlu1 %12012  ;;  %v12050_v7 = vsel %vm5715_vm5, %v12042_v27, %v12015_v17 }
0x1b91   :  { %v12049_v14 = vsel %vm5715_vm5, %v12041_v53, %v12013_v61 }
0x1b92   :  { %15328 = vmatmul.mubr.msk.f32.gmra.mxu1 %vm167_vm2, %v12049_v14 }
0x1b93   :  { %15330 = vmatprep.mubr.msk.f32.mxu1 %vm167_vm2, %v12050_v7  ;;  %v12019_v12 = vpop.permute.xlu0 %12018 }
0x1b94   :  { %v12017_v54 = vpop.permute.xlu1 %12016  ;;  %v12052_v2 = vsel %vm5715_vm5, %v12044_v5, %v12019_v12 }
0x1b95   :  { %v12051_v44 = vsel %vm5715_vm5, %v12043_v45, %v12017_v54 }
0x1b96   :  { %15331 = vmatmul.mubr.msk.f32.gmra.mxu1 %vm167_vm2, %v12051_v44 }
0x1b97   :  { %15333 = vmatprep.mubr.msk.f32.mxu1 %vm167_vm2, %v12052_v2 }
0x1b98   :  { %v12021_v39 = vpop.permute.xlu1 %12020 }
0x1b99   :  { %v12053_v52 = vsel %vm5715_vm5, %v12045_v30, %v12021_v39 }
0x1b9a   :  { %15334 = vmatmul.mubr.msk.f32.gmra.mxu1 %vm167_vm2, %v12053_v52 }
0x1c4a   :  { %v15326_v0 = vpop.f32.mrf.mxu1 }
0x1c4b   :  { %v12159_v31 = vadd.f32 %v15326_v0, %v14059_v36 }
0x1c4c   :  { %v12153_v56 = vpop.f32.mrf.mxu1 }
0x1c4d   :  { %v12193_v57 = vadd.f32 %v12159_v31, %v17199_v26  ;;  %v12154_v18 = vadd.f32 %v14059_v36, %v12153_v56 }
0x1c4f   :  { %v12192_v46 = vadd.f32 %v12154_v18, %v17197_v16  ;;  %v12205_v32 = vsel %vm167_vm2, %v12193_v57, 0.0 }
0x1c50   :  { %12206 = vadd.xlane.f32.xlu1 %v12205_v32 }
0x1c51   :  { %v12202_v62 = vsel %vm167_vm2, %v12192_v46, 0.0 }
0x1c52   :  { %v15329_v11 = vpop.f32.mrf.mxu1  ;;  %12203 = vadd.xlane.f32.xlu0 %v12202_v62 }
0x1c53   :  { %v12169_v60 = vadd.f32 %v15329_v11, %v14059_v36  ;;  %v12333_v11 = vld [vmem:[%s18736_s1 + $0x190] sm:$0xff] }
0x1c54   :  { %v12163_v21 = vpop.f32.mrf.mxu1  ;;  %15336 = vmatprep.subr.mxu0 %v12333_v11 }
0x1c55   :  { %v12164_v59 = vadd.f32 %v14059_v36, %v12163_v21  ;;  %v12195_v1 = vadd.f32 %v12169_v60, %v17211_v28  ;;  %15337 = vmatpush3.msra.mxu0 %v12333_v11  ;;  %v12332_v60 = vld [vmem:[%s18736_s1 + $0x188] sm:$0xff]  ;;  %v12331_v21 = vld [vmem:[%s18736_s1 + $0x180] sm:$0xff] }
0x1c56   :  { %v15332_v9 = vpop.f32.mrf.mxu1  ;;  %15338 = vmatprep.subr.mxu0 %v12332_v60  ;;  %v12545_v11 = vld [vmem:[%s18736_s1 + $0x1c8] sm:$0xff] }
0x1c57   :  { %v12194_v23 = vadd.f32 %v12164_v59, %v17208_v38  ;;  %v12179_v26 = vadd.f32 %v15332_v9, %v14059_v36  ;;  %v12211_v22 = vsel %vm167_vm2, %v12195_v1, 0.0  ;;  %15339 = vmatpush3.msra.mxu0 %v12332_v60  ;;  %v12330_v59 = vld [vmem:[%s18736_s1 + $0x178] sm:$0xff]  ;;  %v12544_v60 = vld [vmem:[%s18736_s1 + $0x1c0] sm:$0xff] }
0x1c58   :  { %v12173_v55 = vpop.f32.mrf.mxu1  ;;  %15340 = vmatprep.subr.mxu0 %v12331_v21 }
0x1c59   :  { %v12174_v33 = vadd.f32 %v14059_v36, %v12173_v55  ;;  %v12208_v16 = vsel %vm167_vm2, %v12194_v23, 0.0  ;;  %v12197_v3 = vadd.f32 %v12179_v26, %v17221_v41  ;;  %15341 = vmatpush3.msra.mxu0 %v12331_v21  ;;  %v12543_v21 = vld [vmem:[%s18736_s1 + $0x1b8] sm:$0xff] }
0x1c5a   :  { %12209 = vadd.xlane.f32.xlu0 %v12208_v16  ;;  %v15335_v49 = vpop.f32.mrf.mxu1  ;;  %15342 = vmatprep.subr.mxu0 %v12330_v59 }
0x1c5b   :  { %v12196_v37 = vadd.f32 %v12174_v33, %v17218_v4  ;;  %v12189_v34 = vadd.f32 %v15335_v49, %v14059_v36  ;;  %v12217_v40 = vsel %vm167_vm2, %v12197_v3, 0.0  ;;  %15343 = vmatpush3.msra.mxu0 %v12330_v59  ;;  %v12542_v59 = vld [vmem:[%s18736_s1 + $0x1b0] sm:$0xff] }
0x1c5c   :  { %v12183_v8 = vpop.f32.mrf.mxu1 }
0x1c5d   :  { %v12184_v47 = vadd.f32 %v14059_v36, %v12183_v8  ;;  %v12214_v38 = vsel %vm167_vm2, %v12196_v37, 0.0  ;;  %v12199_v42 = vadd.f32 %v12189_v34, %v17229_v6 }
0x1c5e   :  { %12212 = vadd.xlane.f32.xlu0 %v12211_v22  ;;  %12215 = vadd.xlane.f32.xlu1 %v12214_v38 }
0x1c5f   :  { %v12198_v28 = vadd.f32 %v12184_v47, %v17227_v50  ;;  %v12223_v4 = vsel %vm167_vm2, %v12199_v42, 0.0 }
0x1c61   :  { %v12220_v29 = vsel %vm167_vm2, %v12198_v28, 0.0 }
0x1c62   :  { %12218 = vadd.xlane.f32.xlu0 %v12217_v40  ;;  %12221 = vadd.xlane.f32.xlu1 %v12220_v29  ;;  %v14068_v29 = vld [vmem:[%s18736_s1 + $0x158] ss:$0 sm:$0xff] }
0x1c66   :  { %12224 = vadd.xlane.f32.xlu0 %v12223_v4 }
0x1cd9   :  { %v12207_v41 = vpop.xlane.xlu1 %12206 }
0x1cda   :  { %v12227_v15 = vmul.f32 0.03125, %v12207_v41 }
0x1cdb   :  { %v12204_v63 = vpop.xlane.xlu0 %12203 }
0x1cdc   :  { %v18142_v43 = vsub.f32 %v12193_v57, %v12227_v15  ;;  %v12226_v13 = vmul.f32 0.03125, %v12204_v63 }
0x1cde   :  { %v18144_v48 = vsub.f32 %v12192_v46, %v12226_v13  ;;  %v12243_v50 = vmul.f32 %v18142_v43, %v18142_v43 }
0x1ce0   :  { %v12253_v6 = vsel %vm167_vm2, %v12243_v50, 0.0  ;;  %v12242_v58 = vmul.f32 %v18144_v48, %v18144_v48 }
0x1ce1   :  { %12254 = vadd.xlane.f32.xlu0 %v12253_v6 }
0x1ce2   :  { %v12250_v19 = vsel %vm167_vm2, %v12242_v58, 0.0 }
0x1ce3   :  { %v12210_v35 = vpop.xlane.xlu0 %12209  ;;  %12251 = vadd.xlane.f32.xlu1 %v12250_v19 }
0x1ce4   :  { %v12228_v24 = vmul.f32 0.03125, %v12210_v35 }
0x1ce6   :  { %v18152_v20 = vsub.f32 %v12194_v23, %v12228_v24  ;;  %v14069_v24 = vld [vmem:[%s18736_s1 + $0x160] ss:$0 sm:$0xff] }
0x1ce7   :  { %v12216_v27 = vpop.xlane.xlu1 %12215  ;;  %v12213_v17 = vpop.xlane.xlu0 %12212 }
0x1ce8   :  { %v12230_v53 = vmul.f32 0.03125, %v12216_v27  ;;  %v12229_v61 = vmul.f32 0.03125, %v12213_v17  ;;  %v12244_v7 = vmul.f32 %v18152_v20, %v18152_v20 }
0x1cea   :  { %v18156_v14 = vsub.f32 %v12196_v37, %v12230_v53  ;;  %v18158_v10 = vsub.f32 %v12195_v1, %v12229_v61  ;;  %v12256_v51 = vsel %vm167_vm2, %v12244_v7, 0.0 }
0x1ceb   :  { %v12222_v5 = vpop.xlane.xlu1 %12221  ;;  %12257 = vadd.xlane.f32.xlu1 %v12256_v51  ;;  %v12219_v12 = vpop.xlane.xlu0 %12218 }
0x1cec   :  { %v12232_v45 = vmul.f32 0.03125, %v12222_v5  ;;  %v12231_v54 = vmul.f32 0.03125, %v12219_v12  ;;  %v12246_v2 = vmul.f32 %v18156_v14, %v18156_v14  ;;  %v12245_v44 = vmul.f32 %v18158_v10, %v18158_v10 }
0x1cee   :  { %v18165_v25 = vsub.f32 %v12198_v28, %v12232_v45  ;;  %v18167_v30 = vsub.f32 %v12197_v3, %v12231_v54  ;;  %v12262_v39 = vsel %vm167_vm2, %v12246_v2, 0.0  ;;  %v12259_v52 = vsel %vm167_vm2, %v12245_v44, 0.0 }
0x1cef   :  { %12263 = vadd.xlane.f32.xlu1 %v12262_v39  ;;  %12260 = vadd.xlane.f32.xlu0 %v12259_v52  ;;  %v12225_v36 = vpop.xlane.xlu0 %12224 }
0x1cf0   :  { %v12233_v0 = vmul.f32 0.03125, %v12225_v36  ;;  %v12248_v31 = vmul.f32 %v18165_v25, %v18165_v25  ;;  %v12247_v56 = vmul.f32 %v18167_v30, %v18167_v30 }
0x1cf2   :  { %v18175_v57 = vsub.f32 %v12199_v42, %v12233_v0  ;;  %v12268_v18 = vsel %vm167_vm2, %v12248_v31, 0.0  ;;  %v12265_v46 = vsel %vm167_vm2, %v12247_v56, 0.0 }
0x1cf3   :  { %12269 = vadd.xlane.f32.xlu1 %v12268_v18  ;;  %12266 = vadd.xlane.f32.xlu0 %v12265_v46 }
0x1cf4   :  { %v12249_v32 = vmul.f32 %v18175_v57, %v18175_v57 }
0x1cf6   :  { %v12271_v62 = vsel %vm167_vm2, %v12249_v32, 0.0 }
0x1cf7   :  { %12272 = vadd.xlane.f32.xlu0 %v12271_v62  ;;  %v12546_v62 = vld [vmem:[%s18736_s1 + $0x1d0] sm:$0xff] }
0x1d6a   :  { %v12255_v9 = vpop.xlane.xlu0 %12254 }
0x1d6b   :  { %v12275_v23 = vmul.f32 0.03125, %v12255_v9  ;;  %v12541_v9 = vld [vmem:[%s18736_s1 + $0x1a8] sm:$0xff] }
0x1d6c   :  { %v12252_v1 = vpop.xlane.xlu1 %12251 }
0x1d6d   :  { %v12283_v55 = vadd.f32 1e-05, %v12275_v23  ;;  %v12274_v26 = vmul.f32 0.03125, %v12252_v1  ;;  %v12540_v23 = vld [vmem:[%s18736_s1 + $0x1a0] sm:$0xff]  ;;  %v14070_v1 = vld [vmem:[%s18736_s1 + $0x198] ss:$0 sm:$0xff] }
0x1d6f   :  { %15784 = vrsqrt.f32 %v12283_v55  ;;  %v12282_v33 = vadd.f32 1e-05, %v12274_v26 }
0x1d71   :  { %15786 = vrsqrt.f32 %v12282_v33 }
0x1d74   :  { %v12258_v16 = vpop.xlane.xlu1 %12257 }
0x1d75   :  { %v12276_v49 = vmul.f32 0.03125, %v12258_v16 }
0x1d77   :  { %v12284_v37 = vadd.f32 1e-05, %v12276_v49 }
0x1d78   :  { %v12264_v8 = vpop.xlane.xlu1 %12263  ;;  %v12261_v22 = vpop.xlane.xlu0 %12260 }
0x1d79   :  { %15788 = vrsqrt.f32 %v12284_v37  ;;  %v12278_v3 = vmul.f32 0.03125, %v12264_v8  ;;  %v12277_v34 = vmul.f32 0.03125, %v12261_v22 }
0x1d7b   :  { %v12286_v47 = vadd.f32 1e-05, %v12278_v3  ;;  %v12285_v38 = vadd.f32 1e-05, %v12277_v34 }
0x1d7c   :  { %v15785_v28 = vpop.eup %15784  ;;  %v12270_v42 = vpop.xlane.xlu1 %12269 }
0x1d7d   :  { %v12267_v40 = vpop.xlane.xlu0 %12266  ;;  %v12299_v4 = vmul.f32 %v15785_v28, %v18142_v43  ;;  %15790 = vrsqrt.f32 %v12286_v47  ;;  %v12280_v41 = vmul.f32 0.03125, %v12270_v42 }
0x1d7e   :  { %v12279_v15 = vmul.f32 0.03125, %v12267_v40  ;;  %v15787_v63 = vpop.eup %15786  ;;  %15792 = vrsqrt.f32 %v12285_v38 }
0x1d7f   :  { %v12288_v13 = vadd.f32 1e-05, %v12280_v41  ;;  %v12298_v6 = vmul.f32 %v15787_v63, %v18144_v48  ;;  %v12311_v58 = vmul.f32 %v14068_v29, %v12299_v4 }
0x1d80   :  { %v12287_v50 = vadd.f32 1e-05, %v12279_v15 }
0x1d81   :  { %v12273_v19 = vpop.xlane.xlu0 %12272  ;;  %15794 = vrsqrt.f32 %v12288_v13  ;;  %v12310_v27 = vmul.f32 %v14068_v29, %v12298_v6  ;;  %v18204_v53 = vadd.f32 %v14069_v24, %v12311_v58 }
0x1d82   :  { %v12281_v35 = vmul.f32 0.03125, %v12273_v19  ;;  %15796 = vrsqrt.f32 %v12287_v50 }
0x1d83   :  { %v18202_v17 = vadd.f32 %v14069_v24, %v12310_v27 }
0x1d84   :  { %v12289_v43 = vadd.f32 1e-05, %v12281_v35 }
0x1d85   :  { %15344 = vmatprep.mubr.msk.f32.mxu0 %vm167_vm2, %v18202_v17 }
0x1d86   :  { %15798 = vrsqrt.f32 %v12289_v43  ;;  %v15789_v48 = vpop.eup %15788  ;;  %15345 = vmatmul.mubr.msk.f32.vlgmr.msra.gmra.mxu0 %vm167_vm2, %v18204_v53 }
0x1d87   :  { %v12300_v61 = vmul.f32 %v15789_v48, %v18152_v20 }
0x1d89   :  { %v12312_v7 = vmul.f32 %v14068_v29, %v12300_v61 }
0x1d8a   :  { %v15791_v51 = vpop.eup %15790 }
0x1d8b   :  { %v15793_v5 = vpop.eup %15792  ;;  %v18211_v12 = vadd.f32 %v14069_v24, %v12312_v7  ;;  %v12302_v45 = vmul.f32 %v15791_v51, %v18156_v14 }
0x1d8c   :  { %v12301_v54 = vmul.f32 %v15793_v5, %v18158_v10 }
0x1d8d   :  { %15347 = vmatprep.mubr.msk.f32.mxu0 %vm167_vm2, %v18211_v12  ;;  %v12314_v2 = vmul.f32 %v14068_v29, %v12302_v45 }
0x1d8e   :  { %v15795_v44 = vpop.eup %15794  ;;  %v12313_v39 = vmul.f32 %v14068_v29, %v12301_v54 }
0x1d8f   :  { %v15797_v52 = vpop.eup %15796  ;;  %v18217_v36 = vadd.f32 %v14069_v24, %v12314_v2  ;;  %v12304_v20 = vmul.f32 %v15795_v44, %v18165_v25 }
0x1d90   :  { %v12303_v0 = vmul.f32 %v15797_v52, %v18167_v30  ;;  %v18221_v31 = vadd.f32 %v14069_v24, %v12313_v39 }
0x1d91   :  { %v12316_v56 = vmul.f32 %v14068_v29, %v12304_v20 }
0x1d92   :  { %15348 = vmatmul.mubr.msk.f32.gmra.mxu0 %vm167_vm2, %v18221_v31  ;;  %v12315_v14 = vmul.f32 %v14068_v29, %v12303_v0 }
0x1d93   :  { %v15799_v18 = vpop.eup %15798  ;;  %15350 = vmatprep.mubr.msk.f32.mxu0 %vm167_vm2, %v18217_v36  ;;  %v18228_v46 = vadd.f32 %v14069_v24, %v12316_v56 }
0x1d94   :  { %v12305_v10 = vmul.f32 %v15799_v18, %v18175_v57  ;;  %v18230_v32 = vadd.f32 %v14069_v24, %v12315_v14  ;;  %v12547_v57 = vld [vmem:[%s18736_s1 + $0x1d8] sm:$0xff] }
0x1d95   :  { %15356 = vmatprep.subr.mxu1 %v12547_v57 }
0x1d96   :  { %v12317_v25 = vmul.f32 %v14068_v29, %v12305_v10  ;;  %15351 = vmatmul.mubr.msk.f32.gmra.mxu0 %vm167_vm2, %v18230_v32  ;;  %15357 = vmatpush3.msra.mxu1 %v12547_v57 }
0x1d97   :  { %15353 = vmatprep.mubr.msk.f32.mxu0 %vm167_vm2, %v18228_v46  ;;  %15358 = vmatprep.subr.mxu1 %v12546_v62 }
0x1d98   :  { %v18236_v30 = vadd.f32 %v14069_v24, %v12317_v25  ;;  %15359 = vmatpush3.msra.mxu1 %v12546_v62 }
0x1d99   :  { %15360 = vmatprep.subr.mxu1 %v12545_v11 }
0x1d9a   :  { %15354 = vmatmul.mubr.msk.f32.gmra.mxu0 %vm167_vm2, %v18236_v30  ;;  %15361 = vmatpush3.msra.mxu1 %v12545_v11 }
0x1d9b   :  { %15362 = vmatprep.subr.mxu1 %v12544_v60 }
0x1d9c   :  { %15363 = vmatpush3.msra.mxu1 %v12544_v60 }
0x1d9d   :  { %15364 = vmatprep.subr.mxu1 %v12543_v21 }
0x1d9e   :  { %15365 = vmatpush3.msra.mxu1 %v12543_v21 }
0x1d9f   :  { %15366 = vmatprep.subr.mxu1 %v12542_v59 }
0x1da0   :  { %15367 = vmatpush3.msra.mxu1 %v12542_v59 }
0x1da1   :  { %15368 = vmatprep.subr.mxu1 %v12541_v9 }
0x1da2   :  { %15369 = vmatpush3.msra.mxu1 %v12541_v9 }
0x1da3   :  { %15370 = vmatprep.subr.mxu1 %v12540_v23 }
0x1da4   :  { %15371 = vmatpush3.msra.mxu1 %v12540_v23 }
0x1e46   :  { %v15346_v55 = vpop.f32.mrf.mxu0 }
0x1e47   :  { %v12435_v26 = vadd.f32 %v15346_v55, %v14070_v1 }
0x1e48   :  { %v12429_v33 = vpop.f32.mrf.mxu0 }
0x1e49   :  { %v12477_v16 = vmul.f32 0.044715, %v12435_v26  ;;  %v12430_v49 = vadd.f32 %v14070_v1, %v12429_v33 }
0x1e4b   :  { %v12485_v37 = vmul.f32 %v12477_v16, %v12435_v26  ;;  %v12476_v8 = vmul.f32 0.044715, %v12430_v49  ;;  %v12468_v9 = vmul.f32 0.5, %v12430_v49 }
0x1e4d   :  { %v12493_v22 = vmul.f32 %v12485_v37, %v12435_v26  ;;  %v12484_v3 = vmul.f32 %v12476_v8, %v12430_v49 }
0x1e4f   :  { %v12501_v34 = vadd.f32 %v12493_v22, %v12435_v26  ;;  %v12492_v47 = vmul.f32 %v12484_v3, %v12430_v49 }
0x1e51   :  { %v12509_v38 = vmul.f32 0.7978846, %v12501_v34  ;;  %v12500_v28 = vadd.f32 %v12492_v47, %v12430_v49 }
0x1e52   :  { %v15349_v42 = vpop.f32.mrf.mxu0 }
0x1e53   :  { %15800 = vtanh.f32 %v12509_v38  ;;  %v18267_v40 = vadd.f32 %v15349_v42, %v14070_v1  ;;  %v12508_v29 = vmul.f32 0.7978846, %v12500_v28 }
0x1e54   :  { %v12439_v4 = vpop.f32.mrf.mxu0 }
0x1e55   :  { %v12479_v41 = vmul.f32 0.044715, %v18267_v40  ;;  %v12440_v15 = vadd.f32 %v14070_v1, %v12439_v4  ;;  %15802 = vtanh.f32 %v12508_v29  ;;  %v12471_v29 = vmul.f32 0.5, %v18267_v40 }
0x1e56   :  { %v15352_v63 = vpop.f32.mrf.mxu0 }
0x1e57   :  { %v12487_v13 = vmul.f32 %v12479_v41, %v18267_v40  ;;  %v12478_v50 = vmul.f32 0.044715, %v12440_v15  ;;  %v18271_v6 = vadd.f32 %v15352_v63, %v14070_v1 }
0x1e58   :  { %v12449_v58 = vpop.f32.mrf.mxu0 }
0x1e59   :  { %v12495_v19 = vmul.f32 %v12487_v13, %v18267_v40  ;;  %v12486_v35 = vmul.f32 %v12478_v50, %v12440_v15  ;;  %v12481_v24 = vmul.f32 0.044715, %v18271_v6  ;;  %v12450_v27 = vadd.f32 %v14070_v1, %v12449_v58 }
0x1e5a   :  { %v15355_v43 = vpop.f32.mrf.mxu0 }
0x1e5b   :  { %v12503_v48 = vadd.f32 %v12495_v19, %v18267_v40  ;;  %v12494_v61 = vmul.f32 %v12486_v35, %v12440_v15  ;;  %v12489_v7 = vmul.f32 %v12481_v24, %v18271_v6  ;;  %v18277_v51 = vadd.f32 %v15355_v43, %v14070_v1 }
0x1e5c   :  { %v12480_v5 = vmul.f32 0.044715, %v12450_v27  ;;  %v12459_v45 = vpop.f32.mrf.mxu0  ;;  %v12472_v50 = vmul.f32 0.5, %v12450_v27  ;;  %v12473_v35 = vmul.f32 0.5, %v18271_v6 }
0x1e5d   :  { %v12511_v54 = vmul.f32 0.7978846, %v12503_v48  ;;  %v12502_v2 = vadd.f32 %v12494_v61, %v12440_v15  ;;  %v12497_v44 = vmul.f32 %v12489_v7, %v18271_v6  ;;  %v12483_v52 = vmul.f32 0.044715, %v18277_v51 }
0x1e5e   :  { %v12488_v39 = vmul.f32 %v12480_v5, %v12450_v27  ;;  %v12460_v20 = vadd.f32 %v14070_v1, %v12459_v45  ;;  %v12469_v1 = vmul.f32 0.5, %v12435_v26  ;;  %v12470_v26 = vmul.f32 0.5, %v12440_v15 }
0x1e5f   :  { %15804 = vtanh.f32 %v12511_v54  ;;  %v12505_v0 = vadd.f32 %v12497_v44, %v18271_v6  ;;  %v12510_v56 = vmul.f32 0.7978846, %v12502_v2  ;;  %v12491_v10 = vmul.f32 %v12483_v52, %v18277_v51  ;;  %v14079_v6 = vld [vmem:[%s18736_s1 + $0x1e0] ss:$0 sm:$0xff] }
0x1e60   :  { %v15801_v18 = vpop.eup %15800  ;;  %v12496_v14 = vmul.f32 %v12488_v39, %v12450_v27  ;;  %v12482_v25 = vmul.f32 0.044715, %v12460_v20  ;;  %v12474_v40 = vmul.f32 0.5, %v12460_v20  ;;  %v12475_v7 = vmul.f32 0.5, %v18277_v51 }
0x1e61   :  { %v12513_v57 = vmul.f32 0.7978846, %v12505_v0  ;;  %15806 = vtanh.f32 %v12510_v56  ;;  %v12525_v11 = vadd.f32 1.0, %v15801_v18  ;;  %v12499_v21 = vmul.f32 %v12491_v10, %v18277_v51 }
0x1e62   :  { %v15803_v62 = vpop.eup %15802  ;;  %v12504_v60 = vadd.f32 %v12496_v14, %v12450_v27  ;;  %v12490_v59 = vmul.f32 %v12482_v25, %v12460_v20 }
0x1e63   :  { %15808 = vtanh.f32 %v12513_v57  ;;  %v12524_v23 = vadd.f32 1.0, %v15803_v62  ;;  %v12507_v55 = vadd.f32 %v12499_v21, %v18277_v51  ;;  %v12533_v8 = vmul.f32 %v12525_v11, %v12469_v1 }
0x1e64   :  { %v12498_v33 = vmul.f32 %v12490_v59, %v12460_v20  ;;  %v12512_v16 = vmul.f32 0.7978846, %v12504_v60 }
0x1e65   :  { %v12532_v37 = vmul.f32 %v12524_v23, %v12468_v9  ;;  %v12515_v22 = vmul.f32 0.7978846, %v12507_v55 }
0x1e66   :  { %v12506_v3 = vadd.f32 %v12498_v33, %v12460_v20  ;;  %15810 = vtanh.f32 %v12512_v16 }
0x1e67   :  { %15372 = vmatprep.mubr.msk.f32.mxu1 %vm6224_vm7, %v12532_v37  ;;  %15812 = vtanh.f32 %v12515_v22 }
0x1e68   :  { %15373 = vmatmul.mubr.msk.f32.vlgmr.msra.gmra.mxu1 %vm6224_vm7, %v12533_v8  ;;  %v12514_v34 = vmul.f32 0.7978846, %v12506_v3 }
0x1e6a   :  { %15814 = vtanh.f32 %v12514_v34 }
0x1e6c   :  { %v15805_v47 = vpop.eup %15804 }
0x1e6d   :  { %v12527_v38 = vadd.f32 1.0, %v15805_v47 }
0x1e6e   :  { %v15807_v49 = vpop.eup %15806 }
0x1e6f   :  { %v12526_v28 = vadd.f32 1.0, %v15807_v49  ;;  %v12535_v41 = vmul.f32 %v12527_v38, %v12471_v29 }
0x1e70   :  { %v15809_v42 = vpop.eup %15808 }
0x1e71   :  { %v12534_v4 = vmul.f32 %v12526_v28, %v12470_v26  ;;  %v12529_v13 = vadd.f32 1.0, %v15809_v42 }
0x1e73   :  { %v15811_v63 = vpop.eup %15810  ;;  %15375 = vmatprep.mubr.msk.f32.mxu1 %vm6224_vm7, %v12534_v4  ;;  %v12537_v15 = vmul.f32 %v12529_v13, %v12473_v35 }
0x1e74   :  { %15376 = vmatmul.mubr.msk.f32.gmra.mxu1 %vm6224_vm7, %v12535_v41  ;;  %v12528_v58 = vadd.f32 1.0, %v15811_v63  ;;  %v15813_v19 = vpop.eup %15812 }
0x1e75   :  { %v12531_v48 = vadd.f32 1.0, %v15813_v19 }
0x1e76   :  { %v12536_v24 = vmul.f32 %v12528_v58, %v12472_v50 }
0x1e77   :  { %v15815_v43 = vpop.eup %15814  ;;  %v12539_v45 = vmul.f32 %v12531_v48, %v12475_v7 }
0x1e78   :  { %15378 = vmatprep.mubr.msk.f32.mxu1 %vm6224_vm7, %v12536_v24  ;;  %v12530_v61 = vadd.f32 1.0, %v15815_v43 }
0x1e79   :  { %15379 = vmatmul.mubr.msk.f32.gmra.mxu1 %vm6224_vm7, %v12537_v15 }
0x1e7a   :  { %v12538_v5 = vmul.f32 %v12530_v61, %v12474_v40 }
0x1e7c   :  { %15381 = vmatprep.mubr.msk.f32.mxu1 %vm6224_vm7, %v12538_v5 }
0x1e7d   :  { %15382 = vmatmul.mubr.msk.f32.gmra.mxu1 %vm6224_vm7, %v12539_v45 }
0x1f28   :  { %v15374_v27 = vpop.f32.mrf.mxu1 }
0x1f29   :  { %v12649_v54 = vadd.f32 %v15374_v27, %v14079_v6 }
0x1f2a   :  { %v12643_v2 = vpop.f32.mrf.mxu1 }
0x1f2b   :  { %v12683_v44 = vadd.f32 %v12649_v54, %v18204_v53  ;;  %v12644_v39 = vadd.f32 %v14079_v6, %v12643_v2 }
0x1f2d   :  { %v12682_v51 = vadd.f32 %v12644_v39, %v18202_v17  ;;  %v12695_v52 = vsel %vm167_vm2, %v12683_v44, 0.0 }
0x1f2e   :  { %12696 = vadd.xlane.f32.xlu0 %v12695_v52 }
0x1f2f   :  { %v12692_v20 = vsel %vm167_vm2, %v12682_v51, 0.0 }
0x1f30   :  { %12693 = vadd.xlane.f32.xlu1 %v12692_v20 }
0x1f34   :  { %v15377_v0 = vpop.f32.mrf.mxu1 }
0x1f35   :  { %v12659_v56 = vadd.f32 %v15377_v0, %v14079_v6 }
0x1f36   :  { %v12653_v18 = vpop.f32.mrf.mxu1 }
0x1f37   :  { %v12685_v14 = vadd.f32 %v12659_v56, %v18221_v31  ;;  %v12654_v10 = vadd.f32 %v14079_v6, %v12653_v18 }
0x1f39   :  { %v12684_v25 = vadd.f32 %v12654_v10, %v18211_v12  ;;  %v15380_v57 = vpop.f32.mrf.mxu1  ;;  %v12701_v53 = vsel %vm167_vm2, %v12685_v14, 0.0 }
0x1f3a   :  { %v12669_v62 = vadd.f32 %v15380_v57, %v14079_v6  ;;  %12702 = vadd.xlane.f32.xlu0 %v12701_v53 }
0x1f3b   :  { %v12663_v17 = vpop.f32.mrf.mxu1  ;;  %v12698_v11 = vsel %vm167_vm2, %v12684_v25, 0.0 }
0x1f3c   :  { %v12687_v60 = vadd.f32 %v12669_v62, %v18230_v32  ;;  %v12664_v21 = vadd.f32 %v14079_v6, %v12663_v17  ;;  %12699 = vadd.xlane.f32.xlu1 %v12698_v11 }
0x1f3d   :  { %v15383_v59 = vpop.f32.mrf.mxu1 }
0x1f3e   :  { %v12686_v9 = vadd.f32 %v12664_v21, %v18217_v36  ;;  %v12679_v23 = vadd.f32 %v15383_v59, %v14079_v6  ;;  %v12707_v31 = vsel %vm167_vm2, %v12687_v60, 0.0 }
0x1f3f   :  { %12708 = vadd.xlane.f32.xlu0 %v12707_v31  ;;  %v12673_v12 = vpop.f32.mrf.mxu1 }
0x1f40   :  { %v12689_v1 = vadd.f32 %v12679_v23, %v18236_v30  ;;  %v12674_v55 = vadd.f32 %v14079_v6, %v12673_v12  ;;  %v12704_v33 = vsel %vm167_vm2, %v12686_v9, 0.0  ;;  %v14088_v23 = vld [vmem:[%s18736_s1 + $0x168] ss:$0 sm:$0xff] }
0x1f41   :  { %12705 = vadd.xlane.f32.xlu1 %v12704_v33 }
0x1f42   :  { %v12688_v16 = vadd.f32 %v12674_v55, %v18228_v46  ;;  %v12713_v32 = vsel %vm167_vm2, %v12689_v1, 0.0 }
0x1f43   :  { %12714 = vadd.xlane.f32.xlu0 %v12713_v32 }
0x1f44   :  { %v12710_v37 = vsel %vm167_vm2, %v12688_v16, 0.0 }
0x1f45   :  { %12711 = vadd.xlane.f32.xlu1 %v12710_v37 }
0x1fb7   :  { %v12697_v36 = vpop.xlane.xlu0 %12696 }
0x1fb8   :  { %v12717_v8 = vmul.f32 0.03125, %v12697_v36 }
0x1fb9   :  { %v12694_v22 = vpop.xlane.xlu1 %12693 }
0x1fba   :  { %v18315_v3 = vsub.f32 %v12683_v44, %v12717_v8  ;;  %v12716_v34 = vmul.f32 0.03125, %v12694_v22 }
0x1fbc   :  { %v18317_v47 = vsub.f32 %v12682_v51, %v12716_v34  ;;  %v12733_v30 = vmul.f32 %v18315_v3, %v18315_v3 }
0x1fbe   :  { %v12743_v49 = vsel %vm167_vm2, %v12733_v30, 0.0  ;;  %v12732_v46 = vmul.f32 %v18317_v47, %v18317_v47 }
0x1fbf   :  { %12744 = vadd.xlane.f32.xlu0 %v12743_v49 }
0x1fc0   :  { %v12740_v38 = vsel %vm167_vm2, %v12732_v46, 0.0 }
0x1fc1   :  { %12741 = vadd.xlane.f32.xlu1 %v12740_v38 }
0x1fc3   :  { %v12703_v26 = vpop.xlane.xlu0 %12702 }
0x1fc4   :  { %v12719_v28 = vmul.f32 0.03125, %v12703_v26 }
0x1fc5   :  { %v12700_v42 = vpop.xlane.xlu1 %12699 }
0x1fc6   :  { %v18325_v29 = vsub.f32 %v12685_v14, %v12719_v28  ;;  %v12718_v4 = vmul.f32 0.03125, %v12700_v42 }
0x1fc8   :  { %v18327_v41 = vsub.f32 %v12684_v25, %v12718_v4  ;;  %v12709_v63 = vpop.xlane.xlu0 %12708  ;;  %v12735_v13 = vmul.f32 %v18325_v29, %v18325_v29 }
0x1fc9   :  { %v12721_v50 = vmul.f32 0.03125, %v12709_v63 }
0x1fca   :  { %v12706_v58 = vpop.xlane.xlu1 %12705  ;;  %v12749_v19 = vsel %vm167_vm2, %v12735_v13, 0.0  ;;  %v12734_v35 = vmul.f32 %v18327_v41, %v18327_v41 }
0x1fcb   :  { %v18334_v24 = vsub.f32 %v12687_v60, %v12721_v50  ;;  %v12720_v43 = vmul.f32 0.03125, %v12706_v58  ;;  %12750 = vadd.xlane.f32.xlu0 %v12749_v19 }
0x1fcc   :  { %v12715_v15 = vpop.xlane.xlu0 %12714  ;;  %v12746_v48 = vsel %vm167_vm2, %v12734_v35, 0.0 }
0x1fcd   :  { %v18337_v40 = vsub.f32 %v12686_v9, %v12720_v43  ;;  %v12723_v61 = vmul.f32 0.03125, %v12715_v15  ;;  %12747 = vadd.xlane.f32.xlu1 %v12746_v48  ;;  %v12737_v7 = vmul.f32 %v18334_v24, %v18334_v24 }
0x1fce   :  { %v12712_v5 = vpop.xlane.xlu1 %12711 }
0x1fcf   :  { %v18341_v45 = vsub.f32 %v12689_v1, %v12723_v61  ;;  %v12722_v6 = vmul.f32 0.03125, %v12712_v5  ;;  %v12755_v27 = vsel %vm167_vm2, %v12737_v7, 0.0  ;;  %v12736_v54 = vmul.f32 %v18337_v40, %v18337_v40 }
0x1fd0   :  { %12756 = vadd.xlane.f32.xlu0 %v12755_v27 }
0x1fd1   :  { %v18346_v2 = vsub.f32 %v12688_v16, %v12722_v6  ;;  %v12752_v44 = vsel %vm167_vm2, %v12736_v54, 0.0  ;;  %v12739_v39 = vmul.f32 %v18341_v45, %v18341_v45  ;;  %v14089_v16 = vld [vmem:[%s18736_s1 + $0x170] ss:$0 sm:$0xff] }
0x1fd2   :  { %12753 = vadd.xlane.f32.xlu1 %v12752_v44 }
0x1fd3   :  { %v12761_v51 = vsel %vm167_vm2, %v12739_v39, 0.0  ;;  %v12738_v52 = vmul.f32 %v18346_v2, %v18346_v2 }
0x1fd4   :  { %12762 = vadd.xlane.f32.xlu0 %v12761_v51 }
0x1fd5   :  { %v12758_v20 = vsel %vm167_vm2, %v12738_v52, 0.0 }
0x1fd6   :  { %12759 = vadd.xlane.f32.xlu1 %v12758_v20 }
0x2048   :  { %v12745_v0 = vpop.xlane.xlu0 %12744 }
0x2049   :  { %v12765_v56 = vmul.f32 0.03125, %v12745_v0 }
0x204a   :  { %v12742_v18 = vpop.xlane.xlu1 %12741 }
0x204b   :  { %v12773_v14 = vadd.f32 1e-05, %v12765_v56  ;;  %v12764_v10 = vmul.f32 0.03125, %v12742_v18 }
0x204d   :  { %15816 = vrsqrt.f32 %v12773_v14  ;;  %v12772_v25 = vadd.f32 1e-05, %v12764_v10 }
0x204f   :  { %15818 = vrsqrt.f32 %v12772_v25 }
0x2054   :  { %v12751_v57 = vpop.xlane.xlu0 %12750 }
0x2055   :  { %v12767_v53 = vmul.f32 0.03125, %v12751_v57 }
0x2056   :  { %v12748_v62 = vpop.xlane.xlu1 %12747 }
0x2057   :  { %v12775_v17 = vadd.f32 1e-05, %v12767_v53  ;;  %v12766_v11 = vmul.f32 0.03125, %v12748_v62 }
0x2059   :  { %15820 = vrsqrt.f32 %v12775_v17  ;;  %v12774_v60 = vadd.f32 1e-05, %v12766_v11  ;;  %v12757_v21 = vpop.xlane.xlu0 %12756 }
0x205a   :  { %v15817_v59 = vpop.eup %15816  ;;  %v12769_v9 = vmul.f32 0.03125, %v12757_v21 }
0x205b   :  { %15822 = vrsqrt.f32 %v12774_v60  ;;  %v12754_v31 = vpop.xlane.xlu1 %12753  ;;  %v12789_v12 = vmul.f32 %v15817_v59, %v18315_v3 }
0x205c   :  { %v15819_v1 = vpop.eup %15818  ;;  %v12777_v55 = vadd.f32 1e-05, %v12769_v9  ;;  %v12768_v33 = vmul.f32 0.03125, %v12754_v31 }
0x205d   :  { %v12763_v32 = vpop.xlane.xlu0 %12762  ;;  %v12801_v37 = vmul.f32 %v14088_v23, %v12789_v12  ;;  %v12788_v36 = vmul.f32 %v15819_v1, %v18317_v47 }
0x205e   :  { %15824 = vrsqrt.f32 %v12777_v55  ;;  %v12776_v8 = vadd.f32 1e-05, %v12768_v33  ;;  %v12771_v22 = vmul.f32 0.03125, %v12763_v32 }
0x205f   :  { %v12760_v34 = vpop.xlane.xlu1 %12759  ;;  %v18363_v30 = vadd.f32 %v14089_v16, %v12801_v37  ;;  %v12800_v49 = vmul.f32 %v14088_v23, %v12788_v36 }
0x2060   :  { %15826 = vrsqrt.f32 %v12776_v8  ;;  %v12779_v3 = vadd.f32 1e-05, %v12771_v22  ;;  %v12770_v46 = vmul.f32 0.03125, %v12760_v34 }
0x2061   :  { %v12825_v38 = vsel %vm167_vm2, %v18363_v30, 0.0  ;;  %v18367_v26 = vadd.f32 %v14089_v16, %v12800_v49 }
0x2062   :  { %15828 = vrsqrt.f32 %v12779_v3  ;;  %v12778_v28 = vadd.f32 1e-05, %v12770_v46  ;;  %12826 = vadd.xlane.f32.xlu0 %v12825_v38 }
0x2063   :  { %v12822_v47 = vsel %vm167_vm2, %v18367_v26, 0.0 }
0x2064   :  { %15830 = vrsqrt.f32 %v12778_v28  ;;  %12823 = vadd.xlane.f32.xlu1 %v12822_v47 }
0x2066   :  { %v15821_v42 = vpop.eup %15820 }
0x2067   :  { %v12791_v4 = vmul.f32 %v15821_v42, %v18325_v29 }
0x2068   :  { %v15823_v63 = vpop.eup %15822 }
0x2069   :  { %v12803_v13 = vmul.f32 %v14088_v23, %v12791_v4  ;;  %v12790_v50 = vmul.f32 %v15823_v63, %v18327_v41 }
0x206b   :  { %v15825_v58 = vpop.eup %15824  ;;  %v18373_v19 = vadd.f32 %v14089_v16, %v12803_v13  ;;  %v12802_v35 = vmul.f32 %v14088_v23, %v12790_v50 }
0x206c   :  { %v12793_v43 = vmul.f32 %v15825_v58, %v18334_v24 }
0x206d   :  { %v15827_v15 = vpop.eup %15826  ;;  %v12831_v48 = vsel %vm167_vm2, %v18373_v19, 0.0  ;;  %v18378_v61 = vadd.f32 %v14089_v16, %v12802_v35 }
0x206e   :  { %12832 = vadd.xlane.f32.xlu0 %v12831_v48  ;;  %v12805_v7 = vmul.f32 %v14088_v23, %v12793_v43  ;;  %v12792_v29 = vmul.f32 %v15827_v15, %v18337_v40  ;;  %v12953_v15 = vld [vmem:[%s18736_s1 + $0x210] sm:$0xff]  ;;  %v12952_v48 = vld [vmem:[%s18736_s1 + $0x208] sm:$0xff] }
0x206f   :  { %v15829_v5 = vpop.eup %15828  ;;  %v12828_v41 = vsel %vm167_vm2, %v18378_v61, 0.0  ;;  %15384 = vmatprep.subr.mxu0 %v12953_v15 }
0x2070   :  { %12829 = vadd.xlane.f32.xlu1 %v12828_v41  ;;  %v18383_v6 = vadd.f32 %v14089_v16, %v12805_v7  ;;  %v12804_v27 = vmul.f32 %v14088_v23, %v12792_v29  ;;  %v12795_v24 = vmul.f32 %v15829_v5, %v18341_v45  ;;  %15385 = vmatpush3.msra.mxu0 %v12953_v15  ;;  %v12951_v7 = vld [vmem:[%s18736_s1 + $0x200] sm:$0xff]  ;;  %v12950_v29 = vld [vmem:[%s18736_s1 + $0x1f8] sm:$0xff] }
0x2071   :  { %v15831_v54 = vpop.eup %15830  ;;  %15386 = vmatprep.subr.mxu0 %v12952_v48  ;;  %v13365_v5 = vld [vmem:[%s18736_s1 + $0x260] sm:$0xff] }
0x2072   :  { %v12837_v44 = vsel %vm167_vm2, %v18383_v6, 0.0  ;;  %v18388_v39 = vadd.f32 %v14089_v16, %v12804_v27  ;;  %v12807_v51 = vmul.f32 %v14088_v23, %v12795_v24  ;;  %v12794_v52 = vmul.f32 %v15831_v54, %v18346_v2  ;;  %15387 = vmatpush3.msra.mxu0 %v12952_v48 }
0x2073   :  { %12838 = vadd.xlane.f32.xlu0 %v12837_v44  ;;  %15388 = vmatprep.subr.mxu0 %v12951_v7 }
0x2074   :  { %v12834_v40 = vsel %vm167_vm2, %v18388_v39, 0.0  ;;  %v18393_v20 = vadd.f32 %v14089_v16, %v12807_v51  ;;  %v12806_v0 = vmul.f32 %v14088_v23, %v12794_v52  ;;  %15389 = vmatpush3.msra.mxu0 %v12951_v7 }
0x2075   :  { %12835 = vadd.xlane.f32.xlu1 %v12834_v40  ;;  %15390 = vmatprep.subr.mxu0 %v12950_v29 }
0x2076   :  { %v12843_v45 = vsel %vm167_vm2, %v18393_v20, 0.0  ;;  %v18397_v56 = vadd.f32 %v14089_v16, %v12806_v0  ;;  %15391 = vmatpush3.msra.mxu0 %v12950_v29 }
0x2077   :  { %12844 = vadd.xlane.f32.xlu0 %v12843_v45  ;;  %15420 = vmatprep.subr.mxu0 %v13365_v5 }
0x2078   :  { %v12840_v18 = vsel %vm167_vm2, %v18397_v56, 0.0 }
0x2079   :  { %12841 = vadd.xlane.f32.xlu1 %v12840_v18 }
0x20eb   :  { %v12827_v14 = vpop.xlane.xlu0 %12826 }
0x20ec   :  { %v12847_v2 = vmul.f32 0.03125, %v12827_v14 }
0x20ed   :  { %v12824_v10 = vpop.xlane.xlu1 %12823 }
0x20ee   :  { %v18402_v25 = vsub.f32 %v18363_v30, %v12847_v2  ;;  %v12846_v57 = vmul.f32 0.03125, %v12824_v10 }
0x20f0   :  { %v18405_v53 = vsub.f32 %v18367_v26, %v12846_v57  ;;  %v12863_v62 = vmul.f32 %v18402_v25, %v18402_v25 }
0x20f2   :  { %v12873_v17 = vsel %vm167_vm2, %v12863_v62, 0.0  ;;  %v12862_v11 = vmul.f32 %v18405_v53, %v18405_v53  ;;  %v14090_v62 = vld [vmem:[%s18736_s1 + $0x1e8] ss:$0 sm:$0xff] }
0x20f3   :  { %12874 = vadd.xlane.f32.xlu0 %v12873_v17 }
0x20f4   :  { %v12870_v60 = vsel %vm167_vm2, %v12862_v11, 0.0 }
0x20f5   :  { %12871 = vadd.xlane.f32.xlu1 %v12870_v60 }
0x20f7   :  { %v12833_v21 = vpop.xlane.xlu0 %12832 }
0x20f8   :  { %v12849_v59 = vmul.f32 0.03125, %v12833_v21 }
0x20f9   :  { %v12830_v9 = vpop.xlane.xlu1 %12829 }
0x20fa   :  { %v18414_v23 = vsub.f32 %v18373_v19, %v12849_v59  ;;  %v12848_v31 = vmul.f32 0.03125, %v12830_v9 }
0x20fc   :  { %v18417_v12 = vsub.f32 %v18378_v61, %v12848_v31  ;;  %v12839_v1 = vpop.xlane.xlu0 %12838  ;;  %v12865_v55 = vmul.f32 %v18414_v23, %v18414_v23 }
0x20fd   :  { %v12851_v33 = vmul.f32 0.03125, %v12839_v1 }
0x20fe   :  { %v12836_v16 = vpop.xlane.xlu1 %12835  ;;  %v12879_v32 = vsel %vm167_vm2, %v12865_v55, 0.0  ;;  %v12864_v37 = vmul.f32 %v18417_v12, %v18417_v12 }
0x20ff   :  { %v18425_v36 = vsub.f32 %v18383_v6, %v12851_v33  ;;  %v12850_v8 = vmul.f32 0.03125, %v12836_v16  ;;  %12880 = vadd.xlane.f32.xlu0 %v12879_v32  ;;  %v14091_v16 = vld [vmem:[%s18736_s1 + $0x1f0] ss:$0 sm:$0xff] }
0x2100   :  { %v12845_v22 = vpop.xlane.xlu0 %12844  ;;  %v12876_v34 = vsel %vm167_vm2, %v12864_v37, 0.0 }
0x2101   :  { %v18429_v49 = vsub.f32 %v18388_v39, %v12850_v8  ;;  %v12853_v3 = vmul.f32 0.03125, %v12845_v22  ;;  %12877 = vadd.xlane.f32.xlu1 %v12876_v34  ;;  %v12867_v46 = vmul.f32 %v18425_v36, %v18425_v36 }
0x2102   :  { %v12842_v38 = vpop.xlane.xlu1 %12841 }
0x2103   :  { %v18434_v28 = vsub.f32 %v18393_v20, %v12853_v3  ;;  %v12852_v47 = vmul.f32 0.03125, %v12842_v38  ;;  %v12885_v42 = vsel %vm167_vm2, %v12867_v46, 0.0  ;;  %v12866_v4 = vmul.f32 %v18429_v49, %v18429_v49  ;;  %v13363_v46 = vld [vmem:[%s18736_s1 + $0x250] sm:$0xff] }
0x2104   :  { %12886 = vadd.xlane.f32.xlu0 %v12885_v42  ;;  %v13362_v42 = vld [vmem:[%s18736_s1 + $0x248] sm:$0xff] }
0x2105   :  { %v18440_v63 = vsub.f32 %v18397_v56, %v12852_v47  ;;  %v12882_v13 = vsel %vm167_vm2, %v12866_v4, 0.0  ;;  %v12869_v50 = vmul.f32 %v18434_v28, %v18434_v28 }
0x2106   :  { %12883 = vadd.xlane.f32.xlu1 %v12882_v13 }
0x2107   :  { %v12891_v58 = vsel %vm167_vm2, %v12869_v50, 0.0  ;;  %v12868_v35 = vmul.f32 %v18440_v63, %v18440_v63 }
0x2108   :  { %12892 = vadd.xlane.f32.xlu0 %v12891_v58 }
0x2109   :  { %v12888_v43 = vsel %vm167_vm2, %v12868_v35, 0.0 }
0x210a   :  { %12889 = vadd.xlane.f32.xlu1 %v12888_v43 }
0x217c   :  { %v12875_v41 = vpop.xlane.xlu0 %12874 }
0x217d   :  { %v12895_v27 = vmul.f32 0.03125, %v12875_v41 }
0x217e   :  { %v12872_v24 = vpop.xlane.xlu1 %12871 }
0x217f   :  { %v12903_v54 = vadd.f32 1e-05, %v12895_v27  ;;  %v12894_v44 = vmul.f32 0.03125, %v12872_v24 }
0x2181   :  { %15832 = vrsqrt.f32 %v12903_v54  ;;  %v12902_v51 = vadd.f32 1e-05, %v12894_v44 }
0x2183   :  { %15834 = vrsqrt.f32 %v12902_v51 }
0x2188   :  { %v12881_v52 = vpop.xlane.xlu0 %12880 }
0x2189   :  { %v12897_v40 = vmul.f32 0.03125, %v12881_v52 }
0x218a   :  { %v12878_v0 = vpop.xlane.xlu1 %12877 }
0x218b   :  { %v12905_v45 = vadd.f32 1e-05, %v12897_v40  ;;  %v12896_v18 = vmul.f32 0.03125, %v12878_v0  ;;  %v14111_v40 = vld [vmem:[%s18736_s1 + $0x240] ss:$0 sm:$0xff] }
0x218d   :  { %15836 = vrsqrt.f32 %v12905_v45  ;;  %v12904_v14 = vadd.f32 1e-05, %v12896_v18  ;;  %v12887_v2 = vpop.xlane.xlu0 %12886 }
0x218e   :  { %v15833_v10 = vpop.eup %15832  ;;  %v12899_v57 = vmul.f32 0.03125, %v12887_v2 }
0x218f   :  { %v18468_v17 = vmul.f32 %v15833_v10, %v18402_v25  ;;  %15838 = vrsqrt.f32 %v12904_v14  ;;  %v12884_v11 = vpop.xlane.xlu1 %12883 }
0x2190   :  { %v15835_v60 = vpop.eup %15834  ;;  %v12907_v21 = vadd.f32 1e-05, %v12899_v57  ;;  %v12898_v59 = vmul.f32 0.03125, %v12884_v11 }
0x2191   :  { %v12893_v9 = vpop.xlane.xlu0 %12892  ;;  %v12918_v31 = vmul.f32 %v15835_v60, %v18405_v53  ;;  %v12931_v1 = vmul.f32 %v14090_v62, %v18468_v17  ;;  %v13364_v53 = vld [vmem:[%s18736_s1 + $0x258] sm:$0xff] }
0x2192   :  { %15840 = vrsqrt.f32 %v12907_v21  ;;  %v12906_v55 = vadd.f32 1e-05, %v12898_v59  ;;  %v12901_v33 = vmul.f32 0.03125, %v12893_v9 }
0x2193   :  { %v12890_v32 = vpop.xlane.xlu1 %12889  ;;  %v12930_v25 = vmul.f32 %v14090_v62, %v12918_v31  ;;  %v12943_v34 = vadd.f32 %v14091_v16, %v12931_v1  ;;  %v13161_v1 = vld [vmem:[%s18736_s1 + $0x228] sm:$0xff] }
0x2194   :  { %15842 = vrsqrt.f32 %v12906_v55  ;;  %v12909_v37 = vadd.f32 1e-05, %v12901_v33  ;;  %v12900_v8 = vmul.f32 0.03125, %v12890_v32  ;;  %15404 = vmatprep.subr.mxu1 %v13161_v1  ;;  %v13160_v55 = vld [vmem:[%s18736_s1 + $0x220] sm:$0xff]  ;;  %v18522_v33 = vld [vmem:[%s18736_s1 + $0x270] sm:$0xff] }
0x2195   :  { %v12942_v22 = vadd.f32 %v14091_v16, %v12930_v25  ;;  %15405 = vmatpush3.msra.mxu1 %v13161_v1 }
0x2196   :  { %15844 = vrsqrt.f32 %v12909_v37  ;;  %v12908_v3 = vadd.f32 1e-05, %v12900_v8  ;;  %15406 = vmatprep.subr.mxu1 %v13160_v55 }
0x2197   :  { %15392 = vmatprep.mubr.msk.f32.mxu0 %vm167_vm2, %v12942_v22  ;;  %15407 = vmatpush3.msra.mxu1 %v13160_v55 }
0x2198   :  { %15846 = vrsqrt.f32 %v12908_v3  ;;  %15393 = vmatmul.mubr.msk.f32.vlgmr.msra.gmra.mxu0 %vm167_vm2, %v12943_v34  ;;  %15440 = vmatprep.subr.mxu1 %v18522_v33 }
0x2199   :  { %15421 = vmatpush3.msra.mxu0 %v13365_v5 }
0x219a   :  { %v15837_v38 = vpop.eup %15836  ;;  %15422 = vmatprep.subr.mxu0 %v13364_v53 }
0x219b   :  { %v12921_v47 = vmul.f32 %v15837_v38, %v18414_v23  ;;  %15423 = vmatpush3.msra.mxu0 %v13364_v53 }
0x219c   :  { %v15839_v4 = vpop.eup %15838  ;;  %15424 = vmatprep.subr.mxu0 %v13363_v46 }
0x219d   :  { %v12920_v13 = vmul.f32 %v15839_v4, %v18417_v12  ;;  %15425 = vmatpush3.msra.mxu0 %v13363_v46  ;;  %v12933_v50 = vmul.f32 %v14090_v62, %v12921_v47 }
0x219e   :  { %15426 = vmatprep.subr.mxu0 %v13362_v42 }
0x219f   :  { %v15841_v58 = vpop.eup %15840  ;;  %v12932_v35 = vmul.f32 %v14090_v62, %v12920_v13  ;;  %15427 = vmatpush3.msra.mxu0 %v13362_v42  ;;  %v12945_v23 = vadd.f32 %v14091_v16, %v12933_v50 }
0x21a0   :  { %v12923_v43 = vmul.f32 %v15841_v58, %v18425_v36  ;;  %v14110_v36 = vld [vmem:[%s18736_s1 + $0x238] ss:$0 sm:$0xff] }
0x21a1   :  { %v15843_v15 = vpop.eup %15842  ;;  %v12944_v48 = vadd.f32 %v14091_v16, %v12932_v35  ;;  %v13342_v52 = vmul.f32 %v14110_v36, %v12918_v31  ;;  %v13343_v0 = vmul.f32 %v14110_v36, %v18468_v17  ;;  %v13344_v18 = vmul.f32 %v14110_v36, %v12920_v13 }
0x21a2   :  { %v12922_v7 = vmul.f32 %v15843_v15, %v18429_v49  ;;  %v12935_v5 = vmul.f32 %v14090_v62, %v12923_v43  ;;  %v13345_v2 = vmul.f32 %v14110_v36, %v12921_v47  ;;  %v13347_v11 = vmul.f32 %v14110_v36, %v12923_v43 }
0x21a3   :  { %v15845_v29 = vpop.eup %15844  ;;  %15395 = vmatprep.mubr.msk.f32.mxu0 %vm167_vm2, %v12944_v48  ;;  %v13354_v45 = vadd.f32 %v14111_v40, %v13342_v52  ;;  %v13355_v14 = vadd.f32 %v14111_v40, %v13343_v0  ;;  %v13356_v10 = vadd.f32 %v14111_v40, %v13344_v18 }
0x21a4   :  { %v12925_v41 = vmul.f32 %v15845_v29, %v18434_v28  ;;  %15396 = vmatmul.mubr.msk.f32.gmra.mxu0 %vm167_vm2, %v12945_v23  ;;  %v12934_v12 = vmul.f32 %v14090_v62, %v12922_v7  ;;  %v12947_v44 = vadd.f32 %v14091_v16, %v12935_v5  ;;  %v13346_v57 = vmul.f32 %v14110_v36, %v12922_v7 }
0x21a5   :  { %v15847_v27 = vpop.eup %15846  ;;  %v13359_v21 = vadd.f32 %v14111_v40, %v13347_v11 }
0x21a6   :  { %v12946_v24 = vadd.f32 %v14091_v16, %v12934_v12  ;;  %v12924_v54 = vmul.f32 %v15847_v27, %v18440_v63  ;;  %v12937_v51 = vmul.f32 %v14090_v62, %v12925_v41  ;;  %v13358_v17 = vadd.f32 %v14111_v40, %v13346_v57 }
0x21a7   :  { %v13349_v59 = vmul.f32 %v14110_v36, %v12925_v41 }
0x21a8   :  { %15398 = vmatprep.mubr.msk.f32.mxu0 %vm167_vm2, %v12946_v24  ;;  %v12936_v49 = vmul.f32 %v14090_v62, %v12924_v54  ;;  %v12949_v63 = vadd.f32 %v14091_v16, %v12937_v51  ;;  %v13357_v62 = vadd.f32 %v14111_v40, %v13345_v2  ;;  %v13348_v60 = vmul.f32 %v14110_v36, %v12924_v54 }
0x21a9   :  { %15399 = vmatmul.mubr.msk.f32.gmra.mxu0 %vm167_vm2, %v12947_v44  ;;  %v13361_v31 = vadd.f32 %v14111_v40, %v13349_v59 }
0x21aa   :  { %v12948_v28 = vadd.f32 %v14091_v16, %v12936_v49  ;;  %v13360_v9 = vadd.f32 %v14111_v40, %v13348_v60  ;;  %v14092_v16 = vld [vmem:[%s18736_s1 + $0x218] ss:$0 sm:$0xff] }
0x21ac   :  { %15401 = vmatprep.mubr.msk.f32.mxu0 %vm167_vm2, %v12948_v28 }
0x21ad   :  { %15402 = vmatmul.mubr.msk.f32.gmra.mxu0 %vm167_vm2, %v12949_v63  ;;  %v18552_v63 = vld [vmem:[%s18736_s1 + $0x268] ss:$0 sm:$0xff] }
0x21ae   :  { %15428 = vmatprep.mubr.msk.f32.mxu0 %vm167_vm2, %v13354_v45 }
0x21b1   :  { %15429 = vmatmul.mubr.msk.f32.vlgmr.msra.gmra.mxu0 %vm167_vm2, %v13355_v14 }
0x21b2   :  { %15431 = vmatprep.mubr.msk.f32.mxu0 %vm167_vm2, %v13356_v10 }
0x21b5   :  { %15432 = vmatmul.mubr.msk.f32.gmra.mxu0 %vm167_vm2, %v13357_v62 }
0x21b6   :  { %15434 = vmatprep.mubr.msk.f32.mxu0 %vm167_vm2, %v13358_v17 }
0x21b9   :  { %15435 = vmatmul.mubr.msk.f32.gmra.mxu0 %vm167_vm2, %v13359_v21 }
0x21ba   :  { %15437 = vmatprep.mubr.msk.f32.mxu0 %vm167_vm2, %v13360_v9 }
0x21bd   :  { %15438 = vmatmul.mubr.msk.f32.gmra.mxu0 %vm167_vm2, %v13361_v31 }
0x2258   :  { %v15394_v32 = vpop.f32.mrf.mxu0 }
0x2259   :  { %v13055_v25 = vadd.f32 %v15394_v32, %v14092_v16 }
0x225a   :  { %v13049_v37 = vpop.f32.mrf.mxu0 }
0x225b   :  { %v13097_v8 = vmul.f32 0.044715, %v13055_v25  ;;  %v13050_v22 = vadd.f32 %v14092_v16, %v13049_v37  ;;  %v13089_v1 = vmul.f32 0.5, %v13055_v25 }
0x225d   :  { %v13105_v34 = vmul.f32 %v13097_v8, %v13055_v25  ;;  %v13096_v3 = vmul.f32 0.044715, %v13050_v22 }
0x225f   :  { %v13113_v53 = vmul.f32 %v13105_v34, %v13055_v25  ;;  %v13104_v46 = vmul.f32 %v13096_v3, %v13050_v22 }
0x2261   :  { %v13121_v38 = vadd.f32 %v13113_v53, %v13055_v25  ;;  %v13112_v47 = vmul.f32 %v13104_v46, %v13050_v22  ;;  %v13088_v53 = vmul.f32 0.5, %v13050_v22 }
0x2263   :  { %v13129_v42 = vmul.f32 0.7978846, %v13121_v38  ;;  %v13120_v4 = vadd.f32 %v13112_v47, %v13050_v22 }
0x2264   :  { %v15397_v13 = vpop.f32.mrf.mxu0 }
0x2265   :  { %v18528_v50 = vadd.f32 %v15397_v13, %v14092_v16  ;;  %v13128_v58 = vmul.f32 0.7978846, %v13120_v4  ;;  %15848 = vtanh.f32 %v13129_v42 }
0x2266   :  { %v13059_v35 = vpop.f32.mrf.mxu0 }
0x2267   :  { %v13099_v43 = vmul.f32 0.044715, %v18528_v50  ;;  %v18531_v15 = vadd.f32 %v14092_v16, %v13059_v35  ;;  %15850 = vtanh.f32 %v13128_v58 }
0x2269   :  { %v13107_v48 = vmul.f32 %v13099_v43, %v18528_v50  ;;  %v13098_v23 = vmul.f32 0.044715, %v18531_v15  ;;  %v15400_v7 = vpop.f32.mrf.mxu0 }
0x226a   :  { %v18535_v29 = vadd.f32 %v15400_v7, %v14092_v16 }
0x226b   :  { %v13115_v5 = vmul.f32 %v13107_v48, %v18528_v50  ;;  %v13106_v41 = vmul.f32 %v13098_v23, %v18531_v15  ;;  %v13069_v12 = vpop.f32.mrf.mxu0 }
0x226c   :  { %v13101_v27 = vmul.f32 0.044715, %v18535_v29  ;;  %v18540_v24 = vadd.f32 %v14092_v16, %v13069_v12 }
0x226d   :  { %v13123_v54 = vadd.f32 %v13115_v5, %v18528_v50  ;;  %v13114_v36 = vmul.f32 %v13106_v41, %v18531_v15  ;;  %v15403_v44 = vpop.f32.mrf.mxu0 }
0x226e   :  { %v13109_v51 = vmul.f32 %v13101_v27, %v18535_v29  ;;  %v13100_v49 = vmul.f32 0.044715, %v18540_v24  ;;  %v18546_v52 = vadd.f32 %v15403_v44, %v14092_v16 }
0x226f   :  { %v13131_v28 = vmul.f32 0.7978846, %v13123_v54  ;;  %v13122_v40 = vadd.f32 %v13114_v36, %v18531_v15  ;;  %v13079_v0 = vpop.f32.mrf.mxu0 }
0x2270   :  { %v13117_v45 = vmul.f32 %v13109_v51, %v18535_v29  ;;  %v13108_v18 = vmul.f32 %v13100_v49, %v18540_v24  ;;  %v13103_v14 = vmul.f32 0.044715, %v18546_v52  ;;  %v18557_v2 = vadd.f32 %v14092_v16, %v13079_v0 }
0x2271   :  { %15852 = vtanh.f32 %v13131_v28  ;;  %v15430_v10 = vpop.f32.mrf.mxu0  ;;  %v13130_v57 = vmul.f32 0.7978846, %v13122_v40 }
0x2272   :  { %v13125_v62 = vadd.f32 %v13117_v45, %v18535_v29  ;;  %v13116_v11 = vmul.f32 %v13108_v18, %v18540_v24  ;;  %v13111_v17 = vmul.f32 %v13103_v14, %v18546_v52  ;;  %v18563_v60 = vadd.f32 %v15430_v10, %v18552_v63  ;;  %v15849_v21 = vpop.eup %15848 }
0x2273   :  { %v13102_v59 = vmul.f32 0.044715, %v18557_v2  ;;  %v13461_v9 = vpop.f32.mrf.mxu0  ;;  %15854 = vtanh.f32 %v13130_v57  ;;  %v13145_v46 = vadd.f32 1.0, %v15849_v21 }
0x2274   :  { %v15851_v31 = vpop.eup %15850  ;;  %v13133_v55 = vmul.f32 0.7978846, %v13125_v62  ;;  %v13124_v16 = vadd.f32 %v13116_v11, %v18540_v24  ;;  %v13119_v32 = vmul.f32 %v13111_v17, %v18546_v52  ;;  %v13509_v8 = vmul.f32 0.044715, %v18563_v60 }
0x2275   :  { %v13110_v37 = vmul.f32 %v13102_v59, %v18557_v2  ;;  %v18571_v34 = vadd.f32 %v18552_v63, %v13461_v9  ;;  %v15433_v3 = vpop.f32.mrf.mxu0  ;;  %v13144_v25 = vadd.f32 1.0, %v15851_v31  ;;  %v13153_v27 = vmul.f32 %v13145_v46, %v13089_v1 }
0x2276   :  { %v13127_v38 = vadd.f32 %v13119_v32, %v18546_v52  ;;  %v18575_v47 = vadd.f32 %v15433_v3, %v18552_v63  ;;  %v13517_v4 = vmul.f32 %v13509_v8, %v18563_v60  ;;  %v13132_v35 = vmul.f32 0.7978846, %v13124_v16 }
0x2277   :  { %v13118_v42 = vmul.f32 %v13110_v37, %v18557_v2  ;;  %v13508_v13 = vmul.f32 0.044715, %v18571_v34  ;;  %v13471_v58 = vpop.f32.mrf.mxu0  ;;  %15856 = vtanh.f32 %v13133_v55  ;;  %v13152_v12 = vmul.f32 %v13144_v25, %v13088_v53 }
0x2278   :  { %v13135_v43 = vmul.f32 0.7978846, %v13127_v38  ;;  %v13511_v48 = vmul.f32 0.044715, %v18575_v47  ;;  %v18582_v22 = vadd.f32 %v18552_v63, %v13471_v58  ;;  %v13525_v7 = vmul.f32 %v13517_v4, %v18563_v60 }
0x2279   :  { %v13126_v23 = vadd.f32 %v13118_v42, %v18557_v2  ;;  %v13516_v5 = vmul.f32 %v13508_v13, %v18571_v34  ;;  %v15436_v41 = vpop.f32.mrf.mxu0  ;;  %15408 = vmatprep.mubr.msk.f32.mxu1 %vm5706_vm6, %v13152_v12  ;;  %15858 = vtanh.f32 %v13132_v35  ;;  %v13090_v55 = vmul.f32 0.5, %v18531_v15 }
0x227a   :  { %v13519_v54 = vmul.f32 %v13511_v48, %v18575_v47  ;;  %v13510_v36 = vmul.f32 0.044715, %v18582_v22  ;;  %v18590_v44 = vadd.f32 %v15436_v41, %v18552_v63  ;;  %v13533_v51 = vadd.f32 %v13525_v7, %v18563_v60  ;;  %15409 = vmatmul.mubr.msk.f32.vlgmr.msra.gmra.mxu1 %vm5706_vm6, %v13153_v27 }
0x227b   :  { %v13524_v49 = vmul.f32 %v13516_v5, %v18571_v34  ;;  %v13481_v28 = vpop.f32.mrf.mxu0  ;;  %v13134_v40 = vmul.f32 0.7978846, %v13126_v23  ;;  %15860 = vtanh.f32 %v13135_v43  ;;  %15441 = vmatpush3.msra.mxu1 %v18522_v33  ;;  %v13091_v25 = vmul.f32 0.5, %v18528_v50 }
0x227c   :  { %v13527_v0 = vmul.f32 %v13519_v54, %v18575_v47  ;;  %v13518_v45 = vmul.f32 %v13510_v36, %v18582_v22  ;;  %v13513_v18 = vmul.f32 0.044715, %v18590_v44  ;;  %v13541_v14 = vmul.f32 0.7978846, %v13533_v51 }
0x227d   :  { %v13532_v10 = vadd.f32 %v13524_v49, %v18571_v34  ;;  %v18601_v57 = vadd.f32 %v18552_v63, %v13481_v28  ;;  %v15439_v62 = vpop.f32.mrf.mxu0  ;;  %15862 = vtanh.f32 %v13134_v40  ;;  %v13092_v36 = vmul.f32 0.5, %v18540_v24 }
0x227e   :  { %v15853_v11 = vpop.eup %15852  ;;  %v13535_v17 = vadd.f32 %v13527_v0, %v18575_v47  ;;  %v13526_v21 = vmul.f32 %v13518_v45, %v18582_v22  ;;  %v13521_v59 = vmul.f32 %v13513_v18, %v18590_v44  ;;  %v18608_v9 = vadd.f32 %v15439_v62, %v18552_v63 }
0x227f   :  { %15864 = vtanh.f32 %v13541_v14  ;;  %v13512_v31 = vmul.f32 0.044715, %v18601_v57  ;;  %v13491_v1 = vpop.f32.mrf.mxu0  ;;  %v13147_v8 = vadd.f32 1.0, %v15853_v11  ;;  %v13540_v42 = vmul.f32 0.7978846, %v13532_v10 }
0x2280   :  { %v15855_v16 = vpop.eup %15854  ;;  %v13543_v32 = vmul.f32 0.7978846, %v13535_v17  ;;  %v13534_v33 = vadd.f32 %v13526_v21, %v18582_v22  ;;  %v13529_v37 = vmul.f32 %v13521_v59, %v18590_v44  ;;  %v13515_v53 = vmul.f32 0.044715, %v18608_v9 }
0x2281   :  { %v13520_v3 = vmul.f32 %v13512_v31, %v18601_v57  ;;  %v18617_v46 = vadd.f32 %v18552_v63, %v13491_v1  ;;  %v13146_v38 = vadd.f32 1.0, %v15855_v16  ;;  %v13155_v48 = vmul.f32 %v13147_v8, %v13091_v25 }
0x2282   :  { %15866 = vtanh.f32 %v13543_v32  ;;  %v13537_v15 = vadd.f32 %v13529_v37, %v18590_v44  ;;  %v13523_v13 = vmul.f32 %v13515_v53, %v18608_v9  ;;  %v13542_v5 = vmul.f32 0.7978846, %v13534_v33 }
0x2283   :  { %v13528_v4 = vmul.f32 %v13520_v3, %v18601_v57  ;;  %v13514_v58 = vmul.f32 0.044715, %v18617_v46  ;;  %v13154_v35 = vmul.f32 %v13146_v38, %v13090_v55  ;;  %15868 = vtanh.f32 %v13540_v42 }
0x2284   :  { %v13545_v43 = vmul.f32 0.7978846, %v13537_v15  ;;  %v15857_v23 = vpop.eup %15856  ;;  %v13531_v7 = vmul.f32 %v13523_v13, %v18608_v9  ;;  %15870 = vtanh.f32 %v13542_v5  ;;  %v13093_v18 = vmul.f32 0.5, %v18535_v29 }
0x2285   :  { %v13536_v63 = vadd.f32 %v13528_v4, %v18601_v57  ;;  %v13522_v50 = vmul.f32 %v13514_v58, %v18617_v46  ;;  %15411 = vmatprep.mubr.msk.f32.mxu1 %vm5706_vm6, %v13154_v35  ;;  %v13149_v51 = vadd.f32 1.0, %v15857_v23  ;;  %v13094_v10 = vmul.f32 0.5, %v18557_v2 }
0x2286   :  { %15412 = vmatmul.mubr.msk.f32.gmra.mxu1 %vm5706_vm6, %v13155_v48  ;;  %v13539_v41 = vadd.f32 %v13531_v7, %v18608_v9  ;;  %v15859_v54 = vpop.eup %15858  ;;  %15872 = vtanh.f32 %v13545_v43  ;;  %v13095_v31 = vmul.f32 0.5, %v18546_v52  ;;  %v13500_v16 = vmul.f32 0.5, %v18571_v34 }
0x2287   :  { %v13530_v12 = vmul.f32 %v13522_v50, %v18617_v46  ;;  %v13544_v27 = vmul.f32 0.7978846, %v13536_v63  ;;  %v13148_v0 = vadd.f32 1.0, %v15859_v54  ;;  %v13157_v21 = vmul.f32 %v13149_v51, %v13093_v18 }
0x2288   :  { %v15861_v49 = vpop.eup %15860  ;;  %v13547_v28 = vmul.f32 0.7978846, %v13539_v41  ;;  %v13501_v33 = vmul.f32 0.5, %v18563_v60  ;;  %v13502_v52 = vmul.f32 0.5, %v18582_v22  ;;  %v13503_v42 = vmul.f32 0.5, %v18575_v47 }
0x2289   :  { %v13538_v40 = vadd.f32 %v13530_v12, %v18617_v46  ;;  %15874 = vtanh.f32 %v13544_v27  ;;  %v13156_v14 = vmul.f32 %v13148_v0, %v13092_v36  ;;  %v13151_v59 = vadd.f32 1.0, %v15861_v49 }
0x228a   :  { %v15863_v45 = vpop.eup %15862  ;;  %15876 = vtanh.f32 %v13547_v28  ;;  %v13504_v34 = vmul.f32 0.5, %v18601_v57  ;;  %v13505_v48 = vmul.f32 0.5, %v18590_v44  ;;  %v13506_v23 = vmul.f32 0.5, %v18617_v46  ;;  %v14101_v44 = vld [vmem:[%s18736_s1 + $0x230] ss:$0 sm:$0xff] }
0x228b   :  { %v13150_v62 = vadd.f32 1.0, %v15863_v45  ;;  %v13546_v11 = vmul.f32 0.7978846, %v13538_v40  ;;  %15414 = vmatprep.mubr.msk.f32.mxu1 %vm5706_vm6, %v13156_v14  ;;  %v13159_v29 = vmul.f32 %v13151_v59, %v13095_v31  ;;  %v13507_v50 = vmul.f32 0.5, %v18608_v9 }
0x228c   :  { %v15865_v17 = vpop.eup %15864  ;;  %15415 = vmatmul.mubr.msk.f32.gmra.mxu1 %vm5706_vm6, %v13157_v21 }
0x228d   :  { %v13158_v24 = vmul.f32 %v13150_v62, %v13094_v10  ;;  %15878 = vtanh.f32 %v13546_v11  ;;  %v13557_v2 = vadd.f32 1.0, %v15865_v17 }
0x228f   :  { %v15867_v1 = vpop.eup %15866  ;;  %15417 = vmatprep.mubr.msk.f32.mxu1 %vm5706_vm6, %v13158_v24  ;;  %v13565_v53 = vmul.f32 %v13557_v2, %v13501_v33 }
0x2290   :  { %v15869_v55 = vpop.eup %15868  ;;  %15418 = vmatmul.mubr.msk.f32.gmra.mxu1 %vm5706_vm6, %v13159_v29  ;;  %v13559_v25 = vadd.f32 1.0, %v15867_v1 }
0x2291   :  { %v13556_v32 = vadd.f32 1.0, %v15869_v55  ;;  %v15871_v37 = vpop.eup %15870 }
0x2292   :  { %v13558_v38 = vadd.f32 1.0, %v15871_v37  ;;  %v13567_v58 = vmul.f32 %v13559_v25, %v13503_v42 }
0x2293   :  { %v13564_v8 = vmul.f32 %v13556_v32, %v13500_v16  ;;  %v15873_v3 = vpop.eup %15872 }
0x2294   :  { %v13566_v4 = vmul.f32 %v13558_v38, %v13502_v52  ;;  %v13561_v43 = vadd.f32 1.0, %v15873_v3  ;;  %v18662_v3 = vld [vmem:[%s18736_s1 + $0x278] ss:$0 sm:$0xff]  ;;  %s15929_s1 = smov 32  }
0x2295   :  { %15442 = vmatprep.mubr.msk.f32.mxu1 %vm300_vm4, %v13564_v8 }
0x2296   :  { %v15875_v15 = vpop.eup %15874  ;;  %15443 = vmatmul.mubr.msk.f32.vlgmr.msra.gmra.mxu1 %vm300_vm4, %v13565_v53  ;;  %v13569_v63 = vmul.f32 %v13561_v43, %v13505_v48 }
0x2297   :  { %v13560_v13 = vadd.f32 1.0, %v15875_v15  ;;  %v15877_v60 = vpop.eup %15876  ;;  %15445 = vmatprep.mubr.msk.f32.mxu1 %vm300_vm4, %v13566_v4 }
0x2298   :  { %v13563_v57 = vadd.f32 1.0, %v15877_v60 }
0x2299   :  { %v13568_v35 = vmul.f32 %v13560_v13, %v13504_v34 }
0x229a   :  { %v15879_v22 = vpop.eup %15878  ;;  %15446 = vmatmul.mubr.msk.f32.gmra.mxu1 %vm300_vm4, %v13567_v58  ;;  %v13571_v5 = vmul.f32 %v13563_v57, %v13507_v50 }
0x229b   :  { %v13562_v47 = vadd.f32 1.0, %v15879_v22  ;;  %15448 = vmatprep.mubr.msk.f32.mxu1 %vm300_vm4, %v13568_v35 }
0x229d   :  { %v13570_v7 = vmul.f32 %v13562_v47, %v13506_v23 }
0x229e   :  { %15449 = vmatmul.mubr.msk.f32.gmra.mxu1 %vm300_vm4, %v13569_v63 }
0x229f   :  { %15451 = vmatprep.mubr.msk.f32.mxu1 %vm300_vm4, %v13570_v7 }
0x22a2   :  { %15452 = vmatmul.mubr.msk.f32.gmra.mxu1 %vm300_vm4, %v13571_v5 }
0x233a   :  { %v15410_v46 = vpop.f32.mrf.mxu1 }
0x233b   :  { %v13263_v41 = vadd.f32 %v15410_v46, %v14101_v44 }
0x233c   :  { %v13257_v12 = vpop.f32.mrf.mxu1 }
0x233d   :  { %v13297_v27 = vsub.f32 0.0, %v13263_v41  ;;  %v13258_v54 = vadd.f32 %v14101_v44, %v13257_v12 }
0x233f   :  { %v13306_v36 = vmul.f32 1.442695, %v13297_v27  ;;  %v13296_v51 = vsub.f32 0.0, %v13258_v54 }
0x2341   :  { %v13304_v49 = vmul.f32 1.442695, %v13296_v51  ;;  %15880 = vpow2.f32 %v13306_v36 }
0x2343   :  { %15882 = vpow2.f32 %v13304_v49 }
0x2346   :  { %v15413_v9 = vpop.f32.mrf.mxu1 }
0x2347   :  { %v13273_v28 = vadd.f32 %v15413_v9, %v14101_v44 }
0x2348   :  { %v13267_v40 = vpop.f32.mrf.mxu1 }
0x2349   :  { %v13299_v0 = vsub.f32 0.0, %v13273_v28  ;;  %v13268_v45 = vadd.f32 %v14101_v44, %v13267_v40 }
0x234b   :  { %v13310_v18 = vmul.f32 1.442695, %v13299_v0  ;;  %v13298_v14 = vsub.f32 0.0, %v13268_v45 }
0x234c   :  { %v15416_v62 = vpop.f32.mrf.mxu1 }
0x234d   :  { %15884 = vpow2.f32 %v13310_v18  ;;  %v13308_v10 = vmul.f32 1.442695, %v13298_v14  ;;  %v13283_v11 = vadd.f32 %v15416_v62, %v14101_v44 }
0x234e   :  { %v13277_v17 = vpop.f32.mrf.mxu1  ;;  %v15881_v21 = vpop.eup %15880 }
0x234f   :  { %15886 = vpow2.f32 %v13308_v10  ;;  %v13301_v59 = vsub.f32 0.0, %v13283_v11  ;;  %v13278_v24 = vadd.f32 %v14101_v44, %v13277_v17  ;;  %v13321_v33 = vadd.f32 1.0, %v15881_v21 }
0x2350   :  { %v15883_v31 = vpop.eup %15882  ;;  %v15419_v1 = vpop.f32.mrf.mxu1 }
0x2351   :  { %v13320_v29 = vadd.f32 1.0, %v15883_v31  ;;  %v13314_v55 = vmul.f32 1.442695, %v13301_v59  ;;  %v13300_v2 = vsub.f32 0.0, %v13278_v24  ;;  %v13293_v16 = vadd.f32 %v15419_v1, %v14101_v44 }
0x2352   :  { %v13287_v32 = vpop.f32.mrf.mxu1 }
0x2353   :  { %15888 = vrcp.f32 %v13320_v29  ;;  %v13312_v37 = vmul.f32 1.442695, %v13300_v2  ;;  %v13288_v8 = vadd.f32 %v14101_v44, %v13287_v32  ;;  %v13303_v53 = vsub.f32 0.0, %v13293_v16 }
0x2354   :  { %15890 = vpow2.f32 %v13314_v55 }
0x2355   :  { %15892 = vpow2.f32 %v13312_v37  ;;  %v13302_v52 = vsub.f32 0.0, %v13288_v8  ;;  %v13318_v25 = vmul.f32 1.442695, %v13303_v53 }
0x2356   :  { %v15444_v38 = vpop.f32.mrf.mxu1  ;;  %15894 = vrcp.f32 %v13321_v33 }
0x2357   :  { %v13674_v15 = vadd.f32 %v15444_v38, %v18662_v3  ;;  %v13316_v42 = vmul.f32 1.442695, %v13302_v52  ;;  %15896 = vpow2.f32 %v13318_v25 }
0x2358   :  { %v13668_v4 = vpop.f32.mrf.mxu1 }
0x2359   :  { %v13669_v13 = vadd.f32 %v18662_v3, %v13668_v4  ;;  %13749 = vrot.lane.b32.xlu1 %v13674_v15, %s15928_s10  ;;  %15898 = vpow2.f32 %v13316_v42 }
0x235a   :  { %v15885_v34 = vpop.eup %15884  ;;  %v15447_v58 = vpop.f32.mrf.mxu1 }
0x235b   :  { %v13323_v60 = vadd.f32 1.0, %v15885_v34  ;;  %v13684_v43 = vadd.f32 %v15447_v58, %v18662_v3  ;;  %13747 = vrot.lane.b32.xlu0 %v13669_v13, %s15928_s10 }
0x235c   :  { %v15887_v35 = vpop.eup %15886  ;;  %v13678_v48 = vpop.f32.mrf.mxu1 }
0x235d   :  { %15900 = vrcp.f32 %v13323_v60  ;;  %v13322_v22 = vadd.f32 1.0, %v15887_v35  ;;  %v13679_v23 = vadd.f32 %v18662_v3, %v13678_v48  ;;  %13753 = vrot.lane.b32.xlu1 %v13684_v43, %s15928_s10 }
0x235e   :  { %v15450_v47 = vpop.f32.mrf.mxu1 }
0x235f   :  { %v13694_v63 = vadd.f32 %v15450_v47, %v18662_v3  ;;  %13751 = vrot.lane.b32.xlu0 %v13679_v23, %s15928_s10  ;;  %15902 = vrcp.f32 %v13322_v22 }
0x2360   :  { %v13688_v7 = vpop.f32.mrf.mxu1  ;;  %v15889_v57 = vpop.eup %15888 }
0x2361   :  { %v13689_v50 = vadd.f32 %v18662_v3, %v13688_v7  ;;  %13757 = vrot.lane.b32.xlu1 %v13694_v63, %s15928_s10  ;;  %v15891_v5 = vpop.eup %15890 }
0x2362   :  { %v15893_v44 = vpop.eup %15892  ;;  %v13325_v46 = vadd.f32 1.0, %v15891_v5  ;;  %v15453_v0 = vpop.f32.mrf.mxu1 }
0x2363   :  { %13755 = vrot.lane.b32.xlu0 %v13689_v50, %s15928_s10  ;;  %v13324_v41 = vadd.f32 1.0, %v15893_v44  ;;  %v15895_v12 = vpop.eup %15894  ;;  %v13704_v10 = vadd.f32 %v15453_v0, %v18662_v3 }
0x2364   :  { %15904 = vrcp.f32 %v13325_v46  ;;  %v15897_v27 = vpop.eup %15896  ;;  %v13698_v14 = vpop.f32.mrf.mxu1 }
0x2365   :  { %13715 = vrot.lane.b32.xlu1 %v15889_v57, %s15929_s1  ;;  %15906 = vrcp.f32 %v13324_v41  ;;  %v13327_v36 = vadd.f32 1.0, %v15897_v27  ;;  %v13699_v62 = vadd.f32 %v18662_v3, %v13698_v14 }
0x2366   :  { %v15899_v54 = vpop.eup %15898 }
0x2367   :  { %13717 = vrot.lane.b32.xlu0 %v15895_v12, %s15929_s1  ;;  %v13326_v51 = vadd.f32 1.0, %v15899_v54  ;;  %15908 = vrcp.f32 %v13327_v36 }
0x2369   :  { %15910 = vrcp.f32 %v13326_v51 }
0x236a   :  { %v15901_v49 = vpop.eup %15900 }
0x236b   :  { %13721 = vrot.lane.b32.xlu1 %v15901_v49, %s15929_s1 }
0x236c   :  { %v15903_v9 = vpop.eup %15902 }
0x236f   :  { %13719 = vrot.lane.b32.xlu1 %v15903_v9, %s15929_s1 }
0x2371   :  { %v15905_v28 = vpop.eup %15904 }
0x2372   :  { %v15907_v40 = vpop.eup %15906 }
0x2373   :  { %13725 = vrot.lane.b32.xlu1 %v15905_v28, %s15929_s1  ;;  %13723 = vrot.lane.b32.xlu0 %v15907_v40, %s15929_s1 }
0x2374   :  { %v15909_v45 = vpop.eup %15908 }
0x2376   :  { %v15911_v18 = vpop.eup %15910 }
0x2377   :  { %13729 = vrot.lane.b32.xlu1 %v15909_v45, %s15929_s1  ;;  %13727 = vrot.lane.b32.xlu0 %v15911_v18, %s15929_s1 }
0x237b   :  { %13761 = vrot.lane.b32.xlu1 %v13704_v10, %s15928_s10  ;;  %13759 = vrot.lane.b32.xlu0 %v13699_v62, %s15928_s10 }
0x23cb   :  { %v13750_v11 = vpop.permute.xlu1 %13749 }
0x23cd   :  { %v13748_v17 = vpop.permute.xlu0 %13747 }
0x23cf   :  { %v13754_v21 = vpop.permute.xlu1 %13753 }
0x23d1   :  { %v13752_v59 = vpop.permute.xlu0 %13751 }
0x23d3   :  { %v13758_v24 = vpop.permute.xlu1 %13757 }
0x23d5   :  { %v13756_v31 = vpop.permute.xlu0 %13755 }
0x23d7   :  { %v13716_v1 = vpop.permute.xlu1 %13715 }
0x23d8   :  { %v13771_v29 = vsel %vm167_vm2, %v18367_v26, %v13716_v1 }
0x23d9   :  { %v13780_v55 = vsel %vm13779_vm8, %v13771_v29, %v13748_v17  ;;  %v13718_v2 = vpop.permute.xlu0 %13717 }
0x23da   :  { %v13789_v16 = vsel %vm13788_vm9, %v13780_v55, 0.0  ;;  %v13772_v32 = vsel %vm167_vm2, %v18363_v30, %v13718_v2 }
0x23db   :  { %13797 = vst [vmem:[%s18738_s2] sm:$0xff] %v13789_v16  ;;  %v13781_v33 = vsel %vm13779_vm8, %v13772_v32, %v13750_v11 }
0x23dc   :  { %v13790_v37 = vsel %vm13788_vm9, %v13781_v33, 0.0 }
0x23dd   :  { %v13722_v8 = vpop.permute.xlu1 %13721  ;;  %13798 = vst [vmem:[%s18738_s2 + $0x8] sm:$0xff] %v13790_v37 }
0x23de   :  { %v13774_v26 = vsel %vm167_vm2, %v18373_v19, %v13722_v8 }
0x23df   :  { %v13783_v3 = vsel %vm13779_vm8, %v13774_v26, %v13754_v21 }
0x23e0   :  { %v13792_v30 = vsel %vm13788_vm9, %v13783_v3, 0.0 }
0x23e1   :  { %13800 = vst [vmem:[%s18738_s2 + $0x18] sm:$0xff] %v13792_v30  ;;  %v13720_v53 = vpop.permute.xlu1 %13719 }
0x23e2   :  { %v13773_v52 = vsel %vm167_vm2, %v18378_v61, %v13720_v53 }
0x23e3   :  { %v13782_v38 = vsel %vm13779_vm8, %v13773_v52, %v13752_v59 }
0x23e4   :  { %v13791_v25 = vsel %vm13788_vm9, %v13782_v38, 0.0 }
0x23e5   :  { %13799 = vst [vmem:[%s18738_s2 + $0x10] sm:$0xff] %v13791_v25  ;;  %v13726_v19 = vpop.permute.xlu1 %13725  ;;  %v13724_v15 = vpop.permute.xlu0 %13723 }
0x23e6   :  { %v13776_v42 = vsel %vm167_vm2, %v18383_v6, %v13726_v19  ;;  %v13775_v4 = vsel %vm167_vm2, %v18388_v39, %v13724_v15 }
0x23e7   :  { %v13785_v34 = vsel %vm13779_vm8, %v13776_v42, %v13758_v24  ;;  %v13784_v61 = vsel %vm13779_vm8, %v13775_v4, %v13756_v31 }
0x23e8   :  { %v13794_v13 = vsel %vm13788_vm9, %v13785_v34, 0.0  ;;  %v13793_v60 = vsel %vm13788_vm9, %v13784_v61, 0.0 }
0x23e9   :  { %13802 = vst [vmem:[%s18738_s2 + $0x28] sm:$0xff] %v13794_v13  ;;  %v13730_v58 = vpop.permute.xlu1 %13729  ;;  %13801 = vst [vmem:[%s18738_s2 + $0x20] sm:$0xff] %v13793_v60  ;;  %v13728_v6 = vpop.permute.xlu0 %13727 }
0x23ea   :  { %v13778_v39 = vsel %vm167_vm2, %v18393_v20, %v13730_v58  ;;  %v13777_v43 = vsel %vm167_vm2, %v18397_v56, %v13728_v6 }
0x23ed   :  { %v13762_v35 = vpop.permute.xlu1 %13761  ;;  %v13760_v22 = vpop.permute.xlu0 %13759 }
0x23ee   :  { %v13787_v48 = vsel %vm13779_vm8, %v13778_v39, %v13762_v35  ;;  %v13786_v23 = vsel %vm13779_vm8, %v13777_v43, %v13760_v22 }
0x23ef   :  { %v13796_v47 = vsel %vm13788_vm9, %v13787_v48, 0.0  ;;  %v13795_v63 = vsel %vm13788_vm9, %v13786_v23, 0.0 }
0x23f0   :  { %13804 = vst [vmem:[%s18738_s2 + $0x38] sm:$0xff] %v13796_v47  ;;  %13803 = vst [vmem:[%s18738_s2 + $0x30] sm:$0xff] %v13795_v63 }

</bundles_post_ra>
